<compile_context>
chip_gen: v7x
topology: tpu7x:2x2x1
jax: 0.10.0
libtpu: 0.0.40
codegen_flags: <defaults>
</compile_context>

<pallas_src>
import jax
import jax.numpy as jnp
from jax import lax
from jax.experimental import pallas as pl
from jax.experimental.pallas import tpu as pltpu

START_TOKEN = 1  # vocabulary.START (SOS token)


def greedy_search_kernel(len_ref, enc_x_ref,
                         ewfi, ewfh, ebf, ebfhn,      # encoder fwd GRU (fused gates)
                         ewbi, ewbh, ebb, ebbhn,      # encoder bwd GRU (fused gates)
                         emb_ref,                     # (V, H) f32 embedding (decoder row fetch)
                         dwi, dwh, dbb, dbhn,         # decoder GRU (fused gates)
                         wcat_h, wcat_c, bcat,        # concat Linear(2H->H), split h / ctx halves
                         wo, bo,                      # out Linear(H -> V)
                         tokens_ref, scores_ref,      # outputs (1, ML)
                         gi_f_ref, gi_b_ref,          # scratch (S, 3H) f32: hoisted input gates
                         enc_f_ref, enc_b_ref,        # scratch (S, H) f32: per-direction outputs
                         enc_bf_ref,                  # scratch (S, H) bf16: summed+masked enc out
                         tok_vmem, tok_smem, tok_sem):
    S, H = enc_f_ref.shape
    V = emb_ref.shape[0]
    ML = tokens_ref.shape[1]
    L = len_ref[0]                                     # input_length (<= S)

    lane_S = lax.broadcasted_iota(jnp.int32, (1, S), 1)
    lane_V = lax.broadcasted_iota(jnp.int32, (1, V), 1)
    lane_ML = lax.broadcasted_iota(jnp.int32, (1, ML), 1)
    row_S = lax.broadcasted_iota(jnp.int32, (S, H), 0)

    def gru_step(gi, h, wh_ref, bhn_ref):
        """PyTorch GRU cell; input gates (incl. folded r/z biases and b_in) in `gi`.

        gi: (1, 3H) f32, gate order (r, z, n).  gh has no bias except b_hn which
        must stay separate: n = tanh(gi_n + r * (gh_n + b_hn)).
        """
        gh = jnp.dot(h.astype(jnp.bfloat16), wh_ref[...],
                     preferred_element_type=jnp.float32)
        r = jax.nn.sigmoid(gi[:, 0:H] + gh[:, 0:H])
        z = jax.nn.sigmoid(gi[:, H:2 * H] + gh[:, H:2 * H])
        n = jnp.tanh(gi[:, 2 * H:3 * H] + r * (gh[:, 2 * H:3 * H] + bhn_ref[...]))
        return (1.0 - z) * n + z * h

    # ---------------- Encoder: 1-layer bidirectional GRU, directions summed.
    # Input-gate matmuls hoisted off the serial recurrence (fills MXU sublanes).
    enc_x = enc_x_ref[...]                                             # (S, H) bf16
    gi_f_ref[...] = jnp.dot(enc_x, ewfi[...],
                            preferred_element_type=jnp.float32) + ebf[...]
    gi_b_ref[...] = jnp.dot(enc_x, ewbi[...],
                            preferred_element_type=jnp.float32) + ebb[...]

    h0 = jnp.zeros((1, H), jnp.float32)

    # Both directions in a single loop: two independent dependence chains per
    # iteration let the scheduler overlap MXU/EUP latency of the two GRUs.
    def enc_step(i, carry):
        hf, hb = carry
        hf = gru_step(gi_f_ref[pl.ds(i, 1), :], hf, ewfh, ebfhn)
        enc_f_ref[pl.ds(i, 1), :] = hf
        tb = L - 1 - i
        hb = gru_step(gi_b_ref[pl.ds(tb, 1), :], hb, ewbh, ebbhn)
        enc_b_ref[pl.ds(tb, 1), :] = hb
        return hf, hb

    h_fwd, _ = lax.fori_loop(0, L, enc_step, (h0, h0))

    # Sum directions once, zero padded rows (so masked attention positions can
    # never contribute stale VMEM to ctx), keep one bf16 copy for the MXU.
    enc_sum = enc_f_ref[...] + enc_b_ref[...]
    enc_bf_ref[...] = jnp.where(row_S < L, enc_sum, 0.0).astype(jnp.bfloat16)

    # decoder_hidden = encoder_hidden[:num_layers] -> forward-direction final h.
    # ---------------- Greedy decode: Luong "dot" attention, argmax feedback.
    def dec_step(t, carry):
        h, tok, toks, scs = carry                      # h:(1,H) f32, tok: () int32

        # Direct embedding-row fetch for the fed-back token (no one-hot matmul).
        # TODO(synk): at realistic V/H keep emb and w_out HBM-resident
        # (memory_space=pl.ANY): DMA this single row per step and stream w_out
        # in (H, V_tile) double-buffered chunks with online max/denom/argmax.
        x = emb_ref[pl.ds(tok, 1), :]                                  # (1, H) f32
        gi = jnp.dot(x.astype(jnp.bfloat16), dwi[...],
                     preferred_element_type=jnp.float32) + dbb[...]
        h = gru_step(gi, h, dwh, dbhn)

        # Attention: bf16 MXU operands, contraction on dim 1 of both operands
        # (no per-step transpose / cast of the (S,H) tile).
        h_bf = h.astype(jnp.bfloat16)
        enc_bf = enc_bf_ref[...]                                       # (S, H) bf16
        s = lax.dot_general(h_bf, enc_bf, (((1,), (1,)), ((), ())),
                            preferred_element_type=jnp.float32)        # (1, S)
        s = jnp.where(lane_S < L, s, -1e30)                            # mask padding
        e = jnp.exp(s - jnp.max(s, axis=1, keepdims=True))
        att = e / jnp.sum(e, axis=1, keepdims=True)                    # exact (1 scalar div)
        ctx = jnp.dot(att.astype(jnp.bfloat16), enc_bf,
                      preferred_element_type=jnp.float32)              # (1, H)

        # concat Linear + tanh with host-split weights (no lane concatenate).
        cat = jnp.tanh(jnp.dot(h_bf, wcat_h[...], preferred_element_type=jnp.float32)
                       + jnp.dot(ctx.astype(jnp.bfloat16), wcat_c[...],
                                 preferred_element_type=jnp.float32)
                       + bcat[...])
        logits = jnp.dot(cat.astype(jnp.bfloat16), wo[...],
                         preferred_element_type=jnp.float32) + bo[...]  # (1, V)

        # Greedy argmax + its softmax probability without a V-wide softmax:
        # argmax(probs) == argmax(logits); max prob = 1 / sum(exp(logits - max)).
        m_l = jnp.max(logits, axis=1, keepdims=True)
        score = 1.0 / jnp.sum(jnp.exp(logits - m_l), axis=1, keepdims=True)
        idx = jnp.min(jnp.where(logits == m_l, lane_V, V),
                      axis=1, keepdims=True)                            # (1, 1) int32

        # Cross the vector->scalar boundary for the feedback token via a 4-byte
        # VMEM->SMEM DMA (overlapped with the tiny lane-select updates below).
        tok_vmem[...] = idx
        cp = pltpu.make_async_copy(tok_vmem, tok_smem, tok_sem)
        cp.start()
        toks = jnp.where(lane_ML == t, idx, toks)
        scs = jnp.where(lane_ML == t, score, scs)
        cp.wait()
        return h, tok_smem[0, 0], toks, scs

    init = (h_fwd,
            jnp.array(START_TOKEN, dtype=jnp.int32),
            jnp.zeros((1, ML), jnp.int32),
            jnp.zeros((1, ML), jnp.float32))
    # Full unroll only for short decodes; larger max_length stays mostly rolled
    # to avoid blowing instruction memory / vreg live ranges (spill regime).
    _, _, toks, scs = lax.fori_loop(0, ML, dec_step, init,
                                    unroll=True if ML <= 16 else 4)

    tokens_ref[...] = toks                              # single lane-dense store
    scores_ref[...] = scs


def greedy_search(params, input_sequence, input_length, max_length):
    emb = params["embedding"]                           # (V, H) bf16
    V, H = emb.shape
    S = input_sequence.shape[0]

    # Glue outside the kernel: encoder embedding gather, kept bf16 (values
    # originate in bf16, halves enc_x VMEM and removes per-step casts).
    enc_x = emb[input_sequence]                         # (S, H) bf16
    # f32 copy for the in-kernel decoder row fetch (dynamic-row-slice friendly).
    emb_f32 = emb.astype(jnp.float32)

    args = (input_length.astype(jnp.int32),
            enc_x,
            params["enc_wi_f"], params["enc_wh_f"], params["enc_b_f"], params["enc_bhn_f"],
            params["enc_wi_b"], params["enc_wh_b"], params["enc_b_b"], params["enc_bhn_b"],
            emb_f32,
            params["dec_wi"], params["dec_wh"], params["dec_b"], params["dec_bhn"],
            params["w_cat_h"], params["w_cat_c"], params["b_cat"],
            params["w_out"], params["b_out"])

    in_specs = ([pl.BlockSpec(memory_space=pltpu.MemorySpace.SMEM)]
                + [pl.BlockSpec(memory_space=pltpu.MemorySpace.VMEM)
                   for _ in range(len(args) - 1)])

    # vmem_limit = resident (weights + scratch + outputs) + fixed headroom,
    # capped below physical VMEM (v7x: 64 MiB/TC, v6e/v5e: 128 MiB).  With
    # grid=() there is no input double-buffering to pay for.
    resident = sum(int(a.size) * a.dtype.itemsize for a in args[1:])
    resident += 2 * S * 3 * H * 4 + 2 * S * H * 4 + S * H * 2 + 4   # scratches
    resident += max_length * 8                                      # outputs
    try:
        phys = int(pltpu.get_tpu_info().vmem_capacity_bytes)
    except Exception:
        phys = 64 << 20
    vmem_limit = max(resident + (16 << 20), 8 << 20)
    vmem_limit = int(min(vmem_limit, phys - (8 << 20)))

    # TODO(synk): for v7x throughput, run independent decode requests on the
    # second TensorCore (core_map over a 2-core mesh); one greedy decode is serial.
    tokens, scores = pl.pallas_call(
        greedy_search_kernel,
        out_shape=(jax.ShapeDtypeStruct((1, max_length), jnp.int32),
                   jax.ShapeDtypeStruct((1, max_length), jnp.float32)),
        in_specs=in_specs,
        out_specs=(pl.BlockSpec(memory_space=pltpu.MemorySpace.VMEM),
                   pl.BlockSpec(memory_space=pltpu.MemorySpace.VMEM)),
        scratch_shapes=[
            pltpu.VMEM((S, 3 * H), jnp.float32),    # gi_f (hoisted fwd input gates)
            pltpu.VMEM((S, 3 * H), jnp.float32),    # gi_b (hoisted bwd input gates)
            pltpu.VMEM((S, H), jnp.float32),        # enc_f
            pltpu.VMEM((S, H), jnp.float32),        # enc_b
            pltpu.VMEM((S, H), jnp.bfloat16),       # enc_bf (summed, masked, bf16)
            pltpu.VMEM((1, 1), jnp.int32),          # tok_vmem (argmax staging)
            pltpu.SMEM((1, 1), jnp.int32),          # tok_smem (scalar feedback token)
            pltpu.SemaphoreType.DMA(()),            # tok_sem
        ],
        compiler_params=pltpu.CompilerParams(vmem_limit_bytes=vmem_limit),
    )(*args)
    return tokens[0], scores[0]          # (max_length,) int32, (max_length,) f32


def init_params(key, vocab_size, hidden_size):
    """Weights pre-transposed for row-vector @ matrix; matmul weights in bf16.

    GRU layout (fused gates, PyTorch (r, z, n) order along the 3H axis):
      wi: (in, 3H) bf16,  wh: (H, 3H) bf16
      b : (1, 3H) f32  = [b_ir + b_hr, b_iz + b_hz, b_in]   (r/z biases folded)
      bhn: (1, H) f32  = b_hn                               (kept separate for n)
    Linear(2H->H) is pre-split into the h-half (w_cat_h) and ctx-half (w_cat_c).
    """
    H, V = hidden_size, vocab_size
    keys = iter(jax.random.split(key, 32))

    def w(shape, dtype=jnp.bfloat16, scale=0.1):
        return (scale * jax.random.normal(next(keys), shape)).astype(dtype)

    def gru(in_dim):
        return (w((in_dim, 3 * H)), w((H, 3 * H)),
                w((1, 3 * H), jnp.float32), w((1, H), jnp.float32))

    p = {"embedding": w((V, H))}
    p["enc_wi_f"], p["enc_wh_f"], p["enc_b_f"], p["enc_bhn_f"] = gru(H)
    p["enc_wi_b"], p["enc_wh_b"], p["enc_b_b"], p["enc_bhn_b"] = gru(H)
    p["dec_wi"], p["dec_wh"], p["dec_b"], p["dec_bhn"] = gru(H)
    p["w_cat_h"] = w((H, H))                         # Linear(2H->H), h half
    p["w_cat_c"] = w((H, H))                         # Linear(2H->H), ctx half
    p["b_cat"] = w((1, H), jnp.float32)
    p["w_out"] = w((H, V))                           # Linear(H -> V)
    p["b_out"] = w((1, V), jnp.float32)
    return p


if __name__ == "__main__":
    # TPU-friendly small shapes: H and V multiples of 128, S multiple of 8.
    HIDDEN, VOCAB, SEQ, MAX_LEN = 128, 256, 8, 8
    key = jax.random.PRNGKey(0)
    pkey, skey = jax.random.split(key)
    params = init_params(pkey, VOCAB, HIDDEN)

    input_sequence = jax.random.randint(skey, (SEQ,), 2, VOCAB, dtype=jnp.int32)
    input_length = jnp.array([SEQ], dtype=jnp.int32)

    word_tokens, softmax_scores = greedy_search(params, input_sequence,
                                                input_length, MAX_LEN)
    jax.block_until_ready((word_tokens, softmax_scores))
    assert word_tokens.shape == (MAX_LEN,) and softmax_scores.shape == (MAX_LEN,)
    assert bool(jnp.all(jnp.isfinite(softmax_scores)))
    assert bool(jnp.all((word_tokens >= 0) & (word_tokens < VOCAB)))
    print("KERNEL_OK")
</pallas_src>

<mosaic_0001>
module attributes {stable_mosaic.version = 11 : i64} {
  func.func @greedy_search_kernel(%arg0: memref<1xi32, #tpu.memory_space<smem>>, %arg1: memref<8x128xbf16, #tpu.memory_space<vmem>>, %arg2: memref<128x384xbf16, #tpu.memory_space<vmem>>, %arg3: memref<128x384xbf16, #tpu.memory_space<vmem>>, %arg4: memref<1x384xf32, #tpu.memory_space<vmem>>, %arg5: memref<1x128xf32, #tpu.memory_space<vmem>>, %arg6: memref<128x384xbf16, #tpu.memory_space<vmem>>, %arg7: memref<128x384xbf16, #tpu.memory_space<vmem>>, %arg8: memref<1x384xf32, #tpu.memory_space<vmem>>, %arg9: memref<1x128xf32, #tpu.memory_space<vmem>>, %arg10: memref<256x128xf32, #tpu.memory_space<vmem>>, %arg11: memref<128x384xbf16, #tpu.memory_space<vmem>>, %arg12: memref<128x384xbf16, #tpu.memory_space<vmem>>, %arg13: memref<1x384xf32, #tpu.memory_space<vmem>>, %arg14: memref<1x128xf32, #tpu.memory_space<vmem>>, %arg15: memref<128x128xbf16, #tpu.memory_space<vmem>>, %arg16: memref<128x128xbf16, #tpu.memory_space<vmem>>, %arg17: memref<1x128xf32, #tpu.memory_space<vmem>>, %arg18: memref<128x256xbf16, #tpu.memory_space<vmem>>, %arg19: memref<1x256xf32, #tpu.memory_space<vmem>>, %arg20: memref<1x8xi32, #tpu.memory_space<vmem>>, %arg21: memref<1x8xf32, #tpu.memory_space<vmem>>, %arg22: memref<8x384xf32, #tpu.memory_space<vmem>>, %arg23: memref<8x384xf32, #tpu.memory_space<vmem>>, %arg24: memref<8x128xf32, #tpu.memory_space<vmem>>, %arg25: memref<8x128xf32, #tpu.memory_space<vmem>>, %arg26: memref<8x128xbf16, #tpu.memory_space<vmem>>, %arg27: memref<1x1xi32, #tpu.memory_space<vmem>>, %arg28: memref<1x1xi32, #tpu.memory_space<smem>>, %arg29: memref<!tpu.dma_semaphore, #tpu.memory_space<semaphore_mem>>) attributes {dimension_semantics = [], scalar_prefetch = 0 : i64, scratch_operands = 8 : i64, tpu.core_type = #tpu.core_type<tc>} {
    %c0 = arith.constant 0 : index
    %0 = memref.load %arg0[%c0] : memref<1xi32, #tpu.memory_space<smem>>
    %1 = tpu.iota {dimensions = array<i32: 1>} : vector<1x8xi32>
    %2 = tpu.iota {dimensions = array<i32: 1>} : vector<1x256xi32>
    %3 = tpu.iota {dimensions = array<i32: 1>} : vector<1x8xi32>
    %4 = tpu.iota {dimensions = array<i32: 0>} : vector<8x128xi32>
    %c0_0 = arith.constant 0 : index
    %c0_1 = arith.constant 0 : index
    %5 = vector.load %arg1[%c0_0, %c0_1] : memref<8x128xbf16, #tpu.memory_space<vmem>>, vector<8x128xbf16>
    %c0_2 = arith.constant 0 : index
    %c0_3 = arith.constant 0 : index
    %6 = vector.load %arg2[%c0_2, %c0_3] : memref<128x384xbf16, #tpu.memory_space<vmem>>, vector<128x384xbf16>
    %cst = arith.constant dense<0.000000e+00> : vector<8x384xf32>
    %7 = tpu.matmul %5, %6, %cst {dimension_numbers = #tpu.dot_dimension_numbers<[1], [0], [0], [1], [0, 0, 1, 1], [], []>} : vector<8x128xbf16>, vector<128x384xbf16>, vector<8x384xf32> -> vector<8x384xf32>
    %c0_4 = arith.constant 0 : index
    %c0_5 = arith.constant 0 : index
    %8 = vector.load %arg4[%c0_4, %c0_5] : memref<1x384xf32, #tpu.memory_space<vmem>>, vector<1x384xf32>
    %9 = vector.broadcast %8 : vector<1x384xf32> to vector<8x384xf32>
    %10 = arith.addf %7, %9 : vector<8x384xf32>
    %c0_6 = arith.constant 0 : index
    %c0_7 = arith.constant 0 : index
    %11 = vector.load %arg22[%c0_6, %c0_7] : memref<8x384xf32, #tpu.memory_space<vmem>>, vector<8x384xf32>
    tpu.vector_store %arg22[%c0_6, %c0_7], %10 {strides = array<i32>} : memref<8x384xf32, #tpu.memory_space<vmem>>, vector<8x384xf32>,
    %c0_8 = arith.constant 0 : index
    %c0_9 = arith.constant 0 : index
    %12 = vector.load %arg6[%c0_8, %c0_9] : memref<128x384xbf16, #tpu.memory_space<vmem>>, vector<128x384xbf16>
    %cst_10 = arith.constant dense<0.000000e+00> : vector<8x384xf32>
    %13 = tpu.matmul %5, %12, %cst_10 {dimension_numbers = #tpu.dot_dimension_numbers<[1], [0], [0], [1], [0, 0, 1, 1], [], []>} : vector<8x128xbf16>, vector<128x384xbf16>, vector<8x384xf32> -> vector<8x384xf32>
    %c0_11 = arith.constant 0 : index
    %c0_12 = arith.constant 0 : index
    %14 = vector.load %arg8[%c0_11, %c0_12] : memref<1x384xf32, #tpu.memory_space<vmem>>, vector<1x384xf32>
    %15 = vector.broadcast %14 : vector<1x384xf32> to vector<8x384xf32>
    %16 = arith.addf %13, %15 : vector<8x384xf32>
    %c0_13 = arith.constant 0 : index
    %c0_14 = arith.constant 0 : index
    %17 = vector.load %arg23[%c0_13, %c0_14] : memref<8x384xf32, #tpu.memory_space<vmem>>, vector<8x384xf32>
    tpu.vector_store %arg23[%c0_13, %c0_14], %16 {strides = array<i32>} : memref<8x384xf32, #tpu.memory_space<vmem>>, vector<8x384xf32>,
    %cst_15 = arith.constant 0.000000e+00 : f32
    %18 = vector.broadcast %cst_15 : f32 to vector<1x128xf32>
    %c0_i32 = arith.constant 0 : i32
    %19 = arith.subi %0, %c0_i32 : i32
    %20 = arith.addi %c0_i32, %19 : i32
    %c1_i32 = arith.constant 1 : i32
    %21:2 = scf.for %arg30 = %c0_i32 to %20 step %c1_i32 iter_args(%arg31 = %18, %arg32 = %18) -> (vector<1x128xf32>, vector<1x128xf32>)  : i32 {
      %811 = arith.index_cast %arg30 : i32 to index
      %c0_375 = arith.constant 0 : index
      %812 = vector.load %arg22[%811, %c0_375] : memref<8x384xf32, #tpu.memory_space<vmem>>, vector<1x384xf32>
      %813 = arith.truncf %arg31 : vector<1x128xf32> to vector<1x128xbf16>
      %c0_376 = arith.constant 0 : index
      %c0_377 = arith.constant 0 : index
      %814 = vector.load %arg3[%c0_376, %c0_377] : memref<128x384xbf16, #tpu.memory_space<vmem>>, vector<128x384xbf16>
      %cst_378 = arith.constant dense<0.000000e+00> : vector<1x384xf32>
      %815 = tpu.matmul %813, %814, %cst_378 {dimension_numbers = #tpu.dot_dimension_numbers<[1], [0], [0], [1], [0, 0, 1, 1], [], []>} : vector<1x128xbf16>, vector<128x384xbf16>, vector<1x384xf32> -> vector<1x384xf32>
      %816 = vector.extract_strided_slice %812 {offsets = [0, 0], sizes = [1, 128], strides = [1, 1]} : vector<1x384xf32> to vector<1x128xf32>
      %817 = vector.extract_strided_slice %815 {offsets = [0, 0], sizes = [1, 128], strides = [1, 1]} : vector<1x384xf32> to vector<1x128xf32>
      %818 = arith.addf %816, %817 : vector<1x128xf32>
      %819 = arith.negf %818 : vector<1x128xf32>
      %820 = math.exp %819 : vector<1x128xf32>
      %cst_379 = arith.constant 1.000000e+00 : f32
      %821 = vector.broadcast %cst_379 : f32 to vector<1x128xf32>
      %822 = arith.addf %821, %820 : vector<1x128xf32>
      %823 = arith.divf %821, %822 : vector<1x128xf32>
      %824 = vector.extract_strided_slice %812 {offsets = [0, 128], sizes = [1, 128], strides = [1, 1]} : vector<1x384xf32> to vector<1x128xf32>
      %825 = vector.extract_strided_slice %815 {offsets = [0, 128], sizes = [1, 128], strides = [1, 1]} : vector<1x384xf32> to vector<1x128xf32>
      %826 = arith.addf %824, %825 : vector<1x128xf32>
      %827 = arith.negf %826 : vector<1x128xf32>
      %828 = math.exp %827 : vector<1x128xf32>
      %cst_380 = arith.constant 1.000000e+00 : f32
      %829 = vector.broadcast %cst_380 : f32 to vector<1x128xf32>
      %830 = arith.addf %829, %828 : vector<1x128xf32>
      %831 = arith.divf %829, %830 : vector<1x128xf32>
      %832 = vector.extract_strided_slice %812 {offsets = [0, 256], sizes = [1, 128], strides = [1, 1]} : vector<1x384xf32> to vector<1x128xf32>
      %833 = vector.extract_strided_slice %815 {offsets = [0, 256], sizes = [1, 128], strides = [1, 1]} : vector<1x384xf32> to vector<1x128xf32>
      %c0_381 = arith.constant 0 : index
      %c0_382 = arith.constant 0 : index
      %834 = vector.load %arg5[%c0_381, %c0_382] : memref<1x128xf32, #tpu.memory_space<vmem>>, vector<1x128xf32>
      %835 = arith.addf %833, %834 : vector<1x128xf32>
      %836 = arith.mulf %823, %835 : vector<1x128xf32>
      %837 = arith.addf %832, %836 : vector<1x128xf32>
      %838 = math.tanh %837 : vector<1x128xf32>
      %cst_383 = arith.constant 1.000000e+00 : f32
      %839 = vector.broadcast %cst_383 : f32 to vector<1x128xf32>
      %840 = arith.subf %839, %831 : vector<1x128xf32>
      %841 = arith.mulf %840, %838 : vector<1x128xf32>
      %842 = arith.mulf %831, %arg31 : vector<1x128xf32>
      %843 = arith.addf %841, %842 : vector<1x128xf32>
      %844 = arith.index_cast %arg30 : i32 to index
      %c0_384 = arith.constant 0 : index
      %845 = vector.load %arg24[%844, %c0_384] : memref<8x128xf32, #tpu.memory_space<vmem>>, vector<1x128xf32>
      tpu.vector_store %arg24[%844, %c0_384], %843 {strides = array<i32>} : memref<8x128xf32, #tpu.memory_space<vmem>>, vector<1x128xf32>,
      %c1_i32_385 = arith.constant 1 : i32
      %846 = arith.subi %0, %c1_i32_385 : i32
      %847 = arith.subi %846, %arg30 : i32
      %848 = arith.index_cast %847 : i32 to index
      %c0_386 = arith.constant 0 : index
      %849 = vector.load %arg23[%848, %c0_386] : memref<8x384xf32, #tpu.memory_space<vmem>>, vector<1x384xf32>
      %850 = arith.truncf %arg32 : vector<1x128xf32> to vector<1x128xbf16>
      %c0_387 = arith.constant 0 : index
      %c0_388 = arith.constant 0 : index
      %851 = vector.load %arg7[%c0_387, %c0_388] : memref<128x384xbf16, #tpu.memory_space<vmem>>, vector<128x384xbf16>
      %cst_389 = arith.constant dense<0.000000e+00> : vector<1x384xf32>
      %852 = tpu.matmul %850, %851, %cst_389 {dimension_numbers = #tpu.dot_dimension_numbers<[1], [0], [0], [1], [0, 0, 1, 1], [], []>} : vector<1x128xbf16>, vector<128x384xbf16>, vector<1x384xf32> -> vector<1x384xf32>
      %853 = vector.extract_strided_slice %849 {offsets = [0, 0], sizes = [1, 128], strides = [1, 1]} : vector<1x384xf32> to vector<1x128xf32>
      %854 = vector.extract_strided_slice %852 {offsets = [0, 0], sizes = [1, 128], strides = [1, 1]} : vector<1x384xf32> to vector<1x128xf32>
      %855 = arith.addf %853, %854 : vector<1x128xf32>
      %856 = arith.negf %855 : vector<1x128xf32>
      %857 = math.exp %856 : vector<1x128xf32>
      %cst_390 = arith.constant 1.000000e+00 : f32
      %858 = vector.broadcast %cst_390 : f32 to vector<1x128xf32>
      %859 = arith.addf %858, %857 : vector<1x128xf32>
      %860 = arith.divf %858, %859 : vector<1x128xf32>
      %861 = vector.extract_strided_slice %849 {offsets = [0, 128], sizes = [1, 128], strides = [1, 1]} : vector<1x384xf32> to vector<1x128xf32>
      %862 = vector.extract_strided_slice %852 {offsets = [0, 128], sizes = [1, 128], strides = [1, 1]} : vector<1x384xf32> to vector<1x128xf32>
      %863 = arith.addf %861, %862 : vector<1x128xf32>
      %864 = arith.negf %863 : vector<1x128xf32>
      %865 = math.exp %864 : vector<1x128xf32>
      %cst_391 = arith.constant 1.000000e+00 : f32
      %866 = vector.broadcast %cst_391 : f32 to vector<1x128xf32>
      %867 = arith.addf %866, %865 : vector<1x128xf32>
      %868 = arith.divf %866, %867 : vector<1x128xf32>
      %869 = vector.extract_strided_slice %849 {offsets = [0, 256], sizes = [1, 128], strides = [1, 1]} : vector<1x384xf32> to vector<1x128xf32>
      %870 = vector.extract_strided_slice %852 {offsets = [0, 256], sizes = [1, 128], strides = [1, 1]} : vector<1x384xf32> to vector<1x128xf32>
      %c0_392 = arith.constant 0 : index
      %c0_393 = arith.constant 0 : index
      %871 = vector.load %arg9[%c0_392, %c0_393] : memref<1x128xf32, #tpu.memory_space<vmem>>, vector<1x128xf32>
      %872 = arith.addf %870, %871 : vector<1x128xf32>
      %873 = arith.mulf %860, %872 : vector<1x128xf32>
      %874 = arith.addf %869, %873 : vector<1x128xf32>
      %875 = math.tanh %874 : vector<1x128xf32>
      %cst_394 = arith.constant 1.000000e+00 : f32
      %876 = vector.broadcast %cst_394 : f32 to vector<1x128xf32>
      %877 = arith.subf %876, %868 : vector<1x128xf32>
      %878 = arith.mulf %877, %875 : vector<1x128xf32>
      %879 = arith.mulf %868, %arg32 : vector<1x128xf32>
      %880 = arith.addf %878, %879 : vector<1x128xf32>
      %881 = arith.index_cast %847 : i32 to index
      %c0_395 = arith.constant 0 : index
      %882 = vector.load %arg25[%881, %c0_395] : memref<8x128xf32, #tpu.memory_space<vmem>>, vector<1x128xf32>
      tpu.vector_store %arg25[%881, %c0_395], %880 {strides = array<i32>} : memref<8x128xf32, #tpu.memory_space<vmem>>, vector<1x128xf32>,
      scf.yield %843, %880 : vector<1x128xf32>, vector<1x128xf32>
    }
    %c0_16 = arith.constant 0 : index
    %c0_17 = arith.constant 0 : index
    %22 = vector.load %arg24[%c0_16, %c0_17] : memref<8x128xf32, #tpu.memory_space<vmem>>, vector<8x128xf32>
    %c0_18 = arith.constant 0 : index
    %c0_19 = arith.constant 0 : index
    %23 = vector.load %arg25[%c0_18, %c0_19] : memref<8x128xf32, #tpu.memory_space<vmem>>, vector<8x128xf32>
    %24 = arith.addf %22, %23 : vector<8x128xf32>
    %25 = vector.broadcast %0 : i32 to vector<8x128xi32>
    %26 = arith.cmpi slt, %4, %25 : vector<8x128xi32>
    %cst_20 = arith.constant 0.000000e+00 : f32
    %27 = vector.broadcast %cst_20 : f32 to vector<8x128xf32>
    %28 = arith.select %26, %24, %27 : vector<8x128xi1>, vector<8x128xf32>
    %29 = arith.truncf %28 : vector<8x128xf32> to vector<8x128xbf16>
    %c0_21 = arith.constant 0 : index
    %c0_22 = arith.constant 0 : index
    %30 = vector.load %arg26[%c0_21, %c0_22] : memref<8x128xbf16, #tpu.memory_space<vmem>>, vector<8x128xbf16>
    tpu.vector_store %arg26[%c0_21, %c0_22], %29 {strides = array<i32>} : memref<8x128xbf16, #tpu.memory_space<vmem>>, vector<8x128xbf16>,
    %c0_i32_23 = arith.constant 0 : i32
    %31 = vector.broadcast %c0_i32_23 : i32 to vector<1x8xi32>
    %cst_24 = arith.constant 0.000000e+00 : f32
    %32 = vector.broadcast %cst_24 : f32 to vector<1x8xf32>
    %c1_i32_25 = arith.constant 1 : i32
    %c0_i32_26 = arith.constant 0 : i32
    %33 = arith.index_cast %c1_i32_25 : i32 to index
    %c0_27 = arith.constant 0 : index
    %34 = vector.load %arg10[%33, %c0_27] : memref<256x128xf32, #tpu.memory_space<vmem>>, vector<1x128xf32>
    %35 = arith.truncf %34 : vector<1x128xf32> to vector<1x128xbf16>
    %c0_28 = arith.constant 0 : index
    %c0_29 = arith.constant 0 : index
    %36 = vector.load %arg11[%c0_28, %c0_29] : memref<128x384xbf16, #tpu.memory_space<vmem>>, vector<128x384xbf16>
    %cst_30 = arith.constant dense<0.000000e+00> : vector<1x384xf32>
    %37 = tpu.matmul %35, %36, %cst_30 {dimension_numbers = #tpu.dot_dimension_numbers<[1], [0], [0], [1], [0, 0, 1, 1], [], []>} : vector<1x128xbf16>, vector<128x384xbf16>, vector<1x384xf32> -> vector<1x384xf32>
    %c0_31 = arith.constant 0 : index
    %c0_32 = arith.constant 0 : index
    %38 = vector.load %arg13[%c0_31, %c0_32] : memref<1x384xf32, #tpu.memory_space<vmem>>, vector<1x384xf32>
    %39 = arith.addf %37, %38 : vector<1x384xf32>
    %40 = arith.truncf %21#0 : vector<1x128xf32> to vector<1x128xbf16>
    %c0_33 = arith.constant 0 : index
    %c0_34 = arith.constant 0 : index
    %41 = vector.load %arg12[%c0_33, %c0_34] : memref<128x384xbf16, #tpu.memory_space<vmem>>, vector<128x384xbf16>
    %cst_35 = arith.constant dense<0.000000e+00> : vector<1x384xf32>
    %42 = tpu.matmul %40, %41, %cst_35 {dimension_numbers = #tpu.dot_dimension_numbers<[1], [0], [0], [1], [0, 0, 1, 1], [], []>} : vector<1x128xbf16>, vector<128x384xbf16>, vector<1x384xf32> -> vector<1x384xf32>
    %43 = vector.extract_strided_slice %39 {offsets = [0, 0], sizes = [1, 128], strides = [1, 1]} : vector<1x384xf32> to vector<1x128xf32>
    %44 = vector.extract_strided_slice %42 {offsets = [0, 0], sizes = [1, 128], strides = [1, 1]} : vector<1x384xf32> to vector<1x128xf32>
    %45 = arith.addf %43, %44 : vector<1x128xf32>
    %46 = arith.negf %45 : vector<1x128xf32>
    %47 = math.exp %46 : vector<1x128xf32>
    %cst_36 = arith.constant 1.000000e+00 : f32
    %48 = vector.broadcast %cst_36 : f32 to vector<1x128xf32>
    %49 = arith.addf %48, %47 : vector<1x128xf32>
    %50 = arith.divf %48, %49 : vector<1x128xf32>
    %51 = vector.extract_strided_slice %39 {offsets = [0, 128], sizes = [1, 128], strides = [1, 1]} : vector<1x384xf32> to vector<1x128xf32>
    %52 = vector.extract_strided_slice %42 {offsets = [0, 128], sizes = [1, 128], strides = [1, 1]} : vector<1x384xf32> to vector<1x128xf32>
    %53 = arith.addf %51, %52 : vector<1x128xf32>
    %54 = arith.negf %53 : vector<1x128xf32>
    %55 = math.exp %54 : vector<1x128xf32>
    %cst_37 = arith.constant 1.000000e+00 : f32
    %56 = vector.broadcast %cst_37 : f32 to vector<1x128xf32>
    %57 = arith.addf %56, %55 : vector<1x128xf32>
    %58 = arith.divf %56, %57 : vector<1x128xf32>
    %59 = vector.extract_strided_slice %39 {offsets = [0, 256], sizes = [1, 128], strides = [1, 1]} : vector<1x384xf32> to vector<1x128xf32>
    %60 = vector.extract_strided_slice %42 {offsets = [0, 256], sizes = [1, 128], strides = [1, 1]} : vector<1x384xf32> to vector<1x128xf32>
    %c0_38 = arith.constant 0 : index
    %c0_39 = arith.constant 0 : index
    %61 = vector.load %arg14[%c0_38, %c0_39] : memref<1x128xf32, #tpu.memory_space<vmem>>, vector<1x128xf32>
    %62 = arith.addf %60, %61 : vector<1x128xf32>
    %63 = arith.mulf %50, %62 : vector<1x128xf32>
    %64 = arith.addf %59, %63 : vector<1x128xf32>
    %65 = math.tanh %64 : vector<1x128xf32>
    %cst_40 = arith.constant 1.000000e+00 : f32
    %66 = vector.broadcast %cst_40 : f32 to vector<1x128xf32>
    %67 = arith.subf %66, %58 : vector<1x128xf32>
    %68 = arith.mulf %67, %65 : vector<1x128xf32>
    %69 = arith.mulf %58, %21#0 : vector<1x128xf32>
    %70 = arith.addf %68, %69 : vector<1x128xf32>
    %71 = arith.truncf %70 : vector<1x128xf32> to vector<1x128xbf16>
    %c0_41 = arith.constant 0 : index
    %c0_42 = arith.constant 0 : index
    %72 = vector.load %arg26[%c0_41, %c0_42] : memref<8x128xbf16, #tpu.memory_space<vmem>>, vector<8x128xbf16>
    %cst_43 = arith.constant dense<0.000000e+00> : vector<1x8xf32>
    %73 = tpu.matmul %71, %72, %cst_43 {dimension_numbers = #tpu.dot_dimension_numbers<[1], [1], [0], [0], [0, 0, 1, 0], [], []>} : vector<1x128xbf16>, vector<8x128xbf16>, vector<1x8xf32> -> vector<1x8xf32>
    %74 = vector.broadcast %0 : i32 to vector<1x8xi32>
    %75 = arith.cmpi slt, %1, %74 : vector<1x8xi32>
    %cst_44 = arith.constant -1.000000e+30 : f32
    %76 = vector.broadcast %cst_44 : f32 to vector<1x8xf32>
    %77 = arith.select %75, %73, %76 : vector<1x8xi1>, vector<1x8xf32>
    %cst_45 = arith.constant dense<0xFF800000> : vector<1xf32>
    %78 = vector.multi_reduction <maximumf>, %77, %cst_45 [1] : vector<1x8xf32> to vector<1xf32>
    %79 = vector.shape_cast %78 : vector<1xf32> to vector<1x1xf32>
    %80 = vector.broadcast %79 : vector<1x1xf32> to vector<1x8xf32>
    %81 = arith.subf %77, %80 : vector<1x8xf32>
    %82 = math.exp %81 : vector<1x8xf32>
    %cst_46 = arith.constant dense<0.000000e+00> : vector<1xf32>
    %83 = vector.multi_reduction <add>, %82, %cst_46 [1] : vector<1x8xf32> to vector<1xf32>
    %84 = vector.shape_cast %83 : vector<1xf32> to vector<1x1xf32>
    %85 = vector.broadcast %84 : vector<1x1xf32> to vector<1x8xf32>
    %86 = arith.divf %82, %85 : vector<1x8xf32>
    %87 = arith.truncf %86 : vector<1x8xf32> to vector<1x8xbf16>
    %cst_47 = arith.constant dense<0.000000e+00> : vector<1x128xf32>
    %88 = tpu.matmul %87, %72, %cst_47 {dimension_numbers = #tpu.dot_dimension_numbers<[1], [0], [0], [1], [0, 0, 1, 1], [], []>} : vector<1x8xbf16>, vector<8x128xbf16>, vector<1x128xf32> -> vector<1x128xf32>
    %c0_48 = arith.constant 0 : index
    %c0_49 = arith.constant 0 : index
    %89 = vector.load %arg15[%c0_48, %c0_49] : memref<128x128xbf16, #tpu.memory_space<vmem>>, vector<128x128xbf16>
    %cst_50 = arith.constant dense<0.000000e+00> : vector<1x128xf32>
    %90 = tpu.matmul %71, %89, %cst_50 {dimension_numbers = #tpu.dot_dimension_numbers<[1], [0], [0], [1], [0, 0, 1, 1], [], []>} : vector<1x128xbf16>, vector<128x128xbf16>, vector<1x128xf32> -> vector<1x128xf32>
    %91 = arith.truncf %88 : vector<1x128xf32> to vector<1x128xbf16>
    %c0_51 = arith.constant 0 : index
    %c0_52 = arith.constant 0 : index
    %92 = vector.load %arg16[%c0_51, %c0_52] : memref<128x128xbf16, #tpu.memory_space<vmem>>, vector<128x128xbf16>
    %cst_53 = arith.constant dense<0.000000e+00> : vector<1x128xf32>
    %93 = tpu.matmul %91, %92, %cst_53 {dimension_numbers = #tpu.dot_dimension_numbers<[1], [0], [0], [1], [0, 0, 1, 1], [], []>} : vector<1x128xbf16>, vector<128x128xbf16>, vector<1x128xf32> -> vector<1x128xf32>
    %94 = arith.addf %90, %93 : vector<1x128xf32>
    %c0_54 = arith.constant 0 : index
    %c0_55 = arith.constant 0 : index
    %95 = vector.load %arg17[%c0_54, %c0_55] : memref<1x128xf32, #tpu.memory_space<vmem>>, vector<1x128xf32>
    %96 = arith.addf %94, %95 : vector<1x128xf32>
    %97 = math.tanh %96 : vector<1x128xf32>
    %98 = arith.truncf %97 : vector<1x128xf32> to vector<1x128xbf16>
    %c0_56 = arith.constant 0 : index
    %c0_57 = arith.constant 0 : index
    %99 = vector.load %arg18[%c0_56, %c0_57] : memref<128x256xbf16, #tpu.memory_space<vmem>>, vector<128x256xbf16>
    %cst_58 = arith.constant dense<0.000000e+00> : vector<1x256xf32>
    %100 = tpu.matmul %98, %99, %cst_58 {dimension_numbers = #tpu.dot_dimension_numbers<[1], [0], [0], [1], [0, 0, 1, 1], [], []>} : vector<1x128xbf16>, vector<128x256xbf16>, vector<1x256xf32> -> vector<1x256xf32>
    %c0_59 = arith.constant 0 : index
    %c0_60 = arith.constant 0 : index
    %101 = vector.load %arg19[%c0_59, %c0_60] : memref<1x256xf32, #tpu.memory_space<vmem>>, vector<1x256xf32>
    %102 = arith.addf %100, %101 : vector<1x256xf32>
    %cst_61 = arith.constant dense<0xFF800000> : vector<1xf32>
    %103 = vector.multi_reduction <maximumf>, %102, %cst_61 [1] : vector<1x256xf32> to vector<1xf32>
    %104 = vector.shape_cast %103 : vector<1xf32> to vector<1x1xf32>
    %105 = vector.broadcast %104 : vector<1x1xf32> to vector<1x256xf32>
    %106 = arith.subf %102, %105 : vector<1x256xf32>
    %107 = math.exp %106 : vector<1x256xf32>
    %cst_62 = arith.constant dense<0.000000e+00> : vector<1xf32>
    %108 = vector.multi_reduction <add>, %107, %cst_62 [1] : vector<1x256xf32> to vector<1xf32>
    %109 = vector.shape_cast %108 : vector<1xf32> to vector<1x1xf32>
    %cst_63 = arith.constant 1.000000e+00 : f32
    %110 = vector.broadcast %cst_63 : f32 to vector<1x1xf32>
    %111 = arith.divf %110, %109 : vector<1x1xf32>
    %112 = vector.broadcast %104 : vector<1x1xf32> to vector<1x256xf32>
    %113 = arith.cmpf oeq, %102, %112 : vector<1x256xf32>
    %c256_i32 = arith.constant 256 : i32
    %114 = vector.broadcast %c256_i32 : i32 to vector<1x256xi32>
    %115 = arith.select %113, %2, %114 : vector<1x256xi1>, vector<1x256xi32>
    %cst_64 = arith.constant dense<2147483647> : vector<1xi32>
    %116 = vector.multi_reduction <minsi>, %115, %cst_64 [1] : vector<1x256xi32> to vector<1xi32>
    %117 = vector.shape_cast %116 : vector<1xi32> to vector<1x1xi32>
    %c0_65 = arith.constant 0 : index
    %c0_66 = arith.constant 0 : index
    %118 = vector.load %arg27[%c0_65, %c0_66] : memref<1x1xi32, #tpu.memory_space<vmem>>, vector<1x1xi32>
    tpu.vector_store %arg27[%c0_65, %c0_66], %117 {strides = array<i32>} : memref<1x1xi32, #tpu.memory_space<vmem>>, vector<1x1xi32>,
    tpu.enqueue_dma source(%arg27 : memref<1x1xi32, #tpu.memory_space<vmem>>) target(%arg28 : memref<1x1xi32, #tpu.memory_space<smem>>) target_semaphore(%arg29 : memref<!tpu.dma_semaphore, #tpu.memory_space<semaphore_mem>>)
    %119 = vector.broadcast %c0_i32_26 : i32 to vector<1x8xi32>
    %120 = arith.cmpi eq, %3, %119 : vector<1x8xi32>
    %121 = vector.shape_cast %117 : vector<1x1xi32> to vector<1x1xi32>
    %122 = vector.broadcast %121 : vector<1x1xi32> to vector<1x8xi32>
    %123 = arith.select %120, %122, %31 : vector<1x8xi1>, vector<1x8xi32>
    %124 = vector.broadcast %c0_i32_26 : i32 to vector<1x8xi32>
    %125 = arith.cmpi eq, %3, %124 : vector<1x8xi32>
    %126 = vector.shape_cast %111 : vector<1x1xf32> to vector<1x1xf32>
    %127 = vector.broadcast %126 : vector<1x1xf32> to vector<1x8xf32>
    %128 = arith.select %125, %127, %32 : vector<1x8xi1>, vector<1x8xf32>
    tpu.wait_dma2 semaphore(%arg29 : memref<!tpu.dma_semaphore, #tpu.memory_space<semaphore_mem>>) src(%arg27 : memref<1x1xi32, #tpu.memory_space<vmem>>) dst(%arg28 : memref<1x1xi32, #tpu.memory_space<smem>>)
    %c0_67 = arith.constant 0 : index
    %c0_68 = arith.constant 0 : index
    %129 = memref.load %arg28[%c0_67, %c0_68] : memref<1x1xi32, #tpu.memory_space<smem>>
    %c1_i32_69 = arith.constant 1 : i32
    %130 = arith.index_cast %129 : i32 to index
    %c0_70 = arith.constant 0 : index
    %131 = vector.load %arg10[%130, %c0_70] : memref<256x128xf32, #tpu.memory_space<vmem>>, vector<1x128xf32>
    %132 = arith.truncf %131 : vector<1x128xf32> to vector<1x128xbf16>
    %c0_71 = arith.constant 0 : index
    %c0_72 = arith.constant 0 : index
    %133 = vector.load %arg11[%c0_71, %c0_72] : memref<128x384xbf16, #tpu.memory_space<vmem>>, vector<128x384xbf16>
    %cst_73 = arith.constant dense<0.000000e+00> : vector<1x384xf32>
    %134 = tpu.matmul %132, %133, %cst_73 {dimension_numbers = #tpu.dot_dimension_numbers<[1], [0], [0], [1], [0, 0, 1, 1], [], []>} : vector<1x128xbf16>, vector<128x384xbf16>, vector<1x384xf32> -> vector<1x384xf32>
    %c0_74 = arith.constant 0 : index
    %c0_75 = arith.constant 0 : index
    %135 = vector.load %arg13[%c0_74, %c0_75] : memref<1x384xf32, #tpu.memory_space<vmem>>, vector<1x384xf32>
    %136 = arith.addf %134, %135 : vector<1x384xf32>
    %137 = arith.truncf %70 : vector<1x128xf32> to vector<1x128xbf16>
    %c0_76 = arith.constant 0 : index
    %c0_77 = arith.constant 0 : index
    %138 = vector.load %arg12[%c0_76, %c0_77] : memref<128x384xbf16, #tpu.memory_space<vmem>>, vector<128x384xbf16>
    %cst_78 = arith.constant dense<0.000000e+00> : vector<1x384xf32>
    %139 = tpu.matmul %137, %138, %cst_78 {dimension_numbers = #tpu.dot_dimension_numbers<[1], [0], [0], [1], [0, 0, 1, 1], [], []>} : vector<1x128xbf16>, vector<128x384xbf16>, vector<1x384xf32> -> vector<1x384xf32>
    %140 = vector.extract_strided_slice %136 {offsets = [0, 0], sizes = [1, 128], strides = [1, 1]} : vector<1x384xf32> to vector<1x128xf32>
    %141 = vector.extract_strided_slice %139 {offsets = [0, 0], sizes = [1, 128], strides = [1, 1]} : vector<1x384xf32> to vector<1x128xf32>
    %142 = arith.addf %140, %141 : vector<1x128xf32>
    %143 = arith.negf %142 : vector<1x128xf32>
    %144 = math.exp %143 : vector<1x128xf32>
    %cst_79 = arith.constant 1.000000e+00 : f32
    %145 = vector.broadcast %cst_79 : f32 to vector<1x128xf32>
    %146 = arith.addf %145, %144 : vector<1x128xf32>
    %147 = arith.divf %145, %146 : vector<1x128xf32>
    %148 = vector.extract_strided_slice %136 {offsets = [0, 128], sizes = [1, 128], strides = [1, 1]} : vector<1x384xf32> to vector<1x128xf32>
    %149 = vector.extract_strided_slice %139 {offsets = [0, 128], sizes = [1, 128], strides = [1, 1]} : vector<1x384xf32> to vector<1x128xf32>
    %150 = arith.addf %148, %149 : vector<1x128xf32>
    %151 = arith.negf %150 : vector<1x128xf32>
    %152 = math.exp %151 : vector<1x128xf32>
    %cst_80 = arith.constant 1.000000e+00 : f32
    %153 = vector.broadcast %cst_80 : f32 to vector<1x128xf32>
    %154 = arith.addf %153, %152 : vector<1x128xf32>
    %155 = arith.divf %153, %154 : vector<1x128xf32>
    %156 = vector.extract_strided_slice %136 {offsets = [0, 256], sizes = [1, 128], strides = [1, 1]} : vector<1x384xf32> to vector<1x128xf32>
    %157 = vector.extract_strided_slice %139 {offsets = [0, 256], sizes = [1, 128], strides = [1, 1]} : vector<1x384xf32> to vector<1x128xf32>
    %c0_81 = arith.constant 0 : index
    %c0_82 = arith.constant 0 : index
    %158 = vector.load %arg14[%c0_81, %c0_82] : memref<1x128xf32, #tpu.memory_space<vmem>>, vector<1x128xf32>
    %159 = arith.addf %157, %158 : vector<1x128xf32>
    %160 = arith.mulf %147, %159 : vector<1x128xf32>
    %161 = arith.addf %156, %160 : vector<1x128xf32>
    %162 = math.tanh %161 : vector<1x128xf32>
    %cst_83 = arith.constant 1.000000e+00 : f32
    %163 = vector.broadcast %cst_83 : f32 to vector<1x128xf32>
    %164 = arith.subf %163, %155 : vector<1x128xf32>
    %165 = arith.mulf %164, %162 : vector<1x128xf32>
    %166 = arith.mulf %155, %70 : vector<1x128xf32>
    %167 = arith.addf %165, %166 : vector<1x128xf32>
    %168 = arith.truncf %167 : vector<1x128xf32> to vector<1x128xbf16>
    %c0_84 = arith.constant 0 : index
    %c0_85 = arith.constant 0 : index
    %169 = vector.load %arg26[%c0_84, %c0_85] : memref<8x128xbf16, #tpu.memory_space<vmem>>, vector<8x128xbf16>
    %cst_86 = arith.constant dense<0.000000e+00> : vector<1x8xf32>
    %170 = tpu.matmul %168, %169, %cst_86 {dimension_numbers = #tpu.dot_dimension_numbers<[1], [1], [0], [0], [0, 0, 1, 0], [], []>} : vector<1x128xbf16>, vector<8x128xbf16>, vector<1x8xf32> -> vector<1x8xf32>
    %171 = vector.broadcast %0 : i32 to vector<1x8xi32>
    %172 = arith.cmpi slt, %1, %171 : vector<1x8xi32>
    %cst_87 = arith.constant -1.000000e+30 : f32
    %173 = vector.broadcast %cst_87 : f32 to vector<1x8xf32>
    %174 = arith.select %172, %170, %173 : vector<1x8xi1>, vector<1x8xf32>
    %cst_88 = arith.constant dense<0xFF800000> : vector<1xf32>
    %175 = vector.multi_reduction <maximumf>, %174, %cst_88 [1] : vector<1x8xf32> to vector<1xf32>
    %176 = vector.shape_cast %175 : vector<1xf32> to vector<1x1xf32>
    %177 = vector.broadcast %176 : vector<1x1xf32> to vector<1x8xf32>
    %178 = arith.subf %174, %177 : vector<1x8xf32>
    %179 = math.exp %178 : vector<1x8xf32>
    %cst_89 = arith.constant dense<0.000000e+00> : vector<1xf32>
    %180 = vector.multi_reduction <add>, %179, %cst_89 [1] : vector<1x8xf32> to vector<1xf32>
    %181 = vector.shape_cast %180 : vector<1xf32> to vector<1x1xf32>
    %182 = vector.broadcast %181 : vector<1x1xf32> to vector<1x8xf32>
    %183 = arith.divf %179, %182 : vector<1x8xf32>
    %184 = arith.truncf %183 : vector<1x8xf32> to vector<1x8xbf16>
    %cst_90 = arith.constant dense<0.000000e+00> : vector<1x128xf32>
    %185 = tpu.matmul %184, %169, %cst_90 {dimension_numbers = #tpu.dot_dimension_numbers<[1], [0], [0], [1], [0, 0, 1, 1], [], []>} : vector<1x8xbf16>, vector<8x128xbf16>, vector<1x128xf32> -> vector<1x128xf32>
    %c0_91 = arith.constant 0 : index
    %c0_92 = arith.constant 0 : index
    %186 = vector.load %arg15[%c0_91, %c0_92] : memref<128x128xbf16, #tpu.memory_space<vmem>>, vector<128x128xbf16>
    %cst_93 = arith.constant dense<0.000000e+00> : vector<1x128xf32>
    %187 = tpu.matmul %168, %186, %cst_93 {dimension_numbers = #tpu.dot_dimension_numbers<[1], [0], [0], [1], [0, 0, 1, 1], [], []>} : vector<1x128xbf16>, vector<128x128xbf16>, vector<1x128xf32> -> vector<1x128xf32>
    %188 = arith.truncf %185 : vector<1x128xf32> to vector<1x128xbf16>
    %c0_94 = arith.constant 0 : index
    %c0_95 = arith.constant 0 : index
    %189 = vector.load %arg16[%c0_94, %c0_95] : memref<128x128xbf16, #tpu.memory_space<vmem>>, vector<128x128xbf16>
    %cst_96 = arith.constant dense<0.000000e+00> : vector<1x128xf32>
    %190 = tpu.matmul %188, %189, %cst_96 {dimension_numbers = #tpu.dot_dimension_numbers<[1], [0], [0], [1], [0, 0, 1, 1], [], []>} : vector<1x128xbf16>, vector<128x128xbf16>, vector<1x128xf32> -> vector<1x128xf32>
    %191 = arith.addf %187, %190 : vector<1x128xf32>
    %c0_97 = arith.constant 0 : index
    %c0_98 = arith.constant 0 : index
    %192 = vector.load %arg17[%c0_97, %c0_98] : memref<1x128xf32, #tpu.memory_space<vmem>>, vector<1x128xf32>
    %193 = arith.addf %191, %192 : vector<1x128xf32>
    %194 = math.tanh %193 : vector<1x128xf32>
    %195 = arith.truncf %194 : vector<1x128xf32> to vector<1x128xbf16>
    %c0_99 = arith.constant 0 : index
    %c0_100 = arith.constant 0 : index
    %196 = vector.load %arg18[%c0_99, %c0_100] : memref<128x256xbf16, #tpu.memory_space<vmem>>, vector<128x256xbf16>
    %cst_101 = arith.constant dense<0.000000e+00> : vector<1x256xf32>
    %197 = tpu.matmul %195, %196, %cst_101 {dimension_numbers = #tpu.dot_dimension_numbers<[1], [0], [0], [1], [0, 0, 1, 1], [], []>} : vector<1x128xbf16>, vector<128x256xbf16>, vector<1x256xf32> -> vector<1x256xf32>
    %c0_102 = arith.constant 0 : index
    %c0_103 = arith.constant 0 : index
    %198 = vector.load %arg19[%c0_102, %c0_103] : memref<1x256xf32, #tpu.memory_space<vmem>>, vector<1x256xf32>
    %199 = arith.addf %197, %198 : vector<1x256xf32>
    %cst_104 = arith.constant dense<0xFF800000> : vector<1xf32>
    %200 = vector.multi_reduction <maximumf>, %199, %cst_104 [1] : vector<1x256xf32> to vector<1xf32>
    %201 = vector.shape_cast %200 : vector<1xf32> to vector<1x1xf32>
    %202 = vector.broadcast %201 : vector<1x1xf32> to vector<1x256xf32>
    %203 = arith.subf %199, %202 : vector<1x256xf32>
    %204 = math.exp %203 : vector<1x256xf32>
    %cst_105 = arith.constant dense<0.000000e+00> : vector<1xf32>
    %205 = vector.multi_reduction <add>, %204, %cst_105 [1] : vector<1x256xf32> to vector<1xf32>
    %206 = vector.shape_cast %205 : vector<1xf32> to vector<1x1xf32>
    %cst_106 = arith.constant 1.000000e+00 : f32
    %207 = vector.broadcast %cst_106 : f32 to vector<1x1xf32>
    %208 = arith.divf %207, %206 : vector<1x1xf32>
    %209 = vector.broadcast %201 : vector<1x1xf32> to vector<1x256xf32>
    %210 = arith.cmpf oeq, %199, %209 : vector<1x256xf32>
    %c256_i32_107 = arith.constant 256 : i32
    %211 = vector.broadcast %c256_i32_107 : i32 to vector<1x256xi32>
    %212 = arith.select %210, %2, %211 : vector<1x256xi1>, vector<1x256xi32>
    %cst_108 = arith.constant dense<2147483647> : vector<1xi32>
    %213 = vector.multi_reduction <minsi>, %212, %cst_108 [1] : vector<1x256xi32> to vector<1xi32>
    %214 = vector.shape_cast %213 : vector<1xi32> to vector<1x1xi32>
    %c0_109 = arith.constant 0 : index
    %c0_110 = arith.constant 0 : index
    %215 = vector.load %arg27[%c0_109, %c0_110] : memref<1x1xi32, #tpu.memory_space<vmem>>, vector<1x1xi32>
    tpu.vector_store %arg27[%c0_109, %c0_110], %214 {strides = array<i32>} : memref<1x1xi32, #tpu.memory_space<vmem>>, vector<1x1xi32>,
    tpu.enqueue_dma source(%arg27 : memref<1x1xi32, #tpu.memory_space<vmem>>) target(%arg28 : memref<1x1xi32, #tpu.memory_space<smem>>) target_semaphore(%arg29 : memref<!tpu.dma_semaphore, #tpu.memory_space<semaphore_mem>>)
    %216 = vector.broadcast %c1_i32_69 : i32 to vector<1x8xi32>
    %217 = arith.cmpi eq, %3, %216 : vector<1x8xi32>
    %218 = vector.shape_cast %214 : vector<1x1xi32> to vector<1x1xi32>
    %219 = vector.broadcast %218 : vector<1x1xi32> to vector<1x8xi32>
    %220 = arith.select %217, %219, %123 : vector<1x8xi1>, vector<1x8xi32>
    %221 = vector.broadcast %c1_i32_69 : i32 to vector<1x8xi32>
    %222 = arith.cmpi eq, %3, %221 : vector<1x8xi32>
    %223 = vector.shape_cast %208 : vector<1x1xf32> to vector<1x1xf32>
    %224 = vector.broadcast %223 : vector<1x1xf32> to vector<1x8xf32>
    %225 = arith.select %222, %224, %128 : vector<1x8xi1>, vector<1x8xf32>
    tpu.wait_dma2 semaphore(%arg29 : memref<!tpu.dma_semaphore, #tpu.memory_space<semaphore_mem>>) src(%arg27 : memref<1x1xi32, #tpu.memory_space<vmem>>) dst(%arg28 : memref<1x1xi32, #tpu.memory_space<smem>>)
    %c0_111 = arith.constant 0 : index
    %c0_112 = arith.constant 0 : index
    %226 = memref.load %arg28[%c0_111, %c0_112] : memref<1x1xi32, #tpu.memory_space<smem>>
    %c2_i32 = arith.constant 2 : i32
    %227 = arith.index_cast %226 : i32 to index
    %c0_113 = arith.constant 0 : index
    %228 = vector.load %arg10[%227, %c0_113] : memref<256x128xf32, #tpu.memory_space<vmem>>, vector<1x128xf32>
    %229 = arith.truncf %228 : vector<1x128xf32> to vector<1x128xbf16>
    %c0_114 = arith.constant 0 : index
    %c0_115 = arith.constant 0 : index
    %230 = vector.load %arg11[%c0_114, %c0_115] : memref<128x384xbf16, #tpu.memory_space<vmem>>, vector<128x384xbf16>
    %cst_116 = arith.constant dense<0.000000e+00> : vector<1x384xf32>
    %231 = tpu.matmul %229, %230, %cst_116 {dimension_numbers = #tpu.dot_dimension_numbers<[1], [0], [0], [1], [0, 0, 1, 1], [], []>} : vector<1x128xbf16>, vector<128x384xbf16>, vector<1x384xf32> -> vector<1x384xf32>
    %c0_117 = arith.constant 0 : index
    %c0_118 = arith.constant 0 : index
    %232 = vector.load %arg13[%c0_117, %c0_118] : memref<1x384xf32, #tpu.memory_space<vmem>>, vector<1x384xf32>
    %233 = arith.addf %231, %232 : vector<1x384xf32>
    %234 = arith.truncf %167 : vector<1x128xf32> to vector<1x128xbf16>
    %c0_119 = arith.constant 0 : index
    %c0_120 = arith.constant 0 : index
    %235 = vector.load %arg12[%c0_119, %c0_120] : memref<128x384xbf16, #tpu.memory_space<vmem>>, vector<128x384xbf16>
    %cst_121 = arith.constant dense<0.000000e+00> : vector<1x384xf32>
    %236 = tpu.matmul %234, %235, %cst_121 {dimension_numbers = #tpu.dot_dimension_numbers<[1], [0], [0], [1], [0, 0, 1, 1], [], []>} : vector<1x128xbf16>, vector<128x384xbf16>, vector<1x384xf32> -> vector<1x384xf32>
    %237 = vector.extract_strided_slice %233 {offsets = [0, 0], sizes = [1, 128], strides = [1, 1]} : vector<1x384xf32> to vector<1x128xf32>
    %238 = vector.extract_strided_slice %236 {offsets = [0, 0], sizes = [1, 128], strides = [1, 1]} : vector<1x384xf32> to vector<1x128xf32>
    %239 = arith.addf %237, %238 : vector<1x128xf32>
    %240 = arith.negf %239 : vector<1x128xf32>
    %241 = math.exp %240 : vector<1x128xf32>
    %cst_122 = arith.constant 1.000000e+00 : f32
    %242 = vector.broadcast %cst_122 : f32 to vector<1x128xf32>
    %243 = arith.addf %242, %241 : vector<1x128xf32>
    %244 = arith.divf %242, %243 : vector<1x128xf32>
    %245 = vector.extract_strided_slice %233 {offsets = [0, 128], sizes = [1, 128], strides = [1, 1]} : vector<1x384xf32> to vector<1x128xf32>
    %246 = vector.extract_strided_slice %236 {offsets = [0, 128], sizes = [1, 128], strides = [1, 1]} : vector<1x384xf32> to vector<1x128xf32>
    %247 = arith.addf %245, %246 : vector<1x128xf32>
    %248 = arith.negf %247 : vector<1x128xf32>
    %249 = math.exp %248 : vector<1x128xf32>
    %cst_123 = arith.constant 1.000000e+00 : f32
    %250 = vector.broadcast %cst_123 : f32 to vector<1x128xf32>
    %251 = arith.addf %250, %249 : vector<1x128xf32>
    %252 = arith.divf %250, %251 : vector<1x128xf32>
    %253 = vector.extract_strided_slice %233 {offsets = [0, 256], sizes = [1, 128], strides = [1, 1]} : vector<1x384xf32> to vector<1x128xf32>
    %254 = vector.extract_strided_slice %236 {offsets = [0, 256], sizes = [1, 128], strides = [1, 1]} : vector<1x384xf32> to vector<1x128xf32>
    %c0_124 = arith.constant 0 : index
    %c0_125 = arith.constant 0 : index
    %255 = vector.load %arg14[%c0_124, %c0_125] : memref<1x128xf32, #tpu.memory_space<vmem>>, vector<1x128xf32>
    %256 = arith.addf %254, %255 : vector<1x128xf32>
    %257 = arith.mulf %244, %256 : vector<1x128xf32>
    %258 = arith.addf %253, %257 : vector<1x128xf32>
    %259 = math.tanh %258 : vector<1x128xf32>
    %cst_126 = arith.constant 1.000000e+00 : f32
    %260 = vector.broadcast %cst_126 : f32 to vector<1x128xf32>
    %261 = arith.subf %260, %252 : vector<1x128xf32>
    %262 = arith.mulf %261, %259 : vector<1x128xf32>
    %263 = arith.mulf %252, %167 : vector<1x128xf32>
    %264 = arith.addf %262, %263 : vector<1x128xf32>
    %265 = arith.truncf %264 : vector<1x128xf32> to vector<1x128xbf16>
    %c0_127 = arith.constant 0 : index
    %c0_128 = arith.constant 0 : index
    %266 = vector.load %arg26[%c0_127, %c0_128] : memref<8x128xbf16, #tpu.memory_space<vmem>>, vector<8x128xbf16>
    %cst_129 = arith.constant dense<0.000000e+00> : vector<1x8xf32>
    %267 = tpu.matmul %265, %266, %cst_129 {dimension_numbers = #tpu.dot_dimension_numbers<[1], [1], [0], [0], [0, 0, 1, 0], [], []>} : vector<1x128xbf16>, vector<8x128xbf16>, vector<1x8xf32> -> vector<1x8xf32>
    %268 = vector.broadcast %0 : i32 to vector<1x8xi32>
    %269 = arith.cmpi slt, %1, %268 : vector<1x8xi32>
    %cst_130 = arith.constant -1.000000e+30 : f32
    %270 = vector.broadcast %cst_130 : f32 to vector<1x8xf32>
    %271 = arith.select %269, %267, %270 : vector<1x8xi1>, vector<1x8xf32>
    %cst_131 = arith.constant dense<0xFF800000> : vector<1xf32>
    %272 = vector.multi_reduction <maximumf>, %271, %cst_131 [1] : vector<1x8xf32> to vector<1xf32>
    %273 = vector.shape_cast %272 : vector<1xf32> to vector<1x1xf32>
    %274 = vector.broadcast %273 : vector<1x1xf32> to vector<1x8xf32>
    %275 = arith.subf %271, %274 : vector<1x8xf32>
    %276 = math.exp %275 : vector<1x8xf32>
    %cst_132 = arith.constant dense<0.000000e+00> : vector<1xf32>
    %277 = vector.multi_reduction <add>, %276, %cst_132 [1] : vector<1x8xf32> to vector<1xf32>
    %278 = vector.shape_cast %277 : vector<1xf32> to vector<1x1xf32>
    %279 = vector.broadcast %278 : vector<1x1xf32> to vector<1x8xf32>
    %280 = arith.divf %276, %279 : vector<1x8xf32>
    %281 = arith.truncf %280 : vector<1x8xf32> to vector<1x8xbf16>
    %cst_133 = arith.constant dense<0.000000e+00> : vector<1x128xf32>
    %282 = tpu.matmul %281, %266, %cst_133 {dimension_numbers = #tpu.dot_dimension_numbers<[1], [0], [0], [1], [0, 0, 1, 1], [], []>} : vector<1x8xbf16>, vector<8x128xbf16>, vector<1x128xf32> -> vector<1x128xf32>
    %c0_134 = arith.constant 0 : index
    %c0_135 = arith.constant 0 : index
    %283 = vector.load %arg15[%c0_134, %c0_135] : memref<128x128xbf16, #tpu.memory_space<vmem>>, vector<128x128xbf16>
    %cst_136 = arith.constant dense<0.000000e+00> : vector<1x128xf32>
    %284 = tpu.matmul %265, %283, %cst_136 {dimension_numbers = #tpu.dot_dimension_numbers<[1], [0], [0], [1], [0, 0, 1, 1], [], []>} : vector<1x128xbf16>, vector<128x128xbf16>, vector<1x128xf32> -> vector<1x128xf32>
    %285 = arith.truncf %282 : vector<1x128xf32> to vector<1x128xbf16>
    %c0_137 = arith.constant 0 : index
    %c0_138 = arith.constant 0 : index
    %286 = vector.load %arg16[%c0_137, %c0_138] : memref<128x128xbf16, #tpu.memory_space<vmem>>, vector<128x128xbf16>
    %cst_139 = arith.constant dense<0.000000e+00> : vector<1x128xf32>
    %287 = tpu.matmul %285, %286, %cst_139 {dimension_numbers = #tpu.dot_dimension_numbers<[1], [0], [0], [1], [0, 0, 1, 1], [], []>} : vector<1x128xbf16>, vector<128x128xbf16>, vector<1x128xf32> -> vector<1x128xf32>
    %288 = arith.addf %284, %287 : vector<1x128xf32>
    %c0_140 = arith.constant 0 : index
    %c0_141 = arith.constant 0 : index
    %289 = vector.load %arg17[%c0_140, %c0_141] : memref<1x128xf32, #tpu.memory_space<vmem>>, vector<1x128xf32>
    %290 = arith.addf %288, %289 : vector<1x128xf32>
    %291 = math.tanh %290 : vector<1x128xf32>
    %292 = arith.truncf %291 : vector<1x128xf32> to vector<1x128xbf16>
    %c0_142 = arith.constant 0 : index
    %c0_143 = arith.constant 0 : index
    %293 = vector.load %arg18[%c0_142, %c0_143] : memref<128x256xbf16, #tpu.memory_space<vmem>>, vector<128x256xbf16>
    %cst_144 = arith.constant dense<0.000000e+00> : vector<1x256xf32>
    %294 = tpu.matmul %292, %293, %cst_144 {dimension_numbers = #tpu.dot_dimension_numbers<[1], [0], [0], [1], [0, 0, 1, 1], [], []>} : vector<1x128xbf16>, vector<128x256xbf16>, vector<1x256xf32> -> vector<1x256xf32>
    %c0_145 = arith.constant 0 : index
    %c0_146 = arith.constant 0 : index
    %295 = vector.load %arg19[%c0_145, %c0_146] : memref<1x256xf32, #tpu.memory_space<vmem>>, vector<1x256xf32>
    %296 = arith.addf %294, %295 : vector<1x256xf32>
    %cst_147 = arith.constant dense<0xFF800000> : vector<1xf32>
    %297 = vector.multi_reduction <maximumf>, %296, %cst_147 [1] : vector<1x256xf32> to vector<1xf32>
    %298 = vector.shape_cast %297 : vector<1xf32> to vector<1x1xf32>
    %299 = vector.broadcast %298 : vector<1x1xf32> to vector<1x256xf32>
    %300 = arith.subf %296, %299 : vector<1x256xf32>
    %301 = math.exp %300 : vector<1x256xf32>
    %cst_148 = arith.constant dense<0.000000e+00> : vector<1xf32>
    %302 = vector.multi_reduction <add>, %301, %cst_148 [1] : vector<1x256xf32> to vector<1xf32>
    %303 = vector.shape_cast %302 : vector<1xf32> to vector<1x1xf32>
    %cst_149 = arith.constant 1.000000e+00 : f32
    %304 = vector.broadcast %cst_149 : f32 to vector<1x1xf32>
    %305 = arith.divf %304, %303 : vector<1x1xf32>
    %306 = vector.broadcast %298 : vector<1x1xf32> to vector<1x256xf32>
    %307 = arith.cmpf oeq, %296, %306 : vector<1x256xf32>
    %c256_i32_150 = arith.constant 256 : i32
    %308 = vector.broadcast %c256_i32_150 : i32 to vector<1x256xi32>
    %309 = arith.select %307, %2, %308 : vector<1x256xi1>, vector<1x256xi32>
    %cst_151 = arith.constant dense<2147483647> : vector<1xi32>
    %310 = vector.multi_reduction <minsi>, %309, %cst_151 [1] : vector<1x256xi32> to vector<1xi32>
    %311 = vector.shape_cast %310 : vector<1xi32> to vector<1x1xi32>
    %c0_152 = arith.constant 0 : index
    %c0_153 = arith.constant 0 : index
    %312 = vector.load %arg27[%c0_152, %c0_153] : memref<1x1xi32, #tpu.memory_space<vmem>>, vector<1x1xi32>
    tpu.vector_store %arg27[%c0_152, %c0_153], %311 {strides = array<i32>} : memref<1x1xi32, #tpu.memory_space<vmem>>, vector<1x1xi32>,
    tpu.enqueue_dma source(%arg27 : memref<1x1xi32, #tpu.memory_space<vmem>>) target(%arg28 : memref<1x1xi32, #tpu.memory_space<smem>>) target_semaphore(%arg29 : memref<!tpu.dma_semaphore, #tpu.memory_space<semaphore_mem>>)
    %313 = vector.broadcast %c2_i32 : i32 to vector<1x8xi32>
    %314 = arith.cmpi eq, %3, %313 : vector<1x8xi32>
    %315 = vector.shape_cast %311 : vector<1x1xi32> to vector<1x1xi32>
    %316 = vector.broadcast %315 : vector<1x1xi32> to vector<1x8xi32>
    %317 = arith.select %314, %316, %220 : vector<1x8xi1>, vector<1x8xi32>
    %318 = vector.broadcast %c2_i32 : i32 to vector<1x8xi32>
    %319 = arith.cmpi eq, %3, %318 : vector<1x8xi32>
    %320 = vector.shape_cast %305 : vector<1x1xf32> to vector<1x1xf32>
    %321 = vector.broadcast %320 : vector<1x1xf32> to vector<1x8xf32>
    %322 = arith.select %319, %321, %225 : vector<1x8xi1>, vector<1x8xf32>
    tpu.wait_dma2 semaphore(%arg29 : memref<!tpu.dma_semaphore, #tpu.memory_space<semaphore_mem>>) src(%arg27 : memref<1x1xi32, #tpu.memory_space<vmem>>) dst(%arg28 : memref<1x1xi32, #tpu.memory_space<smem>>)
    %c0_154 = arith.constant 0 : index
    %c0_155 = arith.constant 0 : index
    %323 = memref.load %arg28[%c0_154, %c0_155] : memref<1x1xi32, #tpu.memory_space<smem>>
    %c3_i32 = arith.constant 3 : i32
    %324 = arith.index_cast %323 : i32 to index
    %c0_156 = arith.constant 0 : index
    %325 = vector.load %arg10[%324, %c0_156] : memref<256x128xf32, #tpu.memory_space<vmem>>, vector<1x128xf32>
    %326 = arith.truncf %325 : vector<1x128xf32> to vector<1x128xbf16>
    %c0_157 = arith.constant 0 : index
    %c0_158 = arith.constant 0 : index
    %327 = vector.load %arg11[%c0_157, %c0_158] : memref<128x384xbf16, #tpu.memory_space<vmem>>, vector<128x384xbf16>
    %cst_159 = arith.constant dense<0.000000e+00> : vector<1x384xf32>
    %328 = tpu.matmul %326, %327, %cst_159 {dimension_numbers = #tpu.dot_dimension_numbers<[1], [0], [0], [1], [0, 0, 1, 1], [], []>} : vector<1x128xbf16>, vector<128x384xbf16>, vector<1x384xf32> -> vector<1x384xf32>
    %c0_160 = arith.constant 0 : index
    %c0_161 = arith.constant 0 : index
    %329 = vector.load %arg13[%c0_160, %c0_161] : memref<1x384xf32, #tpu.memory_space<vmem>>, vector<1x384xf32>
    %330 = arith.addf %328, %329 : vector<1x384xf32>
    %331 = arith.truncf %264 : vector<1x128xf32> to vector<1x128xbf16>
    %c0_162 = arith.constant 0 : index
    %c0_163 = arith.constant 0 : index
    %332 = vector.load %arg12[%c0_162, %c0_163] : memref<128x384xbf16, #tpu.memory_space<vmem>>, vector<128x384xbf16>
    %cst_164 = arith.constant dense<0.000000e+00> : vector<1x384xf32>
    %333 = tpu.matmul %331, %332, %cst_164 {dimension_numbers = #tpu.dot_dimension_numbers<[1], [0], [0], [1], [0, 0, 1, 1], [], []>} : vector<1x128xbf16>, vector<128x384xbf16>, vector<1x384xf32> -> vector<1x384xf32>
    %334 = vector.extract_strided_slice %330 {offsets = [0, 0], sizes = [1, 128], strides = [1, 1]} : vector<1x384xf32> to vector<1x128xf32>
    %335 = vector.extract_strided_slice %333 {offsets = [0, 0], sizes = [1, 128], strides = [1, 1]} : vector<1x384xf32> to vector<1x128xf32>
    %336 = arith.addf %334, %335 : vector<1x128xf32>
    %337 = arith.negf %336 : vector<1x128xf32>
    %338 = math.exp %337 : vector<1x128xf32>
    %cst_165 = arith.constant 1.000000e+00 : f32
    %339 = vector.broadcast %cst_165 : f32 to vector<1x128xf32>
    %340 = arith.addf %339, %338 : vector<1x128xf32>
    %341 = arith.divf %339, %340 : vector<1x128xf32>
    %342 = vector.extract_strided_slice %330 {offsets = [0, 128], sizes = [1, 128], strides = [1, 1]} : vector<1x384xf32> to vector<1x128xf32>
    %343 = vector.extract_strided_slice %333 {offsets = [0, 128], sizes = [1, 128], strides = [1, 1]} : vector<1x384xf32> to vector<1x128xf32>
    %344 = arith.addf %342, %343 : vector<1x128xf32>
    %345 = arith.negf %344 : vector<1x128xf32>
    %346 = math.exp %345 : vector<1x128xf32>
    %cst_166 = arith.constant 1.000000e+00 : f32
    %347 = vector.broadcast %cst_166 : f32 to vector<1x128xf32>
    %348 = arith.addf %347, %346 : vector<1x128xf32>
    %349 = arith.divf %347, %348 : vector<1x128xf32>
    %350 = vector.extract_strided_slice %330 {offsets = [0, 256], sizes = [1, 128], strides = [1, 1]} : vector<1x384xf32> to vector<1x128xf32>
    %351 = vector.extract_strided_slice %333 {offsets = [0, 256], sizes = [1, 128], strides = [1, 1]} : vector<1x384xf32> to vector<1x128xf32>
    %c0_167 = arith.constant 0 : index
    %c0_168 = arith.constant 0 : index
    %352 = vector.load %arg14[%c0_167, %c0_168] : memref<1x128xf32, #tpu.memory_space<vmem>>, vector<1x128xf32>
    %353 = arith.addf %351, %352 : vector<1x128xf32>
    %354 = arith.mulf %341, %353 : vector<1x128xf32>
    %355 = arith.addf %350, %354 : vector<1x128xf32>
    %356 = math.tanh %355 : vector<1x128xf32>
    %cst_169 = arith.constant 1.000000e+00 : f32
    %357 = vector.broadcast %cst_169 : f32 to vector<1x128xf32>
    %358 = arith.subf %357, %349 : vector<1x128xf32>
    %359 = arith.mulf %358, %356 : vector<1x128xf32>
    %360 = arith.mulf %349, %264 : vector<1x128xf32>
    %361 = arith.addf %359, %360 : vector<1x128xf32>
    %362 = arith.truncf %361 : vector<1x128xf32> to vector<1x128xbf16>
    %c0_170 = arith.constant 0 : index
    %c0_171 = arith.constant 0 : index
    %363 = vector.load %arg26[%c0_170, %c0_171] : memref<8x128xbf16, #tpu.memory_space<vmem>>, vector<8x128xbf16>
    %cst_172 = arith.constant dense<0.000000e+00> : vector<1x8xf32>
    %364 = tpu.matmul %362, %363, %cst_172 {dimension_numbers = #tpu.dot_dimension_numbers<[1], [1], [0], [0], [0, 0, 1, 0], [], []>} : vector<1x128xbf16>, vector<8x128xbf16>, vector<1x8xf32> -> vector<1x8xf32>
    %365 = vector.broadcast %0 : i32 to vector<1x8xi32>
    %366 = arith.cmpi slt, %1, %365 : vector<1x8xi32>
    %cst_173 = arith.constant -1.000000e+30 : f32
    %367 = vector.broadcast %cst_173 : f32 to vector<1x8xf32>
    %368 = arith.select %366, %364, %367 : vector<1x8xi1>, vector<1x8xf32>
    %cst_174 = arith.constant dense<0xFF800000> : vector<1xf32>
    %369 = vector.multi_reduction <maximumf>, %368, %cst_174 [1] : vector<1x8xf32> to vector<1xf32>
    %370 = vector.shape_cast %369 : vector<1xf32> to vector<1x1xf32>
    %371 = vector.broadcast %370 : vector<1x1xf32> to vector<1x8xf32>
    %372 = arith.subf %368, %371 : vector<1x8xf32>
    %373 = math.exp %372 : vector<1x8xf32>
    %cst_175 = arith.constant dense<0.000000e+00> : vector<1xf32>
    %374 = vector.multi_reduction <add>, %373, %cst_175 [1] : vector<1x8xf32> to vector<1xf32>
    %375 = vector.shape_cast %374 : vector<1xf32> to vector<1x1xf32>
    %376 = vector.broadcast %375 : vector<1x1xf32> to vector<1x8xf32>
    %377 = arith.divf %373, %376 : vector<1x8xf32>
    %378 = arith.truncf %377 : vector<1x8xf32> to vector<1x8xbf16>
    %cst_176 = arith.constant dense<0.000000e+00> : vector<1x128xf32>
    %379 = tpu.matmul %378, %363, %cst_176 {dimension_numbers = #tpu.dot_dimension_numbers<[1], [0], [0], [1], [0, 0, 1, 1], [], []>} : vector<1x8xbf16>, vector<8x128xbf16>, vector<1x128xf32> -> vector<1x128xf32>
    %c0_177 = arith.constant 0 : index
    %c0_178 = arith.constant 0 : index
    %380 = vector.load %arg15[%c0_177, %c0_178] : memref<128x128xbf16, #tpu.memory_space<vmem>>, vector<128x128xbf16>
    %cst_179 = arith.constant dense<0.000000e+00> : vector<1x128xf32>
    %381 = tpu.matmul %362, %380, %cst_179 {dimension_numbers = #tpu.dot_dimension_numbers<[1], [0], [0], [1], [0, 0, 1, 1], [], []>} : vector<1x128xbf16>, vector<128x128xbf16>, vector<1x128xf32> -> vector<1x128xf32>
    %382 = arith.truncf %379 : vector<1x128xf32> to vector<1x128xbf16>
    %c0_180 = arith.constant 0 : index
    %c0_181 = arith.constant 0 : index
    %383 = vector.load %arg16[%c0_180, %c0_181] : memref<128x128xbf16, #tpu.memory_space<vmem>>, vector<128x128xbf16>
    %cst_182 = arith.constant dense<0.000000e+00> : vector<1x128xf32>
    %384 = tpu.matmul %382, %383, %cst_182 {dimension_numbers = #tpu.dot_dimension_numbers<[1], [0], [0], [1], [0, 0, 1, 1], [], []>} : vector<1x128xbf16>, vector<128x128xbf16>, vector<1x128xf32> -> vector<1x128xf32>
    %385 = arith.addf %381, %384 : vector<1x128xf32>
    %c0_183 = arith.constant 0 : index
    %c0_184 = arith.constant 0 : index
    %386 = vector.load %arg17[%c0_183, %c0_184] : memref<1x128xf32, #tpu.memory_space<vmem>>, vector<1x128xf32>
    %387 = arith.addf %385, %386 : vector<1x128xf32>
    %388 = math.tanh %387 : vector<1x128xf32>
    %389 = arith.truncf %388 : vector<1x128xf32> to vector<1x128xbf16>
    %c0_185 = arith.constant 0 : index
    %c0_186 = arith.constant 0 : index
    %390 = vector.load %arg18[%c0_185, %c0_186] : memref<128x256xbf16, #tpu.memory_space<vmem>>, vector<128x256xbf16>
    %cst_187 = arith.constant dense<0.000000e+00> : vector<1x256xf32>
    %391 = tpu.matmul %389, %390, %cst_187 {dimension_numbers = #tpu.dot_dimension_numbers<[1], [0], [0], [1], [0, 0, 1, 1], [], []>} : vector<1x128xbf16>, vector<128x256xbf16>, vector<1x256xf32> -> vector<1x256xf32>
    %c0_188 = arith.constant 0 : index
    %c0_189 = arith.constant 0 : index
    %392 = vector.load %arg19[%c0_188, %c0_189] : memref<1x256xf32, #tpu.memory_space<vmem>>, vector<1x256xf32>
    %393 = arith.addf %391, %392 : vector<1x256xf32>
    %cst_190 = arith.constant dense<0xFF800000> : vector<1xf32>
    %394 = vector.multi_reduction <maximumf>, %393, %cst_190 [1] : vector<1x256xf32> to vector<1xf32>
    %395 = vector.shape_cast %394 : vector<1xf32> to vector<1x1xf32>
    %396 = vector.broadcast %395 : vector<1x1xf32> to vector<1x256xf32>
    %397 = arith.subf %393, %396 : vector<1x256xf32>
    %398 = math.exp %397 : vector<1x256xf32>
    %cst_191 = arith.constant dense<0.000000e+00> : vector<1xf32>
    %399 = vector.multi_reduction <add>, %398, %cst_191 [1] : vector<1x256xf32> to vector<1xf32>
    %400 = vector.shape_cast %399 : vector<1xf32> to vector<1x1xf32>
    %cst_192 = arith.constant 1.000000e+00 : f32
    %401 = vector.broadcast %cst_192 : f32 to vector<1x1xf32>
    %402 = arith.divf %401, %400 : vector<1x1xf32>
    %403 = vector.broadcast %395 : vector<1x1xf32> to vector<1x256xf32>
    %404 = arith.cmpf oeq, %393, %403 : vector<1x256xf32>
    %c256_i32_193 = arith.constant 256 : i32
    %405 = vector.broadcast %c256_i32_193 : i32 to vector<1x256xi32>
    %406 = arith.select %404, %2, %405 : vector<1x256xi1>, vector<1x256xi32>
    %cst_194 = arith.constant dense<2147483647> : vector<1xi32>
    %407 = vector.multi_reduction <minsi>, %406, %cst_194 [1] : vector<1x256xi32> to vector<1xi32>
    %408 = vector.shape_cast %407 : vector<1xi32> to vector<1x1xi32>
    %c0_195 = arith.constant 0 : index
    %c0_196 = arith.constant 0 : index
    %409 = vector.load %arg27[%c0_195, %c0_196] : memref<1x1xi32, #tpu.memory_space<vmem>>, vector<1x1xi32>
    tpu.vector_store %arg27[%c0_195, %c0_196], %408 {strides = array<i32>} : memref<1x1xi32, #tpu.memory_space<vmem>>, vector<1x1xi32>,
    tpu.enqueue_dma source(%arg27 : memref<1x1xi32, #tpu.memory_space<vmem>>) target(%arg28 : memref<1x1xi32, #tpu.memory_space<smem>>) target_semaphore(%arg29 : memref<!tpu.dma_semaphore, #tpu.memory_space<semaphore_mem>>)
    %410 = vector.broadcast %c3_i32 : i32 to vector<1x8xi32>
    %411 = arith.cmpi eq, %3, %410 : vector<1x8xi32>
    %412 = vector.shape_cast %408 : vector<1x1xi32> to vector<1x1xi32>
    %413 = vector.broadcast %412 : vector<1x1xi32> to vector<1x8xi32>
    %414 = arith.select %411, %413, %317 : vector<1x8xi1>, vector<1x8xi32>
    %415 = vector.broadcast %c3_i32 : i32 to vector<1x8xi32>
    %416 = arith.cmpi eq, %3, %415 : vector<1x8xi32>
    %417 = vector.shape_cast %402 : vector<1x1xf32> to vector<1x1xf32>
    %418 = vector.broadcast %417 : vector<1x1xf32> to vector<1x8xf32>
    %419 = arith.select %416, %418, %322 : vector<1x8xi1>, vector<1x8xf32>
    tpu.wait_dma2 semaphore(%arg29 : memref<!tpu.dma_semaphore, #tpu.memory_space<semaphore_mem>>) src(%arg27 : memref<1x1xi32, #tpu.memory_space<vmem>>) dst(%arg28 : memref<1x1xi32, #tpu.memory_space<smem>>)
    %c0_197 = arith.constant 0 : index
    %c0_198 = arith.constant 0 : index
    %420 = memref.load %arg28[%c0_197, %c0_198] : memref<1x1xi32, #tpu.memory_space<smem>>
    %c4_i32 = arith.constant 4 : i32
    %421 = arith.index_cast %420 : i32 to index
    %c0_199 = arith.constant 0 : index
    %422 = vector.load %arg10[%421, %c0_199] : memref<256x128xf32, #tpu.memory_space<vmem>>, vector<1x128xf32>
    %423 = arith.truncf %422 : vector<1x128xf32> to vector<1x128xbf16>
    %c0_200 = arith.constant 0 : index
    %c0_201 = arith.constant 0 : index
    %424 = vector.load %arg11[%c0_200, %c0_201] : memref<128x384xbf16, #tpu.memory_space<vmem>>, vector<128x384xbf16>
    %cst_202 = arith.constant dense<0.000000e+00> : vector<1x384xf32>
    %425 = tpu.matmul %423, %424, %cst_202 {dimension_numbers = #tpu.dot_dimension_numbers<[1], [0], [0], [1], [0, 0, 1, 1], [], []>} : vector<1x128xbf16>, vector<128x384xbf16>, vector<1x384xf32> -> vector<1x384xf32>
    %c0_203 = arith.constant 0 : index
    %c0_204 = arith.constant 0 : index
    %426 = vector.load %arg13[%c0_203, %c0_204] : memref<1x384xf32, #tpu.memory_space<vmem>>, vector<1x384xf32>
    %427 = arith.addf %425, %426 : vector<1x384xf32>
    %428 = arith.truncf %361 : vector<1x128xf32> to vector<1x128xbf16>
    %c0_205 = arith.constant 0 : index
    %c0_206 = arith.constant 0 : index
    %429 = vector.load %arg12[%c0_205, %c0_206] : memref<128x384xbf16, #tpu.memory_space<vmem>>, vector<128x384xbf16>
    %cst_207 = arith.constant dense<0.000000e+00> : vector<1x384xf32>
    %430 = tpu.matmul %428, %429, %cst_207 {dimension_numbers = #tpu.dot_dimension_numbers<[1], [0], [0], [1], [0, 0, 1, 1], [], []>} : vector<1x128xbf16>, vector<128x384xbf16>, vector<1x384xf32> -> vector<1x384xf32>
    %431 = vector.extract_strided_slice %427 {offsets = [0, 0], sizes = [1, 128], strides = [1, 1]} : vector<1x384xf32> to vector<1x128xf32>
    %432 = vector.extract_strided_slice %430 {offsets = [0, 0], sizes = [1, 128], strides = [1, 1]} : vector<1x384xf32> to vector<1x128xf32>
    %433 = arith.addf %431, %432 : vector<1x128xf32>
    %434 = arith.negf %433 : vector<1x128xf32>
    %435 = math.exp %434 : vector<1x128xf32>
    %cst_208 = arith.constant 1.000000e+00 : f32
    %436 = vector.broadcast %cst_208 : f32 to vector<1x128xf32>
    %437 = arith.addf %436, %435 : vector<1x128xf32>
    %438 = arith.divf %436, %437 : vector<1x128xf32>
    %439 = vector.extract_strided_slice %427 {offsets = [0, 128], sizes = [1, 128], strides = [1, 1]} : vector<1x384xf32> to vector<1x128xf32>
    %440 = vector.extract_strided_slice %430 {offsets = [0, 128], sizes = [1, 128], strides = [1, 1]} : vector<1x384xf32> to vector<1x128xf32>
    %441 = arith.addf %439, %440 : vector<1x128xf32>
    %442 = arith.negf %441 : vector<1x128xf32>
    %443 = math.exp %442 : vector<1x128xf32>
    %cst_209 = arith.constant 1.000000e+00 : f32
    %444 = vector.broadcast %cst_209 : f32 to vector<1x128xf32>
    %445 = arith.addf %444, %443 : vector<1x128xf32>
    %446 = arith.divf %444, %445 : vector<1x128xf32>
    %447 = vector.extract_strided_slice %427 {offsets = [0, 256], sizes = [1, 128], strides = [1, 1]} : vector<1x384xf32> to vector<1x128xf32>
    %448 = vector.extract_strided_slice %430 {offsets = [0, 256], sizes = [1, 128], strides = [1, 1]} : vector<1x384xf32> to vector<1x128xf32>
    %c0_210 = arith.constant 0 : index
    %c0_211 = arith.constant 0 : index
    %449 = vector.load %arg14[%c0_210, %c0_211] : memref<1x128xf32, #tpu.memory_space<vmem>>, vector<1x128xf32>
    %450 = arith.addf %448, %449 : vector<1x128xf32>
    %451 = arith.mulf %438, %450 : vector<1x128xf32>
    %452 = arith.addf %447, %451 : vector<1x128xf32>
    %453 = math.tanh %452 : vector<1x128xf32>
    %cst_212 = arith.constant 1.000000e+00 : f32
    %454 = vector.broadcast %cst_212 : f32 to vector<1x128xf32>
    %455 = arith.subf %454, %446 : vector<1x128xf32>
    %456 = arith.mulf %455, %453 : vector<1x128xf32>
    %457 = arith.mulf %446, %361 : vector<1x128xf32>
    %458 = arith.addf %456, %457 : vector<1x128xf32>
    %459 = arith.truncf %458 : vector<1x128xf32> to vector<1x128xbf16>
    %c0_213 = arith.constant 0 : index
    %c0_214 = arith.constant 0 : index
    %460 = vector.load %arg26[%c0_213, %c0_214] : memref<8x128xbf16, #tpu.memory_space<vmem>>, vector<8x128xbf16>
    %cst_215 = arith.constant dense<0.000000e+00> : vector<1x8xf32>
    %461 = tpu.matmul %459, %460, %cst_215 {dimension_numbers = #tpu.dot_dimension_numbers<[1], [1], [0], [0], [0, 0, 1, 0], [], []>} : vector<1x128xbf16>, vector<8x128xbf16>, vector<1x8xf32> -> vector<1x8xf32>
    %462 = vector.broadcast %0 : i32 to vector<1x8xi32>
    %463 = arith.cmpi slt, %1, %462 : vector<1x8xi32>
    %cst_216 = arith.constant -1.000000e+30 : f32
    %464 = vector.broadcast %cst_216 : f32 to vector<1x8xf32>
    %465 = arith.select %463, %461, %464 : vector<1x8xi1>, vector<1x8xf32>
    %cst_217 = arith.constant dense<0xFF800000> : vector<1xf32>
    %466 = vector.multi_reduction <maximumf>, %465, %cst_217 [1] : vector<1x8xf32> to vector<1xf32>
    %467 = vector.shape_cast %466 : vector<1xf32> to vector<1x1xf32>
    %468 = vector.broadcast %467 : vector<1x1xf32> to vector<1x8xf32>
    %469 = arith.subf %465, %468 : vector<1x8xf32>
    %470 = math.exp %469 : vector<1x8xf32>
    %cst_218 = arith.constant dense<0.000000e+00> : vector<1xf32>
    %471 = vector.multi_reduction <add>, %470, %cst_218 [1] : vector<1x8xf32> to vector<1xf32>
    %472 = vector.shape_cast %471 : vector<1xf32> to vector<1x1xf32>
    %473 = vector.broadcast %472 : vector<1x1xf32> to vector<1x8xf32>
    %474 = arith.divf %470, %473 : vector<1x8xf32>
    %475 = arith.truncf %474 : vector<1x8xf32> to vector<1x8xbf16>
    %cst_219 = arith.constant dense<0.000000e+00> : vector<1x128xf32>
    %476 = tpu.matmul %475, %460, %cst_219 {dimension_numbers = #tpu.dot_dimension_numbers<[1], [0], [0], [1], [0, 0, 1, 1], [], []>} : vector<1x8xbf16>, vector<8x128xbf16>, vector<1x128xf32> -> vector<1x128xf32>
    %c0_220 = arith.constant 0 : index
    %c0_221 = arith.constant 0 : index
    %477 = vector.load %arg15[%c0_220, %c0_221] : memref<128x128xbf16, #tpu.memory_space<vmem>>, vector<128x128xbf16>
    %cst_222 = arith.constant dense<0.000000e+00> : vector<1x128xf32>
    %478 = tpu.matmul %459, %477, %cst_222 {dimension_numbers = #tpu.dot_dimension_numbers<[1], [0], [0], [1], [0, 0, 1, 1], [], []>} : vector<1x128xbf16>, vector<128x128xbf16>, vector<1x128xf32> -> vector<1x128xf32>
    %479 = arith.truncf %476 : vector<1x128xf32> to vector<1x128xbf16>
    %c0_223 = arith.constant 0 : index
    %c0_224 = arith.constant 0 : index
    %480 = vector.load %arg16[%c0_223, %c0_224] : memref<128x128xbf16, #tpu.memory_space<vmem>>, vector<128x128xbf16>
    %cst_225 = arith.constant dense<0.000000e+00> : vector<1x128xf32>
    %481 = tpu.matmul %479, %480, %cst_225 {dimension_numbers = #tpu.dot_dimension_numbers<[1], [0], [0], [1], [0, 0, 1, 1], [], []>} : vector<1x128xbf16>, vector<128x128xbf16>, vector<1x128xf32> -> vector<1x128xf32>
    %482 = arith.addf %478, %481 : vector<1x128xf32>
    %c0_226 = arith.constant 0 : index
    %c0_227 = arith.constant 0 : index
    %483 = vector.load %arg17[%c0_226, %c0_227] : memref<1x128xf32, #tpu.memory_space<vmem>>, vector<1x128xf32>
    %484 = arith.addf %482, %483 : vector<1x128xf32>
    %485 = math.tanh %484 : vector<1x128xf32>
    %486 = arith.truncf %485 : vector<1x128xf32> to vector<1x128xbf16>
    %c0_228 = arith.constant 0 : index
    %c0_229 = arith.constant 0 : index
    %487 = vector.load %arg18[%c0_228, %c0_229] : memref<128x256xbf16, #tpu.memory_space<vmem>>, vector<128x256xbf16>
    %cst_230 = arith.constant dense<0.000000e+00> : vector<1x256xf32>
    %488 = tpu.matmul %486, %487, %cst_230 {dimension_numbers = #tpu.dot_dimension_numbers<[1], [0], [0], [1], [0, 0, 1, 1], [], []>} : vector<1x128xbf16>, vector<128x256xbf16>, vector<1x256xf32> -> vector<1x256xf32>
    %c0_231 = arith.constant 0 : index
    %c0_232 = arith.constant 0 : index
    %489 = vector.load %arg19[%c0_231, %c0_232] : memref<1x256xf32, #tpu.memory_space<vmem>>, vector<1x256xf32>
    %490 = arith.addf %488, %489 : vector<1x256xf32>
    %cst_233 = arith.constant dense<0xFF800000> : vector<1xf32>
    %491 = vector.multi_reduction <maximumf>, %490, %cst_233 [1] : vector<1x256xf32> to vector<1xf32>
    %492 = vector.shape_cast %491 : vector<1xf32> to vector<1x1xf32>
    %493 = vector.broadcast %492 : vector<1x1xf32> to vector<1x256xf32>
    %494 = arith.subf %490, %493 : vector<1x256xf32>
    %495 = math.exp %494 : vector<1x256xf32>
    %cst_234 = arith.constant dense<0.000000e+00> : vector<1xf32>
    %496 = vector.multi_reduction <add>, %495, %cst_234 [1] : vector<1x256xf32> to vector<1xf32>
    %497 = vector.shape_cast %496 : vector<1xf32> to vector<1x1xf32>
    %cst_235 = arith.constant 1.000000e+00 : f32
    %498 = vector.broadcast %cst_235 : f32 to vector<1x1xf32>
    %499 = arith.divf %498, %497 : vector<1x1xf32>
    %500 = vector.broadcast %492 : vector<1x1xf32> to vector<1x256xf32>
    %501 = arith.cmpf oeq, %490, %500 : vector<1x256xf32>
    %c256_i32_236 = arith.constant 256 : i32
    %502 = vector.broadcast %c256_i32_236 : i32 to vector<1x256xi32>
    %503 = arith.select %501, %2, %502 : vector<1x256xi1>, vector<1x256xi32>
    %cst_237 = arith.constant dense<2147483647> : vector<1xi32>
    %504 = vector.multi_reduction <minsi>, %503, %cst_237 [1] : vector<1x256xi32> to vector<1xi32>
    %505 = vector.shape_cast %504 : vector<1xi32> to vector<1x1xi32>
    %c0_238 = arith.constant 0 : index
    %c0_239 = arith.constant 0 : index
    %506 = vector.load %arg27[%c0_238, %c0_239] : memref<1x1xi32, #tpu.memory_space<vmem>>, vector<1x1xi32>
    tpu.vector_store %arg27[%c0_238, %c0_239], %505 {strides = array<i32>} : memref<1x1xi32, #tpu.memory_space<vmem>>, vector<1x1xi32>,
    tpu.enqueue_dma source(%arg27 : memref<1x1xi32, #tpu.memory_space<vmem>>) target(%arg28 : memref<1x1xi32, #tpu.memory_space<smem>>) target_semaphore(%arg29 : memref<!tpu.dma_semaphore, #tpu.memory_space<semaphore_mem>>)
    %507 = vector.broadcast %c4_i32 : i32 to vector<1x8xi32>
    %508 = arith.cmpi eq, %3, %507 : vector<1x8xi32>
    %509 = vector.shape_cast %505 : vector<1x1xi32> to vector<1x1xi32>
    %510 = vector.broadcast %509 : vector<1x1xi32> to vector<1x8xi32>
    %511 = arith.select %508, %510, %414 : vector<1x8xi1>, vector<1x8xi32>
    %512 = vector.broadcast %c4_i32 : i32 to vector<1x8xi32>
    %513 = arith.cmpi eq, %3, %512 : vector<1x8xi32>
    %514 = vector.shape_cast %499 : vector<1x1xf32> to vector<1x1xf32>
    %515 = vector.broadcast %514 : vector<1x1xf32> to vector<1x8xf32>
    %516 = arith.select %513, %515, %419 : vector<1x8xi1>, vector<1x8xf32>
    tpu.wait_dma2 semaphore(%arg29 : memref<!tpu.dma_semaphore, #tpu.memory_space<semaphore_mem>>) src(%arg27 : memref<1x1xi32, #tpu.memory_space<vmem>>) dst(%arg28 : memref<1x1xi32, #tpu.memory_space<smem>>)
    %c0_240 = arith.constant 0 : index
    %c0_241 = arith.constant 0 : index
    %517 = memref.load %arg28[%c0_240, %c0_241] : memref<1x1xi32, #tpu.memory_space<smem>>
    %c5_i32 = arith.constant 5 : i32
    %518 = arith.index_cast %517 : i32 to index
    %c0_242 = arith.constant 0 : index
    %519 = vector.load %arg10[%518, %c0_242] : memref<256x128xf32, #tpu.memory_space<vmem>>, vector<1x128xf32>
    %520 = arith.truncf %519 : vector<1x128xf32> to vector<1x128xbf16>
    %c0_243 = arith.constant 0 : index
    %c0_244 = arith.constant 0 : index
    %521 = vector.load %arg11[%c0_243, %c0_244] : memref<128x384xbf16, #tpu.memory_space<vmem>>, vector<128x384xbf16>
    %cst_245 = arith.constant dense<0.000000e+00> : vector<1x384xf32>
    %522 = tpu.matmul %520, %521, %cst_245 {dimension_numbers = #tpu.dot_dimension_numbers<[1], [0], [0], [1], [0, 0, 1, 1], [], []>} : vector<1x128xbf16>, vector<128x384xbf16>, vector<1x384xf32> -> vector<1x384xf32>
    %c0_246 = arith.constant 0 : index
    %c0_247 = arith.constant 0 : index
    %523 = vector.load %arg13[%c0_246, %c0_247] : memref<1x384xf32, #tpu.memory_space<vmem>>, vector<1x384xf32>
    %524 = arith.addf %522, %523 : vector<1x384xf32>
    %525 = arith.truncf %458 : vector<1x128xf32> to vector<1x128xbf16>
    %c0_248 = arith.constant 0 : index
    %c0_249 = arith.constant 0 : index
    %526 = vector.load %arg12[%c0_248, %c0_249] : memref<128x384xbf16, #tpu.memory_space<vmem>>, vector<128x384xbf16>
    %cst_250 = arith.constant dense<0.000000e+00> : vector<1x384xf32>
    %527 = tpu.matmul %525, %526, %cst_250 {dimension_numbers = #tpu.dot_dimension_numbers<[1], [0], [0], [1], [0, 0, 1, 1], [], []>} : vector<1x128xbf16>, vector<128x384xbf16>, vector<1x384xf32> -> vector<1x384xf32>
    %528 = vector.extract_strided_slice %524 {offsets = [0, 0], sizes = [1, 128], strides = [1, 1]} : vector<1x384xf32> to vector<1x128xf32>
    %529 = vector.extract_strided_slice %527 {offsets = [0, 0], sizes = [1, 128], strides = [1, 1]} : vector<1x384xf32> to vector<1x128xf32>
    %530 = arith.addf %528, %529 : vector<1x128xf32>
    %531 = arith.negf %530 : vector<1x128xf32>
    %532 = math.exp %531 : vector<1x128xf32>
    %cst_251 = arith.constant 1.000000e+00 : f32
    %533 = vector.broadcast %cst_251 : f32 to vector<1x128xf32>
    %534 = arith.addf %533, %532 : vector<1x128xf32>
    %535 = arith.divf %533, %534 : vector<1x128xf32>
    %536 = vector.extract_strided_slice %524 {offsets = [0, 128], sizes = [1, 128], strides = [1, 1]} : vector<1x384xf32> to vector<1x128xf32>
    %537 = vector.extract_strided_slice %527 {offsets = [0, 128], sizes = [1, 128], strides = [1, 1]} : vector<1x384xf32> to vector<1x128xf32>
    %538 = arith.addf %536, %537 : vector<1x128xf32>
    %539 = arith.negf %538 : vector<1x128xf32>
    %540 = math.exp %539 : vector<1x128xf32>
    %cst_252 = arith.constant 1.000000e+00 : f32
    %541 = vector.broadcast %cst_252 : f32 to vector<1x128xf32>
    %542 = arith.addf %541, %540 : vector<1x128xf32>
    %543 = arith.divf %541, %542 : vector<1x128xf32>
    %544 = vector.extract_strided_slice %524 {offsets = [0, 256], sizes = [1, 128], strides = [1, 1]} : vector<1x384xf32> to vector<1x128xf32>
    %545 = vector.extract_strided_slice %527 {offsets = [0, 256], sizes = [1, 128], strides = [1, 1]} : vector<1x384xf32> to vector<1x128xf32>
    %c0_253 = arith.constant 0 : index
    %c0_254 = arith.constant 0 : index
    %546 = vector.load %arg14[%c0_253, %c0_254] : memref<1x128xf32, #tpu.memory_space<vmem>>, vector<1x128xf32>
    %547 = arith.addf %545, %546 : vector<1x128xf32>
    %548 = arith.mulf %535, %547 : vector<1x128xf32>
    %549 = arith.addf %544, %548 : vector<1x128xf32>
    %550 = math.tanh %549 : vector<1x128xf32>
    %cst_255 = arith.constant 1.000000e+00 : f32
    %551 = vector.broadcast %cst_255 : f32 to vector<1x128xf32>
    %552 = arith.subf %551, %543 : vector<1x128xf32>
    %553 = arith.mulf %552, %550 : vector<1x128xf32>
    %554 = arith.mulf %543, %458 : vector<1x128xf32>
    %555 = arith.addf %553, %554 : vector<1x128xf32>
    %556 = arith.truncf %555 : vector<1x128xf32> to vector<1x128xbf16>
    %c0_256 = arith.constant 0 : index
    %c0_257 = arith.constant 0 : index
    %557 = vector.load %arg26[%c0_256, %c0_257] : memref<8x128xbf16, #tpu.memory_space<vmem>>, vector<8x128xbf16>
    %cst_258 = arith.constant dense<0.000000e+00> : vector<1x8xf32>
    %558 = tpu.matmul %556, %557, %cst_258 {dimension_numbers = #tpu.dot_dimension_numbers<[1], [1], [0], [0], [0, 0, 1, 0], [], []>} : vector<1x128xbf16>, vector<8x128xbf16>, vector<1x8xf32> -> vector<1x8xf32>
    %559 = vector.broadcast %0 : i32 to vector<1x8xi32>
    %560 = arith.cmpi slt, %1, %559 : vector<1x8xi32>
    %cst_259 = arith.constant -1.000000e+30 : f32
    %561 = vector.broadcast %cst_259 : f32 to vector<1x8xf32>
    %562 = arith.select %560, %558, %561 : vector<1x8xi1>, vector<1x8xf32>
    %cst_260 = arith.constant dense<0xFF800000> : vector<1xf32>
    %563 = vector.multi_reduction <maximumf>, %562, %cst_260 [1] : vector<1x8xf32> to vector<1xf32>
    %564 = vector.shape_cast %563 : vector<1xf32> to vector<1x1xf32>
    %565 = vector.broadcast %564 : vector<1x1xf32> to vector<1x8xf32>
    %566 = arith.subf %562, %565 : vector<1x8xf32>
    %567 = math.exp %566 : vector<1x8xf32>
    %cst_261 = arith.constant dense<0.000000e+00> : vector<1xf32>
    %568 = vector.multi_reduction <add>, %567, %cst_261 [1] : vector<1x8xf32> to vector<1xf32>
    %569 = vector.shape_cast %568 : vector<1xf32> to vector<1x1xf32>
    %570 = vector.broadcast %569 : vector<1x1xf32> to vector<1x8xf32>
    %571 = arith.divf %567, %570 : vector<1x8xf32>
    %572 = arith.truncf %571 : vector<1x8xf32> to vector<1x8xbf16>
    %cst_262 = arith.constant dense<0.000000e+00> : vector<1x128xf32>
    %573 = tpu.matmul %572, %557, %cst_262 {dimension_numbers = #tpu.dot_dimension_numbers<[1], [0], [0], [1], [0, 0, 1, 1], [], []>} : vector<1x8xbf16>, vector<8x128xbf16>, vector<1x128xf32> -> vector<1x128xf32>
    %c0_263 = arith.constant 0 : index
    %c0_264 = arith.constant 0 : index
    %574 = vector.load %arg15[%c0_263, %c0_264] : memref<128x128xbf16, #tpu.memory_space<vmem>>, vector<128x128xbf16>
    %cst_265 = arith.constant dense<0.000000e+00> : vector<1x128xf32>
    %575 = tpu.matmul %556, %574, %cst_265 {dimension_numbers = #tpu.dot_dimension_numbers<[1], [0], [0], [1], [0, 0, 1, 1], [], []>} : vector<1x128xbf16>, vector<128x128xbf16>, vector<1x128xf32> -> vector<1x128xf32>
    %576 = arith.truncf %573 : vector<1x128xf32> to vector<1x128xbf16>
    %c0_266 = arith.constant 0 : index
    %c0_267 = arith.constant 0 : index
    %577 = vector.load %arg16[%c0_266, %c0_267] : memref<128x128xbf16, #tpu.memory_space<vmem>>, vector<128x128xbf16>
    %cst_268 = arith.constant dense<0.000000e+00> : vector<1x128xf32>
    %578 = tpu.matmul %576, %577, %cst_268 {dimension_numbers = #tpu.dot_dimension_numbers<[1], [0], [0], [1], [0, 0, 1, 1], [], []>} : vector<1x128xbf16>, vector<128x128xbf16>, vector<1x128xf32> -> vector<1x128xf32>
    %579 = arith.addf %575, %578 : vector<1x128xf32>
    %c0_269 = arith.constant 0 : index
    %c0_270 = arith.constant 0 : index
    %580 = vector.load %arg17[%c0_269, %c0_270] : memref<1x128xf32, #tpu.memory_space<vmem>>, vector<1x128xf32>
    %581 = arith.addf %579, %580 : vector<1x128xf32>
    %582 = math.tanh %581 : vector<1x128xf32>
    %583 = arith.truncf %582 : vector<1x128xf32> to vector<1x128xbf16>
    %c0_271 = arith.constant 0 : index
    %c0_272 = arith.constant 0 : index
    %584 = vector.load %arg18[%c0_271, %c0_272] : memref<128x256xbf16, #tpu.memory_space<vmem>>, vector<128x256xbf16>
    %cst_273 = arith.constant dense<0.000000e+00> : vector<1x256xf32>
    %585 = tpu.matmul %583, %584, %cst_273 {dimension_numbers = #tpu.dot_dimension_numbers<[1], [0], [0], [1], [0, 0, 1, 1], [], []>} : vector<1x128xbf16>, vector<128x256xbf16>, vector<1x256xf32> -> vector<1x256xf32>
    %c0_274 = arith.constant 0 : index
    %c0_275 = arith.constant 0 : index
    %586 = vector.load %arg19[%c0_274, %c0_275] : memref<1x256xf32, #tpu.memory_space<vmem>>, vector<1x256xf32>
    %587 = arith.addf %585, %586 : vector<1x256xf32>
    %cst_276 = arith.constant dense<0xFF800000> : vector<1xf32>
    %588 = vector.multi_reduction <maximumf>, %587, %cst_276 [1] : vector<1x256xf32> to vector<1xf32>
    %589 = vector.shape_cast %588 : vector<1xf32> to vector<1x1xf32>
    %590 = vector.broadcast %589 : vector<1x1xf32> to vector<1x256xf32>
    %591 = arith.subf %587, %590 : vector<1x256xf32>
    %592 = math.exp %591 : vector<1x256xf32>
    %cst_277 = arith.constant dense<0.000000e+00> : vector<1xf32>
    %593 = vector.multi_reduction <add>, %592, %cst_277 [1] : vector<1x256xf32> to vector<1xf32>
    %594 = vector.shape_cast %593 : vector<1xf32> to vector<1x1xf32>
    %cst_278 = arith.constant 1.000000e+00 : f32
    %595 = vector.broadcast %cst_278 : f32 to vector<1x1xf32>
    %596 = arith.divf %595, %594 : vector<1x1xf32>
    %597 = vector.broadcast %589 : vector<1x1xf32> to vector<1x256xf32>
    %598 = arith.cmpf oeq, %587, %597 : vector<1x256xf32>
    %c256_i32_279 = arith.constant 256 : i32
    %599 = vector.broadcast %c256_i32_279 : i32 to vector<1x256xi32>
    %600 = arith.select %598, %2, %599 : vector<1x256xi1>, vector<1x256xi32>
    %cst_280 = arith.constant dense<2147483647> : vector<1xi32>
    %601 = vector.multi_reduction <minsi>, %600, %cst_280 [1] : vector<1x256xi32> to vector<1xi32>
    %602 = vector.shape_cast %601 : vector<1xi32> to vector<1x1xi32>
    %c0_281 = arith.constant 0 : index
    %c0_282 = arith.constant 0 : index
    %603 = vector.load %arg27[%c0_281, %c0_282] : memref<1x1xi32, #tpu.memory_space<vmem>>, vector<1x1xi32>
    tpu.vector_store %arg27[%c0_281, %c0_282], %602 {strides = array<i32>} : memref<1x1xi32, #tpu.memory_space<vmem>>, vector<1x1xi32>,
    tpu.enqueue_dma source(%arg27 : memref<1x1xi32, #tpu.memory_space<vmem>>) target(%arg28 : memref<1x1xi32, #tpu.memory_space<smem>>) target_semaphore(%arg29 : memref<!tpu.dma_semaphore, #tpu.memory_space<semaphore_mem>>)
    %604 = vector.broadcast %c5_i32 : i32 to vector<1x8xi32>
    %605 = arith.cmpi eq, %3, %604 : vector<1x8xi32>
    %606 = vector.shape_cast %602 : vector<1x1xi32> to vector<1x1xi32>
    %607 = vector.broadcast %606 : vector<1x1xi32> to vector<1x8xi32>
    %608 = arith.select %605, %607, %511 : vector<1x8xi1>, vector<1x8xi32>
    %609 = vector.broadcast %c5_i32 : i32 to vector<1x8xi32>
    %610 = arith.cmpi eq, %3, %609 : vector<1x8xi32>
    %611 = vector.shape_cast %596 : vector<1x1xf32> to vector<1x1xf32>
    %612 = vector.broadcast %611 : vector<1x1xf32> to vector<1x8xf32>
    %613 = arith.select %610, %612, %516 : vector<1x8xi1>, vector<1x8xf32>
    tpu.wait_dma2 semaphore(%arg29 : memref<!tpu.dma_semaphore, #tpu.memory_space<semaphore_mem>>) src(%arg27 : memref<1x1xi32, #tpu.memory_space<vmem>>) dst(%arg28 : memref<1x1xi32, #tpu.memory_space<smem>>)
    %c0_283 = arith.constant 0 : index
    %c0_284 = arith.constant 0 : index
    %614 = memref.load %arg28[%c0_283, %c0_284] : memref<1x1xi32, #tpu.memory_space<smem>>
    %c6_i32 = arith.constant 6 : i32
    %615 = arith.index_cast %614 : i32 to index
    %c0_285 = arith.constant 0 : index
    %616 = vector.load %arg10[%615, %c0_285] : memref<256x128xf32, #tpu.memory_space<vmem>>, vector<1x128xf32>
    %617 = arith.truncf %616 : vector<1x128xf32> to vector<1x128xbf16>
    %c0_286 = arith.constant 0 : index
    %c0_287 = arith.constant 0 : index
    %618 = vector.load %arg11[%c0_286, %c0_287] : memref<128x384xbf16, #tpu.memory_space<vmem>>, vector<128x384xbf16>
    %cst_288 = arith.constant dense<0.000000e+00> : vector<1x384xf32>
    %619 = tpu.matmul %617, %618, %cst_288 {dimension_numbers = #tpu.dot_dimension_numbers<[1], [0], [0], [1], [0, 0, 1, 1], [], []>} : vector<1x128xbf16>, vector<128x384xbf16>, vector<1x384xf32> -> vector<1x384xf32>
    %c0_289 = arith.constant 0 : index
    %c0_290 = arith.constant 0 : index
    %620 = vector.load %arg13[%c0_289, %c0_290] : memref<1x384xf32, #tpu.memory_space<vmem>>, vector<1x384xf32>
    %621 = arith.addf %619, %620 : vector<1x384xf32>
    %622 = arith.truncf %555 : vector<1x128xf32> to vector<1x128xbf16>
    %c0_291 = arith.constant 0 : index
    %c0_292 = arith.constant 0 : index
    %623 = vector.load %arg12[%c0_291, %c0_292] : memref<128x384xbf16, #tpu.memory_space<vmem>>, vector<128x384xbf16>
    %cst_293 = arith.constant dense<0.000000e+00> : vector<1x384xf32>
    %624 = tpu.matmul %622, %623, %cst_293 {dimension_numbers = #tpu.dot_dimension_numbers<[1], [0], [0], [1], [0, 0, 1, 1], [], []>} : vector<1x128xbf16>, vector<128x384xbf16>, vector<1x384xf32> -> vector<1x384xf32>
    %625 = vector.extract_strided_slice %621 {offsets = [0, 0], sizes = [1, 128], strides = [1, 1]} : vector<1x384xf32> to vector<1x128xf32>
    %626 = vector.extract_strided_slice %624 {offsets = [0, 0], sizes = [1, 128], strides = [1, 1]} : vector<1x384xf32> to vector<1x128xf32>
    %627 = arith.addf %625, %626 : vector<1x128xf32>
    %628 = arith.negf %627 : vector<1x128xf32>
    %629 = math.exp %628 : vector<1x128xf32>
    %cst_294 = arith.constant 1.000000e+00 : f32
    %630 = vector.broadcast %cst_294 : f32 to vector<1x128xf32>
    %631 = arith.addf %630, %629 : vector<1x128xf32>
    %632 = arith.divf %630, %631 : vector<1x128xf32>
    %633 = vector.extract_strided_slice %621 {offsets = [0, 128], sizes = [1, 128], strides = [1, 1]} : vector<1x384xf32> to vector<1x128xf32>
    %634 = vector.extract_strided_slice %624 {offsets = [0, 128], sizes = [1, 128], strides = [1, 1]} : vector<1x384xf32> to vector<1x128xf32>
    %635 = arith.addf %633, %634 : vector<1x128xf32>
    %636 = arith.negf %635 : vector<1x128xf32>
    %637 = math.exp %636 : vector<1x128xf32>
    %cst_295 = arith.constant 1.000000e+00 : f32
    %638 = vector.broadcast %cst_295 : f32 to vector<1x128xf32>
    %639 = arith.addf %638, %637 : vector<1x128xf32>
    %640 = arith.divf %638, %639 : vector<1x128xf32>
    %641 = vector.extract_strided_slice %621 {offsets = [0, 256], sizes = [1, 128], strides = [1, 1]} : vector<1x384xf32> to vector<1x128xf32>
    %642 = vector.extract_strided_slice %624 {offsets = [0, 256], sizes = [1, 128], strides = [1, 1]} : vector<1x384xf32> to vector<1x128xf32>
    %c0_296 = arith.constant 0 : index
    %c0_297 = arith.constant 0 : index
    %643 = vector.load %arg14[%c0_296, %c0_297] : memref<1x128xf32, #tpu.memory_space<vmem>>, vector<1x128xf32>
    %644 = arith.addf %642, %643 : vector<1x128xf32>
    %645 = arith.mulf %632, %644 : vector<1x128xf32>
    %646 = arith.addf %641, %645 : vector<1x128xf32>
    %647 = math.tanh %646 : vector<1x128xf32>
    %cst_298 = arith.constant 1.000000e+00 : f32
    %648 = vector.broadcast %cst_298 : f32 to vector<1x128xf32>
    %649 = arith.subf %648, %640 : vector<1x128xf32>
    %650 = arith.mulf %649, %647 : vector<1x128xf32>
    %651 = arith.mulf %640, %555 : vector<1x128xf32>
    %652 = arith.addf %650, %651 : vector<1x128xf32>
    %653 = arith.truncf %652 : vector<1x128xf32> to vector<1x128xbf16>
    %c0_299 = arith.constant 0 : index
    %c0_300 = arith.constant 0 : index
    %654 = vector.load %arg26[%c0_299, %c0_300] : memref<8x128xbf16, #tpu.memory_space<vmem>>, vector<8x128xbf16>
    %cst_301 = arith.constant dense<0.000000e+00> : vector<1x8xf32>
    %655 = tpu.matmul %653, %654, %cst_301 {dimension_numbers = #tpu.dot_dimension_numbers<[1], [1], [0], [0], [0, 0, 1, 0], [], []>} : vector<1x128xbf16>, vector<8x128xbf16>, vector<1x8xf32> -> vector<1x8xf32>
    %656 = vector.broadcast %0 : i32 to vector<1x8xi32>
    %657 = arith.cmpi slt, %1, %656 : vector<1x8xi32>
    %cst_302 = arith.constant -1.000000e+30 : f32
    %658 = vector.broadcast %cst_302 : f32 to vector<1x8xf32>
    %659 = arith.select %657, %655, %658 : vector<1x8xi1>, vector<1x8xf32>
    %cst_303 = arith.constant dense<0xFF800000> : vector<1xf32>
    %660 = vector.multi_reduction <maximumf>, %659, %cst_303 [1] : vector<1x8xf32> to vector<1xf32>
    %661 = vector.shape_cast %660 : vector<1xf32> to vector<1x1xf32>
    %662 = vector.broadcast %661 : vector<1x1xf32> to vector<1x8xf32>
    %663 = arith.subf %659, %662 : vector<1x8xf32>
    %664 = math.exp %663 : vector<1x8xf32>
    %cst_304 = arith.constant dense<0.000000e+00> : vector<1xf32>
    %665 = vector.multi_reduction <add>, %664, %cst_304 [1] : vector<1x8xf32> to vector<1xf32>
    %666 = vector.shape_cast %665 : vector<1xf32> to vector<1x1xf32>
    %667 = vector.broadcast %666 : vector<1x1xf32> to vector<1x8xf32>
    %668 = arith.divf %664, %667 : vector<1x8xf32>
    %669 = arith.truncf %668 : vector<1x8xf32> to vector<1x8xbf16>
    %cst_305 = arith.constant dense<0.000000e+00> : vector<1x128xf32>
    %670 = tpu.matmul %669, %654, %cst_305 {dimension_numbers = #tpu.dot_dimension_numbers<[1], [0], [0], [1], [0, 0, 1, 1], [], []>} : vector<1x8xbf16>, vector<8x128xbf16>, vector<1x128xf32> -> vector<1x128xf32>
    %c0_306 = arith.constant 0 : index
    %c0_307 = arith.constant 0 : index
    %671 = vector.load %arg15[%c0_306, %c0_307] : memref<128x128xbf16, #tpu.memory_space<vmem>>, vector<128x128xbf16>
    %cst_308 = arith.constant dense<0.000000e+00> : vector<1x128xf32>
    %672 = tpu.matmul %653, %671, %cst_308 {dimension_numbers = #tpu.dot_dimension_numbers<[1], [0], [0], [1], [0, 0, 1, 1], [], []>} : vector<1x128xbf16>, vector<128x128xbf16>, vector<1x128xf32> -> vector<1x128xf32>
    %673 = arith.truncf %670 : vector<1x128xf32> to vector<1x128xbf16>
    %c0_309 = arith.constant 0 : index
    %c0_310 = arith.constant 0 : index
    %674 = vector.load %arg16[%c0_309, %c0_310] : memref<128x128xbf16, #tpu.memory_space<vmem>>, vector<128x128xbf16>
    %cst_311 = arith.constant dense<0.000000e+00> : vector<1x128xf32>
    %675 = tpu.matmul %673, %674, %cst_311 {dimension_numbers = #tpu.dot_dimension_numbers<[1], [0], [0], [1], [0, 0, 1, 1], [], []>} : vector<1x128xbf16>, vector<128x128xbf16>, vector<1x128xf32> -> vector<1x128xf32>
    %676 = arith.addf %672, %675 : vector<1x128xf32>
    %c0_312 = arith.constant 0 : index
    %c0_313 = arith.constant 0 : index
    %677 = vector.load %arg17[%c0_312, %c0_313] : memref<1x128xf32, #tpu.memory_space<vmem>>, vector<1x128xf32>
    %678 = arith.addf %676, %677 : vector<1x128xf32>
    %679 = math.tanh %678 : vector<1x128xf32>
    %680 = arith.truncf %679 : vector<1x128xf32> to vector<1x128xbf16>
    %c0_314 = arith.constant 0 : index
    %c0_315 = arith.constant 0 : index
    %681 = vector.load %arg18[%c0_314, %c0_315] : memref<128x256xbf16, #tpu.memory_space<vmem>>, vector<128x256xbf16>
    %cst_316 = arith.constant dense<0.000000e+00> : vector<1x256xf32>
    %682 = tpu.matmul %680, %681, %cst_316 {dimension_numbers = #tpu.dot_dimension_numbers<[1], [0], [0], [1], [0, 0, 1, 1], [], []>} : vector<1x128xbf16>, vector<128x256xbf16>, vector<1x256xf32> -> vector<1x256xf32>
    %c0_317 = arith.constant 0 : index
    %c0_318 = arith.constant 0 : index
    %683 = vector.load %arg19[%c0_317, %c0_318] : memref<1x256xf32, #tpu.memory_space<vmem>>, vector<1x256xf32>
    %684 = arith.addf %682, %683 : vector<1x256xf32>
    %cst_319 = arith.constant dense<0xFF800000> : vector<1xf32>
    %685 = vector.multi_reduction <maximumf>, %684, %cst_319 [1] : vector<1x256xf32> to vector<1xf32>
    %686 = vector.shape_cast %685 : vector<1xf32> to vector<1x1xf32>
    %687 = vector.broadcast %686 : vector<1x1xf32> to vector<1x256xf32>
    %688 = arith.subf %684, %687 : vector<1x256xf32>
    %689 = math.exp %688 : vector<1x256xf32>
    %cst_320 = arith.constant dense<0.000000e+00> : vector<1xf32>
    %690 = vector.multi_reduction <add>, %689, %cst_320 [1] : vector<1x256xf32> to vector<1xf32>
    %691 = vector.shape_cast %690 : vector<1xf32> to vector<1x1xf32>
    %cst_321 = arith.constant 1.000000e+00 : f32
    %692 = vector.broadcast %cst_321 : f32 to vector<1x1xf32>
    %693 = arith.divf %692, %691 : vector<1x1xf32>
    %694 = vector.broadcast %686 : vector<1x1xf32> to vector<1x256xf32>
    %695 = arith.cmpf oeq, %684, %694 : vector<1x256xf32>
    %c256_i32_322 = arith.constant 256 : i32
    %696 = vector.broadcast %c256_i32_322 : i32 to vector<1x256xi32>
    %697 = arith.select %695, %2, %696 : vector<1x256xi1>, vector<1x256xi32>
    %cst_323 = arith.constant dense<2147483647> : vector<1xi32>
    %698 = vector.multi_reduction <minsi>, %697, %cst_323 [1] : vector<1x256xi32> to vector<1xi32>
    %699 = vector.shape_cast %698 : vector<1xi32> to vector<1x1xi32>
    %c0_324 = arith.constant 0 : index
    %c0_325 = arith.constant 0 : index
    %700 = vector.load %arg27[%c0_324, %c0_325] : memref<1x1xi32, #tpu.memory_space<vmem>>, vector<1x1xi32>
    tpu.vector_store %arg27[%c0_324, %c0_325], %699 {strides = array<i32>} : memref<1x1xi32, #tpu.memory_space<vmem>>, vector<1x1xi32>,
    tpu.enqueue_dma source(%arg27 : memref<1x1xi32, #tpu.memory_space<vmem>>) target(%arg28 : memref<1x1xi32, #tpu.memory_space<smem>>) target_semaphore(%arg29 : memref<!tpu.dma_semaphore, #tpu.memory_space<semaphore_mem>>)
    %701 = vector.broadcast %c6_i32 : i32 to vector<1x8xi32>
    %702 = arith.cmpi eq, %3, %701 : vector<1x8xi32>
    %703 = vector.shape_cast %699 : vector<1x1xi32> to vector<1x1xi32>
    %704 = vector.broadcast %703 : vector<1x1xi32> to vector<1x8xi32>
    %705 = arith.select %702, %704, %608 : vector<1x8xi1>, vector<1x8xi32>
    %706 = vector.broadcast %c6_i32 : i32 to vector<1x8xi32>
    %707 = arith.cmpi eq, %3, %706 : vector<1x8xi32>
    %708 = vector.shape_cast %693 : vector<1x1xf32> to vector<1x1xf32>
    %709 = vector.broadcast %708 : vector<1x1xf32> to vector<1x8xf32>
    %710 = arith.select %707, %709, %613 : vector<1x8xi1>, vector<1x8xf32>
    tpu.wait_dma2 semaphore(%arg29 : memref<!tpu.dma_semaphore, #tpu.memory_space<semaphore_mem>>) src(%arg27 : memref<1x1xi32, #tpu.memory_space<vmem>>) dst(%arg28 : memref<1x1xi32, #tpu.memory_space<smem>>)
    %c0_326 = arith.constant 0 : index
    %c0_327 = arith.constant 0 : index
    %711 = memref.load %arg28[%c0_326, %c0_327] : memref<1x1xi32, #tpu.memory_space<smem>>
    %c7_i32 = arith.constant 7 : i32
    %712 = arith.index_cast %711 : i32 to index
    %c0_328 = arith.constant 0 : index
    %713 = vector.load %arg10[%712, %c0_328] : memref<256x128xf32, #tpu.memory_space<vmem>>, vector<1x128xf32>
    %714 = arith.truncf %713 : vector<1x128xf32> to vector<1x128xbf16>
    %c0_329 = arith.constant 0 : index
    %c0_330 = arith.constant 0 : index
    %715 = vector.load %arg11[%c0_329, %c0_330] : memref<128x384xbf16, #tpu.memory_space<vmem>>, vector<128x384xbf16>
    %cst_331 = arith.constant dense<0.000000e+00> : vector<1x384xf32>
    %716 = tpu.matmul %714, %715, %cst_331 {dimension_numbers = #tpu.dot_dimension_numbers<[1], [0], [0], [1], [0, 0, 1, 1], [], []>} : vector<1x128xbf16>, vector<128x384xbf16>, vector<1x384xf32> -> vector<1x384xf32>
    %c0_332 = arith.constant 0 : index
    %c0_333 = arith.constant 0 : index
    %717 = vector.load %arg13[%c0_332, %c0_333] : memref<1x384xf32, #tpu.memory_space<vmem>>, vector<1x384xf32>
    %718 = arith.addf %716, %717 : vector<1x384xf32>
    %719 = arith.truncf %652 : vector<1x128xf32> to vector<1x128xbf16>
    %c0_334 = arith.constant 0 : index
    %c0_335 = arith.constant 0 : index
    %720 = vector.load %arg12[%c0_334, %c0_335] : memref<128x384xbf16, #tpu.memory_space<vmem>>, vector<128x384xbf16>
    %cst_336 = arith.constant dense<0.000000e+00> : vector<1x384xf32>
    %721 = tpu.matmul %719, %720, %cst_336 {dimension_numbers = #tpu.dot_dimension_numbers<[1], [0], [0], [1], [0, 0, 1, 1], [], []>} : vector<1x128xbf16>, vector<128x384xbf16>, vector<1x384xf32> -> vector<1x384xf32>
    %722 = vector.extract_strided_slice %718 {offsets = [0, 0], sizes = [1, 128], strides = [1, 1]} : vector<1x384xf32> to vector<1x128xf32>
    %723 = vector.extract_strided_slice %721 {offsets = [0, 0], sizes = [1, 128], strides = [1, 1]} : vector<1x384xf32> to vector<1x128xf32>
    %724 = arith.addf %722, %723 : vector<1x128xf32>
    %725 = arith.negf %724 : vector<1x128xf32>
    %726 = math.exp %725 : vector<1x128xf32>
    %cst_337 = arith.constant 1.000000e+00 : f32
    %727 = vector.broadcast %cst_337 : f32 to vector<1x128xf32>
    %728 = arith.addf %727, %726 : vector<1x128xf32>
    %729 = arith.divf %727, %728 : vector<1x128xf32>
    %730 = vector.extract_strided_slice %718 {offsets = [0, 128], sizes = [1, 128], strides = [1, 1]} : vector<1x384xf32> to vector<1x128xf32>
    %731 = vector.extract_strided_slice %721 {offsets = [0, 128], sizes = [1, 128], strides = [1, 1]} : vector<1x384xf32> to vector<1x128xf32>
    %732 = arith.addf %730, %731 : vector<1x128xf32>
    %733 = arith.negf %732 : vector<1x128xf32>
    %734 = math.exp %733 : vector<1x128xf32>
    %cst_338 = arith.constant 1.000000e+00 : f32
    %735 = vector.broadcast %cst_338 : f32 to vector<1x128xf32>
    %736 = arith.addf %735, %734 : vector<1x128xf32>
    %737 = arith.divf %735, %736 : vector<1x128xf32>
    %738 = vector.extract_strided_slice %718 {offsets = [0, 256], sizes = [1, 128], strides = [1, 1]} : vector<1x384xf32> to vector<1x128xf32>
    %739 = vector.extract_strided_slice %721 {offsets = [0, 256], sizes = [1, 128], strides = [1, 1]} : vector<1x384xf32> to vector<1x128xf32>
    %c0_339 = arith.constant 0 : index
    %c0_340 = arith.constant 0 : index
    %740 = vector.load %arg14[%c0_339, %c0_340] : memref<1x128xf32, #tpu.memory_space<vmem>>, vector<1x128xf32>
    %741 = arith.addf %739, %740 : vector<1x128xf32>
    %742 = arith.mulf %729, %741 : vector<1x128xf32>
    %743 = arith.addf %738, %742 : vector<1x128xf32>
    %744 = math.tanh %743 : vector<1x128xf32>
    %cst_341 = arith.constant 1.000000e+00 : f32
    %745 = vector.broadcast %cst_341 : f32 to vector<1x128xf32>
    %746 = arith.subf %745, %737 : vector<1x128xf32>
    %747 = arith.mulf %746, %744 : vector<1x128xf32>
    %748 = arith.mulf %737, %652 : vector<1x128xf32>
    %749 = arith.addf %747, %748 : vector<1x128xf32>
    %750 = arith.truncf %749 : vector<1x128xf32> to vector<1x128xbf16>
    %c0_342 = arith.constant 0 : index
    %c0_343 = arith.constant 0 : index
    %751 = vector.load %arg26[%c0_342, %c0_343] : memref<8x128xbf16, #tpu.memory_space<vmem>>, vector<8x128xbf16>
    %cst_344 = arith.constant dense<0.000000e+00> : vector<1x8xf32>
    %752 = tpu.matmul %750, %751, %cst_344 {dimension_numbers = #tpu.dot_dimension_numbers<[1], [1], [0], [0], [0, 0, 1, 0], [], []>} : vector<1x128xbf16>, vector<8x128xbf16>, vector<1x8xf32> -> vector<1x8xf32>
    %753 = vector.broadcast %0 : i32 to vector<1x8xi32>
    %754 = arith.cmpi slt, %1, %753 : vector<1x8xi32>
    %cst_345 = arith.constant -1.000000e+30 : f32
    %755 = vector.broadcast %cst_345 : f32 to vector<1x8xf32>
    %756 = arith.select %754, %752, %755 : vector<1x8xi1>, vector<1x8xf32>
    %cst_346 = arith.constant dense<0xFF800000> : vector<1xf32>
    %757 = vector.multi_reduction <maximumf>, %756, %cst_346 [1] : vector<1x8xf32> to vector<1xf32>
    %758 = vector.shape_cast %757 : vector<1xf32> to vector<1x1xf32>
    %759 = vector.broadcast %758 : vector<1x1xf32> to vector<1x8xf32>
    %760 = arith.subf %756, %759 : vector<1x8xf32>
    %761 = math.exp %760 : vector<1x8xf32>
    %cst_347 = arith.constant dense<0.000000e+00> : vector<1xf32>
    %762 = vector.multi_reduction <add>, %761, %cst_347 [1] : vector<1x8xf32> to vector<1xf32>
    %763 = vector.shape_cast %762 : vector<1xf32> to vector<1x1xf32>
    %764 = vector.broadcast %763 : vector<1x1xf32> to vector<1x8xf32>
    %765 = arith.divf %761, %764 : vector<1x8xf32>
    %766 = arith.truncf %765 : vector<1x8xf32> to vector<1x8xbf16>
    %cst_348 = arith.constant dense<0.000000e+00> : vector<1x128xf32>
    %767 = tpu.matmul %766, %751, %cst_348 {dimension_numbers = #tpu.dot_dimension_numbers<[1], [0], [0], [1], [0, 0, 1, 1], [], []>} : vector<1x8xbf16>, vector<8x128xbf16>, vector<1x128xf32> -> vector<1x128xf32>
    %c0_349 = arith.constant 0 : index
    %c0_350 = arith.constant 0 : index
    %768 = vector.load %arg15[%c0_349, %c0_350] : memref<128x128xbf16, #tpu.memory_space<vmem>>, vector<128x128xbf16>
    %cst_351 = arith.constant dense<0.000000e+00> : vector<1x128xf32>
    %769 = tpu.matmul %750, %768, %cst_351 {dimension_numbers = #tpu.dot_dimension_numbers<[1], [0], [0], [1], [0, 0, 1, 1], [], []>} : vector<1x128xbf16>, vector<128x128xbf16>, vector<1x128xf32> -> vector<1x128xf32>
    %770 = arith.truncf %767 : vector<1x128xf32> to vector<1x128xbf16>
    %c0_352 = arith.constant 0 : index
    %c0_353 = arith.constant 0 : index
    %771 = vector.load %arg16[%c0_352, %c0_353] : memref<128x128xbf16, #tpu.memory_space<vmem>>, vector<128x128xbf16>
    %cst_354 = arith.constant dense<0.000000e+00> : vector<1x128xf32>
    %772 = tpu.matmul %770, %771, %cst_354 {dimension_numbers = #tpu.dot_dimension_numbers<[1], [0], [0], [1], [0, 0, 1, 1], [], []>} : vector<1x128xbf16>, vector<128x128xbf16>, vector<1x128xf32> -> vector<1x128xf32>
    %773 = arith.addf %769, %772 : vector<1x128xf32>
    %c0_355 = arith.constant 0 : index
    %c0_356 = arith.constant 0 : index
    %774 = vector.load %arg17[%c0_355, %c0_356] : memref<1x128xf32, #tpu.memory_space<vmem>>, vector<1x128xf32>
    %775 = arith.addf %773, %774 : vector<1x128xf32>
    %776 = math.tanh %775 : vector<1x128xf32>
    %777 = arith.truncf %776 : vector<1x128xf32> to vector<1x128xbf16>
    %c0_357 = arith.constant 0 : index
    %c0_358 = arith.constant 0 : index
    %778 = vector.load %arg18[%c0_357, %c0_358] : memref<128x256xbf16, #tpu.memory_space<vmem>>, vector<128x256xbf16>
    %cst_359 = arith.constant dense<0.000000e+00> : vector<1x256xf32>
    %779 = tpu.matmul %777, %778, %cst_359 {dimension_numbers = #tpu.dot_dimension_numbers<[1], [0], [0], [1], [0, 0, 1, 1], [], []>} : vector<1x128xbf16>, vector<128x256xbf16>, vector<1x256xf32> -> vector<1x256xf32>
    %c0_360 = arith.constant 0 : index
    %c0_361 = arith.constant 0 : index
    %780 = vector.load %arg19[%c0_360, %c0_361] : memref<1x256xf32, #tpu.memory_space<vmem>>, vector<1x256xf32>
    %781 = arith.addf %779, %780 : vector<1x256xf32>
    %cst_362 = arith.constant dense<0xFF800000> : vector<1xf32>
    %782 = vector.multi_reduction <maximumf>, %781, %cst_362 [1] : vector<1x256xf32> to vector<1xf32>
    %783 = vector.shape_cast %782 : vector<1xf32> to vector<1x1xf32>
    %784 = vector.broadcast %783 : vector<1x1xf32> to vector<1x256xf32>
    %785 = arith.subf %781, %784 : vector<1x256xf32>
    %786 = math.exp %785 : vector<1x256xf32>
    %cst_363 = arith.constant dense<0.000000e+00> : vector<1xf32>
    %787 = vector.multi_reduction <add>, %786, %cst_363 [1] : vector<1x256xf32> to vector<1xf32>
    %788 = vector.shape_cast %787 : vector<1xf32> to vector<1x1xf32>
    %cst_364 = arith.constant 1.000000e+00 : f32
    %789 = vector.broadcast %cst_364 : f32 to vector<1x1xf32>
    %790 = arith.divf %789, %788 : vector<1x1xf32>
    %791 = vector.broadcast %783 : vector<1x1xf32> to vector<1x256xf32>
    %792 = arith.cmpf oeq, %781, %791 : vector<1x256xf32>
    %c256_i32_365 = arith.constant 256 : i32
    %793 = vector.broadcast %c256_i32_365 : i32 to vector<1x256xi32>
    %794 = arith.select %792, %2, %793 : vector<1x256xi1>, vector<1x256xi32>
    %cst_366 = arith.constant dense<2147483647> : vector<1xi32>
    %795 = vector.multi_reduction <minsi>, %794, %cst_366 [1] : vector<1x256xi32> to vector<1xi32>
    %796 = vector.shape_cast %795 : vector<1xi32> to vector<1x1xi32>
    %c0_367 = arith.constant 0 : index
    %c0_368 = arith.constant 0 : index
    %797 = vector.load %arg27[%c0_367, %c0_368] : memref<1x1xi32, #tpu.memory_space<vmem>>, vector<1x1xi32>
    tpu.vector_store %arg27[%c0_367, %c0_368], %796 {strides = array<i32>} : memref<1x1xi32, #tpu.memory_space<vmem>>, vector<1x1xi32>,
    tpu.enqueue_dma source(%arg27 : memref<1x1xi32, #tpu.memory_space<vmem>>) target(%arg28 : memref<1x1xi32, #tpu.memory_space<smem>>) target_semaphore(%arg29 : memref<!tpu.dma_semaphore, #tpu.memory_space<semaphore_mem>>)
    %798 = vector.broadcast %c7_i32 : i32 to vector<1x8xi32>
    %799 = arith.cmpi eq, %3, %798 : vector<1x8xi32>
    %800 = vector.shape_cast %796 : vector<1x1xi32> to vector<1x1xi32>
    %801 = vector.broadcast %800 : vector<1x1xi32> to vector<1x8xi32>
    %802 = arith.select %799, %801, %705 : vector<1x8xi1>, vector<1x8xi32>
    %803 = vector.broadcast %c7_i32 : i32 to vector<1x8xi32>
    %804 = arith.cmpi eq, %3, %803 : vector<1x8xi32>
    %805 = vector.shape_cast %790 : vector<1x1xf32> to vector<1x1xf32>
    %806 = vector.broadcast %805 : vector<1x1xf32> to vector<1x8xf32>
    %807 = arith.select %804, %806, %710 : vector<1x8xi1>, vector<1x8xf32>
    tpu.wait_dma2 semaphore(%arg29 : memref<!tpu.dma_semaphore, #tpu.memory_space<semaphore_mem>>) src(%arg27 : memref<1x1xi32, #tpu.memory_space<vmem>>) dst(%arg28 : memref<1x1xi32, #tpu.memory_space<smem>>)
    %c0_369 = arith.constant 0 : index
    %c0_370 = arith.constant 0 : index
    %808 = memref.load %arg28[%c0_369, %c0_370] : memref<1x1xi32, #tpu.memory_space<smem>>
    %c8_i32 = arith.constant 8 : i32
    %c0_371 = arith.constant 0 : index
    %c0_372 = arith.constant 0 : index
    %809 = vector.load %arg20[%c0_371, %c0_372] : memref<1x8xi32, #tpu.memory_space<vmem>>, vector<1x8xi32>
    tpu.vector_store %arg20[%c0_371, %c0_372], %802 {strides = array<i32>} : memref<1x8xi32, #tpu.memory_space<vmem>>, vector<1x8xi32>,
    %c0_373 = arith.constant 0 : index
    %c0_374 = arith.constant 0 : index
    %810 = vector.load %arg21[%c0_373, %c0_374] : memref<1x8xf32, #tpu.memory_space<vmem>>, vector<1x8xf32>
    tpu.vector_store %arg21[%c0_373, %c0_374], %807 {strides = array<i32>} : memref<1x8xf32, #tpu.memory_space<vmem>>, vector<1x8xf32>,
    return
  }
}

</mosaic_0001>

<bundles_post_ra>
// kernel: tpu_custom_call.1
= control target key start
LH: loop header
LB: loop body
LE: loop exit
PB: predicated region body
PF: predicated region fallthrough
CT: control target
= control target key end

     0   :  { %s14792_s0 = inlined_call_operand.<no memory space> [shape: s32[1], index: 0, kind: input, shape index: {}]   ;;  %s14793_s1 = inlined_call_operand.hbm [shape: bf16[8,128], index: 1, kind: input, shape index: {}]   ;;  %s14794_s2 = inlined_call_operand.hbm [shape: bf16[128,384], index: 2, kind: input, shape index: {}]   ;;  %s14795_s3 = inlined_call_operand.hbm [shape: bf16[128,384], index: 3, kind: input, shape index: {}]   ;;  %s14796_s4 = inlined_call_operand.vmem [shape: f32[1,384], index: 4, kind: input, shape index: {}]   ;;  %s14797_s5 = inlined_call_operand.vmem [shape: f32[1,128], index: 5, kind: input, shape index: {}]   ;;  %s14798_s6 = inlined_call_operand.hbm [shape: bf16[128,384], index: 6, kind: input, shape index: {}]   ;;  %s14799_s7 = inlined_call_operand.hbm [shape: bf16[128,384], index: 7, kind: input, shape index: {}]   ;;  %s14800_s8 = inlined_call_operand.vmem [shape: f32[1,384], index: 8, kind: input, shape index: {}]   ;;  %s14801_s9 = inlined_call_operand.vmem [shape: f32[1,128], index: 9, kind: input, shape index: {}]   ;;  %s14802_s10 = inlined_call_operand.hbm [shape: f32[256,128], index: 10, kind: input, shape index: {}]   ;;  %s14803_s11 = inlined_call_operand.hbm [shape: bf16[128,384], index: 11, kind: input, shape index: {}]   ;;  %s14804_s12 = inlined_call_operand.hbm [shape: bf16[128,384], index: 12, kind: input, shape index: {}]   ;;  %s14805_s13 = inlined_call_operand.vmem [shape: f32[1,384], index: 13, kind: input, shape index: {}]   ;;  %s14806_s14 = inlined_call_operand.vmem [shape: f32[1,128], index: 14, kind: input, shape index: {}]   ;;  %s14807_s15 = inlined_call_operand.hbm [shape: bf16[128,128], index: 15, kind: input, shape index: {}]   ;;  %s14808_s16 = inlined_call_operand.hbm [shape: bf16[128,128], index: 16, kind: input, shape index: {}]   ;;  %s14809_s17 = inlined_call_operand.vmem [shape: f32[1,128], index: 17, kind: input, shape index: {}]   ;;  %s14810_s18 = inlined_call_operand.hbm [shape: bf16[128,256], index: 18, kind: input, shape index: {}]   ;;  %s14811_s19 = inlined_call_operand.vmem [shape: f32[1,256], index: 19, kind: input, shape index: {}]   ;;  %s14812_s20 = inlined_call_operand.hbm [shape: s32[1,8], index: 20, kind: output, shape index: {0}]   ;;  %s14813_s21 = inlined_call_operand.hbm [shape: f32[1,8], index: 21, kind: output, shape index: {1}]  }
   0x1   :  { %14822 = sst [smem:[#allocation66_spill]] %s14792_s0 }
   0x2   :  { %14823 = sst [smem:[#allocation67_spill]] %s14793_s1 }
   0x3   :  { %14824 = sst [smem:[#allocation68_spill]] %s14794_s2 }
   0x4   :  { %14825 = sst [smem:[#allocation69_spill]] %s14795_s3 }
   0x5   :  { %14826 = sst [smem:[#allocation70_spill]] %s14796_s4 }
   0x6   :  { %14827 = sst [smem:[#allocation71_spill]] %s14797_s5 }
   0x7   :  { %14828 = sst [smem:[#allocation72_spill]] %s14812_s20 }
   0x8   :  { %14829 = sst [smem:[#allocation73_spill]] %s14813_s21 }
   0x9   :  { %28 = vsyncpa [#allocation12], 0 }
   0xa   :  { %29 = vsyncpa [#allocation15], 0 }
   0xb   :  { %30 = vsyncpa [#allocation18], 0 }
   0xc   :  { %31 = vsyncpa [#allocation21], 0 }
   0xd   :  { %32 = vsyncpa [#allocation24], 0 }
   0xe   :  { %33 = vsyncpa [#allocation27], 0 }
   0xf   :  { %34 = vsyncpa [#allocation13], 0 }
  0x10   :  { %35 = vsyncpa [#allocation31], 0  ;;  %s13427_s2 = smov [#allocation14]   ;;  %s14830_s3 = sld [smem:[#allocation68_spill]] }
  0x11   :  { %s53_s25 = sshll.u32 %s13427_s2, 4  ;;  %s54_s25 = int_to_ptr.vmem [resolvable:$true] %s53_s25 }
  0x16   :  { %s12981_s28 = scalar_lea.hbm %s14830_s3, 3072 }
  0x17   :  { %p12982_p0 = scmp.ne.s32.totalorder %s14830_s3, %s12981_s28  ;;  %p12985_p1 = scmp.lt.u32.totalorder %s12981_s28, %s14830_s3 }
  0x19   :  { %p12987_p2 = pnand %p12985_p1, %p12982_p0 }
  0x1b   :  { %12990 = shalt.err (!%p12987_p2)
}
  0x1c   :  { %s12991_s5 = scalar_lea.vmem %s54_s25, 3072  ;;  %p12996_p4 = scmp.lt.s32.totalorder %s54_s25, %s54_s25 }
  0x1d   :  { %p12992_p3 = scmp.ne.s32.totalorder %s54_s25, %s12991_s5  ;;  %p12997_p5 = scmp.lt.s32.totalorder %s12991_s5, %s12991_s5 }
  0x1f   :  { %p12998_p6 = por %p12997_p5, %p12996_p4 }
  0x21   :  { %p12999_p7 = pnand %p12998_p6, %p12992_p3 }
  0x23   :  { %13002 = shalt.err (!%p12999_p7)
}
  0x24   :  { %s13428_s22 = smov 192   ;;  %s13429_s23 = smov 12  }
  0x25   :  { %59 = dma.hbm_to_vmem [thread:$0]  %s14830_s3, 3072, %s54_s25, [#allocation15], %s13428_s22, %s13428_s22, %s13429_s23  }
  0x26   :  { %s13430_s2 = smov [#allocation17]   ;;  %s13431_s27 = smov [#allocation20]  }
  0x27   :  { %s81_s26 = sshll.u32 %s13430_s2, 4  ;;  %s109_s28 = sshll.u32 %s13431_s27, 4  ;;  %s82_s26 = int_to_ptr.vmem [resolvable:$true] %s81_s26  ;;  %s110_s28 = int_to_ptr.vmem [resolvable:$true] %s109_s28 }
  0x28   :  { %s13003_s4 = scalar_lea.hbm %s14798_s6, 3072 }
  0x29   :  { %p13004_p8 = scmp.ne.s32.totalorder %s14798_s6, %s13003_s4  ;;  %p13007_p9 = scmp.lt.u32.totalorder %s13003_s4, %s14798_s6 }
  0x2b   :  { %p13009_p10 = pnand %p13007_p9, %p13004_p8 }
  0x2d   :  { %13012 = shalt.err (!%p13009_p10)
}
  0x2e   :  { %s13013_s25 = scalar_lea.vmem %s82_s26, 3072  ;;  %p13018_p12 = scmp.lt.s32.totalorder %s82_s26, %s82_s26 }
  0x2f   :  { %p13014_p11 = scmp.ne.s32.totalorder %s82_s26, %s13013_s25  ;;  %p13019_p13 = scmp.lt.s32.totalorder %s13013_s25, %s13013_s25 }
  0x31   :  { %p13020_p0 = por %p13019_p13, %p13018_p12 }
  0x33   :  { %p13021_p1 = pnand %p13020_p0, %p13014_p11 }
  0x35   :  { %13024 = shalt.err (!%p13021_p1)
}
  0x36   :  { %87 = dma.hbm_to_vmem [thread:$0]  %s14798_s6, 3072, %s82_s26, [#allocation18], %s13428_s22, %s13428_s22, %s13429_s23  }
  0x37   :  { %s13025_s21 = scalar_lea.hbm %s14802_s10, 4096 }
  0x38   :  { %p13026_p2 = scmp.ne.s32.totalorder %s14802_s10, %s13025_s21  ;;  %p13029_p3 = scmp.lt.u32.totalorder %s13025_s21, %s14802_s10 }
  0x3a   :  { %p13031_p4 = pnand %p13029_p3, %p13026_p2 }
  0x3c   :  { %13034 = shalt.err (!%p13031_p4)
}
  0x3d   :  { %s13035_s4 = scalar_lea.vmem %s110_s28, 4096  ;;  %p13040_p6 = scmp.lt.s32.totalorder %s110_s28, %s110_s28 }
  0x3e   :  { %p13036_p5 = scmp.ne.s32.totalorder %s110_s28, %s13035_s4  ;;  %p13041_p7 = scmp.lt.s32.totalorder %s13035_s4, %s13035_s4 }
  0x40   :  { %p13042_p8 = por %p13041_p7, %p13040_p6 }
  0x42   :  { %p13043_p9 = pnand %p13042_p8, %p13036_p5 }
  0x44   :  { %13046 = shalt.err (!%p13043_p9)
}
  0x45   :  { %s14821_s6 = smov 128   ;;  %s13433_s26 = smov 8  }
  0x46   :  { %115 = dma.hbm_to_vmem [thread:$0]  %s14802_s10, 4096, %s110_s28, [#allocation21], %s14821_s6, %s14821_s6, %s13433_s26  }
  0x47   :  { %s13434_s25 = smov [#allocation23]   ;;  %s13047_s20 = scalar_lea.hbm %s14804_s12, 3072 }
  0x48   :  { %s133_s3 = sshll.u32 %s13434_s25, 4  ;;  %p13048_p10 = scmp.ne.s32.totalorder %s14804_s12, %s13047_s20  ;;  %s134_s3 = int_to_ptr.vmem [resolvable:$true] %s133_s3 }
  0x49   :  { %p13051_p11 = scmp.lt.u32.totalorder %s13047_s20, %s14804_s12 }
  0x4b   :  { %p13053_p12 = pnand %p13051_p11, %p13048_p10 }
  0x4d   :  { %13056 = shalt.err (!%p13053_p12)
}
  0x4e   :  { %s13057_s0 = scalar_lea.vmem %s134_s3, 3072  ;;  %p13062_p0 = scmp.lt.s32.totalorder %s134_s3, %s134_s3 }
  0x4f   :  { %p13058_p13 = scmp.ne.s32.totalorder %s134_s3, %s13057_s0  ;;  %p13063_p1 = scmp.lt.s32.totalorder %s13057_s0, %s13057_s0 }
  0x51   :  { %p13064_p2 = por %p13063_p1, %p13062_p0 }
  0x53   :  { %p13065_p3 = pnand %p13064_p2, %p13058_p13 }
  0x55   :  { %13068 = shalt.err (!%p13065_p3)
}
  0x56   :  { %139 = dma.hbm_to_vmem [thread:$0]  %s14804_s12, 3072, %s134_s3, [#allocation24], %s13428_s22, %s13428_s22, %s13429_s23  }
  0x57   :  { %s13435_s4 = smov [#allocation26]   ;;  %s13436_s5 = smov [#allocation11]  }
  0x58   :  { %s161_s30 = sshll.u32 %s13435_s4, 4  ;;  %s44_s25 = sshll.u32 %s13436_s5, 4  ;;  %s162_s30 = int_to_ptr.vmem [resolvable:$true] %s161_s30  ;;  %s45_s25 = int_to_ptr.vmem [resolvable:$true] %s44_s25 }
  0x59   :  { %s13069_s20 = scalar_lea.hbm %s14808_s16, 1024 }
  0x5a   :  { %p13070_p4 = scmp.ne.s32.totalorder %s14808_s16, %s13069_s20  ;;  %p13073_p5 = scmp.lt.u32.totalorder %s13069_s20, %s14808_s16 }
  0x5c   :  { %p13075_p6 = pnand %p13073_p5, %p13070_p4 }
  0x5e   :  { %13078 = shalt.err (!%p13075_p6)
}
  0x5f   :  { %s13079_s12 = scalar_lea.vmem %s162_s30, 1024  ;;  %p13084_p8 = scmp.lt.s32.totalorder %s162_s30, %s162_s30 }
  0x60   :  { %p13080_p7 = scmp.ne.s32.totalorder %s162_s30, %s13079_s12  ;;  %p13085_p9 = scmp.lt.s32.totalorder %s13079_s12, %s13079_s12 }
  0x62   :  { %p13086_p10 = por %p13085_p9, %p13084_p8 }
  0x64   :  { %p13087_p11 = pnand %p13086_p10, %p13080_p7 }
  0x66   :  { %13090 = shalt.err (!%p13087_p11)
}
  0x67   :  { %s13437_s3 = smov 64   ;;  %s13438_s0 = smov 4  }
  0x68   :  { %167 = dma.hbm_to_vmem [thread:$0]  %s14808_s16, 1024, %s162_s30, [#allocation27], %s13437_s3, %s13437_s3, %s13438_s0  }
  0x69   :  { %s14831_s1 = sld [smem:[#allocation67_spill]] }
  0x6f   :  { %s13091_s24 = scalar_lea.hbm %s14831_s1, 64 }
  0x70   :  { %p13092_p12 = scmp.ne.s32.totalorder %s14831_s1, %s13091_s24  ;;  %p13095_p13 = scmp.lt.u32.totalorder %s13091_s24, %s14831_s1 }
  0x72   :  { %p13097_p0 = pnand %p13095_p13, %p13092_p12 }
  0x74   :  { %13100 = shalt.err (!%p13097_p0)
}
  0x75   :  { %s13101_s29 = scalar_lea.vmem %s45_s25, 64  ;;  %p13106_p2 = scmp.lt.s32.totalorder %s45_s25, %s45_s25 }
  0x76   :  { %p13102_p1 = scmp.ne.s32.totalorder %s45_s25, %s13101_s29  ;;  %p13107_p3 = scmp.lt.s32.totalorder %s13101_s29, %s13101_s29 }
  0x78   :  { %p13108_p4 = por %p13107_p3, %p13106_p2 }
  0x7a   :  { %p13109_p5 = pnand %p13108_p4, %p13102_p1 }
  0x7c   :  { %13112 = shalt.err (!%p13109_p5)
}
  0x7d   :  { %47 = dma.hbm_to_vmem [thread:$0]  %s14831_s1, 64, %s45_s25, [#allocation12]  }
  0x7e   :  { %s13439_s12 = smov [#allocation16]   ;;  %s13440_s28 = smov [#allocation19]  }
  0x7f   :  { %s65_s10 = sshll.u32 %s13439_s12, 4  ;;  %s93_s4 = sshll.u32 %s13440_s28, 4  ;;  %s66_s10 = int_to_ptr.vmem [resolvable:$true] %s65_s10  ;;  %s13651_s4 = int_to_ptr.vmem [resolvable:$true] %s93_s4 }
  0x80   :  { %s14832_s20 = sld [smem:[#allocation69_spill]] }
  0x86   :  { %s13113_s21 = scalar_lea.hbm %s14832_s20, 3072 }
  0x87   :  { %p13114_p6 = scmp.ne.s32.totalorder %s14832_s20, %s13113_s21  ;;  %p13117_p7 = scmp.lt.u32.totalorder %s13113_s21, %s14832_s20 }
  0x89   :  { %p13119_p8 = pnand %p13117_p7, %p13114_p6 }
  0x8b   :  { %13122 = shalt.err (!%p13119_p8)
}
  0x8c   :  { %s13123_s25 = scalar_lea.vmem %s66_s10, 3072  ;;  %p13128_p10 = scmp.lt.s32.totalorder %s66_s10, %s66_s10 }
  0x8d   :  { %p13124_p9 = scmp.ne.s32.totalorder %s66_s10, %s13123_s25  ;;  %p13129_p11 = scmp.lt.s32.totalorder %s13123_s25, %s13123_s25 }
  0x8f   :  { %p13130_p12 = por %p13129_p11, %p13128_p10 }
  0x91   :  { %p13131_p13 = pnand %p13130_p12, %p13124_p9 }
  0x93   :  { %13134 = shalt.err (!%p13131_p13)
}
  0x94   :  { %71 = dma.hbm_to_vmem [thread:$0]  %s14832_s20, 3072, %s66_s10, [#allocation15], %s13428_s22, %s13428_s22, %s13429_s23  }
  0x95   :  { %s13135_s6 = scalar_lea.hbm %s14799_s7, 3072 }
  0x96   :  { %p13136_p0 = scmp.ne.s32.totalorder %s14799_s7, %s13135_s6  ;;  %p13139_p1 = scmp.lt.u32.totalorder %s13135_s6, %s14799_s7 }
  0x98   :  { %p13141_p2 = pnand %p13139_p1, %p13136_p0 }
  0x9a   :  { %13144 = shalt.err (!%p13141_p2)
}
  0x9b   :  { %s13145_s2 = scalar_lea.vmem %s13651_s4, 3072  ;;  %p13150_p4 = scmp.lt.s32.totalorder %s13651_s4, %s13651_s4 }
  0x9c   :  { %p13146_p3 = scmp.ne.s32.totalorder %s13651_s4, %s13145_s2  ;;  %p13151_p5 = scmp.lt.s32.totalorder %s13145_s2, %s13145_s2 }
  0x9e   :  { %p13152_p6 = por %p13151_p5, %p13150_p4 }
  0xa0   :  { %p13153_p7 = pnand %p13152_p6, %p13146_p3 }
  0xa2   :  { %13156 = shalt.err (!%p13153_p7)
}
  0xa3   :  { %99 = dma.hbm_to_vmem [thread:$0]  %s14799_s7, 3072, %s13651_s4, [#allocation18], %s13428_s22, %s13428_s22, %s13429_s23  }
  0xa4   :  { %s13441_s27 = smov [#allocation22]   ;;  %s13442_s25 = smov [#allocation25]  }
  0xa5   :  { %s121_s29 = sshll.u32 %s13441_s27, 4  ;;  %s149_s1 = sshll.u32 %s13442_s25, 4  ;;  %s122_s29 = int_to_ptr.vmem [resolvable:$true] %s121_s29  ;;  %s13688_s1 = int_to_ptr.vmem [resolvable:$true] %s149_s1 }
  0xa6   :  { %s13157_s12 = scalar_lea.hbm %s14803_s11, 3072 }
  0xa7   :  { %p13158_p8 = scmp.ne.s32.totalorder %s14803_s11, %s13157_s12  ;;  %p13161_p9 = scmp.lt.u32.totalorder %s13157_s12, %s14803_s11 }
  0xa9   :  { %p13163_p10 = pnand %p13161_p9, %p13158_p8 }
  0xab   :  { %13166 = shalt.err (!%p13163_p10)
}
  0xac   :  { %s13167_s7 = scalar_lea.vmem %s122_s29, 3072  ;;  %p13172_p12 = scmp.lt.s32.totalorder %s122_s29, %s122_s29 }
  0xad   :  { %p13168_p11 = scmp.ne.s32.totalorder %s122_s29, %s13167_s7  ;;  %p13173_p13 = scmp.lt.s32.totalorder %s13167_s7, %s13167_s7 }
  0xaf   :  { %p13174_p0 = por %p13173_p13, %p13172_p12 }
  0xb1   :  { %p13175_p1 = pnand %p13174_p0, %p13168_p11 }
  0xb3   :  { %13178 = shalt.err (!%p13175_p1)
}
  0xb4   :  { %127 = dma.hbm_to_vmem [thread:$0]  %s14803_s11, 3072, %s122_s29, [#allocation21], %s13428_s22, %s13428_s22, %s13429_s23  }
  0xb5   :  { %s13179_s20 = scalar_lea.hbm %s14807_s15, 1024 }
  0xb6   :  { %p13180_p2 = scmp.ne.s32.totalorder %s14807_s15, %s13179_s20  ;;  %p13183_p3 = scmp.lt.u32.totalorder %s13179_s20, %s14807_s15 }
  0xb8   :  { %p13185_p4 = pnand %p13183_p3, %p13180_p2 }
  0xba   :  { %13188 = shalt.err (!%p13185_p4)
}
  0xbb   :  { %s13189_s12 = scalar_lea.vmem %s13688_s1, 1024  ;;  %p13194_p6 = scmp.lt.s32.totalorder %s13688_s1, %s13688_s1 }
  0xbc   :  { %p13190_p5 = scmp.ne.s32.totalorder %s13688_s1, %s13189_s12  ;;  %p13195_p7 = scmp.lt.s32.totalorder %s13189_s12, %s13189_s12 }
  0xbe   :  { %p13196_p8 = por %p13195_p7, %p13194_p6 }
  0xc0   :  { %p13197_p9 = pnand %p13196_p8, %p13190_p5 }
  0xc2   :  { %13200 = shalt.err (!%p13197_p9)
}
  0xc3   :  { %155 = dma.hbm_to_vmem [thread:$0]  %s14807_s15, 1024, %s13688_s1, [#allocation24], %s13437_s3, %s13437_s3, %s13438_s0  }
  0xc4   :  { %s13443_s23 = smov [#allocation28]   ;;  %s13201_s5 = scalar_lea.hbm %s14810_s18, 2048 }
  0xc5   :  { %s175_s29 = sshll.u32 %s13443_s23, 4  ;;  %p13202_p10 = scmp.ne.s32.totalorder %s14810_s18, %s13201_s5  ;;  %s176_s29 = int_to_ptr.vmem [resolvable:$true] %s175_s29 }
  0xc6   :  { %p13205_p11 = scmp.lt.u32.totalorder %s13201_s5, %s14810_s18 }
  0xc8   :  { %p13207_p12 = pnand %p13205_p11, %p13202_p10 }
  0xca   :  { %13210 = shalt.err (!%p13207_p12)
}
  0xcb   :  { %s13211_s2 = scalar_lea.vmem %s176_s29, 2048  ;;  %p13216_p0 = scmp.lt.s32.totalorder %s176_s29, %s176_s29 }
  0xcc   :  { %p13212_p13 = scmp.ne.s32.totalorder %s176_s29, %s13211_s2  ;;  %p13217_p1 = scmp.lt.s32.totalorder %s13211_s2, %s13211_s2 }
  0xce   :  { %p13218_p2 = por %p13217_p1, %p13216_p0 }
  0xd0   :  { %p13219_p3 = pnand %p13218_p2, %p13212_p13 }
  0xd2   :  { %13222 = shalt.err (!%p13219_p3)
}
  0xd3   :  { %s14833_s15 = smov 128  }
  0xd4   :  { %181 = dma.hbm_to_vmem [thread:$0]  %s14810_s18, 2048, %s176_s29, [#allocation27], %s14833_s15, %s14833_s15, %s13433_s26  }
  0xd5   :  { %13379 = dma.done.wait [#allocation12], 64  }
  0xd6   :  { %13380 = vsyncadd [#allocation12], 4294967232 }
  0xd7   :  { %13381 = dma.done.wait [#allocation15], 6144  }
  0xd8   :  { %13382 = vsyncadd [#allocation15], 4294961152 }
  0xd9   :  { %13383 = dma.done.wait [#allocation18], 6144  }
  0xda   :  { %13384 = vsyncadd [#allocation18], 4294961152 }
  0xdb   :  { %13385 = dma.done.wait [#allocation21], 7168  }
  0xdc   :  { %13386 = vsyncadd [#allocation21], 4294960128 }
  0xdd   :  { %13387 = dma.done.wait [#allocation24], 4096  }
  0xde   :  { %13388 = vsyncadd [#allocation24], 4294963200 }
  0xdf   :  { %13389 = dma.done.wait [#allocation27], 3072  }
  0xe0   :  { %13390 = vsyncadd [#allocation27], 4294964224  ;;  %v219_v0 = vlaneseq  ;;  %v13444_v1 = vmov 0.0   ;;  %vm13445_vm0 = vmmov 0   ;;  %v13446_v2 = vmov 0   ;;  %s14834_s1 = sld [smem:[#allocation70_spill]] }
  0xe1   :  { %10902 = vmatprep.subr.bf16.mxu1 %v13444_v1  ;;  %10918 = vmatprep.mubr.msk.bf16.mxu1 %vm13445_vm0, %v13444_v1  ;;  %v11825_v5 = vld [vmem:[#allocation14 + $0x4] ss:$12 sps:$4 sm:$0xff]   ;;  %v11827_v6 = vld [vmem:[#allocation14 + $0x8] ss:$12 sps:$4 sm:$0xff]   ;;  %v11828_v7 = vld [vmem:[#allocation14] ss:$12 sps:$4 sm:$0xff]  }
  0xe2   :  { %434 = vmatprep.mubr.bf16.mxu0 %v13446_v2  ;;  %v13745_v3 = vand.u32 127, %v219_v0  ;;  %402 = vmatprep.subr.bf16.mxu0 %v11825_v5  ;;  %v11829_v8 = vld [vmem:[#allocation14 + $0x1c] ss:$12 sps:$4 sm:$0xff]   ;;  %v11831_v9 = vld [vmem:[#allocation14 + $0x20] ss:$12 sps:$4 sm:$0xff]   ;;  %v13769_v54 = vshrl.u32 %v219_v0, 7 }
  0xe3   :  { %10903 = vmatpush3.bf16.msra.mxu1 %v11827_v6  ;;  %403 = vmatpush1.bf16.msra.mxu0 %v11828_v7  ;;  %v11832_v10 = vld [vmem:[#allocation14 + $0x18] ss:$12 sps:$4 sm:$0xff]   ;;  %v11833_v11 = vld [vmem:[#allocation14 + $0x34] ss:$12 sps:$4 sm:$0xff]   ;;  %v11836_v13 = vld [vmem:[#allocation14 + $0x30] ss:$12 sps:$4 sm:$0xff]  }
  0xe4   :  { %v13748_v4 = vadd.s32 128, %v13745_v3  ;;  %10904 = vmatprep.subr.bf16.mxu1 %v13444_v1  ;;  %404 = vmatprep.subr.bf16.mxu0 %v11829_v8  ;;  %v11835_v12 = vld [vmem:[#allocation14 + $0x38] ss:$12 sps:$4 sm:$0xff]   ;;  %v11839_v15 = vld [vmem:[#allocation14 + $0x50] ss:$12 sps:$4 sm:$0xff]   ;;  %v13772_v55 = vsub.s32 2, %v13769_v54 }
  0xe5   :  { %v11837_v14 = vld [vmem:[#allocation14 + $0x4c] ss:$12 sps:$4 sm:$0xff]   ;;  %v11840_v16 = vld [vmem:[#allocation14 + $0x48] ss:$12 sps:$4 sm:$0xff]   ;;  %v11841_v17 = vld [vmem:[#allocation14 + $0x64] ss:$12 sps:$4 sm:$0xff]  }
  0xe6   :  { %v11843_v18 = vld [vmem:[#allocation14 + $0x68] ss:$12 sps:$4 sm:$0xff]   ;;  %v11844_v19 = vld [vmem:[#allocation14 + $0x60] ss:$12 sps:$4 sm:$0xff]   ;;  %v11848_v22 = vld [vmem:[#allocation14 + $0x78] ss:$12 sps:$4 sm:$0xff]  }
  0xe7   :  { %10905 = vmatpush3.bf16.msra.mxu1 %v11831_v9  ;;  %405 = vmatpush1.bf16.msra.mxu0 %v11832_v10  ;;  %v11845_v20 = vld [vmem:[#allocation14 + $0x7c] ss:$12 sps:$4 sm:$0xff]   ;;  %v11847_v21 = vld [vmem:[#allocation14 + $0x80] ss:$12 sps:$4 sm:$0xff]   ;;  %v11851_v24 = vld [vmem:[#allocation14 + $0x98] ss:$12 sps:$4 sm:$0xff]  }
  0xe8   :  { %10906 = vmatprep.subr.bf16.mxu1 %v13444_v1  ;;  %406 = vmatprep.subr.bf16.mxu0 %v11833_v11  ;;  %v11849_v23 = vld [vmem:[#allocation14 + $0x94] ss:$12 sps:$4 sm:$0xff]   ;;  %v11852_v25 = vld [vmem:[#allocation14 + $0x90] ss:$12 sps:$4 sm:$0xff]   ;;  %v11853_v26 = vld [vmem:[#allocation14 + $0xac] ss:$12 sps:$4 sm:$0xff]  }
  0xe9   :  { %v11855_v27 = vld [vmem:[#allocation14 + $0xb0] ss:$12 sps:$4 sm:$0xff]   ;;  %v11856_v28 = vld [vmem:[#allocation14 + $0xa8] ss:$12 sps:$4 sm:$0xff]   ;;  %v11857_v32 = vld [vmem:[#allocation17] ss:$12 sps:$4 sm:$0xff]  }
  0xea   :  { %v11859_v29 = vld [vmem:[#allocation17 + $0x4] ss:$12 sps:$4 sm:$0xff]   ;;  %v224_v30 = vld [vmem:[#allocation11] sm:$0xf]  ;;  %v11860_v31 = vld [vmem:[#allocation17 + $0x8] ss:$12 sps:$4 sm:$0xff]  }
  0xeb   :  { %10907 = vmatpush3.bf16.msra.mxu1 %v11835_v12  ;;  %407 = vmatpush1.bf16.msra.mxu0 %v11836_v13  ;;  %v11863_v33 = vld [vmem:[#allocation17 + $0x1c] ss:$12 sps:$4 sm:$0xff]   ;;  %v11864_v34 = vld [vmem:[#allocation17 + $0x20] ss:$12 sps:$4 sm:$0xff]   ;;  %v11861_v35 = vld [vmem:[#allocation17 + $0x18] ss:$12 sps:$4 sm:$0xff]  }
  0xec   :  { %10908 = vmatprep.subr.bf16.mxu1 %v13444_v1  ;;  %408 = vmatprep.subr.bf16.mxu0 %v11837_v14  ;;  %v11867_v36 = vld [vmem:[#allocation17 + $0x34] ss:$12 sps:$4 sm:$0xff]   ;;  %v11868_v37 = vld [vmem:[#allocation17 + $0x38] ss:$12 sps:$4 sm:$0xff]   ;;  %v11865_v38 = vld [vmem:[#allocation17 + $0x30] ss:$12 sps:$4 sm:$0xff]  }
  0xed   :  { %v11871_v39 = vld [vmem:[#allocation17 + $0x4c] ss:$12 sps:$4 sm:$0xff]   ;;  %v11872_v40 = vld [vmem:[#allocation17 + $0x50] ss:$12 sps:$4 sm:$0xff]   ;;  %v11869_v41 = vld [vmem:[#allocation17 + $0x48] ss:$12 sps:$4 sm:$0xff]  }
  0xee   :  { %v11875_v42 = vld [vmem:[#allocation17 + $0x64] ss:$12 sps:$4 sm:$0xff]   ;;  %v11876_v43 = vld [vmem:[#allocation17 + $0x68] ss:$12 sps:$4 sm:$0xff]   ;;  %v11873_v44 = vld [vmem:[#allocation17 + $0x60] ss:$12 sps:$4 sm:$0xff]  }
  0xef   :  { %10909 = vmatpush3.bf16.msra.mxu1 %v11839_v15  ;;  %409 = vmatpush1.bf16.msra.mxu0 %v11840_v16  ;;  %v11879_v45 = vld [vmem:[#allocation17 + $0x7c] ss:$12 sps:$4 sm:$0xff]   ;;  %v11880_v46 = vld [vmem:[#allocation17 + $0x80] ss:$12 sps:$4 sm:$0xff]   ;;  %v11877_v47 = vld [vmem:[#allocation17 + $0x78] ss:$12 sps:$4 sm:$0xff]  }
  0xf0   :  { %10910 = vmatprep.subr.bf16.mxu1 %v13444_v1  ;;  %410 = vmatprep.subr.bf16.mxu0 %v11841_v17  ;;  %v11883_v48 = vld [vmem:[#allocation17 + $0x94] ss:$12 sps:$4 sm:$0xff]   ;;  %v11884_v49 = vld [vmem:[#allocation17 + $0x98] ss:$12 sps:$4 sm:$0xff]   ;;  %v11881_v50 = vld [vmem:[#allocation17 + $0x90] ss:$12 sps:$4 sm:$0xff]  }
  0xf1   :  { %v11887_v51 = vld [vmem:[#allocation17 + $0xac] ss:$12 sps:$4 sm:$0xff]   ;;  %v11888_v52 = vld [vmem:[#allocation17 + $0xb0] ss:$12 sps:$4 sm:$0xff]   ;;  %v11885_v53 = vld [vmem:[#allocation17 + $0xa8] ss:$12 sps:$4 sm:$0xff]  }
  0xf2   :  { %v257_v56 = vld [vmem:[%s14834_s1] sm:$0x7]  ;;  %v13778_v57 = vsub.s32 0, %v13769_v54  ;;  %v13781_v58 = vsub.s32 1, %v13769_v54  ;;  %s14835_s25 = sld [smem:[#allocation66_spill]] }
  0xf3   :  { %10911 = vmatpush3.bf16.msra.mxu1 %v11843_v18  ;;  %411 = vmatpush1.bf16.msra.mxu0 %v11844_v19  ;;  %v270_v59 = vrot.slane %v257_v56, %v13772_v55  ;;  %v518_v13 = vld [vmem:[%s14800_s8] sm:$0x7] }
  0xf4   :  { %10912 = vmatprep.subr.bf16.mxu1 %v13444_v1  ;;  %412 = vmatprep.subr.bf16.mxu0 %v11845_v20  ;;  %v262_v60 = vrot.slane %v257_v56, %v13778_v57  ;;  %v266_v61 = vrot.slane %v257_v56, %v13781_v58  ;;  %v531_v14 = vrot.slane %v518_v13, %v13772_v55 }
  0xf5   :  { %v523_v15 = vrot.slane %v518_v13, %v13778_v57  ;;  %v527_v16 = vrot.slane %v518_v13, %v13781_v58 }
  0xf7   :  { %10913 = vmatpush3.bf16.msra.mxu1 %v11847_v21  ;;  %413 = vmatpush1.bf16.msra.mxu0 %v11848_v22 }
  0xf8   :  { %10914 = vmatprep.subr.bf16.mxu1 %v13444_v1  ;;  %414 = vmatprep.subr.bf16.mxu0 %v11849_v23  ;;  %p9825_p4 = scmp.le.s32.totalorder %s14835_s25, 0 }
  0xf9   :  { %s13801_s16 = smov (!%p9825_p4), 0  }
  0xfb   :  { %10915 = vmatpush3.bf16.msra.mxu1 %v11851_v24  ;;  %415 = vmatpush1.bf16.msra.mxu0 %v11852_v25 }
  0xfc   :  { %10916 = vmatprep.subr.bf16.mxu1 %v13444_v1  ;;  %416 = vmatprep.subr.bf16.mxu0 %v11853_v26 }
  0xff   :  { %10917 = vmatpush3.bf16.msra.mxu1 %v11855_v27  ;;  %417 = vmatpush1.bf16.msra.mxu0 %v11856_v28  ;;  %v13795_v28 = vmov 0.0  }
 0x100   :  { %10922 = vmatprep.subr.bf16.mxu1 %v13444_v1  ;;  %663 = vmatprep.subr.bf16.mxu0 %v11859_v29  ;;  %v13797_v29 = vmov (!%p9825_p4), 0.0  }
 0x102   :  { %10919 = vmatmul.mubr.bf16.vlgmr.msra.gmra.mrb[0].mxu1 %v224_v30  ;;  %435 = vmatmul.mubr.bf16.vlgmr.msra.gmra.mrb[0].mxu0 %v224_v30 }
 0x103   :  { %10923 = vmatpush3.bf16.msra.mxu1 %v11860_v31  ;;  %664 = vmatpush1.bf16.msra.mxu0 %v11857_v32 }
 0x104   :  { %10924 = vmatprep.subr.bf16.mxu1 %v13444_v1  ;;  %665 = vmatprep.subr.bf16.mxu0 %v11863_v33 }
 0x105   :  { %10938 = vmatprep.mubr.msk.bf16.mxu1 %vm13445_vm0, %v13444_v1  ;;  %695 = vmatprep.mubr.bf16.mxu0 %v13446_v2 }
 0x107   :  { %10925 = vmatpush3.bf16.msra.mxu1 %v11864_v34  ;;  %666 = vmatpush1.bf16.msra.mxu0 %v11861_v35 }
 0x108   :  { %10926 = vmatprep.subr.bf16.mxu1 %v13444_v1  ;;  %667 = vmatprep.subr.bf16.mxu0 %v11867_v36 }
 0x10b   :  { %10927 = vmatpush3.bf16.msra.mxu1 %v11868_v37  ;;  %668 = vmatpush1.bf16.msra.mxu0 %v11865_v38 }
 0x10c   :  { %10928 = vmatprep.subr.bf16.mxu1 %v13444_v1  ;;  %669 = vmatprep.subr.bf16.mxu0 %v11871_v39 }
 0x10f   :  { %10929 = vmatpush3.bf16.msra.mxu1 %v11872_v40  ;;  %670 = vmatpush1.bf16.msra.mxu0 %v11869_v41 }
 0x110   :  { %10930 = vmatprep.subr.bf16.mxu1 %v13444_v1  ;;  %671 = vmatprep.subr.bf16.mxu0 %v11875_v42 }
 0x113   :  { %10931 = vmatpush3.bf16.msra.mxu1 %v11876_v43  ;;  %672 = vmatpush1.bf16.msra.mxu0 %v11873_v44 }
 0x114   :  { %10932 = vmatprep.subr.bf16.mxu1 %v13444_v1  ;;  %673 = vmatprep.subr.bf16.mxu0 %v11879_v45 }
 0x117   :  { %10933 = vmatpush3.bf16.msra.mxu1 %v11880_v46  ;;  %674 = vmatpush1.bf16.msra.mxu0 %v11877_v47 }
 0x118   :  { %10934 = vmatprep.subr.bf16.mxu1 %v13444_v1  ;;  %675 = vmatprep.subr.bf16.mxu0 %v11883_v48 }
 0x11b   :  { %10935 = vmatpush3.bf16.msra.mxu1 %v11884_v49  ;;  %676 = vmatpush1.bf16.msra.mxu0 %v11881_v50 }
 0x11c   :  { %10936 = vmatprep.subr.bf16.mxu1 %v13444_v1  ;;  %677 = vmatprep.subr.bf16.mxu0 %v11887_v51 }
 0x11f   :  { %10937 = vmatpush3.bf16.msra.mxu1 %v11888_v52  ;;  %678 = vmatpush1.bf16.msra.mxu0 %v11885_v53 }
 0x122   :  { %10939 = vmatmul.mubr.bf16.vlgmr.msra.gmra.mrb[4].mxu1 %v224_v30  ;;  %696 = vmatmul.mubr.bf16.vlgmr.msra.gmra.mrb[4].mxu0 %v224_v30  ;;  %v13799_v30 = vmov (!%p9825_p4), 0.0  }
 0x1d5   :  { %v477_v62 = vpop.f32.mrb[0].mxu1  ;;  %v436_v0 = vpop.f32.mrb[0].mxu0 }
 0x1d6   :  { %v478_v63 = vadd.f32 %v477_v62, %v270_v59  ;;  %v10920_v5 = vpop.f32.mrb[1].mxu1  ;;  %v437_v6 = vadd.f32 %v436_v0, %v262_v60  ;;  %v438_v7 = vpop.f32.mrb[1].mxu0 }
 0x1d7   :  { %v480_v8 = vpop.f32.mrb[2].mxu1  ;;  %v439_v9 = vadd.f32 %v438_v7, %v266_v61  ;;  %v440_v10 = vpop.f32.mrb[2].mxu0 }
 0x1d8   :  { %485 = vst [vmem:[#allocation2 + $0x10] sm:$0xff] %v478_v63  ;;  %v10921_v11 = vpop.f32.mrb[3].mxu1  ;;  %483 = vst [vmem:[#allocation2] sm:$0xff] %v437_v6  ;;  %v441_v12 = vpop.f32.mrb[3].mxu0 }
 0x1d9   :  { %484 = vst [vmem:[#allocation2 + $0x8] sm:$0xff] %v439_v9 }
 0x1f3   :  { %9770 = sbr.rel (%p9825_p4) target bundleno = 832 (0x340), region = 196 }
 0x1f5   :  { %v738_v17 = vpop.f32.mrb[4].mxu1  ;;  %v697_v19 = vpop.f32.mrb[4].mxu0 }
 0x1f6   :  { %v739_v18 = vadd.f32 %v738_v17, %v531_v14  ;;  %v10940_v20 = vpop.f32.mrb[5].mxu1  ;;  %v698_v21 = vadd.f32 %v697_v19, %v523_v15  ;;  %v699_v22 = vpop.f32.mrb[5].mxu0 }
 0x1f7   :  { %v741_v23 = vpop.f32.mrb[6].mxu1  ;;  %v700_v24 = vadd.f32 %v699_v22, %v527_v16  ;;  %v701_v25 = vpop.f32.mrb[6].mxu0 }
 0x1f8   :  { %746 = vst [vmem:[#allocation3 + $0x10] sm:$0xff] %v739_v18  ;;  %v10941_v26 = vpop.f32.mrb[7].mxu1  ;;  %744 = vst [vmem:[#allocation3] sm:$0xff] %v698_v21  ;;  %v702_v27 = vpop.f32.mrb[7].mxu0 }
 0x1f9   :  { %745 = vst [vmem:[#allocation3 + $0x8] sm:$0xff] %v700_v24 }
 0x1fa LB: > { %v11889_v31 = vld [vmem:[#allocation16 + $0x4] ss:$12 sps:$4 sm:$0xff]   ;;  %v11891_v32 = vld [vmem:[#allocation16] ss:$12 sps:$4 sm:$0xff]   ;;  %v13447_v33 = vmov 0.0   ;;  %v13448_v34 = vmov 0   ;;  %v764_v60 = vpack.c.bf16 %v13417_v30, %v13417_v30  ;;  %v1047_v24 = vpack.c.bf16 %v13413_v29, %v13413_v29  ;;  %s13421_s16 = sphi %s13801_s16, %s750_s16   ;;  %v13417_v30 = vphi %v13799_v30, %v14838_v30   ;;  %v13413_v29 = vphi %v13797_v29, %v1316_v29  }
 0x1fb   : > { %10942 = vmatprep.subr.bf16.mxu1 %v13447_v33  ;;  %957 = vmatprep.mubr.bf16.mxu0 %v13448_v34  ;;  %v11892_v35 = vld [vmem:[#allocation16 + $0x1c] ss:$12 sps:$4 sm:$0xff]   ;;  %vm13449_vm1 = vmmov 0   ;;  %v11894_v36 = vld [vmem:[#allocation16 + $0x18] ss:$12 sps:$4 sm:$0xff]   ;;  %s755_s30 = sshra.s32 %s13421_s16, 3 }
 0x1fc   : > { %925 = vmatprep.subr.bf16.mxu0 %v11889_v31  ;;  %10958 = vmatprep.mubr.msk.bf16.mxu1 %vm13449_vm1, %v13447_v33  ;;  %v11895_v37 = vld [vmem:[#allocation16 + $0x34] ss:$12 sps:$4 sm:$0xff]   ;;  %v11897_v38 = vld [vmem:[#allocation16 + $0x30] ss:$12 sps:$4 sm:$0xff]   ;;  %v11898_v39 = vld [vmem:[#allocation16 + $0x4c] ss:$12 sps:$4 sm:$0xff]  }
 0x1fd   : > { %926 = vmatpush1.bf16.msra.mxu0 %v11891_v32  ;;  %v11909_v40 = vld [vmem:[#allocation16 + $0x8] ss:$12 sps:$4 sm:$0xff]   ;;  %v11901_v42 = vld [vmem:[#allocation16 + $0x64] ss:$12 sps:$4 sm:$0xff]   ;;  %v11913_v43 = vld [vmem:[#allocation16 + $0x20] ss:$12 sps:$4 sm:$0xff]  }
 0x1fe   : > { %927 = vmatprep.subr.bf16.mxu0 %v11892_v35  ;;  %v11900_v41 = vld [vmem:[#allocation16 + $0x48] ss:$12 sps:$4 sm:$0xff]   ;;  %10943 = vmatpush3.bf16.msra.mxu1 %v11909_v40  ;;  %v11903_v44 = vld [vmem:[#allocation16 + $0x60] ss:$12 sps:$4 sm:$0xff]   ;;  %v11915_v45 = vld [vmem:[#allocation16 + $0x38] ss:$12 sps:$4 sm:$0xff]  }
 0x1ff   : > { %10944 = vmatprep.subr.bf16.mxu1 %v13447_v33  ;;  %v11904_v46 = vld [vmem:[#allocation16 + $0x7c] ss:$12 sps:$4 sm:$0xff]   ;;  %v11906_v47 = vld [vmem:[#allocation16 + $0x78] ss:$12 sps:$4 sm:$0xff]   ;;  %v11907_v49 = vld [vmem:[#allocation16 + $0x94] ss:$12 sps:$4 sm:$0xff]  }
 0x200   : > { %v11919_v48 = vld [vmem:[#allocation16 + $0x50] ss:$12 sps:$4 sm:$0xff]   ;;  %v11923_v51 = vld [vmem:[#allocation16 + $0x68] ss:$12 sps:$4 sm:$0xff]   ;;  %v11911_v52 = vld [vmem:[#allocation16 + $0xac] ss:$12 sps:$4 sm:$0xff]  }
 0x201   : > { %928 = vmatpush1.bf16.msra.mxu0 %v11894_v36  ;;  %v11910_v50 = vld [vmem:[#allocation16 + $0x90] ss:$12 sps:$4 sm:$0xff]   ;;  %v11914_v53 = vld [vmem:[#allocation16 + $0xa8] ss:$12 sps:$4 sm:$0xff]   ;;  %v11927_v56 = vld [vmem:[#allocation16 + $0x80] ss:$12 sps:$4 sm:$0xff]  }
 0x202   : > { %929 = vmatprep.subr.bf16.mxu0 %v11895_v37  ;;  %10945 = vmatpush3.bf16.msra.mxu1 %v11913_v43  ;;  %v11918_v59 = vld [vmem:[#allocation19 + $0x4] ss:$12 sps:$4 sm:$0xff]   ;;  %v11916_v61 = vld [vmem:[#allocation19] ss:$12 sps:$4 sm:$0xff]   ;;  %v11922_v63 = vld [vmem:[#allocation19 + $0x1c] ss:$12 sps:$4 sm:$0xff]  }
 0x203   : > { %10946 = vmatprep.subr.bf16.mxu1 %v13447_v33  ;;  %v11931_v62 = vld [vmem:[#allocation16 + $0x98] ss:$12 sps:$4 sm:$0xff]   ;;  %v11935_v5 = vld [vmem:[#allocation16 + $0xb0] ss:$12 sps:$4 sm:$0xff]   ;;  %v11926_v6 = vld [vmem:[#allocation19 + $0x34] ss:$12 sps:$4 sm:$0xff]  }
 0x204   : > { %v11920_v0 = vld [vmem:[#allocation19 + $0x18] ss:$12 sps:$4 sm:$0xff]   ;;  %v11924_v7 = vld [vmem:[#allocation19 + $0x30] ss:$12 sps:$4 sm:$0xff]   ;;  %v11942_v8 = vld [vmem:[#allocation19 + $0x8] ss:$12 sps:$4 sm:$0xff]  }
 0x205   : > { %930 = vmatpush1.bf16.msra.mxu0 %v11897_v38  ;;  %v11930_v9 = vld [vmem:[#allocation19 + $0x4c] ss:$12 sps:$4 sm:$0xff]   ;;  %v11928_v10 = vld [vmem:[#allocation19 + $0x48] ss:$12 sps:$4 sm:$0xff]   ;;  %v11934_v12 = vld [vmem:[#allocation19 + $0x64] ss:$12 sps:$4 sm:$0xff]  }
 0x206   : > { %931 = vmatprep.subr.bf16.mxu0 %v11898_v39  ;;  %10947 = vmatpush3.bf16.msra.mxu1 %v11915_v45  ;;  %v11946_v11 = vld [vmem:[#allocation19 + $0x20] ss:$12 sps:$4 sm:$0xff]   ;;  %v11947_v14 = vld [vmem:[#allocation19 + $0x38] ss:$12 sps:$4 sm:$0xff]   ;;  %v11938_v15 = vld [vmem:[#allocation19 + $0x7c] ss:$12 sps:$4 sm:$0xff]  }
 0x207   : > { %10948 = vmatprep.subr.bf16.mxu1 %v13447_v33  ;;  %v11932_v13 = vld [vmem:[#allocation19 + $0x60] ss:$12 sps:$4 sm:$0xff]   ;;  %v11936_v16 = vld [vmem:[#allocation19 + $0x78] ss:$12 sps:$4 sm:$0xff]   ;;  %v11948_v17 = vld [vmem:[#allocation19 + $0x50] ss:$12 sps:$4 sm:$0xff]  }
 0x208   : > { %v11941_v18 = vld [vmem:[#allocation19 + $0x94] ss:$12 sps:$4 sm:$0xff]   ;;  %v11939_v19 = vld [vmem:[#allocation19 + $0x90] ss:$12 sps:$4 sm:$0xff]   ;;  %v11945_v21 = vld [vmem:[#allocation19 + $0xac] ss:$12 sps:$4 sm:$0xff]  }
 0x209   : > { %932 = vmatpush1.bf16.msra.mxu0 %v11900_v41  ;;  %v11949_v20 = vld [vmem:[#allocation19 + $0x68] ss:$12 sps:$4 sm:$0xff]   ;;  %v11950_v23 = vld [vmem:[#allocation19 + $0x80] ss:$12 sps:$4 sm:$0xff]   ;;  %v11951_v25 = vld [vmem:[#allocation19 + $0x98] ss:$12 sps:$4 sm:$0xff]  }
 0x20a   : > { %933 = vmatprep.subr.bf16.mxu0 %v11901_v42  ;;  %10949 = vmatpush3.bf16.msra.mxu1 %v11919_v48  ;;  %v11943_v22 = vld [vmem:[#allocation19 + $0xa8] ss:$12 sps:$4 sm:$0xff]   ;;  %v11952_v26 = vld [vmem:[#allocation19 + $0xb0] ss:$12 sps:$4 sm:$0xff]   ;;  %s9826_s12 = smul.u32 24, %s755_s30  ;;  %s758_s11 = sand.u32 7, %s13421_s16 }
 0x20b   : > { %10950 = vmatprep.subr.bf16.mxu1 %v13447_v33  ;;  %s14836_s28 = sld [smem:[#allocation66_spill]]  ;;  %s14837_s3 = sld [smem:[#allocation71_spill]] }
 0x20c   : > { %s761_s22 = sadd.s32 %s9826_s12, %s758_s11  ;;  %s1034_s26 = scalar_lea.vmem [#allocation4], %s13421_s16 }
 0x20d   : > { %934 = vmatpush1.bf16.msra.mxu0 %v11903_v44  ;;  %s762_s23 = scalar_lea.vmem [#allocation2], %s761_s22 }
 0x20e   : > { %935 = vmatprep.subr.bf16.mxu0 %v11904_v46  ;;  %10951 = vmatpush3.bf16.msra.mxu1 %v11923_v51  ;;  %v763_v27 = vld [vmem:[%s762_s23] ss:$8 sm:$0x7] }
 0x20f   : > { %10952 = vmatprep.subr.bf16.mxu1 %v13447_v33  ;;  %v1014_v31 = vrot.slane %v763_v27, 1 }
 0x211   : > { %936 = vmatpush1.bf16.msra.mxu0 %v11906_v47  ;;  %s9853_s5 = sadd.s32 4294967295, %s14836_s28  ;;  %v1023_v46 = vld [vmem:[%s14837_s3] sm:$0x1] }
 0x212   : > { %937 = vmatprep.subr.bf16.mxu0 %v11907_v49  ;;  %10953 = vmatpush3.bf16.msra.mxu1 %v11927_v56  ;;  %s13844_s24 = ssub.s32 %s9853_s5, %s13421_s16  ;;  %v1026_v49 = vrot.slane %v763_v27, 2  ;;  %s750_s16 = sadd.s32 1, %s13421_s16  }
 0x213   : > { %10954 = vmatprep.subr.bf16.mxu1 %v13447_v33  ;;  %s1038_s7 = sshra.s32 %s13844_s24, 3  ;;  %s1041_s21 = sand.u32 7, %s13844_s24 }
 0x214   : > { %s9854_s4 = smul.u32 24, %s1038_s7  ;;  %s1317_s20 = scalar_lea.vmem [#allocation5], %s13844_s24 }
 0x215   : > { %938 = vmatpush1.bf16.msra.mxu0 %v11910_v50  ;;  %p749_p5 = scmp.ge.s32.totalorder %s750_s16, %s14836_s28 }
 0x216   : > { %939 = vmatprep.subr.bf16.mxu0 %v11911_v52  ;;  %10955 = vmatpush3.bf16.msra.mxu1 %v11931_v62  ;;  %s1044_s0 = sadd.s32 %s9854_s4, %s1041_s21 }
 0x217   : > { %10956 = vmatprep.subr.bf16.mxu1 %v13447_v33  ;;  %s1045_s18 = scalar_lea.vmem [#allocation3], %s1044_s0 }
 0x218   : > { %v1046_v52 = vld [vmem:[%s1045_s18] ss:$8 sm:$0x7] }
 0x219   : > { %940 = vmatpush1.bf16.msra.mxu0 %v11914_v53 }
 0x21a   : > { %1208 = vmatprep.subr.bf16.mxu0 %v11918_v59  ;;  %10957 = vmatpush3.bf16.msra.mxu1 %v11935_v5  ;;  %v1297_v59 = vrot.slane %v1046_v52, 1 }
 0x21b   : > { %10962 = vmatprep.subr.bf16.mxu1 %v13447_v33 }
 0x21c   : > { %958 = vmatmul.mubr.bf16.vlgmr.msra.gmra.mrb[0].mxu0 %v764_v60 }
 0x21d   : > { %1209 = vmatpush1.bf16.msra.mxu0 %v11916_v61  ;;  %1240 = vmatprep.mubr.bf16.mxu0 %v13448_v34 }
 0x21e   : > { %1210 = vmatprep.subr.bf16.mxu0 %v11922_v63  ;;  %10959 = vmatmul.mubr.bf16.vlgmr.msra.gmra.mrb[0].mxu1 %v764_v60 }
 0x21f   : > { %10963 = vmatpush3.bf16.msra.mxu1 %v11942_v8  ;;  %10978 = vmatprep.mubr.msk.bf16.mxu1 %vm13449_vm1, %v13447_v33 }
 0x220   : > { %10964 = vmatprep.subr.bf16.mxu1 %v13447_v33 }
 0x221   : > { %1211 = vmatpush1.bf16.msra.mxu0 %v11920_v0 }
 0x222   : > { %1212 = vmatprep.subr.bf16.mxu0 %v11926_v6 }
 0x223   : > { %10965 = vmatpush3.bf16.msra.mxu1 %v11946_v11 }
 0x224   : > { %10966 = vmatprep.subr.bf16.mxu1 %v13447_v33 }
 0x225   : > { %1213 = vmatpush1.bf16.msra.mxu0 %v11924_v7 }
 0x226   : > { %1214 = vmatprep.subr.bf16.mxu0 %v11930_v9 }
 0x227   : > { %10967 = vmatpush3.bf16.msra.mxu1 %v11947_v14 }
 0x228   : > { %10968 = vmatprep.subr.bf16.mxu1 %v13447_v33 }
 0x229   : > { %1215 = vmatpush1.bf16.msra.mxu0 %v11928_v10 }
 0x22a   : > { %1216 = vmatprep.subr.bf16.mxu0 %v11934_v12 }
 0x22b   : > { %10969 = vmatpush3.bf16.msra.mxu1 %v11948_v17 }
 0x22c   : > { %10970 = vmatprep.subr.bf16.mxu1 %v13447_v33 }
 0x22d   : > { %1217 = vmatpush1.bf16.msra.mxu0 %v11932_v13 }
 0x22e   : > { %1218 = vmatprep.subr.bf16.mxu0 %v11938_v15 }
 0x22f   : > { %10971 = vmatpush3.bf16.msra.mxu1 %v11949_v20  ;;  %v1306_v20 = vld [vmem:[%s14801_s9] sm:$0x1] }
 0x230   : > { %10972 = vmatprep.subr.bf16.mxu1 %v13447_v33 }
 0x231   : > { %1219 = vmatpush1.bf16.msra.mxu0 %v11936_v16 }
 0x232   : > { %1220 = vmatprep.subr.bf16.mxu0 %v11941_v18 }
 0x233   : > { %10973 = vmatpush3.bf16.msra.mxu1 %v11950_v23  ;;  %v1309_v23 = vrot.slane %v1046_v52, 2 }
 0x234   : > { %10974 = vmatprep.subr.bf16.mxu1 %v13447_v33 }
 0x235   : > { %1221 = vmatpush1.bf16.msra.mxu0 %v11939_v19 }
 0x236   : > { %1222 = vmatprep.subr.bf16.mxu0 %v11945_v21 }
 0x237   : > { %10975 = vmatpush3.bf16.msra.mxu1 %v11951_v25 }
 0x238   : > { %10976 = vmatprep.subr.bf16.mxu1 %v13447_v33 }
 0x239   : > { %1223 = vmatpush1.bf16.msra.mxu0 %v11943_v22 }
 0x23b   : > { %10977 = vmatpush3.bf16.msra.mxu1 %v11952_v26 }
 0x23c   : > { %1241 = vmatmul.mubr.bf16.vlgmr.msra.gmra.mrb[4].mxu0 %v1047_v24 }
 0x23e   : > { %10979 = vmatmul.mubr.bf16.vlgmr.msra.gmra.mrb[4].mxu1 %v1047_v24 }
 0x2ef   : > { %v959_v28 = vpop.f32.mrb[0].mxu0 }
 0x2f0   : > { %v1006_v32 = vadd.f32 %v959_v28, %v763_v27  ;;  %v961_v34 = vpop.f32.mrb[1].mxu0 }
 0x2f1   : > { %v963_v35 = vpop.f32.mrb[2].mxu0  ;;  %v1016_v38 = vadd.f32 %v1014_v31, %v961_v34  ;;  %v1000_v33 = vpop.f32.mrb[0].mxu1 }
 0x2f2   : > { %v9851_v36 = vmul.f32 -1.442695, %v1006_v32  ;;  %v964_v37 = vpop.f32.mrb[3].mxu0  ;;  %v10960_v40 = vpop.f32.mrb[1].mxu1  ;;  %v1024_v48 = vadd.f32 %v1023_v46, %v1000_v33 }
 0x2f3   : > { %v9852_v39 = vmul.f32 -1.442695, %v1016_v38  ;;  %v1003_v41 = vpop.f32.mrb[2].mxu1 }
 0x2f4   : > { %11953 = vpow2.f32 %v9851_v36  ;;  %v10961_v42 = vpop.f32.mrb[3].mxu1 }
 0x2f5   : > { %11955 = vpow2.f32 %v9852_v39 }
 0x2fe   : > { %v11954_v43 = vpop.eup %11953 }
 0x2ff   : > { %v1010_v44 = vadd.f32 1.0, %v11954_v43  ;;  %v11956_v45 = vpop.eup %11955 }
 0x300   : > { %v1020_v47 = vadd.f32 1.0, %v11956_v45 }
 0x301   : > { %11957 = vrcp.f32 %v1010_v44 }
 0x302   : > { %11959 = vrcp.f32 %v1020_v47 }
 0x30b   : > { %v11958_v50 = vpop.eup %11957 }
 0x30c   : > { %v1025_v51 = vmul.f32 %v11958_v50, %v1024_v48  ;;  %v11960_v6 = vpop.eup %11959 }
 0x30d   : > { %v1030_v10 = vsub.f32 1.0, %v11960_v6  ;;  %v1032_v14 = vmul.f32 %v13417_v30, %v11960_v6 }
 0x30e   : > { %v1028_v53 = vadd.f32 %v1026_v49, %v1025_v51 }
 0x30f   : > { %v1242_v56 = vpop.f32.mrb[4].mxu0 }
 0x310   : > { %11961 = vtanh.f32 %v1028_v53  ;;  %v1289_v60 = vadd.f32 %v1242_v56, %v1046_v52  ;;  %v1244_v61 = vpop.f32.mrb[5].mxu0 }
 0x311   : > { %v1246_v62 = vpop.f32.mrb[6].mxu0  ;;  %v1299_v5 = vadd.f32 %v1297_v59, %v1244_v61  ;;  %v1283_v8 = vpop.f32.mrb[4].mxu1 }
 0x312   : > { %v9879_v63 = vmul.f32 -1.442695, %v1289_v60  ;;  %v1247_v0 = vpop.f32.mrb[7].mxu0  ;;  %v10980_v9 = vpop.f32.mrb[5].mxu1  ;;  %v1307_v22 = vadd.f32 %v1306_v20, %v1283_v8 }
 0x313   : > { %v9880_v7 = vmul.f32 -1.442695, %v1299_v5  ;;  %v1286_v11 = vpop.f32.mrb[6].mxu1 }
 0x314   : > { %11963 = vpow2.f32 %v9879_v63  ;;  %v10981_v13 = vpop.f32.mrb[7].mxu1 }
 0x315   : > { %11965 = vpow2.f32 %v9880_v7 }
 0x31a   : > { %v11962_v12 = vpop.eup %11961 }
 0x31b   : > { %v1031_v15 = vmul.f32 %v11962_v12, %v1030_v10 }
 0x31d   : > { %v1033_v16 = vadd.f32 %v1032_v14, %v1031_v15  }
 0x31e   : > { %v11964_v17 = vpop.eup %11963 }
 0x31f   : > { %1035 = vst [vmem:[%s1034_s26] sm:$0x1] %v1033_v16  ;;  %v1293_v18 = vadd.f32 1.0, %v11964_v17  ;;  %v11966_v19 = vpop.eup %11965 }
 0x320   : > { %v1303_v21 = vadd.f32 1.0, %v11966_v19 }
 0x321   : > { %11967 = vrcp.f32 %v1293_v18 }
 0x322   : > { %11969 = vrcp.f32 %v1303_v21 }
 0x32b   : > { %v11968_v24 = vpop.eup %11967 }
 0x32c   : > { %v1308_v30 = vmul.f32 %v11968_v24, %v1307_v22  ;;  %v11970_v26 = vpop.eup %11969 }
 0x32d   : > { %v1313_v27 = vsub.f32 1.0, %v11970_v26  ;;  %v1315_v31 = vmul.f32 %v13413_v29, %v11970_v26 }
 0x32e   : > { %v1311_v25 = vadd.f32 %v1309_v23, %v1308_v30  ;;  %v14838_v30 = vmov %v1033_v16 }
 0x330   : > { %11971 = vtanh.f32 %v1311_v25 }
 0x339   :  { %752 = sbr.rel (!%p749_p5) target bundleno = 506 (0x1fa), region = 202 }
 0x33a   : > { %v11972_v28 = vpop.eup %11971 }
 0x33b   : > { %v1314_v32 = vmul.f32 %v11972_v28, %v1313_v27  ;;  %v14839_v28 = vmov (%p749_p5), %v1033_v16 }
 0x33d   : > { %v1316_v29 = vadd.f32 %v1315_v31, %v1314_v32  }
 0x33f   : > { %1318 = vst [vmem:[%s1317_s20] sm:$0x1] %v1316_v29 }
 0x340 PF:  { %v11973_v34 = vld [vmem:[#allocation22 + $0x4] ss:$12 sps:$4 sm:$0xff]   ;;  %10982 = vmatprep.subr.bf16.mxu1 %v13444_v1  ;;  %1538 = vmatprep.mubr.bf16.mxu0 %v13446_v2  ;;  %v11975_v35 = vld [vmem:[#allocation22] ss:$12 sps:$4 sm:$0xff]   ;;  %v11976_v36 = vld [vmem:[#allocation22 + $0x1c] ss:$12 sps:$4 sm:$0xff]   ;;  %v1587_v24 = vpack.c.bf16 %v13425_v28, %v13425_v28  ;;  %v13425_v28 = vphi %v13795_v28, %v14839_v28  }
 0x341   :  { %10998 = vmatprep.mubr.msk.bf16.mxu1 %vm13445_vm0, %v13444_v1  ;;  %1506 = vmatprep.subr.bf16.mxu0 %v11973_v34  ;;  %v11978_v37 = vld [vmem:[#allocation22 + $0x18] ss:$12 sps:$4 sm:$0xff]   ;;  %v11979_v29 = vld [vmem:[#allocation22 + $0x34] ss:$12 sps:$4 sm:$0xff]   ;;  %v11981_v38 = vld [vmem:[#allocation22 + $0x30] ss:$12 sps:$4 sm:$0xff]  }
 0x342   :  { %1507 = vmatpush1.bf16.msra.mxu0 %v11975_v35  ;;  %v11982_v39 = vld [vmem:[#allocation22 + $0x4c] ss:$12 sps:$4 sm:$0xff]   ;;  %v11993_v33 = vld [vmem:[#allocation22 + $0x8] ss:$12 sps:$4 sm:$0xff]   ;;  %v11985_v41 = vld [vmem:[#allocation22 + $0x64] ss:$12 sps:$4 sm:$0xff]  }
 0x343   :  { %1508 = vmatprep.subr.bf16.mxu0 %v11976_v36  ;;  %v11984_v40 = vld [vmem:[#allocation22 + $0x48] ss:$12 sps:$4 sm:$0xff]   ;;  %10983 = vmatpush3.bf16.msra.mxu1 %v11993_v33  ;;  %v11997_v42 = vld [vmem:[#allocation22 + $0x20] ss:$12 sps:$4 sm:$0xff]   ;;  %v11999_v44 = vld [vmem:[#allocation22 + $0x38] ss:$12 sps:$4 sm:$0xff]  }
 0x344   :  { %10984 = vmatprep.subr.bf16.mxu1 %v13444_v1  ;;  %v11987_v43 = vld [vmem:[#allocation22 + $0x60] ss:$12 sps:$4 sm:$0xff]   ;;  %v11988_v45 = vld [vmem:[#allocation22 + $0x7c] ss:$12 sps:$4 sm:$0xff]   ;;  %v11990_v46 = vld [vmem:[#allocation22 + $0x78] ss:$12 sps:$4 sm:$0xff]  }
 0x345   :  { %v12003_v47 = vld [vmem:[#allocation22 + $0x50] ss:$12 sps:$4 sm:$0xff]   ;;  %v11991_v48 = vld [vmem:[#allocation22 + $0x94] ss:$12 sps:$4 sm:$0xff]   ;;  %v11995_v51 = vld [vmem:[#allocation22 + $0xac] ss:$12 sps:$4 sm:$0xff]  }
 0x346   :  { %1509 = vmatpush1.bf16.msra.mxu0 %v11978_v37  ;;  %v11994_v49 = vld [vmem:[#allocation22 + $0x90] ss:$12 sps:$4 sm:$0xff]   ;;  %v12007_v50 = vld [vmem:[#allocation22 + $0x68] ss:$12 sps:$4 sm:$0xff]   ;;  %v1327_v53 = vld [vmem:[#allocation20 + $0x1] sm:$0x1] }
 0x347   :  { %1510 = vmatprep.subr.bf16.mxu0 %v11979_v29  ;;  %10985 = vmatpush3.bf16.msra.mxu1 %v11997_v42  ;;  %v11998_v52 = vld [vmem:[#allocation22 + $0xa8] ss:$12 sps:$4 sm:$0xff]   ;;  %v12011_v56 = vld [vmem:[#allocation22 + $0x80] ss:$12 sps:$4 sm:$0xff]   ;;  %v12002_v59 = vld [vmem:[#allocation23 + $0x4] ss:$12 sps:$4 sm:$0xff]   ;;  %v1328_v61 = vpack.c.bf16 %v1327_v53, %v1327_v53 }
 0x348   :  { %10986 = vmatprep.subr.bf16.mxu1 %v13444_v1  ;;  %v12000_v60 = vld [vmem:[#allocation23] ss:$12 sps:$4 sm:$0xff]   ;;  %v12015_v62 = vld [vmem:[#allocation22 + $0x98] ss:$12 sps:$4 sm:$0xff]   ;;  %v12006_v63 = vld [vmem:[#allocation23 + $0x1c] ss:$12 sps:$4 sm:$0xff]  }
 0x349   :  { %v12004_v0 = vld [vmem:[#allocation23 + $0x18] ss:$12 sps:$4 sm:$0xff]   ;;  %v12019_v5 = vld [vmem:[#allocation22 + $0xb0] ss:$12 sps:$4 sm:$0xff]   ;;  %v12010_v6 = vld [vmem:[#allocation23 + $0x34] ss:$12 sps:$4 sm:$0xff]  }
 0x34a   :  { %1511 = vmatpush1.bf16.msra.mxu0 %v11981_v38  ;;  %v12008_v7 = vld [vmem:[#allocation23 + $0x30] ss:$12 sps:$4 sm:$0xff]   ;;  %v12026_v8 = vld [vmem:[#allocation23 + $0x8] ss:$12 sps:$4 sm:$0xff]   ;;  %v12014_v9 = vld [vmem:[#allocation23 + $0x4c] ss:$12 sps:$4 sm:$0xff]  }
 0x34b   :  { %1512 = vmatprep.subr.bf16.mxu0 %v11982_v39  ;;  %10987 = vmatpush3.bf16.msra.mxu1 %v11999_v44  ;;  %v12012_v10 = vld [vmem:[#allocation23 + $0x48] ss:$12 sps:$4 sm:$0xff]   ;;  %v12030_v11 = vld [vmem:[#allocation23 + $0x20] ss:$12 sps:$4 sm:$0xff]   ;;  %v12018_v12 = vld [vmem:[#allocation23 + $0x64] ss:$12 sps:$4 sm:$0xff]  }
 0x34c   :  { %10988 = vmatprep.subr.bf16.mxu1 %v13444_v1  ;;  %v12016_v13 = vld [vmem:[#allocation23 + $0x60] ss:$12 sps:$4 sm:$0xff]   ;;  %v12031_v14 = vld [vmem:[#allocation23 + $0x38] ss:$12 sps:$4 sm:$0xff]   ;;  %v12022_v15 = vld [vmem:[#allocation23 + $0x7c] ss:$12 sps:$4 sm:$0xff]  }
 0x34d   :  { %v12020_v16 = vld [vmem:[#allocation23 + $0x78] ss:$12 sps:$4 sm:$0xff]   ;;  %v12032_v17 = vld [vmem:[#allocation23 + $0x50] ss:$12 sps:$4 sm:$0xff]   ;;  %v12025_v18 = vld [vmem:[#allocation23 + $0x94] ss:$12 sps:$4 sm:$0xff]  }
 0x34e   :  { %1513 = vmatpush1.bf16.msra.mxu0 %v11984_v40  ;;  %v12023_v19 = vld [vmem:[#allocation23 + $0x90] ss:$12 sps:$4 sm:$0xff]   ;;  %v12033_v20 = vld [vmem:[#allocation23 + $0x68] ss:$12 sps:$4 sm:$0xff]   ;;  %v12029_v21 = vld [vmem:[#allocation23 + $0xac] ss:$12 sps:$4 sm:$0xff]  }
 0x34f   :  { %1514 = vmatprep.subr.bf16.mxu0 %v11985_v41  ;;  %10989 = vmatpush3.bf16.msra.mxu1 %v12003_v47  ;;  %v12027_v22 = vld [vmem:[#allocation23 + $0xa8] ss:$12 sps:$4 sm:$0xff]   ;;  %v12034_v23 = vld [vmem:[#allocation23 + $0x80] ss:$12 sps:$4 sm:$0xff]   ;;  %v12035_v30 = vld [vmem:[#allocation23 + $0x98] ss:$12 sps:$4 sm:$0xff]  }
 0x350   :  { %10990 = vmatprep.subr.bf16.mxu1 %v13444_v1  ;;  %v12036_v25 = vld [vmem:[#allocation23 + $0xb0] ss:$12 sps:$4 sm:$0xff]   ;;  %v12037_v26 = vld [vmem:[#allocation25] sm:$0xff]   ;;  %v12038_v27 = vld [vmem:[#allocation25 + $0x8] sm:$0xff]   ;;  %s14840_s16 = sld [smem:[#allocation66_spill]]  ;;  %vm1896_vm4 = vcmask 57344  }
 0x351   :  { %v12039_v31 = vld [vmem:[#allocation25 + $0x10] sm:$0xff]   ;;  %v12040_v32 = vld [vmem:[#allocation25 + $0x18] sm:$0xff]   ;;  %v1319_v34 = vld [vmem:[#allocation4] sm:$0xff]  ;;  %vm1913_vm5 = vcmask 1043456   ;;  %vm1909_vm6 = vcmask 64512   ;;  %vm2319_vm7 = vcmask 1040384  }
 0x352   :  { %1515 = vmatpush1.bf16.msra.mxu0 %v11987_v43  ;;  %v1320_v35 = vld [vmem:[#allocation5] sm:$0xff]  ;;  %v12041_v38 = vld [vmem:[#allocation25 + $0x20] sm:$0xff]   ;;  %vm2373_vm12 = vcmp.eq.s32.totalorder %v13745_v3, 0  ;;  %s13450_s21 = smov [#allocation7]   ;;  %vm2360_vm13 = vcmask 0  }
 0x353   :  { %1516 = vmatprep.subr.bf16.mxu0 %v11988_v45  ;;  %10991 = vmatpush3.bf16.msra.mxu1 %v12007_v50  ;;  %v1321_v36 = vadd.f32 %v1320_v35, %v1319_v34  ;;  %v12042_v33 = vld [vmem:[#allocation25 + $0x28] sm:$0xff]   ;;  %v12043_v40 = vld [vmem:[#allocation25 + $0x30] sm:$0xff]   ;;  %s2369_s2 = sshll.u32 %s13450_s21, 4  ;;  %s13991_s2 = int_to_ptr.vmem [resolvable:$true] %s2369_s2 }
 0x354   :  { %10992 = vmatprep.subr.bf16.mxu1 %v13444_v1  ;;  %s13223_s15 = scalar_lea.vmem %s13991_s2, 16  ;;  %p13228_p7 = scmp.lt.s32.totalorder %s13991_s2, %s13991_s2 }
 0x355   :  { %p13224_p6 = scmp.ne.s32.totalorder %s13991_s2, %s13223_s15  ;;  %p13229_p8 = scmp.lt.s32.totalorder %s13223_s15, %s13223_s15 }
 0x356   :  { %1517 = vmatpush1.bf16.msra.mxu0 %v11990_v46  ;;  %v1322_v37 = vstv %s14840_s16  ;;  %v1361_v46 = vld [vmem:[%s14805_s13] sm:$0x7] }
 0x357   :  { %1518 = vmatprep.subr.bf16.mxu0 %v11991_v48  ;;  %10993 = vmatpush3.bf16.msra.mxu1 %v12011_v56  ;;  %vm1323_vm2 = vcmp.lt.s32.totalorder %v13769_v54, %v1322_v37  ;;  %v12044_v54 = vld [vmem:[#allocation25 + $0x38] sm:$0xff]   ;;  %v1494_v47 = vrot.slane %v1361_v46, %v13778_v57  ;;  %vm13947_vm3 = vcmp.lt.s32.totalorder %v13745_v3, %v1322_v37  ;;  %p13230_p9 = por %p13229_p8, %p13228_p7 }
 0x358   :  { %10994 = vmatprep.subr.bf16.mxu1 %v13444_v1  ;;  %v1324_v29 = vsel %vm1323_vm2, %v1321_v36, 0.0 }
 0x359   :  { %v1325_v39 = vpack.c.bf16 %v1324_v29, %v1324_v29  ;;  %p14000_p10 = pnand %p13230_p9, %p13224_p6 }
 0x35a   :  { %1519 = vmatpush1.bf16.msra.mxu0 %v11994_v49  ;;  %v1498_v49 = vrot.slane %v1361_v46, %v13781_v58 }
 0x35b   :  { %1520 = vmatprep.subr.bf16.mxu0 %v11995_v51  ;;  %10995 = vmatpush3.bf16.msra.mxu1 %v12015_v62  ;;  %1326 = vst [vmem:[#allocation6] sm:$0xf] %v1325_v39 }
 0x35c   :  { %10996 = vmatprep.subr.bf16.mxu1 %v13444_v1 }
 0x35e   :  { %1521 = vmatpush1.bf16.msra.mxu0 %v11998_v52 }
 0x35f   :  { %1748 = vmatprep.subr.bf16.mxu0 %v12002_v59  ;;  %10997 = vmatpush3.bf16.msra.mxu1 %v12019_v5 }
 0x360   :  { %11002 = vmatprep.subr.bf16.mxu1 %v13444_v1 }
 0x361   :  { %1539 = vmatmul.mubr.bf16.vlgmr.msra.gmra.mrb[0].mxu0 %v1328_v61 }
 0x362   :  { %1749 = vmatpush1.bf16.msra.mxu0 %v12000_v60  ;;  %1780 = vmatprep.mubr.bf16.mxu0 %v13446_v2  ;;  %v13917_v41 = vld [vmem:[#allocation6] sm:$0xf] }
 0x363   :  { %1750 = vmatprep.subr.bf16.mxu0 %v12006_v63  ;;  %10999 = vmatmul.mubr.bf16.vlgmr.msra.gmra.mrb[0].mxu1 %v1328_v61 }
 0x364   :  { %11003 = vmatpush3.bf16.msra.mxu1 %v12026_v8  ;;  %11018 = vmatprep.mubr.msk.bf16.mxu1 %vm13445_vm0, %v13444_v1  ;;  %v1843_v8 = vld [vmem:[%s14806_s14] sm:$0x1] }
 0x365   :  { %11004 = vmatprep.subr.bf16.mxu1 %v13444_v1 }
 0x366   :  { %1751 = vmatpush1.bf16.msra.mxu0 %v12004_v0 }
 0x367   :  { %1752 = vmatprep.subr.bf16.mxu0 %v12010_v6 }
 0x368   :  { %11005 = vmatpush3.bf16.msra.mxu1 %v12030_v11 }
 0x369   :  { %11006 = vmatprep.subr.bf16.mxu1 %v13444_v1 }
 0x36a   :  { %1753 = vmatpush1.bf16.msra.mxu0 %v12008_v7 }
 0x36b   :  { %1754 = vmatprep.subr.bf16.mxu0 %v12014_v9  ;;  %v1502_v9 = vrot.slane %v1361_v46, %v13772_v55  ;;  %v12048_v46 = vld [vmem:[#allocation26 + $0x18] sm:$0xff]  }
 0x36c   :  { %11007 = vmatpush3.bf16.msra.mxu1 %v12031_v14 }
 0x36d   :  { %11008 = vmatprep.subr.bf16.mxu1 %v13444_v1 }
 0x36e   :  { %1755 = vmatpush1.bf16.msra.mxu0 %v12012_v10 }
 0x36f   :  { %1756 = vmatprep.subr.bf16.mxu0 %v12018_v12 }
 0x370   :  { %11009 = vmatpush3.bf16.msra.mxu1 %v12032_v17 }
 0x371   :  { %11010 = vmatprep.subr.bf16.mxu1 %v13444_v1 }
 0x372   :  { %1757 = vmatpush1.bf16.msra.mxu0 %v12016_v13 }
 0x373   :  { %1758 = vmatprep.subr.bf16.mxu0 %v12022_v15 }
 0x374   :  { %11011 = vmatpush3.bf16.msra.mxu1 %v12033_v20 }
 0x375   :  { %11012 = vmatprep.subr.bf16.mxu1 %v13444_v1 }
 0x376   :  { %1759 = vmatpush1.bf16.msra.mxu0 %v12020_v16 }
 0x377   :  { %1760 = vmatprep.subr.bf16.mxu0 %v12025_v18 }
 0x378   :  { %11013 = vmatpush3.bf16.msra.mxu1 %v12034_v23 }
 0x379   :  { %11014 = vmatprep.subr.bf16.mxu1 %v13444_v1 }
 0x37a   :  { %1761 = vmatpush1.bf16.msra.mxu0 %v12023_v19 }
 0x37b   :  { %1762 = vmatprep.subr.bf16.mxu0 %v12029_v21 }
 0x37c   :  { %11015 = vmatpush3.bf16.msra.mxu1 %v12035_v30 }
 0x37d   :  { %11016 = vmatprep.subr.bf16.mxu1 %v13444_v1 }
 0x37e   :  { %1763 = vmatpush1.bf16.msra.mxu0 %v12027_v22 }
 0x37f   :  { %11022 = vmatprep.subr.bf16.mxu0 %v13444_v1 }
 0x380   :  { %11017 = vmatpush3.bf16.msra.mxu1 %v12036_v25 }
 0x381   :  { %1781 = vmatmul.mubr.bf16.vlgmr.msra.gmra.mrb[0].mxu0 %v1587_v24  ;;  %11054 = vmatprep.subr.bf16.mxu1 %v13444_v1 }
 0x382   :  { %11024 = vmatprep.mubr.msk.bf16.mxu0 %vm13445_vm0, %v13444_v1 }
 0x383   :  { %11019 = vmatmul.mubr.bf16.vlgmr.msra.gmra.mrb[4].mxu1 %v1587_v24 }
 0x384   :  { %11070 = vmatprep.mubr.msk.bf16.mxu1 %vm13445_vm0, %v13444_v1  ;;  %11055 = vmatpush3.bf16.msra.mxu1 %v12037_v26 }
 0x385   :  { %11056 = vmatprep.subr.bf16.mxu1 %v13444_v1 }
 0x387   :  { %11023 = vmatpush3.bf16.xpose.msra.mxu0 %v13917_v41 }
 0x388   :  { %11057 = vmatpush3.bf16.msra.mxu1 %v12038_v27  ;;  %11028 = vmatprep.subr.bf16.mxu0 %v13444_v1 }
 0x389   :  { %11058 = vmatprep.subr.bf16.mxu1 %v13444_v1 }
 0x38c   :  { %11059 = vmatpush3.bf16.msra.mxu1 %v12039_v31 }
 0x38d   :  { %11060 = vmatprep.subr.bf16.mxu1 %v13444_v1 }
 0x390   :  { %11061 = vmatpush3.bf16.msra.mxu1 %v12040_v32 }
 0x391   :  { %11062 = vmatprep.subr.bf16.mxu1 %v13444_v1 }
 0x394   :  { %11063 = vmatpush3.bf16.msra.mxu1 %v12041_v38 }
 0x395   :  { %11064 = vmatprep.subr.bf16.mxu1 %v13444_v1 }
 0x398   :  { %11065 = vmatpush3.bf16.msra.mxu1 %v12042_v33  ;;  %v1915_v33 = vsel %vm1913_vm5, %v13917_v41, 0  ;;  %v12047_v41 = vld [vmem:[#allocation26 + $0x10] sm:$0xff]  }
 0x399   :  { %11066 = vmatprep.subr.bf16.mxu1 %v13444_v1 }
 0x39c   :  { %11067 = vmatpush3.bf16.msra.mxu1 %v12043_v40 }
 0x39d   :  { %11068 = vmatprep.subr.bf16.mxu1 %v13444_v1 }
 0x3a0   :  { %11069 = vmatpush3.bf16.msra.mxu1 %v12044_v54 }
 0x436   :  { %v1581_v42 = vpop.f32.mrb[0].mxu1 }
 0x437   :  { %v11000_v43 = vpop.f32.mrb[1].mxu1  ;;  %v1582_v13 = vadd.f32 %v1581_v42, %v1502_v9  ;;  %v12065_v9 = vld [vmem:[#allocation28 + $0x40] ss:$8 sps:$4 sm:$0xff]  }
 0x438   :  { %v1584_v44 = vpop.f32.mrb[2].mxu1  ;;  %v12045_v43 = vld [vmem:[#allocation26] sm:$0xff]  }
 0x439   :  { %v11001_v45 = vpop.f32.mrb[3].mxu1 }
 0x43a   :  { %v12046_v45 = vld [vmem:[#allocation26 + $0x8] sm:$0xff]  }
 0x454   :  { %v1782_v48 = vpop.f32.mrb[0].mxu0 }
 0x455   :  { %v11718_v50 = vadd.f32 %v1782_v48, %v1494_v47  ;;  %v1784_v51 = vpop.f32.mrb[1].mxu0  ;;  %v12049_v47 = vld [vmem:[#allocation26 + $0x20] sm:$0xff]   ;;  %v12050_v48 = vld [vmem:[#allocation26 + $0x28] sm:$0xff]  }
 0x456   :  { %v1786_v52 = vpop.f32.mrb[2].mxu0  ;;  %v11719_v59 = vadd.f32 %v1784_v51, %v1498_v49  ;;  %v1823_v61 = vpop.f32.mrb[4].mxu1  ;;  %v12051_v49 = vld [vmem:[#allocation26 + $0x30] sm:$0xff]   ;;  %v12055_v51 = vld [vmem:[#allocation28 + $0x4] ss:$8 sps:$4 sm:$0xff]  }
 0x457   :  { %v9929_v53 = vmul.f32 -1.442695, %v11718_v50  ;;  %v1787_v56 = vpop.f32.mrb[3].mxu0  ;;  %v11020_v62 = vpop.f32.mrb[5].mxu1  ;;  %v1844_v11 = vadd.f32 %v1843_v8, %v1823_v61  ;;  %v12052_v50 = vld [vmem:[#allocation26 + $0x38] sm:$0xff]  }
 0x458   :  { %v9930_v60 = vmul.f32 -1.442695, %v11719_v59  ;;  %v1826_v63 = vpop.f32.mrb[6].mxu1  ;;  %v12067_v8 = vld [vmem:[#allocation28 + $0x44] ss:$8 sps:$4 sm:$0xff]  }
 0x459   :  { %12077 = vpow2.f32 %v9929_v53  ;;  %v11021_v0 = vpop.f32.mrb[7].mxu1  ;;  %v12053_v53 = vld [vmem:[#allocation28] ss:$8 sps:$4 sm:$0xff]   ;;  %v12056_v63 = vld [vmem:[#allocation28 + $0x10] ss:$8 sps:$4 sm:$0xff]  }
 0x45a   :  { %12079 = vpow2.f32 %v9930_v60  ;;  %v12058_v60 = vld [vmem:[#allocation28 + $0x14] ss:$8 sps:$4 sm:$0xff]   ;;  %v12061_v0 = vld [vmem:[#allocation28 + $0x24] ss:$8 sps:$4 sm:$0xff]  }
 0x463   :  { %v12078_v5 = vpop.eup %12077 }
 0x464   :  { %v1833_v6 = vadd.f32 1.0, %v12078_v5  ;;  %v12080_v7 = vpop.eup %12079  ;;  %v12059_v5 = vld [vmem:[#allocation28 + $0x20] ss:$8 sps:$4 sm:$0xff]  }
 0x465   :  { %v1840_v10 = vadd.f32 1.0, %v12080_v7  ;;  %v12062_v7 = vld [vmem:[#allocation28 + $0x30] ss:$8 sps:$4 sm:$0xff]  }
 0x466   :  { %12081 = vrcp.f32 %v1833_v6  ;;  %v12064_v6 = vld [vmem:[#allocation28 + $0x34] ss:$8 sps:$4 sm:$0xff]  }
 0x467   :  { %12083 = vrcp.f32 %v1840_v10  ;;  %v12070_v10 = vld [vmem:[#allocation28 + $0x54] ss:$8 sps:$4 sm:$0xff]  }
 0x470   :  { %v12082_v12 = vpop.eup %12081 }
 0x471   :  { %v1845_v14 = vmul.f32 %v12082_v12, %v1844_v11  ;;  %v12084_v16 = vpop.eup %12083  ;;  %v12068_v11 = vld [vmem:[#allocation28 + $0x50] ss:$8 sps:$4 sm:$0xff]   ;;  %v12073_v12 = vld [vmem:[#allocation28 + $0x64] ss:$8 sps:$4 sm:$0xff]  }
 0x472   :  { %v1848_v17 = vsub.f32 1.0, %v12084_v16  ;;  %v1850_v20 = vmul.f32 %v13425_v28, %v12084_v16 }
 0x473   :  { %v1846_v15 = vadd.f32 %v1845_v14, %v1582_v13  ;;  %v12071_v13 = vld [vmem:[#allocation28 + $0x60] ss:$8 sps:$4 sm:$0xff]   ;;  %v12076_v14 = vld [vmem:[#allocation28 + $0x74] ss:$8 sps:$4 sm:$0xff]  }
 0x475   :  { %12085 = vtanh.f32 %v1846_v15  ;;  %v12074_v15 = vld [vmem:[#allocation28 + $0x70] ss:$8 sps:$4 sm:$0xff]  }
 0x47f   :  { %v12086_v18 = vpop.eup %12085 }
 0x480   :  { %v1849_v19 = vmul.f32 %v12086_v18, %v1848_v17  ;;  %v2166_v17 = vld [vmem:[%s14809_s17] sm:$0x1] }
 0x482   :  { %v13932_v21 = vadd.f32 %v1850_v20, %v1849_v19 }
 0x484   :  { %v13936_v22 = vpack.c.bf16 %v13932_v21, %v13932_v21 }
 0x486   :  { %11025 = vmatmul.mubr.bf16.vlgmr.msra.gmra.mrb[4].mxu0 %v13936_v22  ;;  %11071 = vmatmul.mubr.bf16.vlgmr.msra.gmra.mrb[8].mxu1 %v13936_v22 }
 0x487   :  { %11030 = vmatprep.mubr.msk.bf16.mxu0 %vm13445_vm0, %v13444_v1  ;;  %11029 = vmatpush3.bf16.msra.mxu0 %v1915_v33 }
 0x488   :  { %11034 = vmatprep.subr.bf16.mxu0 %v13444_v1 }
 0x559   :  { %v1888_v23 = vpop.f32.mrb[4].mxu0  ;;  %v13951_v24 = vpop.f32.mrb[8].mxu1 }
 0x55a   :  { %v1895_v30 = vsel %vm13947_vm3, %v1888_v23, -1e+30  ;;  %v11026_v25 = vpop.f32.mrb[5].mxu0  ;;  %v11072_v26 = vpop.f32.mrb[9].mxu1 }
 0x55b   :  { %v1891_v27 = vpop.f32.mrb[6].mxu0  ;;  %v2163_v31 = vpop.f32.mrb[10].mxu1  ;;  %v1897_v32 = vsel %vm1896_vm4, %v1895_v30, -inf }
 0x55c   :  { %v11073_v34 = vpop.f32.mrb[11].mxu1  ;;  %1898 = vmax.xlane.f32.xlu0 %v1897_v32  ;;  %v11027_v35 = vpop.f32.mrb[7].mxu0  ;;  %v2186_v27 = vld [vmem:[%s14811_s19] sm:$0x3] }
 0x55d   :  { %v2271_v31 = vrot.slane %v2186_v27, %v13778_v57  ;;  %v2275_v32 = vrot.slane %v2186_v27, %v13781_v58 }
 0x5e9   :  { %v1899_v36 = vpop.xlane.xlu0 %1898 }
 0x5ea   :  { %v1900_v37 = vsub.f32 %v1895_v30, %v1899_v36 }
 0x5ec   :  { %v1901_v29 = vmul.f32 1.442695, %v1900_v37 }
 0x5ee   :  { %12087 = vpow2.f32 %v1901_v29 }
 0x5f8   :  { %v12088_v38 = vpop.eup %12087 }
 0x5f9   :  { %v1903_v39 = vsel %vm1896_vm4, %v12088_v38, 0.0 }
 0x5fa   :  { %1904 = vadd.xlane.f32.xlu0 %v1903_v39 }
 0x687   :  { %v1905_v40 = vpop.xlane.xlu0 %1904 }
 0x688   :  { %12089 = vrcp.f32 %v1905_v40 }
 0x692   :  { %v12090_v54 = vpop.eup %12089 }
 0x693   :  { %v1907_v42 = vmul.f32 %v12090_v54, %v12088_v38 }
 0x695   :  { %v1908_v44 = vpack.c.bf16 %v1907_v42, %v1907_v42 }
 0x697   :  { %11031 = vmatmul.mubr.msk.bf16.vlgmr.msra.gmra.mrb[8].mxu0 %vm1909_vm6, %v1908_v44 }
 0x698   :  { %11035 = vmatpush3.bf16.msra.mxu0 %v12045_v43  ;;  %11050 = vmatprep.mubr.msk.bf16.mxu0 %vm13445_vm0, %v13444_v1 }
 0x699   :  { %11036 = vmatprep.subr.bf16.mxu0 %v13444_v1 }
 0x69c   :  { %11037 = vmatpush3.bf16.msra.mxu0 %v12046_v45 }
 0x69d   :  { %11038 = vmatprep.subr.bf16.mxu0 %v13444_v1 }
 0x6a0   :  { %11039 = vmatpush3.bf16.msra.mxu0 %v12047_v41 }
 0x6a1   :  { %11040 = vmatprep.subr.bf16.mxu0 %v13444_v1 }
 0x6a4   :  { %11041 = vmatpush3.bf16.msra.mxu0 %v12048_v46 }
 0x6a5   :  { %11042 = vmatprep.subr.bf16.mxu0 %v13444_v1 }
 0x6a8   :  { %11043 = vmatpush3.bf16.msra.mxu0 %v12049_v47 }
 0x6a9   :  { %11044 = vmatprep.subr.bf16.mxu0 %v13444_v1 }
 0x6ac   :  { %11045 = vmatpush3.bf16.msra.mxu0 %v12050_v48 }
 0x6ad   :  { %11046 = vmatprep.subr.bf16.mxu0 %v13444_v1 }
 0x6b0   :  { %11047 = vmatpush3.bf16.msra.mxu0 %v12051_v49 }
 0x6b1   :  { %11048 = vmatprep.subr.bf16.mxu0 %v13444_v1 }
 0x6b4   :  { %11049 = vmatpush3.bf16.msra.mxu0 %v12052_v50 }
 0x6b5   :  { %2278 = vmatprep.subr.bf16.mxu0 %v12055_v51 }
 0x76a   :  { %v1951_v52 = vpop.f32.mrb[8].mxu0 }
 0x76b   :  { %v1973_v56 = vpack.c.bf16 %v1951_v52, %v1951_v52  ;;  %v11032_v59 = vpop.f32.mrb[9].mxu0 }
 0x76c   :  { %v1954_v61 = vpop.f32.mrb[10].mxu0 }
 0x76d   :  { %v11033_v62 = vpop.f32.mrb[11].mxu0  ;;  %11051 = vmatmul.mubr.bf16.vlgmr.msra.gmra.mrb[12].mxu0 %v1973_v56 }
 0x76e   :  { %2279 = vmatpush1.bf16.msra.mxu0 %v12053_v53  ;;  %2310 = vmatprep.mubr.bf16.mxu0 %v13446_v2 }
 0x76f   :  { %2280 = vmatprep.subr.bf16.mxu0 %v12058_v60 }
 0x772   :  { %2281 = vmatpush1.bf16.msra.mxu0 %v12056_v63 }
 0x773   :  { %2282 = vmatprep.subr.bf16.mxu0 %v12061_v0 }
 0x776   :  { %2283 = vmatpush1.bf16.msra.mxu0 %v12059_v5 }
 0x777   :  { %2284 = vmatprep.subr.bf16.mxu0 %v12064_v6 }
 0x77a   :  { %2285 = vmatpush1.bf16.msra.mxu0 %v12062_v7 }
 0x77b   :  { %2286 = vmatprep.subr.bf16.mxu0 %v12067_v8 }
 0x77e   :  { %2287 = vmatpush1.bf16.msra.mxu0 %v12065_v9 }
 0x77f   :  { %2288 = vmatprep.subr.bf16.mxu0 %v12070_v10 }
 0x782   :  { %2289 = vmatpush1.bf16.msra.mxu0 %v12068_v11 }
 0x783   :  { %2290 = vmatprep.subr.bf16.mxu0 %v12073_v12 }
 0x786   :  { %2291 = vmatpush1.bf16.msra.mxu0 %v12071_v13 }
 0x787   :  { %2292 = vmatprep.subr.bf16.mxu0 %v12076_v14 }
 0x78a   :  { %2293 = vmatpush1.bf16.msra.mxu0 %v12074_v15 }
 0x840   :  { %v2072_v16 = vpop.f32.mrb[12].mxu0 }
 0x841   :  { %v2161_v18 = vadd.f32 %v13951_v24, %v2072_v16  ;;  %v11052_v19 = vpop.f32.mrb[13].mxu0 }
 0x842   :  { %v2075_v20 = vpop.f32.mrb[14].mxu0 }
 0x843   :  { %v2167_v23 = vadd.f32 %v2166_v17, %v2161_v18  ;;  %v11053_v30 = vpop.f32.mrb[15].mxu0 }
 0x845   :  { %12091 = vtanh.f32 %v2167_v23 }
 0x84f   :  { %v12092_v25 = vpop.eup %12091 }
 0x850   :  { %v2169_v26 = vpack.c.bf16 %v12092_v25, %v12092_v25 }
 0x852   :  { %2311 = vmatmul.mubr.bf16.vlgmr.msra.gmra.mrb[16].mxu0 %v2169_v26 }
 0x925   :  { %v2312_v34 = vpop.f32.mrb[16].mxu0 }
 0x926   :  { %v2313_v35 = vadd.f32 %v2312_v34, %v2271_v31  ;;  %v2314_v24 = vpop.f32.mrb[17].mxu0 }
 0x927   :  { %v2315_v36 = vadd.f32 %v2314_v24, %v2275_v32  ;;  %v2316_v37 = vpop.f32.mrb[18].mxu0 }
 0x928   :  { %v2317_v29 = vpop.f32.mrb[19].mxu0  ;;  %v2320_v38 = vsel %vm2319_vm7, %v2313_v35, -inf }
 0x929   :  { %v2321_v39 = vsel %vm2319_vm7, %v2315_v36, -inf }
 0x92a   :  { %v2322_v33 = vmax.f32 %v2320_v38, %v2321_v39 }
 0x92c   :  { %2323 = vmax.xlane.f32.xlu1 %v2322_v33 }
 0x9b9   :  { %v2324_v40 = vpop.xlane.xlu1 %2323 }
 0x9ba   :  { %v2325_v54 = vsub.f32 %v2313_v35, %v2324_v40  ;;  %v2326_v42 = vsub.f32 %v2315_v36, %v2324_v40  ;;  %vm2338_vm8 = vcmp.eq.f32.partialorder %v2313_v35, %v2324_v40  ;;  %vm2339_vm9 = vcmp.eq.f32.partialorder %v2315_v36, %v2324_v40 }
 0x9bb   :  { %v2340_v43 = vsel %vm2338_vm8, %v13745_v3, 256  ;;  %v2341_v44 = vsel %vm2339_vm9, %v13748_v4, 256 }
 0x9bc   :  { %v2327_v45 = vmul.f32 1.442695, %v2325_v54  ;;  %v2329_v41 = vmul.f32 1.442695, %v2326_v42  ;;  %v2342_v46 = vsel %vm2319_vm7, %v2340_v43, 2147483647 }
 0x9bd   :  { %v2343_v47 = vsel %vm2319_vm7, %v2341_v44, 2147483647 }
 0x9be   :  { %12093 = vpow2.f32 %v2327_v45  ;;  %vm2344_vm10 = vcmp.lt.s32.totalorder %v2342_v46, %v2343_v47 }
 0x9bf   :  { %12095 = vpow2.f32 %v2329_v41  ;;  %v2345_v48 = vsel %vm2344_vm10, %v2342_v46, %v2343_v47 }
 0x9c0   :  { %v2347_v49 = vshra.s32 %v2345_v48, 16  ;;  %v2346_v60 = vand.u32 65535, %v2345_v48 }
 0x9c2   :  { %v2349_v50 = vcvt.s32.f32 %v2347_v49  ;;  %v2348_v62 = vcvt.s32.f32 %v2346_v60 }
 0x9c4   :  { %2350 = vmin.xlane.f32.xlu1 %v2349_v50 }
 0x9c8   :  { %v12094_v51 = vpop.eup %12093 }
 0x9c9   :  { %v12096_v52 = vpop.eup %12095  ;;  %v2331_v53 = vsel %vm2319_vm7, %v12094_v51, 0.0 }
 0x9ca   :  { %v2332_v56 = vsel %vm2319_vm7, %v12096_v52, 0.0 }
 0x9cb   :  { %v2333_v59 = vadd.f32 %v2332_v56, %v2331_v53 }
 0x9cd   :  { %2334 = vadd.xlane.f32.xlu0 %v2333_v59 }
 0xa51   :  { %v2351_v61 = vpop.xlane.xlu1 %2350 }
 0xa52   :  { %vm2352_vm11 = vcmp.eq.f32.partialorder %v2349_v50, %v2351_v61  ;;  %v2357_v7 = vcvt.f32.s32 %v2351_v61 }
 0xa53   :  { %v2353_v63 = vsel %vm2352_vm11, %v2348_v62, inf }
 0xa54   :  { %2354 = vmin.xlane.f32.xlu1 %v2353_v63  ;;  %v2358_v9 = vshll.u32 %v2357_v7, 16 }
 0xa5a   :  { %v2335_v0 = vpop.xlane.xlu0 %2334 }
 0xa5b   :  { %12097 = vrcp.f32 %v2335_v0 }
 0xa65   :  { %v12098_v5 = vpop.eup %12097 }
 0xa66   :  { %v13989_v6 = vsel %vm2373_vm12, %v12098_v5, 0.0 }
 0xae1   :  { %v2355_v8 = vpop.xlane.xlu1 %2354 }
 0xae2   :  { %v2356_v10 = vcvt.f32.s32 %v2355_v8 }
 0xae4   :  { %v2359_v11 = vadd.s32 %v2358_v9, %v2356_v10 }
 0xae6   :  { %v13993_v12 = vsel %vm2373_vm12, %v2359_v11, 0  ;;  %2361 = vst.msk [vmem:[#allocation7] sm:$0x1] %vm2360_vm13, %v2359_v11 }
 0xae7   :  { %13234 = shalt.err (!%p14000_p10)  }
 0xae8   :  { %s13451_s0 = smov [#allocation8]  }
 0xae9   :  { %2372 = dma.vmem_to_smem %s13991_s2, 16, %s13451_s0, [#allocation9] }
 0xaea   :  { %13391 = dma.done.wait [#allocation9], 16 }
 0xaeb   :  { %13392 = vsyncadd [#allocation9], 4294967280 }
 0xaec   :  { %2379 = sfence }
 0xaed   :  { %v12099_v13 = vld [vmem:[#allocation22 + $0x4] ss:$12 sps:$4 sm:$0xff]   ;;  %11074 = vmatprep.subr.bf16.mxu0 %v13444_v1  ;;  %2593 = vmatprep.mubr.bf16.mxu1 %v13446_v2  ;;  %v12101_v14 = vld [vmem:[#allocation22] ss:$12 sps:$4 sm:$0xff]   ;;  %v12102_v15 = vld [vmem:[#allocation22 + $0x1c] ss:$12 sps:$4 sm:$0xff]  }
 0xaee   :  { %11090 = vmatprep.mubr.msk.bf16.mxu0 %vm13445_vm0, %v13444_v1  ;;  %2561 = vmatprep.subr.bf16.mxu1 %v12099_v13  ;;  %v12104_v16 = vld [vmem:[#allocation22 + $0x18] ss:$12 sps:$4 sm:$0xff]   ;;  %v12105_v17 = vld [vmem:[#allocation22 + $0x34] ss:$12 sps:$4 sm:$0xff]   ;;  %v12107_v18 = vld [vmem:[#allocation22 + $0x30] ss:$12 sps:$4 sm:$0xff]  }
 0xaef   :  { %2562 = vmatpush1.bf16.msra.mxu1 %v12101_v14  ;;  %v12108_v19 = vld [vmem:[#allocation22 + $0x4c] ss:$12 sps:$4 sm:$0xff]   ;;  %v12119_v20 = vld [vmem:[#allocation22 + $0x8] ss:$12 sps:$4 sm:$0xff]   ;;  %v12111_v30 = vld [vmem:[#allocation22 + $0x64] ss:$12 sps:$4 sm:$0xff]  }
 0xaf0   :  { %2563 = vmatprep.subr.bf16.mxu1 %v12102_v15  ;;  %v12110_v23 = vld [vmem:[#allocation22 + $0x48] ss:$12 sps:$4 sm:$0xff]   ;;  %11075 = vmatpush3.bf16.msra.mxu0 %v12119_v20  ;;  %v12123_v25 = vld [vmem:[#allocation22 + $0x20] ss:$12 sps:$4 sm:$0xff]   ;;  %s2380_s18 = sld [smem:[#allocation8]]  ;;  %v12166_v14 = vld [vmem:[#allocation25 + $0x18] sm:$0xff]  }
 0xaf1   :  { %11076 = vmatprep.subr.bf16.mxu0 %v13444_v1  ;;  %v12113_v26 = vld [vmem:[#allocation22 + $0x60] ss:$12 sps:$4 sm:$0xff]   ;;  %v12125_v27 = vld [vmem:[#allocation22 + $0x38] ss:$12 sps:$4 sm:$0xff]   ;;  %v12114_v31 = vld [vmem:[#allocation22 + $0x7c] ss:$12 sps:$4 sm:$0xff]  }
 0xaf2   :  { %v12116_v32 = vld [vmem:[#allocation22 + $0x78] ss:$12 sps:$4 sm:$0xff]   ;;  %v12129_v34 = vld [vmem:[#allocation22 + $0x50] ss:$12 sps:$4 sm:$0xff]   ;;  %v12117_v35 = vld [vmem:[#allocation22 + $0x94] ss:$12 sps:$4 sm:$0xff]  }
 0xaf3   :  { %2564 = vmatpush1.bf16.msra.mxu1 %v12104_v16  ;;  %v12120_v24 = vld [vmem:[#allocation22 + $0x90] ss:$12 sps:$4 sm:$0xff]   ;;  %v12133_v36 = vld [vmem:[#allocation22 + $0x68] ss:$12 sps:$4 sm:$0xff]   ;;  %v12121_v37 = vld [vmem:[#allocation22 + $0xac] ss:$12 sps:$4 sm:$0xff]  }
 0xaf4   :  { %2565 = vmatprep.subr.bf16.mxu1 %v12105_v17  ;;  %11077 = vmatpush3.bf16.msra.mxu0 %v12123_v25  ;;  %v12124_v29 = vld [vmem:[#allocation22 + $0xa8] ss:$12 sps:$4 sm:$0xff]   ;;  %v12137_v39 = vld [vmem:[#allocation22 + $0x80] ss:$12 sps:$4 sm:$0xff]   ;;  %v12128_v33 = vld [vmem:[#allocation23 + $0x4] ss:$12 sps:$4 sm:$0xff]  }
 0xaf5   :  { %11078 = vmatprep.subr.bf16.mxu0 %v13444_v1  ;;  %v12126_v40 = vld [vmem:[#allocation23] ss:$12 sps:$4 sm:$0xff]   ;;  %v12141_v42 = vld [vmem:[#allocation22 + $0x98] ss:$12 sps:$4 sm:$0xff]   ;;  %v12132_v43 = vld [vmem:[#allocation23 + $0x1c] ss:$12 sps:$4 sm:$0xff]  }
 0xaf6   :  { %s2381_s26 = scalar_lea.vmem [#allocation20], %s2380_s18  ;;  %v12130_v44 = vld [vmem:[#allocation23 + $0x18] ss:$12 sps:$4 sm:$0xff]   ;;  %v12145_v45 = vld [vmem:[#allocation22 + $0xb0] ss:$12 sps:$4 sm:$0xff]   ;;  %v12164_v11 = vld [vmem:[#allocation25 + $0x8] sm:$0xff]  }
 0xaf7   :  { %2566 = vmatpush1.bf16.msra.mxu1 %v12107_v18  ;;  %v2382_v38 = vld [vmem:[%s2381_s26] sm:$0x1]  ;;  %v12134_v46 = vld [vmem:[#allocation23 + $0x30] ss:$12 sps:$4 sm:$0xff]   ;;  %v12140_v48 = vld [vmem:[#allocation23 + $0x4c] ss:$12 sps:$4 sm:$0xff]  }
 0xaf8   :  { %2567 = vmatprep.subr.bf16.mxu1 %v12108_v19  ;;  %11079 = vmatpush3.bf16.msra.mxu0 %v12125_v27  ;;  %v2383_v54 = vpack.c.bf16 %v2382_v38, %v2382_v38  ;;  %v12136_v41 = vld [vmem:[#allocation23 + $0x34] ss:$12 sps:$4 sm:$0xff]   ;;  %v12144_v51 = vld [vmem:[#allocation23 + $0x64] ss:$12 sps:$4 sm:$0xff]   ;;  %v12148_v56 = vld [vmem:[#allocation23 + $0x7c] ss:$12 sps:$4 sm:$0xff]  }
 0xaf9   :  { %11080 = vmatprep.subr.bf16.mxu0 %v13444_v1  ;;  %v12152_v47 = vld [vmem:[#allocation23 + $0x8] ss:$12 sps:$4 sm:$0xff]   ;;  %v12156_v50 = vld [vmem:[#allocation23 + $0x20] ss:$12 sps:$4 sm:$0xff]   ;;  %v12157_v53 = vld [vmem:[#allocation23 + $0x38] ss:$12 sps:$4 sm:$0xff]  }
 0xafa   :  { %v12138_v49 = vld [vmem:[#allocation23 + $0x48] ss:$12 sps:$4 sm:$0xff]   ;;  %v12142_v52 = vld [vmem:[#allocation23 + $0x60] ss:$12 sps:$4 sm:$0xff]   ;;  %v12146_v59 = vld [vmem:[#allocation23 + $0x78] ss:$12 sps:$4 sm:$0xff]  }
 0xafb   :  { %2568 = vmatpush1.bf16.msra.mxu1 %v12110_v23  ;;  %v12158_v60 = vld [vmem:[#allocation23 + $0x50] ss:$12 sps:$4 sm:$0xff]   ;;  %v12151_v61 = vld [vmem:[#allocation23 + $0x94] ss:$12 sps:$4 sm:$0xff]   ;;  %v12155_v0 = vld [vmem:[#allocation23 + $0xac] ss:$12 sps:$4 sm:$0xff]  }
 0xafc   :  { %2569 = vmatprep.subr.bf16.mxu1 %v12111_v30  ;;  %11081 = vmatpush3.bf16.msra.mxu0 %v12129_v34  ;;  %v12149_v62 = vld [vmem:[#allocation23 + $0x90] ss:$12 sps:$4 sm:$0xff]   ;;  %v12159_v63 = vld [vmem:[#allocation23 + $0x68] ss:$12 sps:$4 sm:$0xff]   ;;  %v12160_v7 = vld [vmem:[#allocation23 + $0x80] ss:$12 sps:$4 sm:$0xff]  }
 0xafd   :  { %11082 = vmatprep.subr.bf16.mxu0 %v13444_v1  ;;  %v12153_v5 = vld [vmem:[#allocation23 + $0xa8] ss:$12 sps:$4 sm:$0xff]   ;;  %v12161_v8 = vld [vmem:[#allocation23 + $0x98] ss:$12 sps:$4 sm:$0xff]   ;;  %v12162_v9 = vld [vmem:[#allocation23 + $0xb0] ss:$12 sps:$4 sm:$0xff]  }
 0xafe   :  { %v12163_v10 = vld [vmem:[#allocation25] sm:$0xff]   ;;  %v12165_v13 = vld [vmem:[#allocation25 + $0x10] sm:$0xff]   ;;  %v12168_v16 = vld [vmem:[#allocation25 + $0x28] sm:$0xff]   ;;  %vm3421_vm8 = vcmp.eq.s32.totalorder %v13745_v3, 1 }
 0xaff   :  { %2570 = vmatpush1.bf16.msra.mxu1 %v12113_v26  ;;  %v14042_v15 = vld [vmem:[#allocation6] sm:$0xf] }
 0xb00   :  { %2571 = vmatprep.subr.bf16.mxu1 %v12114_v31  ;;  %11083 = vmatpush3.bf16.msra.mxu0 %v12133_v36  ;;  %v12169_v17 = vld [vmem:[#allocation25 + $0x30] sm:$0xff]   ;;  %v12170_v18 = vld [vmem:[#allocation25 + $0x38] sm:$0xff]  }
 0xb01   :  { %11084 = vmatprep.subr.bf16.mxu0 %v13444_v1  ;;  %v2416_v25 = vld [vmem:[%s14805_s13] sm:$0x7] }
 0xb02   :  { %v2549_v26 = vrot.slane %v2416_v25, %v13778_v57  ;;  %v2553_v31 = vrot.slane %v2416_v25, %v13781_v58 }
 0xb03   :  { %2572 = vmatpush1.bf16.msra.mxu1 %v12116_v32 }
 0xb04   :  { %2573 = vmatprep.subr.bf16.mxu1 %v12117_v35  ;;  %11085 = vmatpush3.bf16.msra.mxu0 %v12137_v39 }
 0xb05   :  { %11086 = vmatprep.subr.bf16.mxu0 %v13444_v1 }
 0xb07   :  { %2574 = vmatpush1.bf16.msra.mxu1 %v12120_v24 }
 0xb08   :  { %2575 = vmatprep.subr.bf16.mxu1 %v12121_v37  ;;  %11087 = vmatpush3.bf16.msra.mxu0 %v12141_v42 }
 0xb09   :  { %11088 = vmatprep.subr.bf16.mxu0 %v13444_v1 }
 0xb0b   :  { %2576 = vmatpush1.bf16.msra.mxu1 %v12124_v29 }
 0xb0c   :  { %2802 = vmatprep.subr.bf16.mxu1 %v12128_v33  ;;  %11089 = vmatpush3.bf16.msra.mxu0 %v12145_v45  ;;  %v2557_v45 = vrot.slane %v2416_v25, %v13772_v55 }
 0xb0d   :  { %11094 = vmatprep.subr.bf16.mxu0 %v13444_v1 }
 0xb0e   :  { %2594 = vmatmul.mubr.bf16.vlgmr.msra.gmra.mrb[12].mxu1 %v2383_v54 }
 0xb0f   :  { %2803 = vmatpush1.bf16.msra.mxu1 %v12126_v40  ;;  %2834 = vmatprep.mubr.bf16.mxu1 %v13446_v2 }
 0xb10   :  { %2804 = vmatprep.subr.bf16.mxu1 %v12132_v43  ;;  %11091 = vmatmul.mubr.bf16.vlgmr.msra.gmra.mrb[20].mxu0 %v2383_v54 }
 0xb11   :  { %11095 = vmatpush3.bf16.msra.mxu0 %v12152_v47  ;;  %11110 = vmatprep.mubr.msk.bf16.mxu0 %vm13445_vm0, %v13444_v1 }
 0xb12   :  { %11096 = vmatprep.subr.bf16.mxu0 %v13444_v1 }
 0xb13   :  { %2805 = vmatpush1.bf16.msra.mxu1 %v12130_v44  ;;  %v2897_v44 = vld [vmem:[%s14806_s14] sm:$0x1] }
 0xb14   :  { %2806 = vmatprep.subr.bf16.mxu1 %v12136_v41 }
 0xb15   :  { %11097 = vmatpush3.bf16.msra.mxu0 %v12156_v50 }
 0xb16   :  { %11098 = vmatprep.subr.bf16.mxu0 %v13444_v1 }
 0xb17   :  { %2807 = vmatpush1.bf16.msra.mxu1 %v12134_v46 }
 0xb18   :  { %2808 = vmatprep.subr.bf16.mxu1 %v12140_v48 }
 0xb19   :  { %11099 = vmatpush3.bf16.msra.mxu0 %v12157_v53 }
 0xb1a   :  { %11100 = vmatprep.subr.bf16.mxu0 %v13444_v1 }
 0xb1b   :  { %2809 = vmatpush1.bf16.msra.mxu1 %v12138_v49 }
 0xb1c   :  { %2810 = vmatprep.subr.bf16.mxu1 %v12144_v51 }
 0xb1d   :  { %11101 = vmatpush3.bf16.msra.mxu0 %v12158_v60 }
 0xb1e   :  { %11102 = vmatprep.subr.bf16.mxu0 %v13444_v1 }
 0xb1f   :  { %2811 = vmatpush1.bf16.msra.mxu1 %v12142_v52 }
 0xb20   :  { %2812 = vmatprep.subr.bf16.mxu1 %v12148_v56 }
 0xb21   :  { %11103 = vmatpush3.bf16.msra.mxu0 %v12159_v63 }
 0xb22   :  { %11104 = vmatprep.subr.bf16.mxu0 %v13444_v1 }
 0xb23   :  { %2813 = vmatpush1.bf16.msra.mxu1 %v12146_v59 }
 0xb24   :  { %2814 = vmatprep.subr.bf16.mxu1 %v12151_v61 }
 0xb25   :  { %11105 = vmatpush3.bf16.msra.mxu0 %v12160_v7 }
 0xb26   :  { %11106 = vmatprep.subr.bf16.mxu0 %v13444_v1 }
 0xb27   :  { %2815 = vmatpush1.bf16.msra.mxu1 %v12149_v62 }
 0xb28   :  { %2816 = vmatprep.subr.bf16.mxu1 %v12155_v0 }
 0xb29   :  { %11107 = vmatpush3.bf16.msra.mxu0 %v12161_v8 }
 0xb2a   :  { %11108 = vmatprep.subr.bf16.mxu0 %v13444_v1 }
 0xb2b   :  { %2817 = vmatpush1.bf16.msra.mxu1 %v12153_v5 }
 0xb2c   :  { %11114 = vmatprep.subr.bf16.mxu1 %v13444_v1 }
 0xb2d   :  { %11109 = vmatpush3.bf16.msra.mxu0 %v12162_v9 }
 0xb2e   :  { %2835 = vmatmul.mubr.bf16.vlgmr.msra.gmra.mrb[12].mxu1 %v13936_v22  ;;  %11146 = vmatprep.subr.bf16.mxu0 %v13444_v1 }
 0xb2f   :  { %11116 = vmatprep.mubr.msk.bf16.mxu1 %vm13445_vm0, %v13444_v1 }
 0xb30   :  { %11111 = vmatmul.mubr.bf16.vlgmr.msra.gmra.mrb[24].mxu0 %v13936_v22  ;;  %v12167_v22 = vld [vmem:[#allocation25 + $0x20] sm:$0xff]  }
 0xb31   :  { %11162 = vmatprep.mubr.msk.bf16.mxu0 %vm13445_vm0, %v13444_v1  ;;  %11147 = vmatpush3.bf16.msra.mxu0 %v12163_v10 }
 0xb32   :  { %11148 = vmatprep.subr.bf16.mxu0 %v13444_v1 }
 0xb34   :  { %11115 = vmatpush3.bf16.xpose.msra.mxu1 %v14042_v15 }
 0xb35   :  { %11149 = vmatpush3.bf16.msra.mxu0 %v12164_v11  ;;  %11120 = vmatprep.subr.bf16.mxu1 %v13444_v1 }
 0xb36   :  { %11150 = vmatprep.subr.bf16.mxu0 %v13444_v1 }
 0xb39   :  { %11151 = vmatpush3.bf16.msra.mxu0 %v12165_v13 }
 0xb3a   :  { %11152 = vmatprep.subr.bf16.mxu0 %v13444_v1 }
 0xb3d   :  { %11153 = vmatpush3.bf16.msra.mxu0 %v12166_v14 }
 0xb3e   :  { %11154 = vmatprep.subr.bf16.mxu0 %v13444_v1 }
 0xb41   :  { %11155 = vmatpush3.bf16.msra.mxu0 %v12167_v22 }
 0xb42   :  { %11156 = vmatprep.subr.bf16.mxu0 %v13444_v1 }
 0xb45   :  { %11157 = vmatpush3.bf16.msra.mxu0 %v12168_v16 }
 0xb46   :  { %11158 = vmatprep.subr.bf16.mxu0 %v13444_v1 }
 0xb49   :  { %11159 = vmatpush3.bf16.msra.mxu0 %v12169_v17 }
 0xb4a   :  { %11160 = vmatprep.subr.bf16.mxu0 %v13444_v1 }
 0xb4d   :  { %11161 = vmatpush3.bf16.msra.mxu0 %v12170_v18  ;;  %v2965_v18 = vsel %vm1913_vm5, %v14042_v15, 0  ;;  %v12173_v15 = vld [vmem:[#allocation26 + $0x10] sm:$0xff]  }
 0xbe3   :  { %v2636_v19 = vpop.f32.mrb[20].mxu0 }
 0xbe4   :  { %v11092_v20 = vpop.f32.mrb[21].mxu0  ;;  %v2637_v48 = vadd.f32 %v2636_v19, %v2557_v45  ;;  %v12188_v45 = vld [vmem:[#allocation28 + $0x30] ss:$8 sps:$4 sm:$0xff]  }
 0xbe5   :  { %v2639_v23 = vpop.f32.mrb[22].mxu0 }
 0xbe6   :  { %v11093_v30 = vpop.f32.mrb[23].mxu0 }
 0xbe7   :  { %v12171_v30 = vld [vmem:[#allocation26] sm:$0xff]  }
 0xc01   :  { %v2836_v27 = vpop.f32.mrb[12].mxu1 }
 0xc02   :  { %v11720_v32 = vadd.f32 %v2836_v27, %v2549_v26  ;;  %v2838_v34 = vpop.f32.mrb[13].mxu1  ;;  %v12172_v26 = vld [vmem:[#allocation26 + $0x8] sm:$0xff]   ;;  %v12174_v27 = vld [vmem:[#allocation26 + $0x18] sm:$0xff]  }
 0xc03   :  { %v2840_v35 = vpop.f32.mrb[14].mxu1  ;;  %v11721_v37 = vadd.f32 %v2838_v34, %v2553_v31  ;;  %v2877_v38 = vpop.f32.mrb[24].mxu0  ;;  %v12175_v31 = vld [vmem:[#allocation26 + $0x20] sm:$0xff]   ;;  %v12177_v34 = vld [vmem:[#allocation26 + $0x30] sm:$0xff]  }
 0xc04   :  { %v10012_v24 = vmul.f32 -1.442695, %v11720_v32  ;;  %v2841_v36 = vpop.f32.mrb[15].mxu1  ;;  %v11112_v39 = vpop.f32.mrb[25].mxu0  ;;  %v2898_v46 = vadd.f32 %v2897_v44, %v2877_v38  ;;  %v12176_v32 = vld [vmem:[#allocation26 + $0x28] sm:$0xff]   ;;  %v12178_v35 = vld [vmem:[#allocation26 + $0x38] sm:$0xff]  }
 0xc05   :  { %v10013_v29 = vmul.f32 -1.442695, %v11721_v37  ;;  %v2880_v33 = vpop.f32.mrb[26].mxu0  ;;  %v12179_v37 = vld [vmem:[#allocation28] ss:$8 sps:$4 sm:$0xff]  }
 0xc06   :  { %12203 = vpow2.f32 %v10012_v24  ;;  %v11113_v40 = vpop.f32.mrb[27].mxu0  ;;  %v12181_v24 = vld [vmem:[#allocation28 + $0x4] ss:$8 sps:$4 sm:$0xff]   ;;  %v12184_v39 = vld [vmem:[#allocation28 + $0x14] ss:$8 sps:$4 sm:$0xff]  }
 0xc07   :  { %12205 = vpow2.f32 %v10013_v29  ;;  %v12190_v44 = vld [vmem:[#allocation28 + $0x34] ss:$8 sps:$4 sm:$0xff]  }
 0xc10   :  { %v12204_v54 = vpop.eup %12203 }
 0xc11   :  { %v2887_v42 = vadd.f32 1.0, %v12204_v54  ;;  %v12206_v43 = vpop.eup %12205  ;;  %v12182_v54 = vld [vmem:[#allocation28 + $0x10] ss:$8 sps:$4 sm:$0xff]  }
 0xc12   :  { %v2894_v41 = vadd.f32 1.0, %v12206_v43  ;;  %v12185_v43 = vld [vmem:[#allocation28 + $0x20] ss:$8 sps:$4 sm:$0xff]  }
 0xc13   :  { %12207 = vrcp.f32 %v2887_v42  ;;  %v12187_v42 = vld [vmem:[#allocation28 + $0x24] ss:$8 sps:$4 sm:$0xff]  }
 0xc14   :  { %12209 = vrcp.f32 %v2894_v41  ;;  %v12193_v41 = vld [vmem:[#allocation28 + $0x44] ss:$8 sps:$4 sm:$0xff]  }
 0xc1d   :  { %v12208_v47 = vpop.eup %12207 }
 0xc1e   :  { %v2899_v49 = vmul.f32 %v12208_v47, %v2898_v46  ;;  %v12210_v51 = vpop.eup %12209  ;;  %v12191_v46 = vld [vmem:[#allocation28 + $0x40] ss:$8 sps:$4 sm:$0xff]   ;;  %v12196_v47 = vld [vmem:[#allocation28 + $0x54] ss:$8 sps:$4 sm:$0xff]  }
 0xc1f   :  { %v2902_v52 = vsub.f32 1.0, %v12210_v51  ;;  %v2904_v59 = vmul.f32 %v12210_v51, %v13932_v21  ;;  %v12202_v51 = vld [vmem:[#allocation28 + $0x74] ss:$8 sps:$4 sm:$0xff]  }
 0xc20   :  { %v2900_v50 = vadd.f32 %v2899_v49, %v2637_v48  ;;  %v12194_v48 = vld [vmem:[#allocation28 + $0x50] ss:$8 sps:$4 sm:$0xff]   ;;  %v12199_v49 = vld [vmem:[#allocation28 + $0x64] ss:$8 sps:$4 sm:$0xff]  }
 0xc22   :  { %12211 = vtanh.f32 %v2900_v50  ;;  %v12197_v50 = vld [vmem:[#allocation28 + $0x60] ss:$8 sps:$4 sm:$0xff]  }
 0xc2c   :  { %v12212_v53 = vpop.eup %12211 }
 0xc2d   :  { %v2903_v56 = vmul.f32 %v12212_v53, %v2902_v52  ;;  %v12200_v52 = vld [vmem:[#allocation28 + $0x70] ss:$8 sps:$4 sm:$0xff]  }
 0xc2f   :  { %v14059_v60 = vadd.f32 %v2904_v59, %v2903_v56  ;;  %v3216_v56 = vld [vmem:[%s14809_s17] sm:$0x1] }
 0xc31   :  { %v14063_v61 = vpack.c.bf16 %v14059_v60, %v14059_v60 }
 0xc33   :  { %11117 = vmatmul.mubr.bf16.vlgmr.msra.gmra.mrb[16].mxu1 %v14063_v61  ;;  %11163 = vmatmul.mubr.bf16.vlgmr.msra.gmra.mrb[28].mxu0 %v14063_v61 }
 0xc34   :  { %11122 = vmatprep.mubr.msk.bf16.mxu1 %vm13445_vm0, %v13444_v1  ;;  %11121 = vmatpush3.bf16.msra.mxu1 %v2965_v18 }
 0xc35   :  { %11126 = vmatprep.subr.bf16.mxu1 %v13444_v1 }
 0xd06   :  { %v2942_v62 = vpop.f32.mrb[16].mxu1  ;;  %v14069_v63 = vpop.f32.mrb[28].mxu0 }
 0xd07   :  { %v2948_v0 = vsel %vm13947_vm3, %v2942_v62, -1e+30  ;;  %v11118_v21 = vpop.f32.mrb[17].mxu1  ;;  %v11164_v5 = vpop.f32.mrb[29].mxu0 }
 0xd08   :  { %v2945_v7 = vpop.f32.mrb[18].mxu1  ;;  %v3213_v8 = vpop.f32.mrb[30].mxu0  ;;  %v2949_v9 = vsel %vm1896_vm4, %v2948_v0, -inf }
 0xd09   :  { %v11165_v10 = vpop.f32.mrb[31].mxu0  ;;  %2950 = vmax.xlane.f32.xlu0 %v2949_v9  ;;  %v11119_v11 = vpop.f32.mrb[19].mxu1  ;;  %v3236_v9 = vld [vmem:[%s14811_s19] sm:$0x3] }
 0xd0a   :  { %v3321_v10 = vrot.slane %v3236_v9, %v13778_v57  ;;  %v3325_v11 = vrot.slane %v3236_v9, %v13781_v58 }
 0xd96   :  { %v2951_v13 = vpop.xlane.xlu0 %2950 }
 0xd97   :  { %v2952_v14 = vsub.f32 %v2948_v0, %v2951_v13 }
 0xd99   :  { %v2953_v22 = vmul.f32 1.442695, %v2952_v14 }
 0xd9b   :  { %12213 = vpow2.f32 %v2953_v22 }
 0xda5   :  { %v12214_v16 = vpop.eup %12213 }
 0xda6   :  { %v2955_v17 = vsel %vm1896_vm4, %v12214_v16, 0.0 }
 0xda7   :  { %2956 = vadd.xlane.f32.xlu0 %v2955_v17 }
 0xe34   :  { %v2957_v19 = vpop.xlane.xlu0 %2956 }
 0xe35   :  { %12215 = vrcp.f32 %v2957_v19 }
 0xe3f   :  { %v12216_v20 = vpop.eup %12215 }
 0xe40   :  { %v2959_v23 = vmul.f32 %v12216_v20, %v12214_v16 }
 0xe42   :  { %v2960_v25 = vpack.c.bf16 %v2959_v23, %v2959_v23 }
 0xe44   :  { %11123 = vmatmul.mubr.msk.bf16.vlgmr.msra.gmra.mrb[20].mxu1 %vm1909_vm6, %v2960_v25 }
 0xe45   :  { %11127 = vmatpush3.bf16.msra.mxu1 %v12171_v30  ;;  %11142 = vmatprep.mubr.msk.bf16.mxu1 %vm13445_vm0, %v13444_v1 }
 0xe46   :  { %11128 = vmatprep.subr.bf16.mxu1 %v13444_v1 }
 0xe49   :  { %11129 = vmatpush3.bf16.msra.mxu1 %v12172_v26 }
 0xe4a   :  { %11130 = vmatprep.subr.bf16.mxu1 %v13444_v1 }
 0xe4d   :  { %11131 = vmatpush3.bf16.msra.mxu1 %v12173_v15 }
 0xe4e   :  { %11132 = vmatprep.subr.bf16.mxu1 %v13444_v1 }
 0xe51   :  { %11133 = vmatpush3.bf16.msra.mxu1 %v12174_v27 }
 0xe52   :  { %11134 = vmatprep.subr.bf16.mxu1 %v13444_v1 }
 0xe55   :  { %11135 = vmatpush3.bf16.msra.mxu1 %v12175_v31 }
 0xe56   :  { %11136 = vmatprep.subr.bf16.mxu1 %v13444_v1 }
 0xe59   :  { %11137 = vmatpush3.bf16.msra.mxu1 %v12176_v32 }
 0xe5a   :  { %11138 = vmatprep.subr.bf16.mxu1 %v13444_v1 }
 0xe5d   :  { %11139 = vmatpush3.bf16.msra.mxu1 %v12177_v34 }
 0xe5e   :  { %11140 = vmatprep.subr.bf16.mxu1 %v13444_v1 }
 0xe61   :  { %11141 = vmatpush3.bf16.msra.mxu1 %v12178_v35 }
 0xe62   :  { %3328 = vmatprep.subr.bf16.mxu1 %v12181_v24 }
 0xf17   :  { %v3001_v36 = vpop.f32.mrb[20].mxu1 }
 0xf18   :  { %v3023_v29 = vpack.c.bf16 %v3001_v36, %v3001_v36  ;;  %v11124_v38 = vpop.f32.mrb[21].mxu1 }
 0xf19   :  { %v3004_v33 = vpop.f32.mrb[22].mxu1 }
 0xf1a   :  { %v11125_v40 = vpop.f32.mrb[23].mxu1  ;;  %11143 = vmatmul.mubr.bf16.vlgmr.msra.gmra.mrb[24].mxu1 %v3023_v29 }
 0xf1b   :  { %3329 = vmatpush1.bf16.msra.mxu1 %v12179_v37  ;;  %3360 = vmatprep.mubr.bf16.mxu1 %v13446_v2 }
 0xf1c   :  { %3330 = vmatprep.subr.bf16.mxu1 %v12184_v39 }
 0xf1f   :  { %3331 = vmatpush1.bf16.msra.mxu1 %v12182_v54 }
 0xf20   :  { %3332 = vmatprep.subr.bf16.mxu1 %v12187_v42 }
 0xf23   :  { %3333 = vmatpush1.bf16.msra.mxu1 %v12185_v43 }
 0xf24   :  { %3334 = vmatprep.subr.bf16.mxu1 %v12190_v44 }
 0xf27   :  { %3335 = vmatpush1.bf16.msra.mxu1 %v12188_v45 }
 0xf28   :  { %3336 = vmatprep.subr.bf16.mxu1 %v12193_v41 }
 0xf2b   :  { %3337 = vmatpush1.bf16.msra.mxu1 %v12191_v46 }
 0xf2c   :  { %3338 = vmatprep.subr.bf16.mxu1 %v12196_v47 }
 0xf2f   :  { %3339 = vmatpush1.bf16.msra.mxu1 %v12194_v48 }
 0xf30   :  { %3340 = vmatprep.subr.bf16.mxu1 %v12199_v49 }
 0xf33   :  { %3341 = vmatpush1.bf16.msra.mxu1 %v12197_v50 }
 0xf34   :  { %3342 = vmatprep.subr.bf16.mxu1 %v12202_v51 }
 0xf37   :  { %3343 = vmatpush1.bf16.msra.mxu1 %v12200_v52 }
 0xfed   :  { %v3122_v53 = vpop.f32.mrb[24].mxu1 }
 0xfee   :  { %v3211_v59 = vadd.f32 %v14069_v63, %v3122_v53  ;;  %v11144_v62 = vpop.f32.mrb[25].mxu1 }
 0xfef   :  { %v3125_v0 = vpop.f32.mrb[26].mxu1 }
 0xff0   :  { %v3217_v21 = vadd.f32 %v3216_v56, %v3211_v59  ;;  %v11145_v5 = vpop.f32.mrb[27].mxu1 }
 0xff2   :  { %12217 = vtanh.f32 %v3217_v21 }
 0xffc   :  { %v12218_v7 = vpop.eup %12217 }
 0xffd   :  { %v3219_v8 = vpack.c.bf16 %v12218_v7, %v12218_v7 }
 0xfff   :  { %3361 = vmatmul.mubr.bf16.vlgmr.msra.gmra.mrb[28].mxu1 %v3219_v8 }
0x10d2   :  { %v3362_v13 = vpop.f32.mrb[28].mxu1 }
0x10d3   :  { %v3363_v14 = vadd.f32 %v3362_v13, %v3321_v10  ;;  %v3364_v22 = vpop.f32.mrb[29].mxu1 }
0x10d4   :  { %v3365_v63 = vadd.f32 %v3364_v22, %v3325_v11  ;;  %v3366_v16 = vpop.f32.mrb[30].mxu1 }
0x10d5   :  { %v3367_v17 = vpop.f32.mrb[31].mxu1  ;;  %v3369_v18 = vsel %vm2319_vm7, %v3363_v14, -inf }
0x10d6   :  { %v3370_v19 = vsel %vm2319_vm7, %v3365_v63, -inf }
0x10d7   :  { %v3371_v20 = vmax.f32 %v3369_v18, %v3370_v19 }
0x10d9   :  { %3372 = vmax.xlane.f32.xlu1 %v3371_v20 }
0x1166   :  { %v3373_v23 = vpop.xlane.xlu1 %3372 }
0x1167   :  { %v3374_v30 = vsub.f32 %v3363_v14, %v3373_v23  ;;  %v3375_v25 = vsub.f32 %v3365_v63, %v3373_v23  ;;  %vm3387_vm14 = vcmp.eq.f32.partialorder %v3363_v14, %v3373_v23  ;;  %vm3388_vm15 = vcmp.eq.f32.partialorder %v3365_v63, %v3373_v23 }
0x1168   :  { %v3389_v26 = vsel %vm3387_vm14, %v13745_v3, 256  ;;  %v3390_v15 = vsel %vm3388_vm15, %v13748_v4, 256 }
0x1169   :  { %v3391_v27 = vsel %vm2319_vm7, %v3389_v26, 2147483647  ;;  %v3392_v31 = vsel %vm2319_vm7, %v3390_v15, 2147483647  ;;  %v3376_v32 = vmul.f32 1.442695, %v3374_v30 }
0x116a   :  { %vm3393_vm1 = vcmp.lt.s32.totalorder %v3391_v27, %v3392_v31  ;;  %v3378_v34 = vmul.f32 1.442695, %v3375_v25 }
0x116b   :  { %v3394_v35 = vsel %vm3393_vm1, %v3391_v27, %v3392_v31  ;;  %12219 = vpow2.f32 %v3376_v32 }
0x116c   :  { %v3396_v24 = vshra.s32 %v3394_v35, 16  ;;  %12221 = vpow2.f32 %v3378_v34  ;;  %v3395_v40 = vand.u32 65535, %v3394_v35 }
0x116e   :  { %v3398_v36 = vcvt.s32.f32 %v3396_v24  ;;  %v3397_v42 = vcvt.s32.f32 %v3395_v40 }
0x1170   :  { %3399 = vmin.xlane.f32.xlu1 %v3398_v36 }
0x1175   :  { %v12220_v37 = vpop.eup %12219 }
0x1176   :  { %v12222_v29 = vpop.eup %12221  ;;  %v3380_v38 = vsel %vm2319_vm7, %v12220_v37, 0.0 }
0x1177   :  { %v3381_v39 = vsel %vm2319_vm7, %v12222_v29, 0.0 }
0x1178   :  { %v3382_v33 = vadd.f32 %v3381_v39, %v3380_v38 }
0x117a   :  { %3383 = vadd.xlane.f32.xlu0 %v3382_v33 }
0x11fd   :  { %v3400_v54 = vpop.xlane.xlu1 %3399 }
0x11fe   :  { %vm3401_vm2 = vcmp.eq.f32.partialorder %v3398_v36, %v3400_v54  ;;  %v3406_v46 = vcvt.f32.s32 %v3400_v54 }
0x11ff   :  { %v3402_v43 = vsel %vm3401_vm2, %v3397_v42, inf }
0x1200   :  { %3403 = vmin.xlane.f32.xlu1 %v3402_v43  ;;  %v3407_v48 = vshll.u32 %v3406_v46, 16 }
0x1207   :  { %v3384_v44 = vpop.xlane.xlu0 %3383 }
0x1208   :  { %12223 = vrcp.f32 %v3384_v44 }
0x1212   :  { %v12224_v45 = vpop.eup %12223 }
0x1213   :  { %v14108_v41 = vsel %vm3421_vm8, %v12224_v45, %v13989_v6 }
0x128d   :  { %v3404_v47 = vpop.xlane.xlu1 %3403 }
0x128e   :  { %v3405_v49 = vcvt.f32.s32 %v3404_v47 }
0x1290   :  { %v3408_v50 = vadd.s32 %v3407_v48, %v3405_v49 }
0x1292   :  { %v14111_v51 = vsel %vm3421_vm8, %v3408_v50, %v13993_v12  ;;  %3409 = vst.msk [vmem:[#allocation7] sm:$0x1] %vm2360_vm13, %v3408_v50 }
0x1293   :  { %13246 = shalt.err (!%p14000_p10)  }
0x1294   :  { %3420 = dma.vmem_to_smem %s13991_s2, 16, %s13451_s0, [#allocation9] }
0x1295   :  { %13393 = dma.done.wait [#allocation9], 16 }
0x1296   :  { %13394 = vsyncadd [#allocation9], 4294967280 }
0x1297   :  { %3426 = sfence }
0x1298   :  { %v12225_v6 = vld [vmem:[#allocation22 + $0x4] ss:$12 sps:$4 sm:$0xff]   ;;  %11166 = vmatprep.subr.bf16.mxu1 %v13444_v1  ;;  %3640 = vmatprep.mubr.bf16.mxu0 %v13446_v2  ;;  %v12227_v52 = vld [vmem:[#allocation22] ss:$12 sps:$4 sm:$0xff]   ;;  %v12228_v12 = vld [vmem:[#allocation22 + $0x1c] ss:$12 sps:$4 sm:$0xff]  }
0x1299   :  { %11182 = vmatprep.mubr.msk.bf16.mxu1 %vm13445_vm0, %v13444_v1  ;;  %3608 = vmatprep.subr.bf16.mxu0 %v12225_v6  ;;  %v12230_v53 = vld [vmem:[#allocation22 + $0x18] ss:$12 sps:$4 sm:$0xff]   ;;  %v12231_v56 = vld [vmem:[#allocation22 + $0x34] ss:$12 sps:$4 sm:$0xff]   ;;  %v12233_v59 = vld [vmem:[#allocation22 + $0x30] ss:$12 sps:$4 sm:$0xff]  }
0x129a   :  { %3609 = vmatpush1.bf16.msra.mxu0 %v12227_v52  ;;  %v12234_v62 = vld [vmem:[#allocation22 + $0x4c] ss:$12 sps:$4 sm:$0xff]   ;;  %v12245_v0 = vld [vmem:[#allocation22 + $0x8] ss:$12 sps:$4 sm:$0xff]   ;;  %v12237_v5 = vld [vmem:[#allocation22 + $0x64] ss:$12 sps:$4 sm:$0xff]  }
0x129b   :  { %3610 = vmatprep.subr.bf16.mxu0 %v12228_v12  ;;  %v12236_v21 = vld [vmem:[#allocation22 + $0x48] ss:$12 sps:$4 sm:$0xff]   ;;  %11167 = vmatpush3.bf16.msra.mxu1 %v12245_v0  ;;  %v12249_v7 = vld [vmem:[#allocation22 + $0x20] ss:$12 sps:$4 sm:$0xff]   ;;  %s3427_s30 = sld [smem:[#allocation8]]  ;;  %v12292_v52 = vld [vmem:[#allocation25 + $0x18] sm:$0xff]  }
0x129c   :  { %11168 = vmatprep.subr.bf16.mxu1 %v13444_v1  ;;  %v12239_v8 = vld [vmem:[#allocation22 + $0x60] ss:$12 sps:$4 sm:$0xff]   ;;  %v12251_v9 = vld [vmem:[#allocation22 + $0x38] ss:$12 sps:$4 sm:$0xff]   ;;  %v12240_v10 = vld [vmem:[#allocation22 + $0x7c] ss:$12 sps:$4 sm:$0xff]  }
0x129d   :  { %v12242_v11 = vld [vmem:[#allocation22 + $0x78] ss:$12 sps:$4 sm:$0xff]   ;;  %v12255_v13 = vld [vmem:[#allocation22 + $0x50] ss:$12 sps:$4 sm:$0xff]   ;;  %v12243_v14 = vld [vmem:[#allocation22 + $0x94] ss:$12 sps:$4 sm:$0xff]  }
0x129e   :  { %3611 = vmatpush1.bf16.msra.mxu0 %v12230_v53  ;;  %v12246_v22 = vld [vmem:[#allocation22 + $0x90] ss:$12 sps:$4 sm:$0xff]   ;;  %v12259_v63 = vld [vmem:[#allocation22 + $0x68] ss:$12 sps:$4 sm:$0xff]   ;;  %v12247_v16 = vld [vmem:[#allocation22 + $0xac] ss:$12 sps:$4 sm:$0xff]  }
0x129f   :  { %3612 = vmatprep.subr.bf16.mxu0 %v12231_v56  ;;  %11169 = vmatpush3.bf16.msra.mxu1 %v12249_v7  ;;  %v12250_v17 = vld [vmem:[#allocation22 + $0xa8] ss:$12 sps:$4 sm:$0xff]   ;;  %v12263_v19 = vld [vmem:[#allocation22 + $0x80] ss:$12 sps:$4 sm:$0xff]   ;;  %v12254_v20 = vld [vmem:[#allocation23 + $0x4] ss:$12 sps:$4 sm:$0xff]  }
0x12a0   :  { %11170 = vmatprep.subr.bf16.mxu1 %v13444_v1  ;;  %v12252_v23 = vld [vmem:[#allocation23] ss:$12 sps:$4 sm:$0xff]   ;;  %v12267_v25 = vld [vmem:[#allocation22 + $0x98] ss:$12 sps:$4 sm:$0xff]   ;;  %v12258_v26 = vld [vmem:[#allocation23 + $0x1c] ss:$12 sps:$4 sm:$0xff]  }
0x12a1   :  { %s3428_s12 = scalar_lea.vmem [#allocation20], %s3427_s30  ;;  %v12256_v15 = vld [vmem:[#allocation23 + $0x18] ss:$12 sps:$4 sm:$0xff]   ;;  %v12271_v27 = vld [vmem:[#allocation22 + $0xb0] ss:$12 sps:$4 sm:$0xff]   ;;  %v12290_v50 = vld [vmem:[#allocation25 + $0x8] sm:$0xff]  }
0x12a2   :  { %3613 = vmatpush1.bf16.msra.mxu0 %v12233_v59  ;;  %v3429_v18 = vld [vmem:[%s3428_s12] sm:$0x1]  ;;  %v12260_v32 = vld [vmem:[#allocation23 + $0x30] ss:$12 sps:$4 sm:$0xff]   ;;  %v12266_v35 = vld [vmem:[#allocation23 + $0x4c] ss:$12 sps:$4 sm:$0xff]  }
0x12a3   :  { %3614 = vmatprep.subr.bf16.mxu0 %v12234_v62  ;;  %11171 = vmatpush3.bf16.msra.mxu1 %v12251_v9  ;;  %v3430_v30 = vpack.c.bf16 %v3429_v18, %v3429_v18  ;;  %v12262_v31 = vld [vmem:[#allocation23 + $0x34] ss:$12 sps:$4 sm:$0xff]   ;;  %v12270_v37 = vld [vmem:[#allocation23 + $0x64] ss:$12 sps:$4 sm:$0xff]   ;;  %v12274_v39 = vld [vmem:[#allocation23 + $0x7c] ss:$12 sps:$4 sm:$0xff]  }
0x12a4   :  { %11172 = vmatprep.subr.bf16.mxu1 %v13444_v1  ;;  %v12278_v34 = vld [vmem:[#allocation23 + $0x8] ss:$12 sps:$4 sm:$0xff]   ;;  %v12282_v36 = vld [vmem:[#allocation23 + $0x20] ss:$12 sps:$4 sm:$0xff]   ;;  %v12283_v38 = vld [vmem:[#allocation23 + $0x38] ss:$12 sps:$4 sm:$0xff]  }
0x12a5   :  { %v12264_v24 = vld [vmem:[#allocation23 + $0x48] ss:$12 sps:$4 sm:$0xff]   ;;  %v12268_v29 = vld [vmem:[#allocation23 + $0x60] ss:$12 sps:$4 sm:$0xff]   ;;  %v12272_v33 = vld [vmem:[#allocation23 + $0x78] ss:$12 sps:$4 sm:$0xff]  }
0x12a6   :  { %3615 = vmatpush1.bf16.msra.mxu0 %v12236_v21  ;;  %v12284_v40 = vld [vmem:[#allocation23 + $0x50] ss:$12 sps:$4 sm:$0xff]   ;;  %v12277_v54 = vld [vmem:[#allocation23 + $0x94] ss:$12 sps:$4 sm:$0xff]   ;;  %v12281_v44 = vld [vmem:[#allocation23 + $0xac] ss:$12 sps:$4 sm:$0xff]  }
0x12a7   :  { %3616 = vmatprep.subr.bf16.mxu0 %v12237_v5  ;;  %11173 = vmatpush3.bf16.msra.mxu1 %v12255_v13  ;;  %v12275_v42 = vld [vmem:[#allocation23 + $0x90] ss:$12 sps:$4 sm:$0xff]   ;;  %v12285_v43 = vld [vmem:[#allocation23 + $0x68] ss:$12 sps:$4 sm:$0xff]   ;;  %v12286_v46 = vld [vmem:[#allocation23 + $0x80] ss:$12 sps:$4 sm:$0xff]  }
0x12a8   :  { %11174 = vmatprep.subr.bf16.mxu1 %v13444_v1  ;;  %v12279_v45 = vld [vmem:[#allocation23 + $0xa8] ss:$12 sps:$4 sm:$0xff]   ;;  %v12287_v47 = vld [vmem:[#allocation23 + $0x98] ss:$12 sps:$4 sm:$0xff]   ;;  %v12288_v48 = vld [vmem:[#allocation23 + $0xb0] ss:$12 sps:$4 sm:$0xff]  }
0x12a9   :  { %v12289_v49 = vld [vmem:[#allocation25] sm:$0xff]   ;;  %v12291_v6 = vld [vmem:[#allocation25 + $0x10] sm:$0xff]   ;;  %v12294_v53 = vld [vmem:[#allocation25 + $0x28] sm:$0xff]   ;;  %vm4468_vm14 = vcmp.eq.s32.totalorder %v13745_v3, 2 }
0x12aa   :  { %3617 = vmatpush1.bf16.msra.mxu0 %v12239_v8  ;;  %v14152_v12 = vld [vmem:[#allocation6] sm:$0xf] }
0x12ab   :  { %3618 = vmatprep.subr.bf16.mxu0 %v12240_v10  ;;  %11175 = vmatpush3.bf16.msra.mxu1 %v12259_v63  ;;  %v12295_v56 = vld [vmem:[#allocation25 + $0x30] sm:$0xff]   ;;  %v12296_v59 = vld [vmem:[#allocation25 + $0x38] sm:$0xff]  }
0x12ac   :  { %11176 = vmatprep.subr.bf16.mxu1 %v13444_v1  ;;  %v3463_v7 = vld [vmem:[%s14805_s13] sm:$0x7] }
0x12ad   :  { %v3596_v8 = vrot.slane %v3463_v7, %v13778_v57  ;;  %v3600_v10 = vrot.slane %v3463_v7, %v13781_v58 }
0x12ae   :  { %3619 = vmatpush1.bf16.msra.mxu0 %v12242_v11 }
0x12af   :  { %3620 = vmatprep.subr.bf16.mxu0 %v12243_v14  ;;  %11177 = vmatpush3.bf16.msra.mxu1 %v12263_v19 }
0x12b0   :  { %11178 = vmatprep.subr.bf16.mxu1 %v13444_v1 }
0x12b2   :  { %3621 = vmatpush1.bf16.msra.mxu0 %v12246_v22 }
0x12b3   :  { %3622 = vmatprep.subr.bf16.mxu0 %v12247_v16  ;;  %11179 = vmatpush3.bf16.msra.mxu1 %v12267_v25 }
0x12b4   :  { %11180 = vmatprep.subr.bf16.mxu1 %v13444_v1 }
0x12b6   :  { %3623 = vmatpush1.bf16.msra.mxu0 %v12250_v17 }
0x12b7   :  { %3849 = vmatprep.subr.bf16.mxu0 %v12254_v20  ;;  %11181 = vmatpush3.bf16.msra.mxu1 %v12271_v27  ;;  %v3604_v27 = vrot.slane %v3463_v7, %v13772_v55 }
0x12b8   :  { %11186 = vmatprep.subr.bf16.mxu1 %v13444_v1 }
0x12b9   :  { %3641 = vmatmul.mubr.bf16.vlgmr.msra.gmra.mrb[32].mxu0 %v3430_v30 }
0x12ba   :  { %3850 = vmatpush1.bf16.msra.mxu0 %v12252_v23  ;;  %3881 = vmatprep.mubr.bf16.mxu0 %v13446_v2 }
0x12bb   :  { %3851 = vmatprep.subr.bf16.mxu0 %v12258_v26  ;;  %11183 = vmatmul.mubr.bf16.vlgmr.msra.gmra.mrb[32].mxu1 %v3430_v30 }
0x12bc   :  { %11187 = vmatpush3.bf16.msra.mxu1 %v12278_v34  ;;  %11202 = vmatprep.mubr.msk.bf16.mxu1 %vm13445_vm0, %v13444_v1 }
0x12bd   :  { %11188 = vmatprep.subr.bf16.mxu1 %v13444_v1 }
0x12be   :  { %3852 = vmatpush1.bf16.msra.mxu0 %v12256_v15  ;;  %v3944_v15 = vld [vmem:[%s14806_s14] sm:$0x1] }
0x12bf   :  { %3853 = vmatprep.subr.bf16.mxu0 %v12262_v31 }
0x12c0   :  { %11189 = vmatpush3.bf16.msra.mxu1 %v12282_v36 }
0x12c1   :  { %11190 = vmatprep.subr.bf16.mxu1 %v13444_v1 }
0x12c2   :  { %3854 = vmatpush1.bf16.msra.mxu0 %v12260_v32 }
0x12c3   :  { %3855 = vmatprep.subr.bf16.mxu0 %v12266_v35 }
0x12c4   :  { %11191 = vmatpush3.bf16.msra.mxu1 %v12283_v38 }
0x12c5   :  { %11192 = vmatprep.subr.bf16.mxu1 %v13444_v1 }
0x12c6   :  { %3856 = vmatpush1.bf16.msra.mxu0 %v12264_v24 }
0x12c7   :  { %3857 = vmatprep.subr.bf16.mxu0 %v12270_v37 }
0x12c8   :  { %11193 = vmatpush3.bf16.msra.mxu1 %v12284_v40 }
0x12c9   :  { %11194 = vmatprep.subr.bf16.mxu1 %v13444_v1 }
0x12ca   :  { %3858 = vmatpush1.bf16.msra.mxu0 %v12268_v29 }
0x12cb   :  { %3859 = vmatprep.subr.bf16.mxu0 %v12274_v39 }
0x12cc   :  { %11195 = vmatpush3.bf16.msra.mxu1 %v12285_v43 }
0x12cd   :  { %11196 = vmatprep.subr.bf16.mxu1 %v13444_v1 }
0x12ce   :  { %3860 = vmatpush1.bf16.msra.mxu0 %v12272_v33 }
0x12cf   :  { %3861 = vmatprep.subr.bf16.mxu0 %v12277_v54 }
0x12d0   :  { %11197 = vmatpush3.bf16.msra.mxu1 %v12286_v46 }
0x12d1   :  { %11198 = vmatprep.subr.bf16.mxu1 %v13444_v1 }
0x12d2   :  { %3862 = vmatpush1.bf16.msra.mxu0 %v12275_v42 }
0x12d3   :  { %3863 = vmatprep.subr.bf16.mxu0 %v12281_v44 }
0x12d4   :  { %11199 = vmatpush3.bf16.msra.mxu1 %v12287_v47 }
0x12d5   :  { %11200 = vmatprep.subr.bf16.mxu1 %v13444_v1 }
0x12d6   :  { %3864 = vmatpush1.bf16.msra.mxu0 %v12279_v45 }
0x12d7   :  { %11206 = vmatprep.subr.bf16.mxu0 %v13444_v1 }
0x12d8   :  { %11201 = vmatpush3.bf16.msra.mxu1 %v12288_v48 }
0x12d9   :  { %3882 = vmatmul.mubr.bf16.vlgmr.msra.gmra.mrb[32].mxu0 %v14063_v61  ;;  %11238 = vmatprep.subr.bf16.mxu1 %v13444_v1 }
0x12da   :  { %11208 = vmatprep.mubr.msk.bf16.mxu0 %vm13445_vm0, %v13444_v1 }
0x12db   :  { %11203 = vmatmul.mubr.bf16.vlgmr.msra.gmra.mrb[36].mxu1 %v14063_v61  ;;  %v12293_v61 = vld [vmem:[#allocation25 + $0x20] sm:$0xff]  }
0x12dc   :  { %11254 = vmatprep.mubr.msk.bf16.mxu1 %vm13445_vm0, %v13444_v1  ;;  %11239 = vmatpush3.bf16.msra.mxu1 %v12289_v49 }
0x12dd   :  { %11240 = vmatprep.subr.bf16.mxu1 %v13444_v1 }
0x12df   :  { %11207 = vmatpush3.bf16.xpose.msra.mxu0 %v14152_v12 }
0x12e0   :  { %11241 = vmatpush3.bf16.msra.mxu1 %v12290_v50  ;;  %11212 = vmatprep.subr.bf16.mxu0 %v13444_v1 }
0x12e1   :  { %11242 = vmatprep.subr.bf16.mxu1 %v13444_v1 }
0x12e4   :  { %11243 = vmatpush3.bf16.msra.mxu1 %v12291_v6 }
0x12e5   :  { %11244 = vmatprep.subr.bf16.mxu1 %v13444_v1 }
0x12e8   :  { %11245 = vmatpush3.bf16.msra.mxu1 %v12292_v52 }
0x12e9   :  { %11246 = vmatprep.subr.bf16.mxu1 %v13444_v1 }
0x12ec   :  { %11247 = vmatpush3.bf16.msra.mxu1 %v12293_v61 }
0x12ed   :  { %11248 = vmatprep.subr.bf16.mxu1 %v13444_v1 }
0x12f0   :  { %11249 = vmatpush3.bf16.msra.mxu1 %v12294_v53 }
0x12f1   :  { %11250 = vmatprep.subr.bf16.mxu1 %v13444_v1 }
0x12f4   :  { %11251 = vmatpush3.bf16.msra.mxu1 %v12295_v56 }
0x12f5   :  { %11252 = vmatprep.subr.bf16.mxu1 %v13444_v1 }
0x12f8   :  { %11253 = vmatpush3.bf16.msra.mxu1 %v12296_v59  ;;  %v4012_v59 = vsel %vm1913_vm5, %v14152_v12, 0  ;;  %v12299_v12 = vld [vmem:[#allocation26 + $0x10] sm:$0xff]  }
0x138e   :  { %v3683_v62 = vpop.f32.mrb[32].mxu1 }
0x138f   :  { %v11184_v0 = vpop.f32.mrb[33].mxu1  ;;  %v3684_v35 = vadd.f32 %v3683_v62, %v3604_v27  ;;  %v12314_v27 = vld [vmem:[#allocation28 + $0x30] ss:$8 sps:$4 sm:$0xff]  }
0x1390   :  { %v3686_v21 = vpop.f32.mrb[34].mxu1 }
0x1391   :  { %v11185_v5 = vpop.f32.mrb[35].mxu1 }
0x1392   :  { %v12297_v5 = vld [vmem:[#allocation26] sm:$0xff]  }
0x13ac   :  { %v3883_v9 = vpop.f32.mrb[32].mxu0 }
0x13ad   :  { %v11722_v11 = vadd.f32 %v3883_v9, %v3596_v8  ;;  %v3885_v13 = vpop.f32.mrb[33].mxu0  ;;  %v12298_v8 = vld [vmem:[#allocation26 + $0x8] sm:$0xff]   ;;  %v12300_v9 = vld [vmem:[#allocation26 + $0x18] sm:$0xff]  }
0x13ae   :  { %v3887_v14 = vpop.f32.mrb[34].mxu0  ;;  %v11723_v16 = vadd.f32 %v3885_v13, %v3600_v10  ;;  %v3924_v18 = vpop.f32.mrb[36].mxu1  ;;  %v12301_v10 = vld [vmem:[#allocation26 + $0x20] sm:$0xff]   ;;  %v12303_v13 = vld [vmem:[#allocation26 + $0x30] sm:$0xff]  }
0x13af   :  { %v10095_v22 = vmul.f32 -1.442695, %v11722_v11  ;;  %v3888_v63 = vpop.f32.mrb[35].mxu0  ;;  %v11204_v19 = vpop.f32.mrb[37].mxu1  ;;  %v3945_v32 = vadd.f32 %v3944_v15, %v3924_v18  ;;  %v12302_v11 = vld [vmem:[#allocation26 + $0x28] sm:$0xff]   ;;  %v12304_v14 = vld [vmem:[#allocation26 + $0x38] sm:$0xff]  }
0x13b0   :  { %v10096_v17 = vmul.f32 -1.442695, %v11723_v16  ;;  %v3927_v20 = vpop.f32.mrb[38].mxu1  ;;  %v12305_v16 = vld [vmem:[#allocation28] ss:$8 sps:$4 sm:$0xff]  }
0x13b1   :  { %12329 = vpow2.f32 %v10095_v22  ;;  %v11205_v23 = vpop.f32.mrb[39].mxu1  ;;  %v12307_v22 = vld [vmem:[#allocation28 + $0x4] ss:$8 sps:$4 sm:$0xff]   ;;  %v12310_v19 = vld [vmem:[#allocation28 + $0x14] ss:$8 sps:$4 sm:$0xff]  }
0x13b2   :  { %12331 = vpow2.f32 %v10096_v17  ;;  %v12316_v15 = vld [vmem:[#allocation28 + $0x34] ss:$8 sps:$4 sm:$0xff]  }
0x13bb   :  { %v12330_v30 = vpop.eup %12329 }
0x13bc   :  { %v3934_v25 = vadd.f32 1.0, %v12330_v30  ;;  %v12332_v26 = vpop.eup %12331  ;;  %v12308_v30 = vld [vmem:[#allocation28 + $0x10] ss:$8 sps:$4 sm:$0xff]  }
0x13bd   :  { %v3941_v31 = vadd.f32 1.0, %v12332_v26  ;;  %v12311_v26 = vld [vmem:[#allocation28 + $0x20] ss:$8 sps:$4 sm:$0xff]  }
0x13be   :  { %12333 = vrcp.f32 %v3934_v25  ;;  %v12313_v25 = vld [vmem:[#allocation28 + $0x24] ss:$8 sps:$4 sm:$0xff]  }
0x13bf   :  { %12335 = vrcp.f32 %v3941_v31  ;;  %v12319_v31 = vld [vmem:[#allocation28 + $0x44] ss:$8 sps:$4 sm:$0xff]  }
0x13c8   :  { %v12334_v34 = vpop.eup %12333 }
0x13c9   :  { %v3946_v24 = vmul.f32 %v12334_v34, %v3945_v32  ;;  %v12336_v37 = vpop.eup %12335  ;;  %v12317_v32 = vld [vmem:[#allocation28 + $0x40] ss:$8 sps:$4 sm:$0xff]   ;;  %v12322_v34 = vld [vmem:[#allocation28 + $0x54] ss:$8 sps:$4 sm:$0xff]  }
0x13ca   :  { %v3949_v29 = vsub.f32 1.0, %v12336_v37  ;;  %v3951_v33 = vmul.f32 %v12336_v37, %v14059_v60  ;;  %v12328_v37 = vld [vmem:[#allocation28 + $0x74] ss:$8 sps:$4 sm:$0xff]  }
0x13cb   :  { %v3947_v36 = vadd.f32 %v3946_v24, %v3684_v35  ;;  %v12320_v35 = vld [vmem:[#allocation28 + $0x50] ss:$8 sps:$4 sm:$0xff]   ;;  %v12325_v24 = vld [vmem:[#allocation28 + $0x64] ss:$8 sps:$4 sm:$0xff]  }
0x13cd   :  { %12337 = vtanh.f32 %v3947_v36  ;;  %v12323_v36 = vld [vmem:[#allocation28 + $0x60] ss:$8 sps:$4 sm:$0xff]  }
0x13d7   :  { %v12338_v38 = vpop.eup %12337 }
0x13d8   :  { %v3950_v39 = vmul.f32 %v12338_v38, %v3949_v29  ;;  %v12326_v29 = vld [vmem:[#allocation28 + $0x70] ss:$8 sps:$4 sm:$0xff]  }
0x13da   :  { %v14169_v40 = vadd.f32 %v3951_v33, %v3950_v39  ;;  %v4263_v39 = vld [vmem:[%s14809_s17] sm:$0x1] }
0x13dc   :  { %v14173_v54 = vpack.c.bf16 %v14169_v40, %v14169_v40 }
0x13de   :  { %11209 = vmatmul.mubr.bf16.vlgmr.msra.gmra.mrb[36].mxu0 %v14173_v54  ;;  %11255 = vmatmul.mubr.bf16.vlgmr.msra.gmra.mrb[40].mxu1 %v14173_v54 }
0x13df   :  { %11214 = vmatprep.mubr.msk.bf16.mxu0 %vm13445_vm0, %v13444_v1  ;;  %11213 = vmatpush3.bf16.msra.mxu0 %v4012_v59 }
0x13e0   :  { %11218 = vmatprep.subr.bf16.mxu0 %v13444_v1 }
0x14b1   :  { %v3989_v42 = vpop.f32.mrb[36].mxu0  ;;  %v14179_v43 = vpop.f32.mrb[40].mxu1 }
0x14b2   :  { %v3995_v44 = vsel %vm13947_vm3, %v3989_v42, -1e+30  ;;  %v11210_v60 = vpop.f32.mrb[37].mxu0  ;;  %v11256_v45 = vpop.f32.mrb[41].mxu1 }
0x14b3   :  { %v3992_v46 = vpop.f32.mrb[38].mxu0  ;;  %v4260_v47 = vpop.f32.mrb[42].mxu1  ;;  %v3996_v48 = vsel %vm1896_vm4, %v3995_v44, -inf }
0x14b4   :  { %v11257_v49 = vpop.f32.mrb[43].mxu1  ;;  %3997 = vmax.xlane.f32.xlu0 %v3996_v48  ;;  %v11211_v50 = vpop.f32.mrb[39].mxu0  ;;  %v4283_v48 = vld [vmem:[%s14811_s19] sm:$0x3] }
0x14b5   :  { %v4368_v49 = vrot.slane %v4283_v48, %v13778_v57  ;;  %v4372_v50 = vrot.slane %v4283_v48, %v13781_v58 }
0x1541   :  { %v3998_v6 = vpop.xlane.xlu0 %3997 }
0x1542   :  { %v3999_v52 = vsub.f32 %v3995_v44, %v3998_v6 }
0x1544   :  { %v4000_v61 = vmul.f32 1.442695, %v3999_v52 }
0x1546   :  { %12339 = vpow2.f32 %v4000_v61 }
0x1550   :  { %v12340_v53 = vpop.eup %12339 }
0x1551   :  { %v4002_v56 = vsel %vm1896_vm4, %v12340_v53, 0.0 }
0x1552   :  { %4003 = vadd.xlane.f32.xlu0 %v4002_v56 }
0x15df   :  { %v4004_v62 = vpop.xlane.xlu0 %4003 }
0x15e0   :  { %12341 = vrcp.f32 %v4004_v62 }
0x15ea   :  { %v12342_v0 = vpop.eup %12341 }
0x15eb   :  { %v4006_v21 = vmul.f32 %v12342_v0, %v12340_v53 }
0x15ed   :  { %v4007_v7 = vpack.c.bf16 %v4006_v21, %v4006_v21 }
0x15ef   :  { %11215 = vmatmul.mubr.msk.bf16.vlgmr.msra.gmra.mrb[40].mxu0 %vm1909_vm6, %v4007_v7 }
0x15f0   :  { %11219 = vmatpush3.bf16.msra.mxu0 %v12297_v5  ;;  %11234 = vmatprep.mubr.msk.bf16.mxu0 %vm13445_vm0, %v13444_v1 }
0x15f1   :  { %11220 = vmatprep.subr.bf16.mxu0 %v13444_v1 }
0x15f4   :  { %11221 = vmatpush3.bf16.msra.mxu0 %v12298_v8 }
0x15f5   :  { %11222 = vmatprep.subr.bf16.mxu0 %v13444_v1 }
0x15f8   :  { %11223 = vmatpush3.bf16.msra.mxu0 %v12299_v12 }
0x15f9   :  { %11224 = vmatprep.subr.bf16.mxu0 %v13444_v1 }
0x15fc   :  { %11225 = vmatpush3.bf16.msra.mxu0 %v12300_v9 }
0x15fd   :  { %11226 = vmatprep.subr.bf16.mxu0 %v13444_v1 }
0x1600   :  { %11227 = vmatpush3.bf16.msra.mxu0 %v12301_v10 }
0x1601   :  { %11228 = vmatprep.subr.bf16.mxu0 %v13444_v1 }
0x1604   :  { %11229 = vmatpush3.bf16.msra.mxu0 %v12302_v11 }
0x1605   :  { %11230 = vmatprep.subr.bf16.mxu0 %v13444_v1 }
0x1608   :  { %11231 = vmatpush3.bf16.msra.mxu0 %v12303_v13 }
0x1609   :  { %11232 = vmatprep.subr.bf16.mxu0 %v13444_v1 }
0x160c   :  { %11233 = vmatpush3.bf16.msra.mxu0 %v12304_v14 }
0x160d   :  { %4375 = vmatprep.subr.bf16.mxu0 %v12307_v22 }
0x16c2   :  { %v4048_v63 = vpop.f32.mrb[40].mxu0 }
0x16c3   :  { %v4070_v17 = vpack.c.bf16 %v4048_v63, %v4048_v63  ;;  %v11216_v18 = vpop.f32.mrb[41].mxu0 }
0x16c4   :  { %v4051_v20 = vpop.f32.mrb[42].mxu0 }
0x16c5   :  { %v11217_v23 = vpop.f32.mrb[43].mxu0  ;;  %11235 = vmatmul.mubr.bf16.vlgmr.msra.gmra.mrb[44].mxu0 %v4070_v17 }
0x16c6   :  { %4376 = vmatpush1.bf16.msra.mxu0 %v12305_v16  ;;  %4407 = vmatprep.mubr.bf16.mxu0 %v13446_v2 }
0x16c7   :  { %4377 = vmatprep.subr.bf16.mxu0 %v12310_v19 }
0x16ca   :  { %4378 = vmatpush1.bf16.msra.mxu0 %v12308_v30 }
0x16cb   :  { %4379 = vmatprep.subr.bf16.mxu0 %v12313_v25 }
0x16ce   :  { %4380 = vmatpush1.bf16.msra.mxu0 %v12311_v26 }
0x16cf   :  { %4381 = vmatprep.subr.bf16.mxu0 %v12316_v15 }
0x16d2   :  { %4382 = vmatpush1.bf16.msra.mxu0 %v12314_v27 }
0x16d3   :  { %4383 = vmatprep.subr.bf16.mxu0 %v12319_v31 }
0x16d6   :  { %4384 = vmatpush1.bf16.msra.mxu0 %v12317_v32 }
0x16d7   :  { %4385 = vmatprep.subr.bf16.mxu0 %v12322_v34 }
0x16da   :  { %4386 = vmatpush1.bf16.msra.mxu0 %v12320_v35 }
0x16db   :  { %4387 = vmatprep.subr.bf16.mxu0 %v12325_v24 }
0x16de   :  { %4388 = vmatpush1.bf16.msra.mxu0 %v12323_v36 }
0x16df   :  { %4389 = vmatprep.subr.bf16.mxu0 %v12328_v37 }
0x16e2   :  { %4390 = vmatpush1.bf16.msra.mxu0 %v12326_v29 }
0x1798   :  { %v4169_v38 = vpop.f32.mrb[44].mxu0 }
0x1799   :  { %v4258_v33 = vadd.f32 %v14179_v43, %v4169_v38  ;;  %v11236_v42 = vpop.f32.mrb[45].mxu0 }
0x179a   :  { %v4172_v44 = vpop.f32.mrb[46].mxu0 }
0x179b   :  { %v4264_v60 = vadd.f32 %v4263_v39, %v4258_v33  ;;  %v11237_v45 = vpop.f32.mrb[47].mxu0 }
0x179d   :  { %12343 = vtanh.f32 %v4264_v60 }
0x17a7   :  { %v12344_v46 = vpop.eup %12343 }
0x17a8   :  { %v4266_v47 = vpack.c.bf16 %v12344_v46, %v12344_v46 }
0x17aa   :  { %4408 = vmatmul.mubr.bf16.vlgmr.msra.gmra.mrb[48].mxu0 %v4266_v47 }
0x187d   :  { %v4409_v6 = vpop.f32.mrb[48].mxu0 }
0x187e   :  { %v4410_v52 = vadd.f32 %v4409_v6, %v4368_v49  ;;  %v4411_v61 = vpop.f32.mrb[49].mxu0 }
0x187f   :  { %v4412_v43 = vadd.f32 %v4411_v61, %v4372_v50  ;;  %v4413_v53 = vpop.f32.mrb[50].mxu0 }
0x1880   :  { %v4414_v56 = vpop.f32.mrb[51].mxu0  ;;  %v4416_v59 = vsel %vm2319_vm7, %v4410_v52, -inf }
0x1881   :  { %v4417_v62 = vsel %vm2319_vm7, %v4412_v43, -inf }
0x1882   :  { %v4418_v0 = vmax.f32 %v4416_v59, %v4417_v62 }
0x1884   :  { %4419 = vmax.xlane.f32.xlu1 %v4418_v0 }
0x1911   :  { %v4420_v21 = vpop.xlane.xlu1 %4419 }
0x1912   :  { %v4421_v5 = vsub.f32 %v4410_v52, %v4420_v21  ;;  %v4422_v7 = vsub.f32 %v4412_v43, %v4420_v21  ;;  %vm4434_vm9 = vcmp.eq.f32.partialorder %v4410_v52, %v4420_v21  ;;  %vm4435_vm10 = vcmp.eq.f32.partialorder %v4412_v43, %v4420_v21 }
0x1913   :  { %v4436_v8 = vsel %vm4434_vm9, %v13745_v3, 256  ;;  %v4437_v12 = vsel %vm4435_vm10, %v13748_v4, 256 }
0x1914   :  { %v4438_v9 = vsel %vm2319_vm7, %v4436_v8, 2147483647  ;;  %v4439_v10 = vsel %vm2319_vm7, %v4437_v12, 2147483647  ;;  %v4423_v11 = vmul.f32 1.442695, %v4421_v5 }
0x1915   :  { %vm4440_vm11 = vcmp.lt.s32.totalorder %v4438_v9, %v4439_v10  ;;  %v4425_v13 = vmul.f32 1.442695, %v4422_v7 }
0x1916   :  { %v4441_v14 = vsel %vm4440_vm11, %v4438_v9, %v4439_v10  ;;  %12345 = vpow2.f32 %v4423_v11 }
0x1917   :  { %v4443_v22 = vshra.s32 %v4441_v14, 16  ;;  %12347 = vpow2.f32 %v4425_v13  ;;  %v4442_v23 = vand.u32 65535, %v4441_v14 }
0x1919   :  { %v4445_v63 = vcvt.s32.f32 %v4443_v22  ;;  %v4444_v25 = vcvt.s32.f32 %v4442_v23 }
0x191b   :  { %4446 = vmin.xlane.f32.xlu1 %v4445_v63 }
0x1920   :  { %v12346_v16 = vpop.eup %12345 }
0x1921   :  { %v12348_v17 = vpop.eup %12347  ;;  %v4427_v18 = vsel %vm2319_vm7, %v12346_v16, 0.0 }
0x1922   :  { %v4428_v19 = vsel %vm2319_vm7, %v12348_v17, 0.0 }
0x1923   :  { %v4429_v20 = vadd.f32 %v4428_v19, %v4427_v18 }
0x1925   :  { %4430 = vadd.xlane.f32.xlu0 %v4429_v20 }
0x19a8   :  { %v4447_v30 = vpop.xlane.xlu1 %4446 }
0x19a9   :  { %vm4448_vm12 = vcmp.eq.f32.partialorder %v4445_v63, %v4447_v30  ;;  %v4453_v32 = vcvt.f32.s32 %v4447_v30 }
0x19aa   :  { %v4449_v26 = vsel %vm4448_vm12, %v4444_v25, inf }
0x19ab   :  { %4450 = vmin.xlane.f32.xlu1 %v4449_v26  ;;  %v4454_v35 = vshll.u32 %v4453_v32, 16 }
0x19b2   :  { %v4431_v15 = vpop.xlane.xlu0 %4430 }
0x19b3   :  { %12349 = vrcp.f32 %v4431_v15 }
0x19bd   :  { %v12350_v27 = vpop.eup %12349 }
0x19be   :  { %v14218_v31 = vsel %vm4468_vm14, %v12350_v27, %v14108_v41 }
0x1a38   :  { %v4451_v34 = vpop.xlane.xlu1 %4450 }
0x1a39   :  { %v4452_v24 = vcvt.f32.s32 %v4451_v34 }
0x1a3b   :  { %v4455_v36 = vadd.s32 %v4454_v35, %v4452_v24 }
0x1a3d   :  { %v14221_v37 = vsel %vm4468_vm14, %v4455_v36, %v14111_v51  ;;  %4456 = vst.msk [vmem:[#allocation7] sm:$0x1] %vm2360_vm13, %v4455_v36 }
0x1a3e   :  { %13258 = shalt.err (!%p14000_p10)  }
0x1a3f   :  { %4467 = dma.vmem_to_smem %s13991_s2, 16, %s13451_s0, [#allocation9] }
0x1a40   :  { %13395 = dma.done.wait [#allocation9], 16 }
0x1a41   :  { %13396 = vsyncadd [#allocation9], 4294967280 }
0x1a42   :  { %4473 = sfence }
0x1a43   :  { %v12351_v41 = vld [vmem:[#allocation22 + $0x4] ss:$12 sps:$4 sm:$0xff]   ;;  %11258 = vmatprep.subr.bf16.mxu0 %v13444_v1  ;;  %4687 = vmatprep.mubr.bf16.mxu1 %v13446_v2  ;;  %v12353_v29 = vld [vmem:[#allocation22] ss:$12 sps:$4 sm:$0xff]   ;;  %v12354_v51 = vld [vmem:[#allocation22 + $0x1c] ss:$12 sps:$4 sm:$0xff]  }
0x1a44   :  { %11274 = vmatprep.mubr.msk.bf16.mxu0 %vm13445_vm0, %v13444_v1  ;;  %4655 = vmatprep.subr.bf16.mxu1 %v12351_v41  ;;  %v12356_v38 = vld [vmem:[#allocation22 + $0x18] ss:$12 sps:$4 sm:$0xff]   ;;  %v12357_v39 = vld [vmem:[#allocation22 + $0x34] ss:$12 sps:$4 sm:$0xff]   ;;  %v12359_v33 = vld [vmem:[#allocation22 + $0x30] ss:$12 sps:$4 sm:$0xff]  }
0x1a45   :  { %4656 = vmatpush1.bf16.msra.mxu1 %v12353_v29  ;;  %v12360_v42 = vld [vmem:[#allocation22 + $0x4c] ss:$12 sps:$4 sm:$0xff]   ;;  %v12371_v44 = vld [vmem:[#allocation22 + $0x8] ss:$12 sps:$4 sm:$0xff]   ;;  %v12363_v45 = vld [vmem:[#allocation22 + $0x64] ss:$12 sps:$4 sm:$0xff]  }
0x1a46   :  { %4657 = vmatprep.subr.bf16.mxu1 %v12354_v51  ;;  %v12362_v60 = vld [vmem:[#allocation22 + $0x48] ss:$12 sps:$4 sm:$0xff]   ;;  %11259 = vmatpush3.bf16.msra.mxu0 %v12371_v44  ;;  %v12375_v46 = vld [vmem:[#allocation22 + $0x20] ss:$12 sps:$4 sm:$0xff]   ;;  %s4474_s7 = sld [smem:[#allocation8]]  ;;  %v12418_v29 = vld [vmem:[#allocation25 + $0x18] sm:$0xff]  }
0x1a47   :  { %11260 = vmatprep.subr.bf16.mxu0 %v13444_v1  ;;  %v12365_v47 = vld [vmem:[#allocation22 + $0x60] ss:$12 sps:$4 sm:$0xff]   ;;  %v12377_v48 = vld [vmem:[#allocation22 + $0x38] ss:$12 sps:$4 sm:$0xff]   ;;  %v12366_v49 = vld [vmem:[#allocation22 + $0x7c] ss:$12 sps:$4 sm:$0xff]  }
0x1a48   :  { %v12368_v50 = vld [vmem:[#allocation22 + $0x78] ss:$12 sps:$4 sm:$0xff]   ;;  %v12381_v6 = vld [vmem:[#allocation22 + $0x50] ss:$12 sps:$4 sm:$0xff]   ;;  %v12369_v52 = vld [vmem:[#allocation22 + $0x94] ss:$12 sps:$4 sm:$0xff]  }
0x1a49   :  { %4658 = vmatpush1.bf16.msra.mxu1 %v12356_v38  ;;  %v12372_v61 = vld [vmem:[#allocation22 + $0x90] ss:$12 sps:$4 sm:$0xff]   ;;  %v12385_v43 = vld [vmem:[#allocation22 + $0x68] ss:$12 sps:$4 sm:$0xff]   ;;  %v12373_v53 = vld [vmem:[#allocation22 + $0xac] ss:$12 sps:$4 sm:$0xff]  }
0x1a4a   :  { %4659 = vmatprep.subr.bf16.mxu1 %v12357_v39  ;;  %11261 = vmatpush3.bf16.msra.mxu0 %v12375_v46  ;;  %v12376_v56 = vld [vmem:[#allocation22 + $0xa8] ss:$12 sps:$4 sm:$0xff]   ;;  %v12389_v62 = vld [vmem:[#allocation22 + $0x80] ss:$12 sps:$4 sm:$0xff]   ;;  %v12380_v0 = vld [vmem:[#allocation23 + $0x4] ss:$12 sps:$4 sm:$0xff]  }
0x1a4b   :  { %11262 = vmatprep.subr.bf16.mxu0 %v13444_v1  ;;  %v12378_v21 = vld [vmem:[#allocation23] ss:$12 sps:$4 sm:$0xff]   ;;  %v12393_v7 = vld [vmem:[#allocation22 + $0x98] ss:$12 sps:$4 sm:$0xff]   ;;  %v12384_v8 = vld [vmem:[#allocation23 + $0x1c] ss:$12 sps:$4 sm:$0xff]  }
0x1a4c   :  { %s4475_s4 = scalar_lea.vmem [#allocation20], %s4474_s7  ;;  %v12382_v12 = vld [vmem:[#allocation23 + $0x18] ss:$12 sps:$4 sm:$0xff]   ;;  %v12397_v9 = vld [vmem:[#allocation22 + $0xb0] ss:$12 sps:$4 sm:$0xff]   ;;  %v12416_v36 = vld [vmem:[#allocation25 + $0x8] sm:$0xff]  }
0x1a4d   :  { %4660 = vmatpush1.bf16.msra.mxu1 %v12359_v33  ;;  %v4476_v59 = vld [vmem:[%s4475_s4] sm:$0x1]  ;;  %v12386_v11 = vld [vmem:[#allocation23 + $0x30] ss:$12 sps:$4 sm:$0xff]   ;;  %v12392_v14 = vld [vmem:[#allocation23 + $0x4c] ss:$12 sps:$4 sm:$0xff]  }
0x1a4e   :  { %4661 = vmatprep.subr.bf16.mxu1 %v12360_v42  ;;  %11263 = vmatpush3.bf16.msra.mxu0 %v12377_v48  ;;  %v4477_v5 = vpack.c.bf16 %v4476_v59, %v4476_v59  ;;  %v12388_v10 = vld [vmem:[#allocation23 + $0x34] ss:$12 sps:$4 sm:$0xff]   ;;  %v12396_v16 = vld [vmem:[#allocation23 + $0x64] ss:$12 sps:$4 sm:$0xff]   ;;  %v12400_v19 = vld [vmem:[#allocation23 + $0x7c] ss:$12 sps:$4 sm:$0xff]  }
0x1a4f   :  { %11264 = vmatprep.subr.bf16.mxu0 %v13444_v1  ;;  %v12404_v13 = vld [vmem:[#allocation23 + $0x8] ss:$12 sps:$4 sm:$0xff]   ;;  %v12408_v63 = vld [vmem:[#allocation23 + $0x20] ss:$12 sps:$4 sm:$0xff]   ;;  %v12409_v18 = vld [vmem:[#allocation23 + $0x38] ss:$12 sps:$4 sm:$0xff]  }
0x1a50   :  { %v12390_v22 = vld [vmem:[#allocation23 + $0x48] ss:$12 sps:$4 sm:$0xff]   ;;  %v12394_v17 = vld [vmem:[#allocation23 + $0x60] ss:$12 sps:$4 sm:$0xff]   ;;  %v12398_v20 = vld [vmem:[#allocation23 + $0x78] ss:$12 sps:$4 sm:$0xff]  }
0x1a51   :  { %4662 = vmatpush1.bf16.msra.mxu1 %v12362_v60  ;;  %v12410_v23 = vld [vmem:[#allocation23 + $0x50] ss:$12 sps:$4 sm:$0xff]   ;;  %v12403_v30 = vld [vmem:[#allocation23 + $0x94] ss:$12 sps:$4 sm:$0xff]   ;;  %v12407_v15 = vld [vmem:[#allocation23 + $0xac] ss:$12 sps:$4 sm:$0xff]  }
0x1a52   :  { %4663 = vmatprep.subr.bf16.mxu1 %v12363_v45  ;;  %11265 = vmatpush3.bf16.msra.mxu0 %v12381_v6  ;;  %v12401_v25 = vld [vmem:[#allocation23 + $0x90] ss:$12 sps:$4 sm:$0xff]   ;;  %v12411_v26 = vld [vmem:[#allocation23 + $0x68] ss:$12 sps:$4 sm:$0xff]   ;;  %v12412_v32 = vld [vmem:[#allocation23 + $0x80] ss:$12 sps:$4 sm:$0xff]  }
0x1a53   :  { %11266 = vmatprep.subr.bf16.mxu0 %v13444_v1  ;;  %v12405_v27 = vld [vmem:[#allocation23 + $0xa8] ss:$12 sps:$4 sm:$0xff]   ;;  %v12413_v34 = vld [vmem:[#allocation23 + $0x98] ss:$12 sps:$4 sm:$0xff]   ;;  %v12414_v35 = vld [vmem:[#allocation23 + $0xb0] ss:$12 sps:$4 sm:$0xff]  }
0x1a54   :  { %v12415_v24 = vld [vmem:[#allocation25] sm:$0xff]   ;;  %v12417_v41 = vld [vmem:[#allocation25 + $0x10] sm:$0xff]   ;;  %v12420_v38 = vld [vmem:[#allocation25 + $0x28] sm:$0xff]   ;;  %vm5515_vm9 = vcmp.eq.s32.totalorder %v13745_v3, 3 }
0x1a55   :  { %4664 = vmatpush1.bf16.msra.mxu1 %v12365_v47  ;;  %v14262_v51 = vld [vmem:[#allocation6] sm:$0xf] }
0x1a56   :  { %4665 = vmatprep.subr.bf16.mxu1 %v12366_v49  ;;  %11267 = vmatpush3.bf16.msra.mxu0 %v12385_v43  ;;  %v12421_v39 = vld [vmem:[#allocation25 + $0x30] sm:$0xff]   ;;  %v12422_v33 = vld [vmem:[#allocation25 + $0x38] sm:$0xff]  }
0x1a57   :  { %11268 = vmatprep.subr.bf16.mxu0 %v13444_v1  ;;  %v4510_v46 = vld [vmem:[%s14805_s13] sm:$0x7] }
0x1a58   :  { %v4643_v47 = vrot.slane %v4510_v46, %v13778_v57  ;;  %v4647_v49 = vrot.slane %v4510_v46, %v13781_v58 }
0x1a59   :  { %4666 = vmatpush1.bf16.msra.mxu1 %v12368_v50 }
0x1a5a   :  { %4667 = vmatprep.subr.bf16.mxu1 %v12369_v52  ;;  %11269 = vmatpush3.bf16.msra.mxu0 %v12389_v62 }
0x1a5b   :  { %11270 = vmatprep.subr.bf16.mxu0 %v13444_v1 }
0x1a5d   :  { %4668 = vmatpush1.bf16.msra.mxu1 %v12372_v61 }
0x1a5e   :  { %4669 = vmatprep.subr.bf16.mxu1 %v12373_v53  ;;  %11271 = vmatpush3.bf16.msra.mxu0 %v12393_v7 }
0x1a5f   :  { %11272 = vmatprep.subr.bf16.mxu0 %v13444_v1 }
0x1a61   :  { %4670 = vmatpush1.bf16.msra.mxu1 %v12376_v56 }
0x1a62   :  { %4896 = vmatprep.subr.bf16.mxu1 %v12380_v0  ;;  %11273 = vmatpush3.bf16.msra.mxu0 %v12397_v9  ;;  %v4651_v9 = vrot.slane %v4510_v46, %v13772_v55 }
0x1a63   :  { %11278 = vmatprep.subr.bf16.mxu0 %v13444_v1 }
0x1a64   :  { %4688 = vmatmul.mubr.bf16.vlgmr.msra.gmra.mrb[44].mxu1 %v4477_v5 }
0x1a65   :  { %4897 = vmatpush1.bf16.msra.mxu1 %v12378_v21  ;;  %4928 = vmatprep.mubr.bf16.mxu1 %v13446_v2 }
0x1a66   :  { %4898 = vmatprep.subr.bf16.mxu1 %v12384_v8  ;;  %11275 = vmatmul.mubr.bf16.vlgmr.msra.gmra.mrb[52].mxu0 %v4477_v5 }
0x1a67   :  { %11279 = vmatpush3.bf16.msra.mxu0 %v12404_v13  ;;  %11294 = vmatprep.mubr.msk.bf16.mxu0 %vm13445_vm0, %v13444_v1 }
0x1a68   :  { %11280 = vmatprep.subr.bf16.mxu0 %v13444_v1 }
0x1a69   :  { %4899 = vmatpush1.bf16.msra.mxu1 %v12382_v12  ;;  %v4991_v12 = vld [vmem:[%s14806_s14] sm:$0x1] }
0x1a6a   :  { %4900 = vmatprep.subr.bf16.mxu1 %v12388_v10 }
0x1a6b   :  { %11281 = vmatpush3.bf16.msra.mxu0 %v12408_v63 }
0x1a6c   :  { %11282 = vmatprep.subr.bf16.mxu0 %v13444_v1 }
0x1a6d   :  { %4901 = vmatpush1.bf16.msra.mxu1 %v12386_v11 }
0x1a6e   :  { %4902 = vmatprep.subr.bf16.mxu1 %v12392_v14 }
0x1a6f   :  { %11283 = vmatpush3.bf16.msra.mxu0 %v12409_v18 }
0x1a70   :  { %11284 = vmatprep.subr.bf16.mxu0 %v13444_v1 }
0x1a71   :  { %4903 = vmatpush1.bf16.msra.mxu1 %v12390_v22 }
0x1a72   :  { %4904 = vmatprep.subr.bf16.mxu1 %v12396_v16 }
0x1a73   :  { %11285 = vmatpush3.bf16.msra.mxu0 %v12410_v23 }
0x1a74   :  { %11286 = vmatprep.subr.bf16.mxu0 %v13444_v1 }
0x1a75   :  { %4905 = vmatpush1.bf16.msra.mxu1 %v12394_v17 }
0x1a76   :  { %4906 = vmatprep.subr.bf16.mxu1 %v12400_v19 }
0x1a77   :  { %11287 = vmatpush3.bf16.msra.mxu0 %v12411_v26 }
0x1a78   :  { %11288 = vmatprep.subr.bf16.mxu0 %v13444_v1 }
0x1a79   :  { %4907 = vmatpush1.bf16.msra.mxu1 %v12398_v20 }
0x1a7a   :  { %4908 = vmatprep.subr.bf16.mxu1 %v12403_v30 }
0x1a7b   :  { %11289 = vmatpush3.bf16.msra.mxu0 %v12412_v32 }
0x1a7c   :  { %11290 = vmatprep.subr.bf16.mxu0 %v13444_v1 }
0x1a7d   :  { %4909 = vmatpush1.bf16.msra.mxu1 %v12401_v25 }
0x1a7e   :  { %4910 = vmatprep.subr.bf16.mxu1 %v12407_v15 }
0x1a7f   :  { %11291 = vmatpush3.bf16.msra.mxu0 %v12413_v34 }
0x1a80   :  { %11292 = vmatprep.subr.bf16.mxu0 %v13444_v1 }
0x1a81   :  { %4911 = vmatpush1.bf16.msra.mxu1 %v12405_v27 }
0x1a82   :  { %11298 = vmatprep.subr.bf16.mxu1 %v13444_v1 }
0x1a83   :  { %11293 = vmatpush3.bf16.msra.mxu0 %v12414_v35 }
0x1a84   :  { %4929 = vmatmul.mubr.bf16.vlgmr.msra.gmra.mrb[44].mxu1 %v14173_v54  ;;  %11330 = vmatprep.subr.bf16.mxu0 %v13444_v1 }
0x1a85   :  { %11300 = vmatprep.mubr.msk.bf16.mxu1 %vm13445_vm0, %v13444_v1 }
0x1a86   :  { %11295 = vmatmul.mubr.bf16.vlgmr.msra.gmra.mrb[56].mxu0 %v14173_v54  ;;  %v12419_v54 = vld [vmem:[#allocation25 + $0x20] sm:$0xff]  }
0x1a87   :  { %11346 = vmatprep.mubr.msk.bf16.mxu0 %vm13445_vm0, %v13444_v1  ;;  %11331 = vmatpush3.bf16.msra.mxu0 %v12415_v24 }
0x1a88   :  { %11332 = vmatprep.subr.bf16.mxu0 %v13444_v1 }
0x1a8a   :  { %11299 = vmatpush3.bf16.xpose.msra.mxu1 %v14262_v51 }
0x1a8b   :  { %11333 = vmatpush3.bf16.msra.mxu0 %v12416_v36  ;;  %11304 = vmatprep.subr.bf16.mxu1 %v13444_v1 }
0x1a8c   :  { %11334 = vmatprep.subr.bf16.mxu0 %v13444_v1 }
0x1a8f   :  { %11335 = vmatpush3.bf16.msra.mxu0 %v12417_v41 }
0x1a90   :  { %11336 = vmatprep.subr.bf16.mxu0 %v13444_v1 }
0x1a93   :  { %11337 = vmatpush3.bf16.msra.mxu0 %v12418_v29 }
0x1a94   :  { %11338 = vmatprep.subr.bf16.mxu0 %v13444_v1 }
0x1a97   :  { %11339 = vmatpush3.bf16.msra.mxu0 %v12419_v54 }
0x1a98   :  { %11340 = vmatprep.subr.bf16.mxu0 %v13444_v1 }
0x1a9b   :  { %11341 = vmatpush3.bf16.msra.mxu0 %v12420_v38 }
0x1a9c   :  { %11342 = vmatprep.subr.bf16.mxu0 %v13444_v1 }
0x1a9f   :  { %11343 = vmatpush3.bf16.msra.mxu0 %v12421_v39 }
0x1aa0   :  { %11344 = vmatprep.subr.bf16.mxu0 %v13444_v1 }
0x1aa3   :  { %11345 = vmatpush3.bf16.msra.mxu0 %v12422_v33  ;;  %v5059_v33 = vsel %vm1913_vm5, %v14262_v51, 0  ;;  %v12425_v51 = vld [vmem:[#allocation26 + $0x10] sm:$0xff]  }
0x1b39   :  { %v4730_v42 = vpop.f32.mrb[52].mxu0 }
0x1b3a   :  { %v11276_v44 = vpop.f32.mrb[53].mxu0  ;;  %v4731_v14 = vadd.f32 %v4730_v42, %v4651_v9  ;;  %v12440_v9 = vld [vmem:[#allocation28 + $0x30] ss:$8 sps:$4 sm:$0xff]  }
0x1b3b   :  { %v4733_v60 = vpop.f32.mrb[54].mxu0 }
0x1b3c   :  { %v11277_v45 = vpop.f32.mrb[55].mxu0 }
0x1b3d   :  { %v12423_v45 = vld [vmem:[#allocation26] sm:$0xff]  }
0x1b57   :  { %v4930_v48 = vpop.f32.mrb[44].mxu1 }
0x1b58   :  { %v11724_v50 = vadd.f32 %v4930_v48, %v4643_v47  ;;  %v4932_v6 = vpop.f32.mrb[45].mxu1  ;;  %v12424_v47 = vld [vmem:[#allocation26 + $0x8] sm:$0xff]   ;;  %v12426_v48 = vld [vmem:[#allocation26 + $0x18] sm:$0xff]  }
0x1b59   :  { %v4934_v52 = vpop.f32.mrb[46].mxu1  ;;  %v11725_v53 = vadd.f32 %v4932_v6, %v4647_v49  ;;  %v4971_v59 = vpop.f32.mrb[56].mxu0  ;;  %v12427_v49 = vld [vmem:[#allocation26 + $0x20] sm:$0xff]   ;;  %v12429_v6 = vld [vmem:[#allocation26 + $0x30] sm:$0xff]  }
0x1b5a   :  { %v10178_v61 = vmul.f32 -1.442695, %v11724_v50  ;;  %v4935_v43 = vpop.f32.mrb[47].mxu1  ;;  %v11296_v62 = vpop.f32.mrb[57].mxu0  ;;  %v4992_v11 = vadd.f32 %v4991_v12, %v4971_v59  ;;  %v12428_v50 = vld [vmem:[#allocation26 + $0x28] sm:$0xff]   ;;  %v12430_v52 = vld [vmem:[#allocation26 + $0x38] sm:$0xff]  }
0x1b5b   :  { %v10179_v56 = vmul.f32 -1.442695, %v11725_v53  ;;  %v4974_v0 = vpop.f32.mrb[58].mxu0  ;;  %v12431_v53 = vld [vmem:[#allocation28] ss:$8 sps:$4 sm:$0xff]  }
0x1b5c   :  { %12455 = vpow2.f32 %v10178_v61  ;;  %v11297_v21 = vpop.f32.mrb[59].mxu0  ;;  %v12433_v61 = vld [vmem:[#allocation28 + $0x4] ss:$8 sps:$4 sm:$0xff]   ;;  %v12436_v62 = vld [vmem:[#allocation28 + $0x14] ss:$8 sps:$4 sm:$0xff]  }
0x1b5d   :  { %12457 = vpow2.f32 %v10179_v56  ;;  %v12442_v12 = vld [vmem:[#allocation28 + $0x34] ss:$8 sps:$4 sm:$0xff]  }
0x1b66   :  { %v12456_v5 = vpop.eup %12455 }
0x1b67   :  { %v4981_v7 = vadd.f32 1.0, %v12456_v5  ;;  %v12458_v8 = vpop.eup %12457  ;;  %v12434_v5 = vld [vmem:[#allocation28 + $0x10] ss:$8 sps:$4 sm:$0xff]  }
0x1b68   :  { %v4988_v10 = vadd.f32 1.0, %v12458_v8  ;;  %v12437_v8 = vld [vmem:[#allocation28 + $0x20] ss:$8 sps:$4 sm:$0xff]  }
0x1b69   :  { %12459 = vrcp.f32 %v4981_v7  ;;  %v12439_v7 = vld [vmem:[#allocation28 + $0x24] ss:$8 sps:$4 sm:$0xff]  }
0x1b6a   :  { %12461 = vrcp.f32 %v4988_v10  ;;  %v12445_v10 = vld [vmem:[#allocation28 + $0x44] ss:$8 sps:$4 sm:$0xff]  }
0x1b73   :  { %v12460_v13 = vpop.eup %12459 }
0x1b74   :  { %v4993_v22 = vmul.f32 %v12460_v13, %v4992_v11  ;;  %v12462_v16 = vpop.eup %12461  ;;  %v12443_v11 = vld [vmem:[#allocation28 + $0x40] ss:$8 sps:$4 sm:$0xff]   ;;  %v12448_v13 = vld [vmem:[#allocation28 + $0x54] ss:$8 sps:$4 sm:$0xff]  }
0x1b75   :  { %v4996_v17 = vsub.f32 1.0, %v12462_v16  ;;  %v4998_v20 = vmul.f32 %v12462_v16, %v14169_v40  ;;  %v12454_v16 = vld [vmem:[#allocation28 + $0x74] ss:$8 sps:$4 sm:$0xff]  }
0x1b76   :  { %v4994_v63 = vadd.f32 %v4993_v22, %v4731_v14  ;;  %v12446_v14 = vld [vmem:[#allocation28 + $0x50] ss:$8 sps:$4 sm:$0xff]   ;;  %v12451_v22 = vld [vmem:[#allocation28 + $0x64] ss:$8 sps:$4 sm:$0xff]  }
0x1b78   :  { %12463 = vtanh.f32 %v4994_v63  ;;  %v12449_v63 = vld [vmem:[#allocation28 + $0x60] ss:$8 sps:$4 sm:$0xff]  }
0x1b82   :  { %v12464_v18 = vpop.eup %12463 }
0x1b83   :  { %v4997_v19 = vmul.f32 %v12464_v18, %v4996_v17  ;;  %v12452_v17 = vld [vmem:[#allocation28 + $0x70] ss:$8 sps:$4 sm:$0xff]  }
0x1b85   :  { %v14279_v23 = vadd.f32 %v4998_v20, %v4997_v19  ;;  %v5310_v19 = vld [vmem:[%s14809_s17] sm:$0x1] }
0x1b87   :  { %v14283_v30 = vpack.c.bf16 %v14279_v23, %v14279_v23 }
0x1b89   :  { %11301 = vmatmul.mubr.bf16.vlgmr.msra.gmra.mrb[48].mxu1 %v14283_v30  ;;  %11347 = vmatmul.mubr.bf16.vlgmr.msra.gmra.mrb[60].mxu0 %v14283_v30 }
0x1b8a   :  { %11306 = vmatprep.mubr.msk.bf16.mxu1 %vm13445_vm0, %v13444_v1  ;;  %11305 = vmatpush3.bf16.msra.mxu1 %v5059_v33 }
0x1b8b   :  { %11310 = vmatprep.subr.bf16.mxu1 %v13444_v1 }
0x1c5c   :  { %v5036_v25 = vpop.f32.mrb[48].mxu1  ;;  %v14289_v26 = vpop.f32.mrb[60].mxu0 }
0x1c5d   :  { %v5042_v15 = vsel %vm13947_vm3, %v5036_v25, -1e+30  ;;  %v11302_v40 = vpop.f32.mrb[49].mxu1  ;;  %v11348_v27 = vpop.f32.mrb[61].mxu0 }
0x1c5e   :  { %v5039_v32 = vpop.f32.mrb[50].mxu1  ;;  %v5307_v34 = vpop.f32.mrb[62].mxu0  ;;  %v5043_v35 = vsel %vm1896_vm4, %v5042_v15, -inf }
0x1c5f   :  { %v11349_v24 = vpop.f32.mrb[63].mxu0  ;;  %5044 = vmax.xlane.f32.xlu0 %v5043_v35  ;;  %v11303_v36 = vpop.f32.mrb[51].mxu1  ;;  %v5330_v35 = vld [vmem:[%s14811_s19] sm:$0x3] }
0x1c60   :  { %v5415_v24 = vrot.slane %v5330_v35, %v13778_v57  ;;  %v5419_v36 = vrot.slane %v5330_v35, %v13781_v58 }
0x1cec   :  { %v5045_v41 = vpop.xlane.xlu0 %5044 }
0x1ced   :  { %v5046_v29 = vsub.f32 %v5042_v15, %v5045_v41 }
0x1cef   :  { %v5047_v54 = vmul.f32 1.442695, %v5046_v29 }
0x1cf1   :  { %12465 = vpow2.f32 %v5047_v54 }
0x1cfb   :  { %v12466_v38 = vpop.eup %12465 }
0x1cfc   :  { %v5049_v39 = vsel %vm1896_vm4, %v12466_v38, 0.0 }
0x1cfd   :  { %5050 = vadd.xlane.f32.xlu0 %v5049_v39 }
0x1d8a   :  { %v5051_v42 = vpop.xlane.xlu0 %5050 }
0x1d8b   :  { %12467 = vrcp.f32 %v5051_v42 }
0x1d95   :  { %v12468_v44 = vpop.eup %12467 }
0x1d96   :  { %v5053_v60 = vmul.f32 %v12468_v44, %v12466_v38 }
0x1d98   :  { %v5054_v46 = vpack.c.bf16 %v5053_v60, %v5053_v60 }
0x1d9a   :  { %11307 = vmatmul.mubr.msk.bf16.vlgmr.msra.gmra.mrb[52].mxu1 %vm1909_vm6, %v5054_v46 }
0x1d9b   :  { %11311 = vmatpush3.bf16.msra.mxu1 %v12423_v45  ;;  %11326 = vmatprep.mubr.msk.bf16.mxu1 %vm13445_vm0, %v13444_v1 }
0x1d9c   :  { %11312 = vmatprep.subr.bf16.mxu1 %v13444_v1 }
0x1d9f   :  { %11313 = vmatpush3.bf16.msra.mxu1 %v12424_v47 }
0x1da0   :  { %11314 = vmatprep.subr.bf16.mxu1 %v13444_v1 }
0x1da3   :  { %11315 = vmatpush3.bf16.msra.mxu1 %v12425_v51 }
0x1da4   :  { %11316 = vmatprep.subr.bf16.mxu1 %v13444_v1 }
0x1da7   :  { %11317 = vmatpush3.bf16.msra.mxu1 %v12426_v48 }
0x1da8   :  { %11318 = vmatprep.subr.bf16.mxu1 %v13444_v1 }
0x1dab   :  { %11319 = vmatpush3.bf16.msra.mxu1 %v12427_v49 }
0x1dac   :  { %11320 = vmatprep.subr.bf16.mxu1 %v13444_v1 }
0x1daf   :  { %11321 = vmatpush3.bf16.msra.mxu1 %v12428_v50 }
0x1db0   :  { %11322 = vmatprep.subr.bf16.mxu1 %v13444_v1 }
0x1db3   :  { %11323 = vmatpush3.bf16.msra.mxu1 %v12429_v6 }
0x1db4   :  { %11324 = vmatprep.subr.bf16.mxu1 %v13444_v1 }
0x1db7   :  { %11325 = vmatpush3.bf16.msra.mxu1 %v12430_v52 }
0x1db8   :  { %5422 = vmatprep.subr.bf16.mxu1 %v12433_v61 }
0x1e6d   :  { %v5095_v43 = vpop.f32.mrb[52].mxu1 }
0x1e6e   :  { %v5117_v56 = vpack.c.bf16 %v5095_v43, %v5095_v43  ;;  %v11308_v59 = vpop.f32.mrb[53].mxu1 }
0x1e6f   :  { %v5098_v0 = vpop.f32.mrb[54].mxu1 }
0x1e70   :  { %v11309_v21 = vpop.f32.mrb[55].mxu1  ;;  %11327 = vmatmul.mubr.bf16.vlgmr.msra.gmra.mrb[56].mxu1 %v5117_v56 }
0x1e71   :  { %5423 = vmatpush1.bf16.msra.mxu1 %v12431_v53  ;;  %5454 = vmatprep.mubr.bf16.mxu1 %v13446_v2 }
0x1e72   :  { %5424 = vmatprep.subr.bf16.mxu1 %v12436_v62 }
0x1e75   :  { %5425 = vmatpush1.bf16.msra.mxu1 %v12434_v5 }
0x1e76   :  { %5426 = vmatprep.subr.bf16.mxu1 %v12439_v7 }
0x1e79   :  { %5427 = vmatpush1.bf16.msra.mxu1 %v12437_v8 }
0x1e7a   :  { %5428 = vmatprep.subr.bf16.mxu1 %v12442_v12 }
0x1e7d   :  { %5429 = vmatpush1.bf16.msra.mxu1 %v12440_v9 }
0x1e7e   :  { %5430 = vmatprep.subr.bf16.mxu1 %v12445_v10 }
0x1e81   :  { %5431 = vmatpush1.bf16.msra.mxu1 %v12443_v11 }
0x1e82   :  { %5432 = vmatprep.subr.bf16.mxu1 %v12448_v13 }
0x1e85   :  { %5433 = vmatpush1.bf16.msra.mxu1 %v12446_v14 }
0x1e86   :  { %5434 = vmatprep.subr.bf16.mxu1 %v12451_v22 }
0x1e89   :  { %5435 = vmatpush1.bf16.msra.mxu1 %v12449_v63 }
0x1e8a   :  { %5436 = vmatprep.subr.bf16.mxu1 %v12454_v16 }
0x1e8d   :  { %5437 = vmatpush1.bf16.msra.mxu1 %v12452_v17 }
0x1f43   :  { %v5216_v18 = vpop.f32.mrb[56].mxu1 }
0x1f44   :  { %v5305_v20 = vadd.f32 %v14289_v26, %v5216_v18  ;;  %v11328_v25 = vpop.f32.mrb[57].mxu1 }
0x1f45   :  { %v5219_v15 = vpop.f32.mrb[58].mxu1 }
0x1f46   :  { %v5311_v40 = vadd.f32 %v5310_v19, %v5305_v20  ;;  %v11329_v27 = vpop.f32.mrb[59].mxu1 }
0x1f48   :  { %12469 = vtanh.f32 %v5311_v40 }
0x1f52   :  { %v12470_v32 = vpop.eup %12469 }
0x1f53   :  { %v5313_v34 = vpack.c.bf16 %v12470_v32, %v12470_v32 }
0x1f55   :  { %5455 = vmatmul.mubr.bf16.vlgmr.msra.gmra.mrb[60].mxu1 %v5313_v34 }
0x2028   :  { %v5456_v41 = vpop.f32.mrb[60].mxu1 }
0x2029   :  { %v5457_v29 = vadd.f32 %v5456_v41, %v5415_v24  ;;  %v5458_v54 = vpop.f32.mrb[61].mxu1 }
0x202a   :  { %v5459_v26 = vadd.f32 %v5458_v54, %v5419_v36  ;;  %v5460_v38 = vpop.f32.mrb[62].mxu1 }
0x202b   :  { %v5461_v39 = vpop.f32.mrb[63].mxu1  ;;  %v5463_v33 = vsel %vm2319_vm7, %v5457_v29, -inf }
0x202c   :  { %v5464_v42 = vsel %vm2319_vm7, %v5459_v26, -inf }
0x202d   :  { %v5465_v44 = vmax.f32 %v5463_v33, %v5464_v42 }
0x202f   :  { %5466 = vmax.xlane.f32.xlu1 %v5465_v44 }
0x20bc   :  { %v5467_v60 = vpop.xlane.xlu1 %5466 }
0x20bd   :  { %v5468_v45 = vsub.f32 %v5457_v29, %v5467_v60  ;;  %v5469_v46 = vsub.f32 %v5459_v26, %v5467_v60  ;;  %vm5481_vm15 = vcmp.eq.f32.partialorder %v5457_v29, %v5467_v60  ;;  %vm5482_vm1 = vcmp.eq.f32.partialorder %v5459_v26, %v5467_v60 }
0x20be   :  { %v5483_v47 = vsel %vm5481_vm15, %v13745_v3, 256  ;;  %v5484_v51 = vsel %vm5482_vm1, %v13748_v4, 256 }
0x20bf   :  { %v5485_v48 = vsel %vm2319_vm7, %v5483_v47, 2147483647  ;;  %v5486_v49 = vsel %vm2319_vm7, %v5484_v51, 2147483647  ;;  %v5470_v50 = vmul.f32 1.442695, %v5468_v45 }
0x20c0   :  { %vm5487_vm2 = vcmp.lt.s32.totalorder %v5485_v48, %v5486_v49  ;;  %v5472_v6 = vmul.f32 1.442695, %v5469_v46 }
0x20c1   :  { %v5488_v52 = vsel %vm5487_vm2, %v5485_v48, %v5486_v49  ;;  %12471 = vpow2.f32 %v5470_v50 }
0x20c2   :  { %v5490_v61 = vshra.s32 %v5488_v52, 16  ;;  %12473 = vpow2.f32 %v5472_v6  ;;  %v5489_v21 = vand.u32 65535, %v5488_v52 }
0x20c4   :  { %v5492_v43 = vcvt.s32.f32 %v5490_v61  ;;  %v5491_v7 = vcvt.s32.f32 %v5489_v21 }
0x20c6   :  { %5493 = vmin.xlane.f32.xlu1 %v5492_v43 }
0x20cb   :  { %v12472_v53 = vpop.eup %12471 }
0x20cc   :  { %v12474_v56 = vpop.eup %12473  ;;  %v5474_v59 = vsel %vm2319_vm7, %v12472_v53, 0.0 }
0x20cd   :  { %v5475_v62 = vsel %vm2319_vm7, %v12474_v56, 0.0 }
0x20ce   :  { %v5476_v0 = vadd.f32 %v5475_v62, %v5474_v59 }
0x20d0   :  { %5477 = vadd.xlane.f32.xlu0 %v5476_v0 }
0x2153   :  { %v5494_v5 = vpop.xlane.xlu1 %5493 }
0x2154   :  { %vm5495_vm8 = vcmp.eq.f32.partialorder %v5492_v43, %v5494_v5  ;;  %v5500_v11 = vcvt.f32.s32 %v5494_v5 }
0x2155   :  { %v5496_v8 = vsel %vm5495_vm8, %v5491_v7, inf }
0x2156   :  { %5497 = vmin.xlane.f32.xlu1 %v5496_v8  ;;  %v5501_v14 = vshll.u32 %v5500_v11, 16 }
0x215d   :  { %v5478_v12 = vpop.xlane.xlu0 %5477 }
0x215e   :  { %12475 = vrcp.f32 %v5478_v12 }
0x2168   :  { %v12476_v9 = vpop.eup %12475 }
0x2169   :  { %v14328_v10 = vsel %vm5515_vm9, %v12476_v9, %v14218_v31 }
0x21e3   :  { %v5498_v13 = vpop.xlane.xlu1 %5497 }
0x21e4   :  { %v5499_v22 = vcvt.f32.s32 %v5498_v13 }
0x21e6   :  { %v5502_v63 = vadd.s32 %v5501_v14, %v5499_v22 }
0x21e8   :  { %v14331_v16 = vsel %vm5515_vm9, %v5502_v63, %v14221_v37  ;;  %5503 = vst.msk [vmem:[#allocation7] sm:$0x1] %vm2360_vm13, %v5502_v63 }
0x21e9   :  { %13270 = shalt.err (!%p14000_p10)  }
0x21ea   :  { %5514 = dma.vmem_to_smem %s13991_s2, 16, %s13451_s0, [#allocation9] }
0x21eb   :  { %13397 = dma.done.wait [#allocation9], 16 }
0x21ec   :  { %13398 = vsyncadd [#allocation9], 4294967280 }
0x21ed   :  { %5520 = sfence }
0x21ee   :  { %v12477_v31 = vld [vmem:[#allocation22 + $0x4] ss:$12 sps:$4 sm:$0xff]   ;;  %11350 = vmatprep.subr.bf16.mxu1 %v13444_v1  ;;  %5734 = vmatprep.mubr.bf16.mxu0 %v13446_v2  ;;  %v12479_v17 = vld [vmem:[#allocation22] ss:$12 sps:$4 sm:$0xff]   ;;  %v12480_v37 = vld [vmem:[#allocation22 + $0x1c] ss:$12 sps:$4 sm:$0xff]  }
0x21ef   :  { %11366 = vmatprep.mubr.msk.bf16.mxu1 %vm13445_vm0, %v13444_v1  ;;  %5702 = vmatprep.subr.bf16.mxu0 %v12477_v31  ;;  %v12482_v18 = vld [vmem:[#allocation22 + $0x18] ss:$12 sps:$4 sm:$0xff]   ;;  %v12483_v19 = vld [vmem:[#allocation22 + $0x34] ss:$12 sps:$4 sm:$0xff]   ;;  %v12485_v20 = vld [vmem:[#allocation22 + $0x30] ss:$12 sps:$4 sm:$0xff]  }
0x21f0   :  { %5703 = vmatpush1.bf16.msra.mxu0 %v12479_v17  ;;  %v12486_v25 = vld [vmem:[#allocation22 + $0x4c] ss:$12 sps:$4 sm:$0xff]   ;;  %v12497_v15 = vld [vmem:[#allocation22 + $0x8] ss:$12 sps:$4 sm:$0xff]   ;;  %v12489_v27 = vld [vmem:[#allocation22 + $0x64] ss:$12 sps:$4 sm:$0xff]  }
0x21f1   :  { %5704 = vmatprep.subr.bf16.mxu0 %v12480_v37  ;;  %v12488_v40 = vld [vmem:[#allocation22 + $0x48] ss:$12 sps:$4 sm:$0xff]   ;;  %11351 = vmatpush3.bf16.msra.mxu1 %v12497_v15  ;;  %v12501_v32 = vld [vmem:[#allocation22 + $0x20] ss:$12 sps:$4 sm:$0xff]   ;;  %s5521_s27 = sld [smem:[#allocation8]]  ;;  %v12544_v17 = vld [vmem:[#allocation25 + $0x18] sm:$0xff]  }
0x21f2   :  { %11352 = vmatprep.subr.bf16.mxu1 %v13444_v1  ;;  %v12491_v34 = vld [vmem:[#allocation22 + $0x60] ss:$12 sps:$4 sm:$0xff]   ;;  %v12503_v35 = vld [vmem:[#allocation22 + $0x38] ss:$12 sps:$4 sm:$0xff]   ;;  %v12492_v24 = vld [vmem:[#allocation22 + $0x7c] ss:$12 sps:$4 sm:$0xff]  }
0x21f3   :  { %v12494_v36 = vld [vmem:[#allocation22 + $0x78] ss:$12 sps:$4 sm:$0xff]   ;;  %v12507_v41 = vld [vmem:[#allocation22 + $0x50] ss:$12 sps:$4 sm:$0xff]   ;;  %v12495_v29 = vld [vmem:[#allocation22 + $0x94] ss:$12 sps:$4 sm:$0xff]  }
0x21f4   :  { %5705 = vmatpush1.bf16.msra.mxu0 %v12482_v18  ;;  %v12498_v54 = vld [vmem:[#allocation22 + $0x90] ss:$12 sps:$4 sm:$0xff]   ;;  %v12511_v26 = vld [vmem:[#allocation22 + $0x68] ss:$12 sps:$4 sm:$0xff]   ;;  %v12499_v38 = vld [vmem:[#allocation22 + $0xac] ss:$12 sps:$4 sm:$0xff]  }
0x21f5   :  { %5706 = vmatprep.subr.bf16.mxu0 %v12483_v19  ;;  %11353 = vmatpush3.bf16.msra.mxu1 %v12501_v32  ;;  %v12502_v39 = vld [vmem:[#allocation22 + $0xa8] ss:$12 sps:$4 sm:$0xff]   ;;  %v12515_v42 = vld [vmem:[#allocation22 + $0x80] ss:$12 sps:$4 sm:$0xff]   ;;  %v12506_v44 = vld [vmem:[#allocation23 + $0x4] ss:$12 sps:$4 sm:$0xff]  }
0x21f6   :  { %11354 = vmatprep.subr.bf16.mxu1 %v13444_v1  ;;  %v12504_v60 = vld [vmem:[#allocation23] ss:$12 sps:$4 sm:$0xff]   ;;  %v12519_v46 = vld [vmem:[#allocation22 + $0x98] ss:$12 sps:$4 sm:$0xff]   ;;  %v12510_v47 = vld [vmem:[#allocation23 + $0x1c] ss:$12 sps:$4 sm:$0xff]  }
0x21f7   :  { %s5522_s9 = scalar_lea.vmem [#allocation20], %s5521_s27  ;;  %v12508_v51 = vld [vmem:[#allocation23 + $0x18] ss:$12 sps:$4 sm:$0xff]   ;;  %v12523_v48 = vld [vmem:[#allocation22 + $0xb0] ss:$12 sps:$4 sm:$0xff]   ;;  %v12542_v63 = vld [vmem:[#allocation25 + $0x8] sm:$0xff]  }
0x21f8   :  { %5707 = vmatpush1.bf16.msra.mxu0 %v12485_v20  ;;  %v5523_v33 = vld [vmem:[%s5522_s9] sm:$0x1]  ;;  %v12512_v50 = vld [vmem:[#allocation23 + $0x30] ss:$12 sps:$4 sm:$0xff]   ;;  %v12518_v52 = vld [vmem:[#allocation23 + $0x4c] ss:$12 sps:$4 sm:$0xff]  }
0x21f9   :  { %5708 = vmatprep.subr.bf16.mxu0 %v12486_v25  ;;  %11355 = vmatpush3.bf16.msra.mxu1 %v12503_v35  ;;  %v5524_v45 = vpack.c.bf16 %v5523_v33, %v5523_v33  ;;  %v12514_v49 = vld [vmem:[#allocation23 + $0x34] ss:$12 sps:$4 sm:$0xff]   ;;  %v12522_v53 = vld [vmem:[#allocation23 + $0x64] ss:$12 sps:$4 sm:$0xff]   ;;  %v12526_v62 = vld [vmem:[#allocation23 + $0x7c] ss:$12 sps:$4 sm:$0xff]  }
0x21fa   :  { %11356 = vmatprep.subr.bf16.mxu1 %v13444_v1  ;;  %v12530_v6 = vld [vmem:[#allocation23 + $0x8] ss:$12 sps:$4 sm:$0xff]   ;;  %v12534_v43 = vld [vmem:[#allocation23 + $0x20] ss:$12 sps:$4 sm:$0xff]   ;;  %v12535_v59 = vld [vmem:[#allocation23 + $0x38] ss:$12 sps:$4 sm:$0xff]  }
0x21fb   :  { %v12516_v61 = vld [vmem:[#allocation23 + $0x48] ss:$12 sps:$4 sm:$0xff]   ;;  %v12520_v56 = vld [vmem:[#allocation23 + $0x60] ss:$12 sps:$4 sm:$0xff]   ;;  %v12524_v0 = vld [vmem:[#allocation23 + $0x78] ss:$12 sps:$4 sm:$0xff]  }
0x21fc   :  { %5709 = vmatpush1.bf16.msra.mxu0 %v12488_v40  ;;  %v12536_v21 = vld [vmem:[#allocation23 + $0x50] ss:$12 sps:$4 sm:$0xff]   ;;  %v12529_v5 = vld [vmem:[#allocation23 + $0x94] ss:$12 sps:$4 sm:$0xff]   ;;  %v12533_v12 = vld [vmem:[#allocation23 + $0xac] ss:$12 sps:$4 sm:$0xff]  }
0x21fd   :  { %5710 = vmatprep.subr.bf16.mxu0 %v12489_v27  ;;  %11357 = vmatpush3.bf16.msra.mxu1 %v12507_v41  ;;  %v12527_v7 = vld [vmem:[#allocation23 + $0x90] ss:$12 sps:$4 sm:$0xff]   ;;  %v12537_v8 = vld [vmem:[#allocation23 + $0x68] ss:$12 sps:$4 sm:$0xff]   ;;  %v12538_v11 = vld [vmem:[#allocation23 + $0x80] ss:$12 sps:$4 sm:$0xff]  }
0x21fe   :  { %11358 = vmatprep.subr.bf16.mxu1 %v13444_v1  ;;  %v12531_v9 = vld [vmem:[#allocation23 + $0xa8] ss:$12 sps:$4 sm:$0xff]   ;;  %v12539_v13 = vld [vmem:[#allocation23 + $0x98] ss:$12 sps:$4 sm:$0xff]   ;;  %v12540_v14 = vld [vmem:[#allocation23 + $0xb0] ss:$12 sps:$4 sm:$0xff]  }
0x21ff   :  { %v12541_v22 = vld [vmem:[#allocation25] sm:$0xff]   ;;  %v12543_v31 = vld [vmem:[#allocation25 + $0x10] sm:$0xff]   ;;  %v12546_v18 = vld [vmem:[#allocation25 + $0x28] sm:$0xff]   ;;  %vm6562_vm15 = vcmp.eq.s32.totalorder %v13745_v3, 4 }
0x2200   :  { %5711 = vmatpush1.bf16.msra.mxu0 %v12491_v34  ;;  %v14372_v37 = vld [vmem:[#allocation6] sm:$0xf] }
0x2201   :  { %5712 = vmatprep.subr.bf16.mxu0 %v12492_v24  ;;  %11359 = vmatpush3.bf16.msra.mxu1 %v12511_v26  ;;  %v12547_v19 = vld [vmem:[#allocation25 + $0x30] sm:$0xff]   ;;  %v12548_v20 = vld [vmem:[#allocation25 + $0x38] sm:$0xff]  }
0x2202   :  { %11360 = vmatprep.subr.bf16.mxu1 %v13444_v1  ;;  %v5557_v32 = vld [vmem:[%s14805_s13] sm:$0x7] }
0x2203   :  { %v5690_v34 = vrot.slane %v5557_v32, %v13778_v57  ;;  %v5694_v24 = vrot.slane %v5557_v32, %v13781_v58 }
0x2204   :  { %5713 = vmatpush1.bf16.msra.mxu0 %v12494_v36 }
0x2205   :  { %5714 = vmatprep.subr.bf16.mxu0 %v12495_v29  ;;  %11361 = vmatpush3.bf16.msra.mxu1 %v12515_v42 }
0x2206   :  { %11362 = vmatprep.subr.bf16.mxu1 %v13444_v1 }
0x2208   :  { %5715 = vmatpush1.bf16.msra.mxu0 %v12498_v54 }
0x2209   :  { %5716 = vmatprep.subr.bf16.mxu0 %v12499_v38  ;;  %11363 = vmatpush3.bf16.msra.mxu1 %v12519_v46 }
0x220a   :  { %11364 = vmatprep.subr.bf16.mxu1 %v13444_v1 }
0x220c   :  { %5717 = vmatpush1.bf16.msra.mxu0 %v12502_v39 }
0x220d   :  { %5943 = vmatprep.subr.bf16.mxu0 %v12506_v44  ;;  %11365 = vmatpush3.bf16.msra.mxu1 %v12523_v48  ;;  %v5698_v48 = vrot.slane %v5557_v32, %v13772_v55 }
0x220e   :  { %11370 = vmatprep.subr.bf16.mxu1 %v13444_v1 }
0x220f   :  { %5735 = vmatmul.mubr.bf16.vlgmr.msra.gmra.mrb[64].mxu0 %v5524_v45 }
0x2210   :  { %5944 = vmatpush1.bf16.msra.mxu0 %v12504_v60  ;;  %5975 = vmatprep.mubr.bf16.mxu0 %v13446_v2 }
0x2211   :  { %5945 = vmatprep.subr.bf16.mxu0 %v12510_v47  ;;  %11367 = vmatmul.mubr.bf16.vlgmr.msra.gmra.mrb[64].mxu1 %v5524_v45 }
0x2212   :  { %11371 = vmatpush3.bf16.msra.mxu1 %v12530_v6  ;;  %11386 = vmatprep.mubr.msk.bf16.mxu1 %vm13445_vm0, %v13444_v1 }
0x2213   :  { %11372 = vmatprep.subr.bf16.mxu1 %v13444_v1 }
0x2214   :  { %5946 = vmatpush1.bf16.msra.mxu0 %v12508_v51  ;;  %v6038_v51 = vld [vmem:[%s14806_s14] sm:$0x1] }
0x2215   :  { %5947 = vmatprep.subr.bf16.mxu0 %v12514_v49 }
0x2216   :  { %11373 = vmatpush3.bf16.msra.mxu1 %v12534_v43 }
0x2217   :  { %11374 = vmatprep.subr.bf16.mxu1 %v13444_v1 }
0x2218   :  { %5948 = vmatpush1.bf16.msra.mxu0 %v12512_v50 }
0x2219   :  { %5949 = vmatprep.subr.bf16.mxu0 %v12518_v52 }
0x221a   :  { %11375 = vmatpush3.bf16.msra.mxu1 %v12535_v59 }
0x221b   :  { %11376 = vmatprep.subr.bf16.mxu1 %v13444_v1 }
0x221c   :  { %5950 = vmatpush1.bf16.msra.mxu0 %v12516_v61 }
0x221d   :  { %5951 = vmatprep.subr.bf16.mxu0 %v12522_v53 }
0x221e   :  { %11377 = vmatpush3.bf16.msra.mxu1 %v12536_v21 }
0x221f   :  { %11378 = vmatprep.subr.bf16.mxu1 %v13444_v1 }
0x2220   :  { %5952 = vmatpush1.bf16.msra.mxu0 %v12520_v56 }
0x2221   :  { %5953 = vmatprep.subr.bf16.mxu0 %v12526_v62 }
0x2222   :  { %11379 = vmatpush3.bf16.msra.mxu1 %v12537_v8 }
0x2223   :  { %11380 = vmatprep.subr.bf16.mxu1 %v13444_v1 }
0x2224   :  { %5954 = vmatpush1.bf16.msra.mxu0 %v12524_v0 }
0x2225   :  { %5955 = vmatprep.subr.bf16.mxu0 %v12529_v5 }
0x2226   :  { %11381 = vmatpush3.bf16.msra.mxu1 %v12538_v11 }
0x2227   :  { %11382 = vmatprep.subr.bf16.mxu1 %v13444_v1 }
0x2228   :  { %5956 = vmatpush1.bf16.msra.mxu0 %v12527_v7 }
0x2229   :  { %5957 = vmatprep.subr.bf16.mxu0 %v12533_v12 }
0x222a   :  { %11383 = vmatpush3.bf16.msra.mxu1 %v12539_v13 }
0x222b   :  { %11384 = vmatprep.subr.bf16.mxu1 %v13444_v1 }
0x222c   :  { %5958 = vmatpush1.bf16.msra.mxu0 %v12531_v9 }
0x222d   :  { %11390 = vmatprep.subr.bf16.mxu0 %v13444_v1 }
0x222e   :  { %11385 = vmatpush3.bf16.msra.mxu1 %v12540_v14 }
0x222f   :  { %5976 = vmatmul.mubr.bf16.vlgmr.msra.gmra.mrb[64].mxu0 %v14283_v30  ;;  %11422 = vmatprep.subr.bf16.mxu1 %v13444_v1 }
0x2230   :  { %11392 = vmatprep.mubr.msk.bf16.mxu0 %vm13445_vm0, %v13444_v1 }
0x2231   :  { %11387 = vmatmul.mubr.bf16.vlgmr.msra.gmra.mrb[68].mxu1 %v14283_v30  ;;  %v12545_v30 = vld [vmem:[#allocation25 + $0x20] sm:$0xff]  }
0x2232   :  { %11438 = vmatprep.mubr.msk.bf16.mxu1 %vm13445_vm0, %v13444_v1  ;;  %11423 = vmatpush3.bf16.msra.mxu1 %v12541_v22 }
0x2233   :  { %11424 = vmatprep.subr.bf16.mxu1 %v13444_v1 }
0x2235   :  { %11391 = vmatpush3.bf16.xpose.msra.mxu0 %v14372_v37 }
0x2236   :  { %11425 = vmatpush3.bf16.msra.mxu1 %v12542_v63  ;;  %11396 = vmatprep.subr.bf16.mxu0 %v13444_v1 }
0x2237   :  { %11426 = vmatprep.subr.bf16.mxu1 %v13444_v1 }
0x223a   :  { %11427 = vmatpush3.bf16.msra.mxu1 %v12543_v31 }
0x223b   :  { %11428 = vmatprep.subr.bf16.mxu1 %v13444_v1 }
0x223e   :  { %11429 = vmatpush3.bf16.msra.mxu1 %v12544_v17 }
0x223f   :  { %11430 = vmatprep.subr.bf16.mxu1 %v13444_v1 }
0x2242   :  { %11431 = vmatpush3.bf16.msra.mxu1 %v12545_v30 }
0x2243   :  { %11432 = vmatprep.subr.bf16.mxu1 %v13444_v1 }
0x2246   :  { %11433 = vmatpush3.bf16.msra.mxu1 %v12546_v18 }
0x2247   :  { %11434 = vmatprep.subr.bf16.mxu1 %v13444_v1 }
0x224a   :  { %11435 = vmatpush3.bf16.msra.mxu1 %v12547_v19 }
0x224b   :  { %11436 = vmatprep.subr.bf16.mxu1 %v13444_v1 }
0x224e   :  { %11437 = vmatpush3.bf16.msra.mxu1 %v12548_v20  ;;  %v6106_v20 = vsel %vm1913_vm5, %v14372_v37, 0  ;;  %v12551_v37 = vld [vmem:[#allocation26 + $0x10] sm:$0xff]  }
0x22e4   :  { %v5777_v25 = vpop.f32.mrb[64].mxu1 }
0x22e5   :  { %v11368_v15 = vpop.f32.mrb[65].mxu1  ;;  %v5778_v52 = vadd.f32 %v5777_v25, %v5698_v48  ;;  %v12566_v48 = vld [vmem:[#allocation28 + $0x30] ss:$8 sps:$4 sm:$0xff]  }
0x22e6   :  { %v5780_v40 = vpop.f32.mrb[66].mxu1 }
0x22e7   :  { %v11369_v27 = vpop.f32.mrb[67].mxu1 }
0x22e8   :  { %v12549_v27 = vld [vmem:[#allocation26] sm:$0xff]  }
0x2302   :  { %v5977_v35 = vpop.f32.mrb[64].mxu0 }
0x2303   :  { %v11726_v36 = vadd.f32 %v5977_v35, %v5690_v34  ;;  %v5979_v41 = vpop.f32.mrb[65].mxu0  ;;  %v12550_v34 = vld [vmem:[#allocation26 + $0x8] sm:$0xff]   ;;  %v12552_v35 = vld [vmem:[#allocation26 + $0x18] sm:$0xff]  }
0x2304   :  { %v5981_v29 = vpop.f32.mrb[66].mxu0  ;;  %v11727_v38 = vadd.f32 %v5979_v41, %v5694_v24  ;;  %v6018_v33 = vpop.f32.mrb[68].mxu1  ;;  %v12553_v24 = vld [vmem:[#allocation26 + $0x20] sm:$0xff]   ;;  %v12555_v41 = vld [vmem:[#allocation26 + $0x30] sm:$0xff]  }
0x2305   :  { %v10261_v54 = vmul.f32 -1.442695, %v11726_v36  ;;  %v5982_v26 = vpop.f32.mrb[67].mxu0  ;;  %v11388_v42 = vpop.f32.mrb[69].mxu1  ;;  %v6039_v50 = vadd.f32 %v6038_v51, %v6018_v33  ;;  %v12554_v36 = vld [vmem:[#allocation26 + $0x28] sm:$0xff]   ;;  %v12556_v29 = vld [vmem:[#allocation26 + $0x38] sm:$0xff]  }
0x2306   :  { %v10262_v39 = vmul.f32 -1.442695, %v11727_v38  ;;  %v6021_v44 = vpop.f32.mrb[70].mxu1  ;;  %v12557_v38 = vld [vmem:[#allocation28] ss:$8 sps:$4 sm:$0xff]  }
0x2307   :  { %12581 = vpow2.f32 %v10261_v54  ;;  %v11389_v60 = vpop.f32.mrb[71].mxu1  ;;  %v12559_v54 = vld [vmem:[#allocation28 + $0x4] ss:$8 sps:$4 sm:$0xff]   ;;  %v12562_v42 = vld [vmem:[#allocation28 + $0x14] ss:$8 sps:$4 sm:$0xff]  }
0x2308   :  { %12583 = vpow2.f32 %v10262_v39  ;;  %v12568_v51 = vld [vmem:[#allocation28 + $0x34] ss:$8 sps:$4 sm:$0xff]  }
0x2311   :  { %v12582_v45 = vpop.eup %12581 }
0x2312   :  { %v6028_v46 = vadd.f32 1.0, %v12582_v45  ;;  %v12584_v47 = vpop.eup %12583  ;;  %v12560_v45 = vld [vmem:[#allocation28 + $0x10] ss:$8 sps:$4 sm:$0xff]  }
0x2313   :  { %v6035_v49 = vadd.f32 1.0, %v12584_v47  ;;  %v12563_v47 = vld [vmem:[#allocation28 + $0x20] ss:$8 sps:$4 sm:$0xff]  }
0x2314   :  { %12585 = vrcp.f32 %v6028_v46  ;;  %v12565_v46 = vld [vmem:[#allocation28 + $0x24] ss:$8 sps:$4 sm:$0xff]  }
0x2315   :  { %12587 = vrcp.f32 %v6035_v49  ;;  %v12571_v49 = vld [vmem:[#allocation28 + $0x44] ss:$8 sps:$4 sm:$0xff]  }
0x231e   :  { %v12586_v6 = vpop.eup %12585 }
0x231f   :  { %v6040_v61 = vmul.f32 %v12586_v6, %v6039_v50  ;;  %v12588_v53 = vpop.eup %12587  ;;  %v12569_v50 = vld [vmem:[#allocation28 + $0x40] ss:$8 sps:$4 sm:$0xff]   ;;  %v12574_v6 = vld [vmem:[#allocation28 + $0x54] ss:$8 sps:$4 sm:$0xff]  }
0x2320   :  { %v6043_v56 = vsub.f32 1.0, %v12588_v53  ;;  %v6045_v0 = vmul.f32 %v12588_v53, %v14279_v23  ;;  %v12580_v53 = vld [vmem:[#allocation28 + $0x74] ss:$8 sps:$4 sm:$0xff]  }
0x2321   :  { %v6041_v43 = vadd.f32 %v6040_v61, %v5778_v52  ;;  %v12572_v52 = vld [vmem:[#allocation28 + $0x50] ss:$8 sps:$4 sm:$0xff]   ;;  %v12577_v61 = vld [vmem:[#allocation28 + $0x64] ss:$8 sps:$4 sm:$0xff]  }
0x2323   :  { %12589 = vtanh.f32 %v6041_v43  ;;  %v12575_v43 = vld [vmem:[#allocation28 + $0x60] ss:$8 sps:$4 sm:$0xff]  }
0x232d   :  { %v12590_v59 = vpop.eup %12589 }
0x232e   :  { %v6044_v62 = vmul.f32 %v12590_v59, %v6043_v56  ;;  %v12578_v56 = vld [vmem:[#allocation28 + $0x70] ss:$8 sps:$4 sm:$0xff]  }
0x2330   :  { %v14389_v21 = vadd.f32 %v6045_v0, %v6044_v62  ;;  %v6357_v62 = vld [vmem:[%s14809_s17] sm:$0x1] }
0x2332   :  { %v14393_v5 = vpack.c.bf16 %v14389_v21, %v14389_v21 }
0x2334   :  { %11393 = vmatmul.mubr.bf16.vlgmr.msra.gmra.mrb[68].mxu0 %v14393_v5  ;;  %11439 = vmatmul.mubr.bf16.vlgmr.msra.gmra.mrb[72].mxu1 %v14393_v5 }
0x2335   :  { %11398 = vmatprep.mubr.msk.bf16.mxu0 %vm13445_vm0, %v13444_v1  ;;  %11397 = vmatpush3.bf16.msra.mxu0 %v6106_v20 }
0x2336   :  { %11402 = vmatprep.subr.bf16.mxu0 %v13444_v1 }
0x2407   :  { %v6083_v7 = vpop.f32.mrb[68].mxu0  ;;  %v14399_v8 = vpop.f32.mrb[72].mxu1 }
0x2408   :  { %v6089_v12 = vsel %vm13947_vm3, %v6083_v7, -1e+30  ;;  %v11394_v23 = vpop.f32.mrb[69].mxu0  ;;  %v11440_v9 = vpop.f32.mrb[73].mxu1 }
0x2409   :  { %v6086_v11 = vpop.f32.mrb[70].mxu0  ;;  %v6354_v13 = vpop.f32.mrb[74].mxu1  ;;  %v6090_v14 = vsel %vm1896_vm4, %v6089_v12, -inf }
0x240a   :  { %v11441_v22 = vpop.f32.mrb[75].mxu1  ;;  %6091 = vmax.xlane.f32.xlu0 %v6090_v14  ;;  %v11395_v63 = vpop.f32.mrb[71].mxu0  ;;  %v6377_v14 = vld [vmem:[%s14811_s19] sm:$0x3] }
0x240b   :  { %v6462_v22 = vrot.slane %v6377_v14, %v13778_v57  ;;  %v6466_v63 = vrot.slane %v6377_v14, %v13781_v58 }
0x2497   :  { %v6092_v31 = vpop.xlane.xlu0 %6091 }
0x2498   :  { %v6093_v17 = vsub.f32 %v6089_v12, %v6092_v31 }
0x249a   :  { %v6094_v30 = vmul.f32 1.442695, %v6093_v17 }
0x249c   :  { %12591 = vpow2.f32 %v6094_v30 }
0x24a6   :  { %v12592_v18 = vpop.eup %12591 }
0x24a7   :  { %v6096_v19 = vsel %vm1896_vm4, %v12592_v18, 0.0 }
0x24a8   :  { %6097 = vadd.xlane.f32.xlu0 %v6096_v19 }
0x2535   :  { %v6098_v25 = vpop.xlane.xlu0 %6097 }
0x2536   :  { %12593 = vrcp.f32 %v6098_v25 }
0x2540   :  { %v12594_v15 = vpop.eup %12593 }
0x2541   :  { %v6100_v40 = vmul.f32 %v12594_v15, %v12592_v18 }
0x2543   :  { %v6101_v32 = vpack.c.bf16 %v6100_v40, %v6100_v40 }
0x2545   :  { %11399 = vmatmul.mubr.msk.bf16.vlgmr.msra.gmra.mrb[72].mxu0 %vm1909_vm6, %v6101_v32 }
0x2546   :  { %11403 = vmatpush3.bf16.msra.mxu0 %v12549_v27  ;;  %11418 = vmatprep.mubr.msk.bf16.mxu0 %vm13445_vm0, %v13444_v1 }
0x2547   :  { %11404 = vmatprep.subr.bf16.mxu0 %v13444_v1 }
0x254a   :  { %11405 = vmatpush3.bf16.msra.mxu0 %v12550_v34 }
0x254b   :  { %11406 = vmatprep.subr.bf16.mxu0 %v13444_v1 }
0x254e   :  { %11407 = vmatpush3.bf16.msra.mxu0 %v12551_v37 }
0x254f   :  { %11408 = vmatprep.subr.bf16.mxu0 %v13444_v1 }
0x2552   :  { %11409 = vmatpush3.bf16.msra.mxu0 %v12552_v35 }
0x2553   :  { %11410 = vmatprep.subr.bf16.mxu0 %v13444_v1 }
0x2556   :  { %11411 = vmatpush3.bf16.msra.mxu0 %v12553_v24 }
0x2557   :  { %11412 = vmatprep.subr.bf16.mxu0 %v13444_v1 }
0x255a   :  { %11413 = vmatpush3.bf16.msra.mxu0 %v12554_v36 }
0x255b   :  { %11414 = vmatprep.subr.bf16.mxu0 %v13444_v1 }
0x255e   :  { %11415 = vmatpush3.bf16.msra.mxu0 %v12555_v41 }
0x255f   :  { %11416 = vmatprep.subr.bf16.mxu0 %v13444_v1 }
0x2562   :  { %11417 = vmatpush3.bf16.msra.mxu0 %v12556_v29 }
0x2563   :  { %6469 = vmatprep.subr.bf16.mxu0 %v12559_v54 }
0x2618   :  { %v6142_v26 = vpop.f32.mrb[72].mxu0 }
0x2619   :  { %v6164_v39 = vpack.c.bf16 %v6142_v26, %v6142_v26  ;;  %v11400_v33 = vpop.f32.mrb[73].mxu0 }
0x261a   :  { %v6145_v44 = vpop.f32.mrb[74].mxu0 }
0x261b   :  { %v11401_v60 = vpop.f32.mrb[75].mxu0  ;;  %11419 = vmatmul.mubr.bf16.vlgmr.msra.gmra.mrb[76].mxu0 %v6164_v39 }
0x261c   :  { %6470 = vmatpush1.bf16.msra.mxu0 %v12557_v38  ;;  %6501 = vmatprep.mubr.bf16.mxu0 %v13446_v2 }
0x261d   :  { %6471 = vmatprep.subr.bf16.mxu0 %v12562_v42 }
0x2620   :  { %6472 = vmatpush1.bf16.msra.mxu0 %v12560_v45 }
0x2621   :  { %6473 = vmatprep.subr.bf16.mxu0 %v12565_v46 }
0x2624   :  { %6474 = vmatpush1.bf16.msra.mxu0 %v12563_v47 }
0x2625   :  { %6475 = vmatprep.subr.bf16.mxu0 %v12568_v51 }
0x2628   :  { %6476 = vmatpush1.bf16.msra.mxu0 %v12566_v48 }
0x2629   :  { %6477 = vmatprep.subr.bf16.mxu0 %v12571_v49 }
0x262c   :  { %6478 = vmatpush1.bf16.msra.mxu0 %v12569_v50 }
0x262d   :  { %6479 = vmatprep.subr.bf16.mxu0 %v12574_v6 }
0x2630   :  { %6480 = vmatpush1.bf16.msra.mxu0 %v12572_v52 }
0x2631   :  { %6481 = vmatprep.subr.bf16.mxu0 %v12577_v61 }
0x2634   :  { %6482 = vmatpush1.bf16.msra.mxu0 %v12575_v43 }
0x2635   :  { %6483 = vmatprep.subr.bf16.mxu0 %v12580_v53 }
0x2638   :  { %6484 = vmatpush1.bf16.msra.mxu0 %v12578_v56 }
0x26ee   :  { %v6263_v59 = vpop.f32.mrb[76].mxu0 }
0x26ef   :  { %v6352_v0 = vadd.f32 %v14399_v8, %v6263_v59  ;;  %v11420_v7 = vpop.f32.mrb[77].mxu0 }
0x26f0   :  { %v6266_v12 = vpop.f32.mrb[78].mxu0 }
0x26f1   :  { %v6358_v23 = vadd.f32 %v6357_v62, %v6352_v0  ;;  %v11421_v9 = vpop.f32.mrb[79].mxu0 }
0x26f3   :  { %12595 = vtanh.f32 %v6358_v23 }
0x26fd   :  { %v12596_v11 = vpop.eup %12595 }
0x26fe   :  { %v6360_v13 = vpack.c.bf16 %v12596_v11, %v12596_v11 }
0x2700   :  { %6502 = vmatmul.mubr.bf16.vlgmr.msra.gmra.mrb[80].mxu0 %v6360_v13 }
0x27d3   :  { %v6503_v31 = vpop.f32.mrb[80].mxu0 }
0x27d4   :  { %v6504_v17 = vadd.f32 %v6503_v31, %v6462_v22  ;;  %v6505_v30 = vpop.f32.mrb[81].mxu0 }
0x27d5   :  { %v6506_v8 = vadd.f32 %v6505_v30, %v6466_v63  ;;  %v6507_v18 = vpop.f32.mrb[82].mxu0 }
0x27d6   :  { %v6508_v19 = vpop.f32.mrb[83].mxu0  ;;  %v6510_v20 = vsel %vm2319_vm7, %v6504_v17, -inf }
0x27d7   :  { %v6511_v25 = vsel %vm2319_vm7, %v6506_v8, -inf }
0x27d8   :  { %v6512_v15 = vmax.f32 %v6510_v20, %v6511_v25 }
0x27da   :  { %6513 = vmax.xlane.f32.xlu1 %v6512_v15 }
0x2867   :  { %v6514_v40 = vpop.xlane.xlu1 %6513 }
0x2868   :  { %v6515_v27 = vsub.f32 %v6504_v17, %v6514_v40  ;;  %v6516_v32 = vsub.f32 %v6506_v8, %v6514_v40  ;;  %vm6528_vm10 = vcmp.eq.f32.partialorder %v6504_v17, %v6514_v40  ;;  %vm6529_vm11 = vcmp.eq.f32.partialorder %v6506_v8, %v6514_v40 }
0x2869   :  { %v6530_v34 = vsel %vm6528_vm10, %v13745_v3, 256  ;;  %v6531_v37 = vsel %vm6529_vm11, %v13748_v4, 256 }
0x286a   :  { %v6532_v35 = vsel %vm2319_vm7, %v6530_v34, 2147483647  ;;  %v6533_v24 = vsel %vm2319_vm7, %v6531_v37, 2147483647  ;;  %v6517_v36 = vmul.f32 1.442695, %v6515_v27 }
0x286b   :  { %vm6534_vm12 = vcmp.lt.s32.totalorder %v6532_v35, %v6533_v24  ;;  %v6519_v41 = vmul.f32 1.442695, %v6516_v32 }
0x286c   :  { %v6535_v29 = vsel %vm6534_vm12, %v6532_v35, %v6533_v24  ;;  %12597 = vpow2.f32 %v6517_v36 }
0x286d   :  { %v6537_v54 = vshra.s32 %v6535_v29, 16  ;;  %12599 = vpow2.f32 %v6519_v41  ;;  %v6536_v60 = vand.u32 65535, %v6535_v29 }
0x286f   :  { %v6539_v26 = vcvt.s32.f32 %v6537_v54  ;;  %v6538_v46 = vcvt.s32.f32 %v6536_v60 }
0x2871   :  { %6540 = vmin.xlane.f32.xlu1 %v6539_v26 }
0x2876   :  { %v12598_v38 = vpop.eup %12597 }
0x2877   :  { %v12600_v39 = vpop.eup %12599  ;;  %v6521_v33 = vsel %vm2319_vm7, %v12598_v38, 0.0 }
0x2878   :  { %v6522_v42 = vsel %vm2319_vm7, %v12600_v39, 0.0 }
0x2879   :  { %v6523_v44 = vadd.f32 %v6522_v42, %v6521_v33 }
0x287b   :  { %6524 = vadd.xlane.f32.xlu0 %v6523_v44 }
0x28fe   :  { %v6541_v45 = vpop.xlane.xlu1 %6540 }
0x28ff   :  { %vm6542_vm14 = vcmp.eq.f32.partialorder %v6539_v26, %v6541_v45  ;;  %v6547_v50 = vcvt.f32.s32 %v6541_v45 }
0x2900   :  { %v6543_v47 = vsel %vm6542_vm14, %v6538_v46, inf }
0x2901   :  { %6544 = vmin.xlane.f32.xlu1 %v6543_v47  ;;  %v6548_v52 = vshll.u32 %v6547_v50, 16 }
0x2908   :  { %v6525_v51 = vpop.xlane.xlu0 %6524 }
0x2909   :  { %12601 = vrcp.f32 %v6525_v51 }
0x2913   :  { %v12602_v48 = vpop.eup %12601 }
0x2914   :  { %v14438_v49 = vsel %vm6562_vm15, %v12602_v48, %v14328_v10 }
0x298e   :  { %v6545_v6 = vpop.xlane.xlu1 %6544 }
0x298f   :  { %v6546_v61 = vcvt.f32.s32 %v6545_v6 }
0x2991   :  { %v6549_v43 = vadd.s32 %v6548_v52, %v6546_v61 }
0x2993   :  { %v14441_v53 = vsel %vm6562_vm15, %v6549_v43, %v14331_v16  ;;  %6550 = vst.msk [vmem:[#allocation7] sm:$0x1] %vm2360_vm13, %v6549_v43 }
0x2994   :  { %13282 = shalt.err (!%p14000_p10)  }
0x2995   :  { %6561 = dma.vmem_to_smem %s13991_s2, 16, %s13451_s0, [#allocation9] }
0x2996   :  { %13399 = dma.done.wait [#allocation9], 16 }
0x2997   :  { %13400 = vsyncadd [#allocation9], 4294967280 }
0x2998   :  { %6567 = sfence }
0x2999   :  { %v12603_v10 = vld [vmem:[#allocation22 + $0x4] ss:$12 sps:$4 sm:$0xff]   ;;  %11442 = vmatprep.subr.bf16.mxu0 %v13444_v1  ;;  %6781 = vmatprep.mubr.bf16.mxu1 %v13446_v2  ;;  %v12605_v56 = vld [vmem:[#allocation22] ss:$12 sps:$4 sm:$0xff]   ;;  %v12606_v16 = vld [vmem:[#allocation22 + $0x1c] ss:$12 sps:$4 sm:$0xff]  }
0x299a   :  { %11458 = vmatprep.mubr.msk.bf16.mxu0 %vm13445_vm0, %v13444_v1  ;;  %6749 = vmatprep.subr.bf16.mxu1 %v12603_v10  ;;  %v12608_v59 = vld [vmem:[#allocation22 + $0x18] ss:$12 sps:$4 sm:$0xff]   ;;  %v12609_v62 = vld [vmem:[#allocation22 + $0x34] ss:$12 sps:$4 sm:$0xff]   ;;  %v12611_v0 = vld [vmem:[#allocation22 + $0x30] ss:$12 sps:$4 sm:$0xff]  }
0x299b   :  { %6750 = vmatpush1.bf16.msra.mxu1 %v12605_v56  ;;  %v12612_v7 = vld [vmem:[#allocation22 + $0x4c] ss:$12 sps:$4 sm:$0xff]   ;;  %v12623_v12 = vld [vmem:[#allocation22 + $0x8] ss:$12 sps:$4 sm:$0xff]   ;;  %v12615_v9 = vld [vmem:[#allocation22 + $0x64] ss:$12 sps:$4 sm:$0xff]  }
0x299c   :  { %6751 = vmatprep.subr.bf16.mxu1 %v12606_v16  ;;  %v12614_v23 = vld [vmem:[#allocation22 + $0x48] ss:$12 sps:$4 sm:$0xff]   ;;  %11443 = vmatpush3.bf16.msra.mxu0 %v12623_v12  ;;  %v12627_v11 = vld [vmem:[#allocation22 + $0x20] ss:$12 sps:$4 sm:$0xff]   ;;  %s6568_s6 = sld [smem:[#allocation8]]  ;;  %v12670_v56 = vld [vmem:[#allocation25 + $0x18] sm:$0xff]  }
0x299d   :  { %11444 = vmatprep.subr.bf16.mxu0 %v13444_v1  ;;  %v12617_v13 = vld [vmem:[#allocation22 + $0x60] ss:$12 sps:$4 sm:$0xff]   ;;  %v12629_v14 = vld [vmem:[#allocation22 + $0x38] ss:$12 sps:$4 sm:$0xff]   ;;  %v12618_v22 = vld [vmem:[#allocation22 + $0x7c] ss:$12 sps:$4 sm:$0xff]  }
0x299e   :  { %v12620_v63 = vld [vmem:[#allocation22 + $0x78] ss:$12 sps:$4 sm:$0xff]   ;;  %v12633_v31 = vld [vmem:[#allocation22 + $0x50] ss:$12 sps:$4 sm:$0xff]   ;;  %v12621_v17 = vld [vmem:[#allocation22 + $0x94] ss:$12 sps:$4 sm:$0xff]  }
0x299f   :  { %6752 = vmatpush1.bf16.msra.mxu1 %v12608_v59  ;;  %v12624_v30 = vld [vmem:[#allocation22 + $0x90] ss:$12 sps:$4 sm:$0xff]   ;;  %v12637_v8 = vld [vmem:[#allocation22 + $0x68] ss:$12 sps:$4 sm:$0xff]   ;;  %v12625_v18 = vld [vmem:[#allocation22 + $0xac] ss:$12 sps:$4 sm:$0xff]  }
0x29a0   :  { %6753 = vmatprep.subr.bf16.mxu1 %v12609_v62  ;;  %11445 = vmatpush3.bf16.msra.mxu0 %v12627_v11  ;;  %v12628_v19 = vld [vmem:[#allocation22 + $0xa8] ss:$12 sps:$4 sm:$0xff]   ;;  %v12641_v25 = vld [vmem:[#allocation22 + $0x80] ss:$12 sps:$4 sm:$0xff]   ;;  %v12632_v15 = vld [vmem:[#allocation23 + $0x4] ss:$12 sps:$4 sm:$0xff]  }
0x29a1   :  { %11446 = vmatprep.subr.bf16.mxu0 %v13444_v1  ;;  %v12630_v40 = vld [vmem:[#allocation23] ss:$12 sps:$4 sm:$0xff]   ;;  %v12645_v32 = vld [vmem:[#allocation22 + $0x98] ss:$12 sps:$4 sm:$0xff]   ;;  %v12636_v34 = vld [vmem:[#allocation23 + $0x1c] ss:$12 sps:$4 sm:$0xff]  }
0x29a2   :  { %s6569_s28 = scalar_lea.vmem [#allocation20], %s6568_s6  ;;  %v12634_v37 = vld [vmem:[#allocation23 + $0x18] ss:$12 sps:$4 sm:$0xff]   ;;  %v12649_v35 = vld [vmem:[#allocation22 + $0xb0] ss:$12 sps:$4 sm:$0xff]   ;;  %v12668_v43 = vld [vmem:[#allocation25 + $0x8] sm:$0xff]  }
0x29a3   :  { %6754 = vmatpush1.bf16.msra.mxu1 %v12611_v0  ;;  %v6570_v20 = vld [vmem:[%s6569_s28] sm:$0x1]  ;;  %v12638_v36 = vld [vmem:[#allocation23 + $0x30] ss:$12 sps:$4 sm:$0xff]   ;;  %v12644_v29 = vld [vmem:[#allocation23 + $0x4c] ss:$12 sps:$4 sm:$0xff]  }
0x29a4   :  { %6755 = vmatprep.subr.bf16.mxu1 %v12612_v7  ;;  %11447 = vmatpush3.bf16.msra.mxu0 %v12629_v14  ;;  %v6571_v27 = vpack.c.bf16 %v6570_v20, %v6570_v20  ;;  %v12640_v24 = vld [vmem:[#allocation23 + $0x34] ss:$12 sps:$4 sm:$0xff]   ;;  %v12648_v38 = vld [vmem:[#allocation23 + $0x64] ss:$12 sps:$4 sm:$0xff]   ;;  %v12652_v42 = vld [vmem:[#allocation23 + $0x7c] ss:$12 sps:$4 sm:$0xff]  }
0x29a5   :  { %11448 = vmatprep.subr.bf16.mxu0 %v13444_v1  ;;  %v12656_v41 = vld [vmem:[#allocation23 + $0x8] ss:$12 sps:$4 sm:$0xff]   ;;  %v12660_v26 = vld [vmem:[#allocation23 + $0x20] ss:$12 sps:$4 sm:$0xff]   ;;  %v12661_v33 = vld [vmem:[#allocation23 + $0x38] ss:$12 sps:$4 sm:$0xff]  }
0x29a6   :  { %v12642_v54 = vld [vmem:[#allocation23 + $0x48] ss:$12 sps:$4 sm:$0xff]   ;;  %v12646_v39 = vld [vmem:[#allocation23 + $0x60] ss:$12 sps:$4 sm:$0xff]   ;;  %v12650_v44 = vld [vmem:[#allocation23 + $0x78] ss:$12 sps:$4 sm:$0xff]  }
0x29a7   :  { %6756 = vmatpush1.bf16.msra.mxu1 %v12614_v23  ;;  %v12662_v60 = vld [vmem:[#allocation23 + $0x50] ss:$12 sps:$4 sm:$0xff]   ;;  %v12655_v45 = vld [vmem:[#allocation23 + $0x94] ss:$12 sps:$4 sm:$0xff]   ;;  %v12659_v51 = vld [vmem:[#allocation23 + $0xac] ss:$12 sps:$4 sm:$0xff]  }
0x29a8   :  { %6757 = vmatprep.subr.bf16.mxu1 %v12615_v9  ;;  %11449 = vmatpush3.bf16.msra.mxu0 %v12633_v31  ;;  %v12653_v46 = vld [vmem:[#allocation23 + $0x90] ss:$12 sps:$4 sm:$0xff]   ;;  %v12663_v47 = vld [vmem:[#allocation23 + $0x68] ss:$12 sps:$4 sm:$0xff]   ;;  %v12664_v50 = vld [vmem:[#allocation23 + $0x80] ss:$12 sps:$4 sm:$0xff]  }
0x29a9   :  { %11450 = vmatprep.subr.bf16.mxu0 %v13444_v1  ;;  %v12657_v48 = vld [vmem:[#allocation23 + $0xa8] ss:$12 sps:$4 sm:$0xff]   ;;  %v12665_v6 = vld [vmem:[#allocation23 + $0x98] ss:$12 sps:$4 sm:$0xff]   ;;  %v12666_v52 = vld [vmem:[#allocation23 + $0xb0] ss:$12 sps:$4 sm:$0xff]  }
0x29aa   :  { %v12667_v61 = vld [vmem:[#allocation25] sm:$0xff]   ;;  %v12669_v10 = vld [vmem:[#allocation25 + $0x10] sm:$0xff]   ;;  %v12672_v59 = vld [vmem:[#allocation25 + $0x28] sm:$0xff]   ;;  %vm7609_vm10 = vcmp.eq.s32.totalorder %v13745_v3, 5 }
0x29ab   :  { %6758 = vmatpush1.bf16.msra.mxu1 %v12617_v13  ;;  %v14482_v16 = vld [vmem:[#allocation6] sm:$0xf] }
0x29ac   :  { %6759 = vmatprep.subr.bf16.mxu1 %v12618_v22  ;;  %11451 = vmatpush3.bf16.msra.mxu0 %v12637_v8  ;;  %v12673_v62 = vld [vmem:[#allocation25 + $0x30] sm:$0xff]   ;;  %v12674_v0 = vld [vmem:[#allocation25 + $0x38] sm:$0xff]  }
0x29ad   :  { %11452 = vmatprep.subr.bf16.mxu0 %v13444_v1  ;;  %v6604_v11 = vld [vmem:[%s14805_s13] sm:$0x7] }
0x29ae   :  { %v6737_v13 = vrot.slane %v6604_v11, %v13778_v57  ;;  %v6741_v22 = vrot.slane %v6604_v11, %v13781_v58 }
0x29af   :  { %6760 = vmatpush1.bf16.msra.mxu1 %v12620_v63 }
0x29b0   :  { %6761 = vmatprep.subr.bf16.mxu1 %v12621_v17  ;;  %11453 = vmatpush3.bf16.msra.mxu0 %v12641_v25 }
0x29b1   :  { %11454 = vmatprep.subr.bf16.mxu0 %v13444_v1 }
0x29b3   :  { %6762 = vmatpush1.bf16.msra.mxu1 %v12624_v30 }
0x29b4   :  { %6763 = vmatprep.subr.bf16.mxu1 %v12625_v18  ;;  %11455 = vmatpush3.bf16.msra.mxu0 %v12645_v32 }
0x29b5   :  { %11456 = vmatprep.subr.bf16.mxu0 %v13444_v1 }
0x29b7   :  { %6764 = vmatpush1.bf16.msra.mxu1 %v12628_v19 }
0x29b8   :  { %6990 = vmatprep.subr.bf16.mxu1 %v12632_v15  ;;  %11457 = vmatpush3.bf16.msra.mxu0 %v12649_v35  ;;  %v6745_v35 = vrot.slane %v6604_v11, %v13772_v55 }
0x29b9   :  { %11462 = vmatprep.subr.bf16.mxu0 %v13444_v1 }
0x29ba   :  { %6782 = vmatmul.mubr.bf16.vlgmr.msra.gmra.mrb[76].mxu1 %v6571_v27 }
0x29bb   :  { %6991 = vmatpush1.bf16.msra.mxu1 %v12630_v40  ;;  %7022 = vmatprep.mubr.bf16.mxu1 %v13446_v2 }
0x29bc   :  { %6992 = vmatprep.subr.bf16.mxu1 %v12636_v34  ;;  %11459 = vmatmul.mubr.bf16.vlgmr.msra.gmra.mrb[84].mxu0 %v6571_v27 }
0x29bd   :  { %11463 = vmatpush3.bf16.msra.mxu0 %v12656_v41  ;;  %11478 = vmatprep.mubr.msk.bf16.mxu0 %vm13445_vm0, %v13444_v1 }
0x29be   :  { %11464 = vmatprep.subr.bf16.mxu0 %v13444_v1 }
0x29bf   :  { %6993 = vmatpush1.bf16.msra.mxu1 %v12634_v37  ;;  %v7085_v37 = vld [vmem:[%s14806_s14] sm:$0x1] }
0x29c0   :  { %6994 = vmatprep.subr.bf16.mxu1 %v12640_v24 }
0x29c1   :  { %11465 = vmatpush3.bf16.msra.mxu0 %v12660_v26 }
0x29c2   :  { %11466 = vmatprep.subr.bf16.mxu0 %v13444_v1 }
0x29c3   :  { %6995 = vmatpush1.bf16.msra.mxu1 %v12638_v36 }
0x29c4   :  { %6996 = vmatprep.subr.bf16.mxu1 %v12644_v29 }
0x29c5   :  { %11467 = vmatpush3.bf16.msra.mxu0 %v12661_v33 }
0x29c6   :  { %11468 = vmatprep.subr.bf16.mxu0 %v13444_v1 }
0x29c7   :  { %6997 = vmatpush1.bf16.msra.mxu1 %v12642_v54 }
0x29c8   :  { %6998 = vmatprep.subr.bf16.mxu1 %v12648_v38 }
0x29c9   :  { %11469 = vmatpush3.bf16.msra.mxu0 %v12662_v60 }
0x29ca   :  { %11470 = vmatprep.subr.bf16.mxu0 %v13444_v1 }
0x29cb   :  { %6999 = vmatpush1.bf16.msra.mxu1 %v12646_v39 }
0x29cc   :  { %7000 = vmatprep.subr.bf16.mxu1 %v12652_v42 }
0x29cd   :  { %11471 = vmatpush3.bf16.msra.mxu0 %v12663_v47 }
0x29ce   :  { %11472 = vmatprep.subr.bf16.mxu0 %v13444_v1 }
0x29cf   :  { %7001 = vmatpush1.bf16.msra.mxu1 %v12650_v44 }
0x29d0   :  { %7002 = vmatprep.subr.bf16.mxu1 %v12655_v45 }
0x29d1   :  { %11473 = vmatpush3.bf16.msra.mxu0 %v12664_v50 }
0x29d2   :  { %11474 = vmatprep.subr.bf16.mxu0 %v13444_v1 }
0x29d3   :  { %7003 = vmatpush1.bf16.msra.mxu1 %v12653_v46 }
0x29d4   :  { %7004 = vmatprep.subr.bf16.mxu1 %v12659_v51 }
0x29d5   :  { %11475 = vmatpush3.bf16.msra.mxu0 %v12665_v6 }
0x29d6   :  { %11476 = vmatprep.subr.bf16.mxu0 %v13444_v1 }
0x29d7   :  { %7005 = vmatpush1.bf16.msra.mxu1 %v12657_v48 }
0x29d8   :  { %11482 = vmatprep.subr.bf16.mxu1 %v13444_v1 }
0x29d9   :  { %11477 = vmatpush3.bf16.msra.mxu0 %v12666_v52 }
0x29da   :  { %7023 = vmatmul.mubr.bf16.vlgmr.msra.gmra.mrb[76].mxu1 %v14393_v5  ;;  %11514 = vmatprep.subr.bf16.mxu0 %v13444_v1 }
0x29db   :  { %11484 = vmatprep.mubr.msk.bf16.mxu1 %vm13445_vm0, %v13444_v1 }
0x29dc   :  { %11479 = vmatmul.mubr.bf16.vlgmr.msra.gmra.mrb[88].mxu0 %v14393_v5  ;;  %v12671_v5 = vld [vmem:[#allocation25 + $0x20] sm:$0xff]  }
0x29dd   :  { %11530 = vmatprep.mubr.msk.bf16.mxu0 %vm13445_vm0, %v13444_v1  ;;  %11515 = vmatpush3.bf16.msra.mxu0 %v12667_v61 }
0x29de   :  { %11516 = vmatprep.subr.bf16.mxu0 %v13444_v1 }
0x29e0   :  { %11483 = vmatpush3.bf16.xpose.msra.mxu1 %v14482_v16 }
0x29e1   :  { %11517 = vmatpush3.bf16.msra.mxu0 %v12668_v43  ;;  %11488 = vmatprep.subr.bf16.mxu1 %v13444_v1 }
0x29e2   :  { %11518 = vmatprep.subr.bf16.mxu0 %v13444_v1 }
0x29e5   :  { %11519 = vmatpush3.bf16.msra.mxu0 %v12669_v10 }
0x29e6   :  { %11520 = vmatprep.subr.bf16.mxu0 %v13444_v1 }
0x29e9   :  { %11521 = vmatpush3.bf16.msra.mxu0 %v12670_v56 }
0x29ea   :  { %11522 = vmatprep.subr.bf16.mxu0 %v13444_v1 }
0x29ed   :  { %11523 = vmatpush3.bf16.msra.mxu0 %v12671_v5 }
0x29ee   :  { %11524 = vmatprep.subr.bf16.mxu0 %v13444_v1 }
0x29f1   :  { %11525 = vmatpush3.bf16.msra.mxu0 %v12672_v59 }
0x29f2   :  { %11526 = vmatprep.subr.bf16.mxu0 %v13444_v1 }
0x29f5   :  { %11527 = vmatpush3.bf16.msra.mxu0 %v12673_v62 }
0x29f6   :  { %11528 = vmatprep.subr.bf16.mxu0 %v13444_v1 }
0x29f9   :  { %11529 = vmatpush3.bf16.msra.mxu0 %v12674_v0  ;;  %v7153_v0 = vsel %vm1913_vm5, %v14482_v16, 0  ;;  %v12677_v16 = vld [vmem:[#allocation26 + $0x10] sm:$0xff]  }
0x2a8f   :  { %v6824_v7 = vpop.f32.mrb[84].mxu0 }
0x2a90   :  { %v11460_v12 = vpop.f32.mrb[85].mxu0  ;;  %v6825_v29 = vadd.f32 %v6824_v7, %v6745_v35  ;;  %v12692_v35 = vld [vmem:[#allocation28 + $0x30] ss:$8 sps:$4 sm:$0xff]  }
0x2a91   :  { %v6827_v23 = vpop.f32.mrb[86].mxu0 }
0x2a92   :  { %v11461_v9 = vpop.f32.mrb[87].mxu0 }
0x2a93   :  { %v12675_v9 = vld [vmem:[#allocation26] sm:$0xff]  }
0x2aad   :  { %v7024_v14 = vpop.f32.mrb[76].mxu1 }
0x2aae   :  { %v11728_v63 = vadd.f32 %v7024_v14, %v6737_v13  ;;  %v7026_v31 = vpop.f32.mrb[77].mxu1  ;;  %v12676_v13 = vld [vmem:[#allocation26 + $0x8] sm:$0xff]   ;;  %v12678_v14 = vld [vmem:[#allocation26 + $0x18] sm:$0xff]  }
0x2aaf   :  { %v7028_v17 = vpop.f32.mrb[78].mxu1  ;;  %v11729_v18 = vadd.f32 %v7026_v31, %v6741_v22  ;;  %v7065_v20 = vpop.f32.mrb[88].mxu0  ;;  %v12679_v22 = vld [vmem:[#allocation26 + $0x20] sm:$0xff]   ;;  %v12681_v31 = vld [vmem:[#allocation26 + $0x30] sm:$0xff]  }
0x2ab0   :  { %v10344_v30 = vmul.f32 -1.442695, %v11728_v63  ;;  %v7029_v8 = vpop.f32.mrb[79].mxu1  ;;  %v11480_v25 = vpop.f32.mrb[89].mxu0  ;;  %v7086_v36 = vadd.f32 %v7085_v37, %v7065_v20  ;;  %v12680_v63 = vld [vmem:[#allocation26 + $0x28] sm:$0xff]   ;;  %v12682_v17 = vld [vmem:[#allocation26 + $0x38] sm:$0xff]  }
0x2ab1   :  { %v10345_v19 = vmul.f32 -1.442695, %v11729_v18  ;;  %v7068_v15 = vpop.f32.mrb[90].mxu0  ;;  %v12683_v18 = vld [vmem:[#allocation28] ss:$8 sps:$4 sm:$0xff]  }
0x2ab2   :  { %12707 = vpow2.f32 %v10344_v30  ;;  %v11481_v40 = vpop.f32.mrb[91].mxu0  ;;  %v12685_v30 = vld [vmem:[#allocation28 + $0x4] ss:$8 sps:$4 sm:$0xff]   ;;  %v12688_v25 = vld [vmem:[#allocation28 + $0x14] ss:$8 sps:$4 sm:$0xff]  }
0x2ab3   :  { %12709 = vpow2.f32 %v10345_v19  ;;  %v12694_v37 = vld [vmem:[#allocation28 + $0x34] ss:$8 sps:$4 sm:$0xff]  }
0x2abc   :  { %v12708_v27 = vpop.eup %12707 }
0x2abd   :  { %v7075_v32 = vadd.f32 1.0, %v12708_v27  ;;  %v12710_v34 = vpop.eup %12709  ;;  %v12686_v27 = vld [vmem:[#allocation28 + $0x10] ss:$8 sps:$4 sm:$0xff]  }
0x2abe   :  { %v7082_v24 = vadd.f32 1.0, %v12710_v34  ;;  %v12689_v34 = vld [vmem:[#allocation28 + $0x20] ss:$8 sps:$4 sm:$0xff]  }
0x2abf   :  { %12711 = vrcp.f32 %v7075_v32  ;;  %v12691_v32 = vld [vmem:[#allocation28 + $0x24] ss:$8 sps:$4 sm:$0xff]  }
0x2ac0   :  { %12713 = vrcp.f32 %v7082_v24  ;;  %v12697_v24 = vld [vmem:[#allocation28 + $0x44] ss:$8 sps:$4 sm:$0xff]  }
0x2ac9   :  { %v12712_v41 = vpop.eup %12711 }
0x2aca   :  { %v7087_v54 = vmul.f32 %v12712_v41, %v7086_v36  ;;  %v12714_v38 = vpop.eup %12713  ;;  %v12695_v36 = vld [vmem:[#allocation28 + $0x40] ss:$8 sps:$4 sm:$0xff]   ;;  %v12700_v41 = vld [vmem:[#allocation28 + $0x54] ss:$8 sps:$4 sm:$0xff]  }
0x2acb   :  { %v7090_v39 = vsub.f32 1.0, %v12714_v38  ;;  %v7092_v44 = vmul.f32 %v12714_v38, %v14389_v21  ;;  %v12706_v38 = vld [vmem:[#allocation28 + $0x74] ss:$8 sps:$4 sm:$0xff]  }
0x2acc   :  { %v7088_v26 = vadd.f32 %v7087_v54, %v6825_v29  ;;  %v12698_v29 = vld [vmem:[#allocation28 + $0x50] ss:$8 sps:$4 sm:$0xff]   ;;  %v12703_v54 = vld [vmem:[#allocation28 + $0x64] ss:$8 sps:$4 sm:$0xff]  }
0x2ace   :  { %12715 = vtanh.f32 %v7088_v26  ;;  %v12701_v26 = vld [vmem:[#allocation28 + $0x60] ss:$8 sps:$4 sm:$0xff]  }
0x2ad8   :  { %v12716_v33 = vpop.eup %12715 }
0x2ad9   :  { %v7091_v42 = vmul.f32 %v12716_v33, %v7090_v39  ;;  %v12704_v39 = vld [vmem:[#allocation28 + $0x70] ss:$8 sps:$4 sm:$0xff]  }
0x2adb   :  { %v14499_v60 = vadd.f32 %v7092_v44, %v7091_v42  ;;  %v7404_v42 = vld [vmem:[%s14809_s17] sm:$0x1] }
0x2add   :  { %v14503_v45 = vpack.c.bf16 %v14499_v60, %v14499_v60 }
0x2adf   :  { %11485 = vmatmul.mubr.bf16.vlgmr.msra.gmra.mrb[80].mxu1 %v14503_v45  ;;  %11531 = vmatmul.mubr.bf16.vlgmr.msra.gmra.mrb[92].mxu0 %v14503_v45 }
0x2ae0   :  { %11490 = vmatprep.mubr.msk.bf16.mxu1 %vm13445_vm0, %v13444_v1  ;;  %11489 = vmatpush3.bf16.msra.mxu1 %v7153_v0 }
0x2ae1   :  { %11494 = vmatprep.subr.bf16.mxu1 %v13444_v1 }
0x2bb2   :  { %v7130_v46 = vpop.f32.mrb[80].mxu1  ;;  %v14509_v47 = vpop.f32.mrb[92].mxu0 }
0x2bb3   :  { %v7136_v51 = vsel %vm13947_vm3, %v7130_v46, -1e+30  ;;  %v11486_v21 = vpop.f32.mrb[81].mxu1  ;;  %v11532_v48 = vpop.f32.mrb[93].mxu0 }
0x2bb4   :  { %v7133_v50 = vpop.f32.mrb[82].mxu1  ;;  %v7401_v6 = vpop.f32.mrb[94].mxu0  ;;  %v7137_v52 = vsel %vm1896_vm4, %v7136_v51, -inf }
0x2bb5   :  { %v11533_v61 = vpop.f32.mrb[95].mxu0  ;;  %7138 = vmax.xlane.f32.xlu0 %v7137_v52  ;;  %v11487_v43 = vpop.f32.mrb[83].mxu1  ;;  %v7424_v52 = vld [vmem:[%s14811_s19] sm:$0x3] }
0x2bb6   :  { %v7509_v61 = vrot.slane %v7424_v52, %v13778_v57  ;;  %v7513_v43 = vrot.slane %v7424_v52, %v13781_v58 }
0x2c42   :  { %v7139_v10 = vpop.xlane.xlu0 %7138 }
0x2c43   :  { %v7140_v56 = vsub.f32 %v7136_v51, %v7139_v10 }
0x2c45   :  { %v7141_v5 = vmul.f32 1.442695, %v7140_v56 }
0x2c47   :  { %12717 = vpow2.f32 %v7141_v5 }
0x2c51   :  { %v12718_v59 = vpop.eup %12717 }
0x2c52   :  { %v7143_v62 = vsel %vm1896_vm4, %v12718_v59, 0.0 }
0x2c53   :  { %7144 = vadd.xlane.f32.xlu0 %v7143_v62 }
0x2ce0   :  { %v7145_v7 = vpop.xlane.xlu0 %7144 }
0x2ce1   :  { %12719 = vrcp.f32 %v7145_v7 }
0x2ceb   :  { %v12720_v12 = vpop.eup %12719 }
0x2cec   :  { %v7147_v23 = vmul.f32 %v12720_v12, %v12718_v59 }
0x2cee   :  { %v7148_v11 = vpack.c.bf16 %v7147_v23, %v7147_v23 }
0x2cf0   :  { %11491 = vmatmul.mubr.msk.bf16.vlgmr.msra.gmra.mrb[84].mxu1 %vm1909_vm6, %v7148_v11 }
0x2cf1   :  { %11495 = vmatpush3.bf16.msra.mxu1 %v12675_v9  ;;  %11510 = vmatprep.mubr.msk.bf16.mxu1 %vm13445_vm0, %v13444_v1 }
0x2cf2   :  { %11496 = vmatprep.subr.bf16.mxu1 %v13444_v1 }
0x2cf5   :  { %11497 = vmatpush3.bf16.msra.mxu1 %v12676_v13 }
0x2cf6   :  { %11498 = vmatprep.subr.bf16.mxu1 %v13444_v1 }
0x2cf9   :  { %11499 = vmatpush3.bf16.msra.mxu1 %v12677_v16 }
0x2cfa   :  { %11500 = vmatprep.subr.bf16.mxu1 %v13444_v1 }
0x2cfd   :  { %11501 = vmatpush3.bf16.msra.mxu1 %v12678_v14 }
0x2cfe   :  { %11502 = vmatprep.subr.bf16.mxu1 %v13444_v1 }
0x2d01   :  { %11503 = vmatpush3.bf16.msra.mxu1 %v12679_v22 }
0x2d02   :  { %11504 = vmatprep.subr.bf16.mxu1 %v13444_v1 }
0x2d05   :  { %11505 = vmatpush3.bf16.msra.mxu1 %v12680_v63 }
0x2d06   :  { %11506 = vmatprep.subr.bf16.mxu1 %v13444_v1 }
0x2d09   :  { %11507 = vmatpush3.bf16.msra.mxu1 %v12681_v31 }
0x2d0a   :  { %11508 = vmatprep.subr.bf16.mxu1 %v13444_v1 }
0x2d0d   :  { %11509 = vmatpush3.bf16.msra.mxu1 %v12682_v17 }
0x2d0e   :  { %7516 = vmatprep.subr.bf16.mxu1 %v12685_v30 }
0x2dc3   :  { %v7189_v8 = vpop.f32.mrb[84].mxu1 }
0x2dc4   :  { %v7211_v19 = vpack.c.bf16 %v7189_v8, %v7189_v8  ;;  %v11492_v20 = vpop.f32.mrb[85].mxu1 }
0x2dc5   :  { %v7192_v15 = vpop.f32.mrb[86].mxu1 }
0x2dc6   :  { %v11493_v40 = vpop.f32.mrb[87].mxu1  ;;  %11511 = vmatmul.mubr.bf16.vlgmr.msra.gmra.mrb[88].mxu1 %v7211_v19 }
0x2dc7   :  { %7517 = vmatpush1.bf16.msra.mxu1 %v12683_v18  ;;  %7548 = vmatprep.mubr.bf16.mxu1 %v13446_v2 }
0x2dc8   :  { %7518 = vmatprep.subr.bf16.mxu1 %v12688_v25 }
0x2dcb   :  { %7519 = vmatpush1.bf16.msra.mxu1 %v12686_v27 }
0x2dcc   :  { %7520 = vmatprep.subr.bf16.mxu1 %v12691_v32 }
0x2dcf   :  { %7521 = vmatpush1.bf16.msra.mxu1 %v12689_v34 }
0x2dd0   :  { %7522 = vmatprep.subr.bf16.mxu1 %v12694_v37 }
0x2dd3   :  { %7523 = vmatpush1.bf16.msra.mxu1 %v12692_v35 }
0x2dd4   :  { %7524 = vmatprep.subr.bf16.mxu1 %v12697_v24 }
0x2dd7   :  { %7525 = vmatpush1.bf16.msra.mxu1 %v12695_v36 }
0x2dd8   :  { %7526 = vmatprep.subr.bf16.mxu1 %v12700_v41 }
0x2ddb   :  { %7527 = vmatpush1.bf16.msra.mxu1 %v12698_v29 }
0x2ddc   :  { %7528 = vmatprep.subr.bf16.mxu1 %v12703_v54 }
0x2ddf   :  { %7529 = vmatpush1.bf16.msra.mxu1 %v12701_v26 }
0x2de0   :  { %7530 = vmatprep.subr.bf16.mxu1 %v12706_v38 }
0x2de3   :  { %7531 = vmatpush1.bf16.msra.mxu1 %v12704_v39 }
0x2e99   :  { %v7310_v33 = vpop.f32.mrb[88].mxu1 }
0x2e9a   :  { %v7399_v44 = vadd.f32 %v14509_v47, %v7310_v33  ;;  %v11512_v46 = vpop.f32.mrb[89].mxu1 }
0x2e9b   :  { %v7313_v51 = vpop.f32.mrb[90].mxu1 }
0x2e9c   :  { %v7405_v21 = vadd.f32 %v7404_v42, %v7399_v44  ;;  %v11513_v48 = vpop.f32.mrb[91].mxu1 }
0x2e9e   :  { %12721 = vtanh.f32 %v7405_v21 }
0x2ea8   :  { %v12722_v50 = vpop.eup %12721 }
0x2ea9   :  { %v7407_v6 = vpack.c.bf16 %v12722_v50, %v12722_v50 }
0x2eab   :  { %7549 = vmatmul.mubr.bf16.vlgmr.msra.gmra.mrb[92].mxu1 %v7407_v6 }
0x2f7e   :  { %v7550_v10 = vpop.f32.mrb[92].mxu1 }
0x2f7f   :  { %v7551_v56 = vadd.f32 %v7550_v10, %v7509_v61  ;;  %v7552_v5 = vpop.f32.mrb[93].mxu1 }
0x2f80   :  { %v7553_v47 = vadd.f32 %v7552_v5, %v7513_v43  ;;  %v7554_v59 = vpop.f32.mrb[94].mxu1 }
0x2f81   :  { %v7555_v62 = vpop.f32.mrb[95].mxu1  ;;  %v7557_v0 = vsel %vm2319_vm7, %v7551_v56, -inf }
0x2f82   :  { %v7558_v7 = vsel %vm2319_vm7, %v7553_v47, -inf }
0x2f83   :  { %v7559_v12 = vmax.f32 %v7557_v0, %v7558_v7 }
0x2f85   :  { %7560 = vmax.xlane.f32.xlu1 %v7559_v12 }
0x3012   :  { %v7561_v23 = vpop.xlane.xlu1 %7560 }
0x3013   :  { %v7562_v9 = vsub.f32 %v7551_v56, %v7561_v23  ;;  %v7563_v11 = vsub.f32 %v7553_v47, %v7561_v23  ;;  %vm7575_vm1 = vcmp.eq.f32.partialorder %v7551_v56, %v7561_v23  ;;  %vm7576_vm2 = vcmp.eq.f32.partialorder %v7553_v47, %v7561_v23 }
0x3014   :  { %v7577_v13 = vsel %vm7575_vm1, %v13745_v3, 256  ;;  %v7578_v16 = vsel %vm7576_vm2, %v13748_v4, 256 }
0x3015   :  { %v7579_v14 = vsel %vm2319_vm7, %v7577_v13, 2147483647  ;;  %v7580_v22 = vsel %vm2319_vm7, %v7578_v16, 2147483647  ;;  %v7564_v63 = vmul.f32 1.442695, %v7562_v9 }
0x3016   :  { %vm7581_vm8 = vcmp.lt.s32.totalorder %v7579_v14, %v7580_v22  ;;  %v7566_v31 = vmul.f32 1.442695, %v7563_v11 }
0x3017   :  { %v7582_v17 = vsel %vm7581_vm8, %v7579_v14, %v7580_v22  ;;  %12723 = vpow2.f32 %v7564_v63 }
0x3018   :  { %v7584_v30 = vshra.s32 %v7582_v17, 16  ;;  %12725 = vpow2.f32 %v7566_v31  ;;  %v7583_v40 = vand.u32 65535, %v7582_v17 }
0x301a   :  { %v7586_v8 = vcvt.s32.f32 %v7584_v30  ;;  %v7585_v32 = vcvt.s32.f32 %v7583_v40 }
0x301c   :  { %7587 = vmin.xlane.f32.xlu1 %v7586_v8 }
0x3021   :  { %v12724_v18 = vpop.eup %12723 }
0x3022   :  { %v12726_v19 = vpop.eup %12725  ;;  %v7568_v20 = vsel %vm2319_vm7, %v12724_v18, 0.0 }
0x3023   :  { %v7569_v25 = vsel %vm2319_vm7, %v12726_v19, 0.0 }
0x3024   :  { %v7570_v15 = vadd.f32 %v7569_v25, %v7568_v20 }
0x3026   :  { %7571 = vadd.xlane.f32.xlu0 %v7570_v15 }
0x30a9   :  { %v7588_v27 = vpop.xlane.xlu1 %7587 }
0x30aa   :  { %vm7589_vm9 = vcmp.eq.f32.partialorder %v7586_v8, %v7588_v27  ;;  %v7594_v36 = vcvt.f32.s32 %v7588_v27 }
0x30ab   :  { %v7590_v34 = vsel %vm7589_vm9, %v7585_v32, inf }
0x30ac   :  { %7591 = vmin.xlane.f32.xlu1 %v7590_v34  ;;  %v7595_v29 = vshll.u32 %v7594_v36, 16 }
0x30b3   :  { %v7572_v37 = vpop.xlane.xlu0 %7571 }
0x30b4   :  { %12727 = vrcp.f32 %v7572_v37 }
0x30be   :  { %v12728_v35 = vpop.eup %12727 }
0x30bf   :  { %v14548_v24 = vsel %vm7609_vm10, %v12728_v35, %v14438_v49 }
0x3139   :  { %v7592_v41 = vpop.xlane.xlu1 %7591 }
0x313a   :  { %v7593_v54 = vcvt.f32.s32 %v7592_v41 }
0x313c   :  { %v7596_v26 = vadd.s32 %v7595_v29, %v7593_v54 }
0x313e   :  { %v14551_v38 = vsel %vm7609_vm10, %v7596_v26, %v14441_v53  ;;  %7597 = vst.msk [vmem:[#allocation7] sm:$0x1] %vm2360_vm13, %v7596_v26 }
0x313f   :  { %13294 = shalt.err (!%p14000_p10)  }
0x3140   :  { %7608 = dma.vmem_to_smem %s13991_s2, 16, %s13451_s0, [#allocation9] }
0x3141   :  { %13401 = dma.done.wait [#allocation9], 16 }
0x3142   :  { %13402 = vsyncadd [#allocation9], 4294967280 }
0x3143   :  { %7614 = sfence }
0x3144   :  { %v12729_v49 = vld [vmem:[#allocation22 + $0x4] ss:$12 sps:$4 sm:$0xff]   ;;  %11534 = vmatprep.subr.bf16.mxu1 %v13444_v1  ;;  %7828 = vmatprep.mubr.bf16.mxu0 %v13446_v2  ;;  %v12731_v39 = vld [vmem:[#allocation22] ss:$12 sps:$4 sm:$0xff]   ;;  %v12732_v53 = vld [vmem:[#allocation22 + $0x1c] ss:$12 sps:$4 sm:$0xff]  }
0x3145   :  { %11550 = vmatprep.mubr.msk.bf16.mxu1 %vm13445_vm0, %v13444_v1  ;;  %7796 = vmatprep.subr.bf16.mxu0 %v12729_v49  ;;  %v12734_v33 = vld [vmem:[#allocation22 + $0x18] ss:$12 sps:$4 sm:$0xff]   ;;  %v12735_v42 = vld [vmem:[#allocation22 + $0x34] ss:$12 sps:$4 sm:$0xff]   ;;  %v12737_v44 = vld [vmem:[#allocation22 + $0x30] ss:$12 sps:$4 sm:$0xff]  }
0x3146   :  { %7797 = vmatpush1.bf16.msra.mxu0 %v12731_v39  ;;  %v12738_v46 = vld [vmem:[#allocation22 + $0x4c] ss:$12 sps:$4 sm:$0xff]   ;;  %v12749_v51 = vld [vmem:[#allocation22 + $0x8] ss:$12 sps:$4 sm:$0xff]   ;;  %v12741_v48 = vld [vmem:[#allocation22 + $0x64] ss:$12 sps:$4 sm:$0xff]  }
0x3147   :  { %7798 = vmatprep.subr.bf16.mxu0 %v12732_v53  ;;  %v12740_v21 = vld [vmem:[#allocation22 + $0x48] ss:$12 sps:$4 sm:$0xff]   ;;  %11535 = vmatpush3.bf16.msra.mxu1 %v12749_v51  ;;  %v12753_v50 = vld [vmem:[#allocation22 + $0x20] ss:$12 sps:$4 sm:$0xff]   ;;  %s7615_s1 = sld [smem:[#allocation8]]  ;;  %v12796_v39 = vld [vmem:[#allocation25 + $0x18] sm:$0xff]  }
0x3148   :  { %11536 = vmatprep.subr.bf16.mxu1 %v13444_v1  ;;  %v12743_v6 = vld [vmem:[#allocation22 + $0x60] ss:$12 sps:$4 sm:$0xff]   ;;  %v12755_v52 = vld [vmem:[#allocation22 + $0x38] ss:$12 sps:$4 sm:$0xff]   ;;  %v12744_v61 = vld [vmem:[#allocation22 + $0x7c] ss:$12 sps:$4 sm:$0xff]  }
0x3149   :  { %v12746_v43 = vld [vmem:[#allocation22 + $0x78] ss:$12 sps:$4 sm:$0xff]   ;;  %v12759_v10 = vld [vmem:[#allocation22 + $0x50] ss:$12 sps:$4 sm:$0xff]   ;;  %v12747_v56 = vld [vmem:[#allocation22 + $0x94] ss:$12 sps:$4 sm:$0xff]  }
0x314a   :  { %7799 = vmatpush1.bf16.msra.mxu0 %v12734_v33  ;;  %v12750_v5 = vld [vmem:[#allocation22 + $0x90] ss:$12 sps:$4 sm:$0xff]   ;;  %v12763_v47 = vld [vmem:[#allocation22 + $0x68] ss:$12 sps:$4 sm:$0xff]   ;;  %v12751_v59 = vld [vmem:[#allocation22 + $0xac] ss:$12 sps:$4 sm:$0xff]  }
0x314b   :  { %7800 = vmatprep.subr.bf16.mxu0 %v12735_v42  ;;  %11537 = vmatpush3.bf16.msra.mxu1 %v12753_v50  ;;  %v12754_v62 = vld [vmem:[#allocation22 + $0xa8] ss:$12 sps:$4 sm:$0xff]   ;;  %v12767_v7 = vld [vmem:[#allocation22 + $0x80] ss:$12 sps:$4 sm:$0xff]   ;;  %v12758_v12 = vld [vmem:[#allocation23 + $0x4] ss:$12 sps:$4 sm:$0xff]  }
0x314c   :  { %11538 = vmatprep.subr.bf16.mxu1 %v13444_v1  ;;  %v12756_v23 = vld [vmem:[#allocation23] ss:$12 sps:$4 sm:$0xff]   ;;  %v12771_v11 = vld [vmem:[#allocation22 + $0x98] ss:$12 sps:$4 sm:$0xff]   ;;  %v12762_v13 = vld [vmem:[#allocation23 + $0x1c] ss:$12 sps:$4 sm:$0xff]  }
0x314d   :  { %s7616_s10 = scalar_lea.vmem [#allocation20], %s7615_s1  ;;  %v12760_v16 = vld [vmem:[#allocation23 + $0x18] ss:$12 sps:$4 sm:$0xff]   ;;  %v12775_v14 = vld [vmem:[#allocation22 + $0xb0] ss:$12 sps:$4 sm:$0xff]   ;;  %v12794_v26 = vld [vmem:[#allocation25 + $0x8] sm:$0xff]  }
0x314e   :  { %7801 = vmatpush1.bf16.msra.mxu0 %v12737_v44  ;;  %v7617_v0 = vld [vmem:[%s7616_s10] sm:$0x1]  ;;  %v12764_v63 = vld [vmem:[#allocation23 + $0x30] ss:$12 sps:$4 sm:$0xff]   ;;  %v12770_v17 = vld [vmem:[#allocation23 + $0x4c] ss:$12 sps:$4 sm:$0xff]  }
0x314f   :  { %7802 = vmatprep.subr.bf16.mxu0 %v12738_v46  ;;  %11539 = vmatpush3.bf16.msra.mxu1 %v12755_v52  ;;  %v7618_v9 = vpack.c.bf16 %v7617_v0, %v7617_v0  ;;  %v12766_v22 = vld [vmem:[#allocation23 + $0x34] ss:$12 sps:$4 sm:$0xff]   ;;  %v12774_v18 = vld [vmem:[#allocation23 + $0x64] ss:$12 sps:$4 sm:$0xff]   ;;  %v12778_v25 = vld [vmem:[#allocation23 + $0x7c] ss:$12 sps:$4 sm:$0xff]  }
0x3150   :  { %11540 = vmatprep.subr.bf16.mxu1 %v13444_v1  ;;  %v12782_v31 = vld [vmem:[#allocation23 + $0x8] ss:$12 sps:$4 sm:$0xff]   ;;  %v12786_v8 = vld [vmem:[#allocation23 + $0x20] ss:$12 sps:$4 sm:$0xff]   ;;  %v12787_v20 = vld [vmem:[#allocation23 + $0x38] ss:$12 sps:$4 sm:$0xff]  }
0x3151   :  { %v12768_v30 = vld [vmem:[#allocation23 + $0x48] ss:$12 sps:$4 sm:$0xff]   ;;  %v12772_v19 = vld [vmem:[#allocation23 + $0x60] ss:$12 sps:$4 sm:$0xff]   ;;  %v12776_v15 = vld [vmem:[#allocation23 + $0x78] ss:$12 sps:$4 sm:$0xff]  }
0x3152   :  { %7803 = vmatpush1.bf16.msra.mxu0 %v12740_v21  ;;  %v12788_v40 = vld [vmem:[#allocation23 + $0x50] ss:$12 sps:$4 sm:$0xff]   ;;  %v12781_v27 = vld [vmem:[#allocation23 + $0x94] ss:$12 sps:$4 sm:$0xff]   ;;  %v12785_v37 = vld [vmem:[#allocation23 + $0xac] ss:$12 sps:$4 sm:$0xff]  }
0x3153   :  { %7804 = vmatprep.subr.bf16.mxu0 %v12741_v48  ;;  %11541 = vmatpush3.bf16.msra.mxu1 %v12759_v10  ;;  %v12779_v32 = vld [vmem:[#allocation23 + $0x90] ss:$12 sps:$4 sm:$0xff]   ;;  %v12789_v34 = vld [vmem:[#allocation23 + $0x68] ss:$12 sps:$4 sm:$0xff]   ;;  %v12790_v36 = vld [vmem:[#allocation23 + $0x80] ss:$12 sps:$4 sm:$0xff]  }
0x3154   :  { %11542 = vmatprep.subr.bf16.mxu1 %v13444_v1  ;;  %v12783_v35 = vld [vmem:[#allocation23 + $0xa8] ss:$12 sps:$4 sm:$0xff]   ;;  %v12791_v41 = vld [vmem:[#allocation23 + $0x98] ss:$12 sps:$4 sm:$0xff]   ;;  %v12792_v29 = vld [vmem:[#allocation23 + $0xb0] ss:$12 sps:$4 sm:$0xff]  }
0x3155   :  { %v12793_v54 = vld [vmem:[#allocation25] sm:$0xff]   ;;  %v12795_v49 = vld [vmem:[#allocation25 + $0x10] sm:$0xff]   ;;  %v12798_v33 = vld [vmem:[#allocation25 + $0x28] sm:$0xff]   ;;  %vm8656_vm1 = vcmp.eq.s32.totalorder %v13745_v3, 6 }
0x3156   :  { %7805 = vmatpush1.bf16.msra.mxu0 %v12743_v6  ;;  %v14592_v53 = vld [vmem:[#allocation6] sm:$0xf] }
0x3157   :  { %7806 = vmatprep.subr.bf16.mxu0 %v12744_v61  ;;  %11543 = vmatpush3.bf16.msra.mxu1 %v12763_v47  ;;  %v12799_v42 = vld [vmem:[#allocation25 + $0x30] sm:$0xff]   ;;  %v12800_v44 = vld [vmem:[#allocation25 + $0x38] sm:$0xff]  }
0x3158   :  { %11544 = vmatprep.subr.bf16.mxu1 %v13444_v1  ;;  %v7651_v50 = vld [vmem:[%s14805_s13] sm:$0x7] }
0x3159   :  { %v7784_v6 = vrot.slane %v7651_v50, %v13778_v57  ;;  %v7788_v61 = vrot.slane %v7651_v50, %v13781_v58 }
0x315a   :  { %7807 = vmatpush1.bf16.msra.mxu0 %v12746_v43 }
0x315b   :  { %7808 = vmatprep.subr.bf16.mxu0 %v12747_v56  ;;  %11545 = vmatpush3.bf16.msra.mxu1 %v12767_v7 }
0x315c   :  { %11546 = vmatprep.subr.bf16.mxu1 %v13444_v1 }
0x315e   :  { %7809 = vmatpush1.bf16.msra.mxu0 %v12750_v5 }
0x315f   :  { %7810 = vmatprep.subr.bf16.mxu0 %v12751_v59  ;;  %11547 = vmatpush3.bf16.msra.mxu1 %v12771_v11 }
0x3160   :  { %11548 = vmatprep.subr.bf16.mxu1 %v13444_v1 }
0x3162   :  { %7811 = vmatpush1.bf16.msra.mxu0 %v12754_v62 }
0x3163   :  { %8037 = vmatprep.subr.bf16.mxu0 %v12758_v12  ;;  %11549 = vmatpush3.bf16.msra.mxu1 %v12775_v14  ;;  %v7792_v14 = vrot.slane %v7651_v50, %v13772_v55 }
0x3164   :  { %11554 = vmatprep.subr.bf16.mxu1 %v13444_v1 }
0x3165   :  { %7829 = vmatmul.mubr.bf16.vlgmr.msra.gmra.mrb[96].mxu0 %v7618_v9 }
0x3166   :  { %8038 = vmatpush1.bf16.msra.mxu0 %v12756_v23  ;;  %8069 = vmatprep.mubr.bf16.mxu0 %v13446_v2 }
0x3167   :  { %8039 = vmatprep.subr.bf16.mxu0 %v12762_v13  ;;  %11551 = vmatmul.mubr.bf16.vlgmr.msra.gmra.mrb[96].mxu1 %v7618_v9 }
0x3168   :  { %11555 = vmatpush3.bf16.msra.mxu1 %v12782_v31  ;;  %11570 = vmatprep.mubr.msk.bf16.mxu1 %vm13445_vm0, %v13444_v1 }
0x3169   :  { %11556 = vmatprep.subr.bf16.mxu1 %v13444_v1 }
0x316a   :  { %8040 = vmatpush1.bf16.msra.mxu0 %v12760_v16  ;;  %v8132_v16 = vld [vmem:[%s14806_s14] sm:$0x1] }
0x316b   :  { %8041 = vmatprep.subr.bf16.mxu0 %v12766_v22 }
0x316c   :  { %11557 = vmatpush3.bf16.msra.mxu1 %v12786_v8 }
0x316d   :  { %11558 = vmatprep.subr.bf16.mxu1 %v13444_v1 }
0x316e   :  { %8042 = vmatpush1.bf16.msra.mxu0 %v12764_v63 }
0x316f   :  { %8043 = vmatprep.subr.bf16.mxu0 %v12770_v17 }
0x3170   :  { %11559 = vmatpush3.bf16.msra.mxu1 %v12787_v20 }
0x3171   :  { %11560 = vmatprep.subr.bf16.mxu1 %v13444_v1 }
0x3172   :  { %8044 = vmatpush1.bf16.msra.mxu0 %v12768_v30 }
0x3173   :  { %8045 = vmatprep.subr.bf16.mxu0 %v12774_v18 }
0x3174   :  { %11561 = vmatpush3.bf16.msra.mxu1 %v12788_v40 }
0x3175   :  { %11562 = vmatprep.subr.bf16.mxu1 %v13444_v1 }
0x3176   :  { %8046 = vmatpush1.bf16.msra.mxu0 %v12772_v19 }
0x3177   :  { %8047 = vmatprep.subr.bf16.mxu0 %v12778_v25 }
0x3178   :  { %11563 = vmatpush3.bf16.msra.mxu1 %v12789_v34 }
0x3179   :  { %11564 = vmatprep.subr.bf16.mxu1 %v13444_v1 }
0x317a   :  { %8048 = vmatpush1.bf16.msra.mxu0 %v12776_v15 }
0x317b   :  { %8049 = vmatprep.subr.bf16.mxu0 %v12781_v27 }
0x317c   :  { %11565 = vmatpush3.bf16.msra.mxu1 %v12790_v36 }
0x317d   :  { %11566 = vmatprep.subr.bf16.mxu1 %v13444_v1 }
0x317e   :  { %8050 = vmatpush1.bf16.msra.mxu0 %v12779_v32 }
0x317f   :  { %8051 = vmatprep.subr.bf16.mxu0 %v12785_v37 }
0x3180   :  { %11567 = vmatpush3.bf16.msra.mxu1 %v12791_v41 }
0x3181   :  { %11568 = vmatprep.subr.bf16.mxu1 %v13444_v1 }
0x3182   :  { %8052 = vmatpush1.bf16.msra.mxu0 %v12783_v35 }
0x3183   :  { %11574 = vmatprep.subr.bf16.mxu0 %v13444_v1 }
0x3184   :  { %11569 = vmatpush3.bf16.msra.mxu1 %v12792_v29 }
0x3185   :  { %8070 = vmatmul.mubr.bf16.vlgmr.msra.gmra.mrb[96].mxu0 %v14503_v45  ;;  %11606 = vmatprep.subr.bf16.mxu1 %v13444_v1 }
0x3186   :  { %11576 = vmatprep.mubr.msk.bf16.mxu0 %vm13445_vm0, %v13444_v1 }
0x3187   :  { %11571 = vmatmul.mubr.bf16.vlgmr.msra.gmra.mrb[100].mxu1 %v14503_v45  ;;  %v12797_v45 = vld [vmem:[#allocation25 + $0x20] sm:$0xff]  }
0x3188   :  { %11622 = vmatprep.mubr.msk.bf16.mxu1 %vm13445_vm0, %v13444_v1  ;;  %11607 = vmatpush3.bf16.msra.mxu1 %v12793_v54 }
0x3189   :  { %11608 = vmatprep.subr.bf16.mxu1 %v13444_v1 }
0x318b   :  { %11575 = vmatpush3.bf16.xpose.msra.mxu0 %v14592_v53 }
0x318c   :  { %11609 = vmatpush3.bf16.msra.mxu1 %v12794_v26  ;;  %11580 = vmatprep.subr.bf16.mxu0 %v13444_v1 }
0x318d   :  { %11610 = vmatprep.subr.bf16.mxu1 %v13444_v1 }
0x3190   :  { %11611 = vmatpush3.bf16.msra.mxu1 %v12795_v49 }
0x3191   :  { %11612 = vmatprep.subr.bf16.mxu1 %v13444_v1 }
0x3194   :  { %11613 = vmatpush3.bf16.msra.mxu1 %v12796_v39 }
0x3195   :  { %11614 = vmatprep.subr.bf16.mxu1 %v13444_v1 }
0x3198   :  { %11615 = vmatpush3.bf16.msra.mxu1 %v12797_v45 }
0x3199   :  { %11616 = vmatprep.subr.bf16.mxu1 %v13444_v1 }
0x319c   :  { %11617 = vmatpush3.bf16.msra.mxu1 %v12798_v33 }
0x319d   :  { %11618 = vmatprep.subr.bf16.mxu1 %v13444_v1 }
0x31a0   :  { %11619 = vmatpush3.bf16.msra.mxu1 %v12799_v42 }
0x31a1   :  { %11620 = vmatprep.subr.bf16.mxu1 %v13444_v1 }
0x31a4   :  { %11621 = vmatpush3.bf16.msra.mxu1 %v12800_v44  ;;  %v8200_v44 = vsel %vm1913_vm5, %v14592_v53, 0  ;;  %v12803_v53 = vld [vmem:[#allocation26 + $0x10] sm:$0xff]  }
0x323a   :  { %v7871_v46 = vpop.f32.mrb[96].mxu1 }
0x323b   :  { %v11552_v51 = vpop.f32.mrb[97].mxu1  ;;  %v7872_v17 = vadd.f32 %v7871_v46, %v7792_v14  ;;  %v12818_v14 = vld [vmem:[#allocation28 + $0x30] ss:$8 sps:$4 sm:$0xff]  }
0x323c   :  { %v7874_v21 = vpop.f32.mrb[98].mxu1 }
0x323d   :  { %v11553_v48 = vpop.f32.mrb[99].mxu1 }
0x323e   :  { %v12801_v48 = vld [vmem:[#allocation26] sm:$0xff]  }
0x3258   :  { %v8071_v52 = vpop.f32.mrb[96].mxu0 }
0x3259   :  { %v11730_v43 = vadd.f32 %v8071_v52, %v7784_v6  ;;  %v8073_v10 = vpop.f32.mrb[97].mxu0  ;;  %v12802_v6 = vld [vmem:[#allocation26 + $0x8] sm:$0xff]   ;;  %v12804_v52 = vld [vmem:[#allocation26 + $0x18] sm:$0xff]  }
0x325a   :  { %v8075_v56 = vpop.f32.mrb[98].mxu0  ;;  %v11731_v59 = vadd.f32 %v8073_v10, %v7788_v61  ;;  %v8112_v0 = vpop.f32.mrb[100].mxu1  ;;  %v12805_v61 = vld [vmem:[#allocation26 + $0x20] sm:$0xff]   ;;  %v12807_v10 = vld [vmem:[#allocation26 + $0x30] sm:$0xff]  }
0x325b   :  { %v10427_v5 = vmul.f32 -1.442695, %v11730_v43  ;;  %v8076_v47 = vpop.f32.mrb[99].mxu0  ;;  %v11572_v7 = vpop.f32.mrb[101].mxu1  ;;  %v8133_v63 = vadd.f32 %v8132_v16, %v8112_v0  ;;  %v12806_v43 = vld [vmem:[#allocation26 + $0x28] sm:$0xff]   ;;  %v12808_v56 = vld [vmem:[#allocation26 + $0x38] sm:$0xff]  }
0x325c   :  { %v10428_v62 = vmul.f32 -1.442695, %v11731_v59  ;;  %v8115_v12 = vpop.f32.mrb[102].mxu1  ;;  %v12809_v59 = vld [vmem:[#allocation28] ss:$8 sps:$4 sm:$0xff]  }
0x325d   :  { %12833 = vpow2.f32 %v10427_v5  ;;  %v11573_v23 = vpop.f32.mrb[103].mxu1  ;;  %v12811_v5 = vld [vmem:[#allocation28 + $0x4] ss:$8 sps:$4 sm:$0xff]   ;;  %v12814_v7 = vld [vmem:[#allocation28 + $0x14] ss:$8 sps:$4 sm:$0xff]  }
0x325e   :  { %12835 = vpow2.f32 %v10428_v62  ;;  %v12820_v16 = vld [vmem:[#allocation28 + $0x34] ss:$8 sps:$4 sm:$0xff]  }
0x3267   :  { %v12834_v9 = vpop.eup %12833 }
0x3268   :  { %v8122_v11 = vadd.f32 1.0, %v12834_v9  ;;  %v12836_v13 = vpop.eup %12835  ;;  %v12812_v9 = vld [vmem:[#allocation28 + $0x10] ss:$8 sps:$4 sm:$0xff]  }
0x3269   :  { %v8129_v22 = vadd.f32 1.0, %v12836_v13  ;;  %v12815_v13 = vld [vmem:[#allocation28 + $0x20] ss:$8 sps:$4 sm:$0xff]  }
0x326a   :  { %12837 = vrcp.f32 %v8122_v11  ;;  %v12817_v11 = vld [vmem:[#allocation28 + $0x24] ss:$8 sps:$4 sm:$0xff]  }
0x326b   :  { %12839 = vrcp.f32 %v8129_v22  ;;  %v12823_v22 = vld [vmem:[#allocation28 + $0x44] ss:$8 sps:$4 sm:$0xff]  }
0x3274   :  { %v12838_v31 = vpop.eup %12837 }
0x3275   :  { %v8134_v30 = vmul.f32 %v12838_v31, %v8133_v63  ;;  %v12840_v18 = vpop.eup %12839  ;;  %v12821_v63 = vld [vmem:[#allocation28 + $0x40] ss:$8 sps:$4 sm:$0xff]   ;;  %v12826_v31 = vld [vmem:[#allocation28 + $0x54] ss:$8 sps:$4 sm:$0xff]  }
0x3276   :  { %v8137_v19 = vsub.f32 1.0, %v12840_v18  ;;  %v8139_v15 = vmul.f32 %v12840_v18, %v14499_v60  ;;  %v12832_v18 = vld [vmem:[#allocation28 + $0x74] ss:$8 sps:$4 sm:$0xff]  }
0x3277   :  { %v8135_v8 = vadd.f32 %v8134_v30, %v7872_v17  ;;  %v12824_v17 = vld [vmem:[#allocation28 + $0x50] ss:$8 sps:$4 sm:$0xff]   ;;  %v12829_v30 = vld [vmem:[#allocation28 + $0x64] ss:$8 sps:$4 sm:$0xff]  }
0x3279   :  { %12841 = vtanh.f32 %v8135_v8  ;;  %v12827_v8 = vld [vmem:[#allocation28 + $0x60] ss:$8 sps:$4 sm:$0xff]  }
0x3283   :  { %v12842_v20 = vpop.eup %12841 }
0x3284   :  { %v8138_v25 = vmul.f32 %v12842_v20, %v8137_v19  ;;  %v12830_v19 = vld [vmem:[#allocation28 + $0x70] ss:$8 sps:$4 sm:$0xff]  }
0x3286   :  { %v14609_v40 = vadd.f32 %v8139_v15, %v8138_v25  ;;  %v8451_v25 = vld [vmem:[%s14809_s17] sm:$0x1] }
0x3288   :  { %v14613_v27 = vpack.c.bf16 %v14609_v40, %v14609_v40 }
0x328a   :  { %11577 = vmatmul.mubr.bf16.vlgmr.msra.gmra.mrb[100].mxu0 %v14613_v27  ;;  %11623 = vmatmul.mubr.bf16.vlgmr.msra.gmra.mrb[104].mxu1 %v14613_v27 }
0x328b   :  { %11582 = vmatprep.mubr.msk.bf16.mxu0 %vm13445_vm0, %v13444_v1  ;;  %11581 = vmatpush3.bf16.msra.mxu0 %v8200_v44 }
0x328c   :  { %11586 = vmatprep.subr.bf16.mxu0 %v13444_v1 }
0x335d   :  { %v8177_v32 = vpop.f32.mrb[100].mxu0  ;;  %v14619_v34 = vpop.f32.mrb[104].mxu1 }
0x335e   :  { %v8183_v37 = vsel %vm13947_vm3, %v8177_v32, -1e+30  ;;  %v11578_v60 = vpop.f32.mrb[101].mxu0  ;;  %v11624_v35 = vpop.f32.mrb[105].mxu1 }
0x335f   :  { %v8180_v36 = vpop.f32.mrb[102].mxu0  ;;  %v8448_v41 = vpop.f32.mrb[106].mxu1  ;;  %v8184_v29 = vsel %vm1896_vm4, %v8183_v37, -inf }
0x3360   :  { %v11625_v54 = vpop.f32.mrb[107].mxu1  ;;  %8185 = vmax.xlane.f32.xlu0 %v8184_v29  ;;  %v11579_v26 = vpop.f32.mrb[103].mxu0  ;;  %v8471_v29 = vld [vmem:[%s14811_s19] sm:$0x3] }
0x3361   :  { %v8556_v54 = vrot.slane %v8471_v29, %v13778_v57  ;;  %v8560_v26 = vrot.slane %v8471_v29, %v13781_v58 }
0x33ed   :  { %v8186_v49 = vpop.xlane.xlu0 %8185 }
0x33ee   :  { %v8187_v39 = vsub.f32 %v8183_v37, %v8186_v49 }
0x33f0   :  { %v8188_v45 = vmul.f32 1.442695, %v8187_v39 }
0x33f2   :  { %12843 = vpow2.f32 %v8188_v45 }
0x33fc   :  { %v12844_v33 = vpop.eup %12843 }
0x33fd   :  { %v8190_v42 = vsel %vm1896_vm4, %v12844_v33, 0.0 }
0x33fe   :  { %8191 = vadd.xlane.f32.xlu0 %v8190_v42 }
0x348b   :  { %v8192_v46 = vpop.xlane.xlu0 %8191 }
0x348c   :  { %12845 = vrcp.f32 %v8192_v46 }
0x3496   :  { %v12846_v51 = vpop.eup %12845 }
0x3497   :  { %v8194_v21 = vmul.f32 %v12846_v51, %v12844_v33 }
0x3499   :  { %v8195_v50 = vpack.c.bf16 %v8194_v21, %v8194_v21 }
0x349b   :  { %11583 = vmatmul.mubr.msk.bf16.vlgmr.msra.gmra.mrb[104].mxu0 %vm1909_vm6, %v8195_v50 }
0x349c   :  { %11587 = vmatpush3.bf16.msra.mxu0 %v12801_v48  ;;  %11602 = vmatprep.mubr.msk.bf16.mxu0 %vm13445_vm0, %v13444_v1 }
0x349d   :  { %11588 = vmatprep.subr.bf16.mxu0 %v13444_v1 }
0x34a0   :  { %11589 = vmatpush3.bf16.msra.mxu0 %v12802_v6 }
0x34a1   :  { %11590 = vmatprep.subr.bf16.mxu0 %v13444_v1 }
0x34a4   :  { %11591 = vmatpush3.bf16.msra.mxu0 %v12803_v53 }
0x34a5   :  { %11592 = vmatprep.subr.bf16.mxu0 %v13444_v1 }
0x34a8   :  { %11593 = vmatpush3.bf16.msra.mxu0 %v12804_v52 }
0x34a9   :  { %11594 = vmatprep.subr.bf16.mxu0 %v13444_v1 }
0x34ac   :  { %11595 = vmatpush3.bf16.msra.mxu0 %v12805_v61 }
0x34ad   :  { %11596 = vmatprep.subr.bf16.mxu0 %v13444_v1 }
0x34b0   :  { %11597 = vmatpush3.bf16.msra.mxu0 %v12806_v43 }
0x34b1   :  { %11598 = vmatprep.subr.bf16.mxu0 %v13444_v1 }
0x34b4   :  { %11599 = vmatpush3.bf16.msra.mxu0 %v12807_v10 }
0x34b5   :  { %11600 = vmatprep.subr.bf16.mxu0 %v13444_v1 }
0x34b8   :  { %11601 = vmatpush3.bf16.msra.mxu0 %v12808_v56 }
0x34b9   :  { %8563 = vmatprep.subr.bf16.mxu0 %v12811_v5 }
0x356e   :  { %v8236_v47 = vpop.f32.mrb[104].mxu0 }
0x356f   :  { %v8258_v62 = vpack.c.bf16 %v8236_v47, %v8236_v47  ;;  %v11584_v0 = vpop.f32.mrb[105].mxu0 }
0x3570   :  { %v8239_v12 = vpop.f32.mrb[106].mxu0 }
0x3571   :  { %v11585_v23 = vpop.f32.mrb[107].mxu0  ;;  %11603 = vmatmul.mubr.bf16.vlgmr.msra.gmra.mrb[108].mxu0 %v8258_v62 }
0x3572   :  { %8564 = vmatpush1.bf16.msra.mxu0 %v12809_v59  ;;  %8595 = vmatprep.mubr.bf16.mxu0 %v13446_v2 }
0x3573   :  { %8565 = vmatprep.subr.bf16.mxu0 %v12814_v7 }
0x3576   :  { %8566 = vmatpush1.bf16.msra.mxu0 %v12812_v9 }
0x3577   :  { %8567 = vmatprep.subr.bf16.mxu0 %v12817_v11 }
0x357a   :  { %8568 = vmatpush1.bf16.msra.mxu0 %v12815_v13 }
0x357b   :  { %8569 = vmatprep.subr.bf16.mxu0 %v12820_v16 }
0x357e   :  { %8570 = vmatpush1.bf16.msra.mxu0 %v12818_v14 }
0x357f   :  { %8571 = vmatprep.subr.bf16.mxu0 %v12823_v22 }
0x3582   :  { %8572 = vmatpush1.bf16.msra.mxu0 %v12821_v63 }
0x3583   :  { %8573 = vmatprep.subr.bf16.mxu0 %v12826_v31 }
0x3586   :  { %8574 = vmatpush1.bf16.msra.mxu0 %v12824_v17 }
0x3587   :  { %8575 = vmatprep.subr.bf16.mxu0 %v12829_v30 }
0x358a   :  { %8576 = vmatpush1.bf16.msra.mxu0 %v12827_v8 }
0x358b   :  { %8577 = vmatprep.subr.bf16.mxu0 %v12832_v18 }
0x358e   :  { %8578 = vmatpush1.bf16.msra.mxu0 %v12830_v19 }
0x3644   :  { %v8357_v20 = vpop.f32.mrb[108].mxu0 }
0x3645   :  { %v8446_v15 = vadd.f32 %v14619_v34, %v8357_v20  ;;  %v11604_v32 = vpop.f32.mrb[109].mxu0 }
0x3646   :  { %v8360_v37 = vpop.f32.mrb[110].mxu0 }
0x3647   :  { %v8452_v60 = vadd.f32 %v8451_v25, %v8446_v15  ;;  %v11605_v35 = vpop.f32.mrb[111].mxu0 }
0x3649   :  { %12847 = vtanh.f32 %v8452_v60 }
0x3653   :  { %v12848_v36 = vpop.eup %12847 }
0x3654   :  { %v8454_v41 = vpack.c.bf16 %v12848_v36, %v12848_v36 }
0x3656   :  { %8596 = vmatmul.mubr.bf16.vlgmr.msra.gmra.mrb[112].mxu0 %v8454_v41 }
0x3729   :  { %v8597_v49 = vpop.f32.mrb[112].mxu0 }
0x372a   :  { %v8598_v39 = vadd.f32 %v8597_v49, %v8556_v54  ;;  %v8599_v45 = vpop.f32.mrb[113].mxu0 }
0x372b   :  { %v8600_v34 = vadd.f32 %v8599_v45, %v8560_v26  ;;  %v8601_v33 = vpop.f32.mrb[114].mxu0 }
0x372c   :  { %v8602_v42 = vpop.f32.mrb[115].mxu0  ;;  %v8604_v44 = vsel %vm2319_vm7, %v8598_v39, -inf }
0x372d   :  { %v8605_v46 = vsel %vm2319_vm7, %v8600_v34, -inf }
0x372e   :  { %v8606_v51 = vmax.f32 %v8604_v44, %v8605_v46 }
0x3730   :  { %8607 = vmax.xlane.f32.xlu1 %v8606_v51 }
0x37bd   :  { %v8608_v21 = vpop.xlane.xlu1 %8607 }
0x37be   :  { %v8609_v48 = vsub.f32 %v8598_v39, %v8608_v21  ;;  %v8610_v50 = vsub.f32 %v8600_v34, %v8608_v21  ;;  %vm8622_vm11 = vcmp.eq.f32.partialorder %v8598_v39, %v8608_v21  ;;  %vm8623_vm12 = vcmp.eq.f32.partialorder %v8600_v34, %v8608_v21 }
0x37bf   :  { %v8624_v6 = vsel %vm8622_vm11, %v13745_v3, 256  ;;  %v8625_v53 = vsel %vm8623_vm12, %v13748_v4, 256 }
0x37c0   :  { %v8626_v52 = vsel %vm2319_vm7, %v8624_v6, 2147483647  ;;  %v8627_v61 = vsel %vm2319_vm7, %v8625_v53, 2147483647  ;;  %v8611_v43 = vmul.f32 1.442695, %v8609_v48 }
0x37c1   :  { %vm8628_vm14 = vcmp.lt.s32.totalorder %v8626_v52, %v8627_v61  ;;  %v8613_v10 = vmul.f32 1.442695, %v8610_v50 }
0x37c2   :  { %v8629_v56 = vsel %vm8628_vm14, %v8626_v52, %v8627_v61  ;;  %12849 = vpow2.f32 %v8611_v43 }
0x37c3   :  { %v8631_v5 = vshra.s32 %v8629_v56, 16  ;;  %12851 = vpow2.f32 %v8613_v10  ;;  %v8630_v23 = vand.u32 65535, %v8629_v56 }
0x37c5   :  { %v8633_v47 = vcvt.s32.f32 %v8631_v5  ;;  %v8632_v11 = vcvt.s32.f32 %v8630_v23 }
0x37c7   :  { %8634 = vmin.xlane.f32.xlu1 %v8633_v47 }
0x37cc   :  { %v12850_v59 = vpop.eup %12849 }
0x37cd   :  { %v12852_v62 = vpop.eup %12851  ;;  %v8615_v0 = vsel %vm2319_vm7, %v12850_v59, 0.0 }
0x37ce   :  { %v8616_v7 = vsel %vm2319_vm7, %v12852_v62, 0.0 }
0x37cf   :  { %v8617_v12 = vadd.f32 %v8616_v7, %v8615_v0 }
0x37d1   :  { %8618 = vadd.xlane.f32.xlu0 %v8617_v12 }
0x3854   :  { %v8635_v9 = vpop.xlane.xlu1 %8634 }
0x3855   :  { %vm8636_vm15 = vcmp.eq.f32.partialorder %v8633_v47, %v8635_v9  ;;  %v8641_v63 = vcvt.f32.s32 %v8635_v9 }
0x3856   :  { %v8637_v13 = vsel %vm8636_vm15, %v8632_v11, inf }
0x3857   :  { %8638 = vmin.xlane.f32.xlu1 %v8637_v13  ;;  %v8642_v17 = vshll.u32 %v8641_v63, 16 }
0x385e   :  { %v8619_v16 = vpop.xlane.xlu0 %8618 }
0x385f   :  { %12853 = vrcp.f32 %v8619_v16 }
0x3869   :  { %v12854_v14 = vpop.eup %12853 }
0x386a   :  { %v14658_v22 = vsel %vm8656_vm1, %v12854_v14, %v14548_v24 }
0x38e4   :  { %v8639_v31 = vpop.xlane.xlu1 %8638 }
0x38e5   :  { %v8640_v30 = vcvt.f32.s32 %v8639_v31 }
0x38e7   :  { %v8643_v8 = vadd.s32 %v8642_v17, %v8640_v30 }
0x38e9   :  { %v14661_v18 = vsel %vm8656_vm1, %v8643_v8, %v14551_v38  ;;  %8644 = vst.msk [vmem:[#allocation7] sm:$0x1] %vm2360_vm13, %v8643_v8 }
0x38ea   :  { %13306 = shalt.err (!%p14000_p10)  }
0x38eb   :  { %8655 = dma.vmem_to_smem %s13991_s2, 16, %s13451_s0, [#allocation9] }
0x38ec   :  { %13403 = dma.done.wait [#allocation9], 16 }
0x38ed   :  { %13404 = vsyncadd [#allocation9], 4294967280 }
0x38ee   :  { %8661 = sfence }
0x38ef   :  { %v12855_v24 = vld [vmem:[#allocation22 + $0x4] ss:$12 sps:$4 sm:$0xff]   ;;  %11626 = vmatprep.subr.bf16.mxu0 %v13444_v1  ;;  %8875 = vmatprep.mubr.bf16.mxu1 %v13446_v2  ;;  %v12857_v19 = vld [vmem:[#allocation22] ss:$12 sps:$4 sm:$0xff]   ;;  %v12858_v38 = vld [vmem:[#allocation22 + $0x1c] ss:$12 sps:$4 sm:$0xff]  }
0x38f0   :  { %11642 = vmatprep.mubr.msk.bf16.mxu0 %vm13445_vm0, %v13444_v1  ;;  %8843 = vmatprep.subr.bf16.mxu1 %v12855_v24  ;;  %v12860_v20 = vld [vmem:[#allocation22 + $0x18] ss:$12 sps:$4 sm:$0xff]   ;;  %v12861_v25 = vld [vmem:[#allocation22 + $0x34] ss:$12 sps:$4 sm:$0xff]   ;;  %v12863_v15 = vld [vmem:[#allocation22 + $0x30] ss:$12 sps:$4 sm:$0xff]  }
0x38f1   :  { %8844 = vmatpush1.bf16.msra.mxu1 %v12857_v19  ;;  %v12864_v32 = vld [vmem:[#allocation22 + $0x4c] ss:$12 sps:$4 sm:$0xff]   ;;  %v12875_v37 = vld [vmem:[#allocation22 + $0x8] ss:$12 sps:$4 sm:$0xff]   ;;  %v12867_v35 = vld [vmem:[#allocation22 + $0x64] ss:$12 sps:$4 sm:$0xff]  }
0x38f2   :  { %8845 = vmatprep.subr.bf16.mxu1 %v12858_v38  ;;  %v12866_v60 = vld [vmem:[#allocation22 + $0x48] ss:$12 sps:$4 sm:$0xff]   ;;  %11627 = vmatpush3.bf16.msra.mxu0 %v12875_v37  ;;  %v12879_v36 = vld [vmem:[#allocation22 + $0x20] ss:$12 sps:$4 sm:$0xff]   ;;  %s8662_s11 = sld [smem:[#allocation8]]  ;;  %v12922_v19 = vld [vmem:[#allocation25 + $0x18] sm:$0xff]  }
0x38f3   :  { %11628 = vmatprep.subr.bf16.mxu0 %v13444_v1  ;;  %v12869_v41 = vld [vmem:[#allocation22 + $0x60] ss:$12 sps:$4 sm:$0xff]   ;;  %v12881_v29 = vld [vmem:[#allocation22 + $0x38] ss:$12 sps:$4 sm:$0xff]   ;;  %v12870_v54 = vld [vmem:[#allocation22 + $0x7c] ss:$12 sps:$4 sm:$0xff]  }
0x38f4   :  { %v12872_v26 = vld [vmem:[#allocation22 + $0x78] ss:$12 sps:$4 sm:$0xff]   ;;  %v12885_v49 = vld [vmem:[#allocation22 + $0x50] ss:$12 sps:$4 sm:$0xff]   ;;  %v12873_v39 = vld [vmem:[#allocation22 + $0x94] ss:$12 sps:$4 sm:$0xff]  }
0x38f5   :  { %8846 = vmatpush1.bf16.msra.mxu1 %v12860_v20  ;;  %v12876_v45 = vld [vmem:[#allocation22 + $0x90] ss:$12 sps:$4 sm:$0xff]   ;;  %v12889_v34 = vld [vmem:[#allocation22 + $0x68] ss:$12 sps:$4 sm:$0xff]   ;;  %v12877_v33 = vld [vmem:[#allocation22 + $0xac] ss:$12 sps:$4 sm:$0xff]  }
0x38f6   :  { %8847 = vmatprep.subr.bf16.mxu1 %v12861_v25  ;;  %11629 = vmatpush3.bf16.msra.mxu0 %v12879_v36  ;;  %v12880_v42 = vld [vmem:[#allocation22 + $0xa8] ss:$12 sps:$4 sm:$0xff]   ;;  %v12893_v46 = vld [vmem:[#allocation22 + $0x80] ss:$12 sps:$4 sm:$0xff]   ;;  %v12884_v51 = vld [vmem:[#allocation23 + $0x4] ss:$12 sps:$4 sm:$0xff]  }
0x38f7   :  { %11630 = vmatprep.subr.bf16.mxu0 %v13444_v1  ;;  %v12882_v21 = vld [vmem:[#allocation23] ss:$12 sps:$4 sm:$0xff]   ;;  %v12897_v50 = vld [vmem:[#allocation22 + $0x98] ss:$12 sps:$4 sm:$0xff]   ;;  %v12888_v6 = vld [vmem:[#allocation23 + $0x1c] ss:$12 sps:$4 sm:$0xff]  }
0x38f8   :  { %s8663_s22 = scalar_lea.vmem [#allocation20], %s8662_s11  ;;  %v12886_v53 = vld [vmem:[#allocation23 + $0x18] ss:$12 sps:$4 sm:$0xff]   ;;  %v12901_v52 = vld [vmem:[#allocation22 + $0xb0] ss:$12 sps:$4 sm:$0xff]   ;;  %v12920_v8 = vld [vmem:[#allocation25 + $0x8] sm:$0xff]  }
0x38f9   :  { %8848 = vmatpush1.bf16.msra.mxu1 %v12863_v15  ;;  %v8664_v44 = vld [vmem:[%s8663_s22] sm:$0x1]  ;;  %v12890_v43 = vld [vmem:[#allocation23 + $0x30] ss:$12 sps:$4 sm:$0xff]   ;;  %v12896_v56 = vld [vmem:[#allocation23 + $0x4c] ss:$12 sps:$4 sm:$0xff]  }
0x38fa   :  { %8849 = vmatprep.subr.bf16.mxu1 %v12864_v32  ;;  %11631 = vmatpush3.bf16.msra.mxu0 %v12881_v29  ;;  %v8665_v48 = vpack.c.bf16 %v8664_v44, %v8664_v44  ;;  %v12892_v61 = vld [vmem:[#allocation23 + $0x34] ss:$12 sps:$4 sm:$0xff]   ;;  %v12900_v59 = vld [vmem:[#allocation23 + $0x64] ss:$12 sps:$4 sm:$0xff]   ;;  %v12904_v7 = vld [vmem:[#allocation23 + $0x7c] ss:$12 sps:$4 sm:$0xff]  }
0x38fb   :  { %11632 = vmatprep.subr.bf16.mxu0 %v13444_v1  ;;  %v12908_v10 = vld [vmem:[#allocation23 + $0x8] ss:$12 sps:$4 sm:$0xff]   ;;  %v12912_v47 = vld [vmem:[#allocation23 + $0x20] ss:$12 sps:$4 sm:$0xff]   ;;  %v12913_v0 = vld [vmem:[#allocation23 + $0x38] ss:$12 sps:$4 sm:$0xff]  }
0x38fc   :  { %v12894_v5 = vld [vmem:[#allocation23 + $0x48] ss:$12 sps:$4 sm:$0xff]   ;;  %v12898_v62 = vld [vmem:[#allocation23 + $0x60] ss:$12 sps:$4 sm:$0xff]   ;;  %v12902_v12 = vld [vmem:[#allocation23 + $0x78] ss:$12 sps:$4 sm:$0xff]  }
0x38fd   :  { %8850 = vmatpush1.bf16.msra.mxu1 %v12866_v60  ;;  %v12914_v23 = vld [vmem:[#allocation23 + $0x50] ss:$12 sps:$4 sm:$0xff]   ;;  %v12907_v9 = vld [vmem:[#allocation23 + $0x94] ss:$12 sps:$4 sm:$0xff]   ;;  %v12911_v16 = vld [vmem:[#allocation23 + $0xac] ss:$12 sps:$4 sm:$0xff]  }
0x38fe   :  { %8851 = vmatprep.subr.bf16.mxu1 %v12867_v35  ;;  %11633 = vmatpush3.bf16.msra.mxu0 %v12885_v49  ;;  %v12905_v11 = vld [vmem:[#allocation23 + $0x90] ss:$12 sps:$4 sm:$0xff]   ;;  %v12915_v13 = vld [vmem:[#allocation23 + $0x68] ss:$12 sps:$4 sm:$0xff]   ;;  %v12916_v63 = vld [vmem:[#allocation23 + $0x80] ss:$12 sps:$4 sm:$0xff]  }
0x38ff   :  { %11634 = vmatprep.subr.bf16.mxu0 %v13444_v1  ;;  %v12909_v14 = vld [vmem:[#allocation23 + $0xa8] ss:$12 sps:$4 sm:$0xff]   ;;  %v12917_v31 = vld [vmem:[#allocation23 + $0x98] ss:$12 sps:$4 sm:$0xff]   ;;  %v12918_v17 = vld [vmem:[#allocation23 + $0xb0] ss:$12 sps:$4 sm:$0xff]  }
0x3900   :  { %v12919_v30 = vld [vmem:[#allocation25] sm:$0xff]   ;;  %v12921_v24 = vld [vmem:[#allocation25 + $0x10] sm:$0xff]   ;;  %v12924_v20 = vld [vmem:[#allocation25 + $0x28] sm:$0xff]   ;;  %vm9703_vm2 = vcmp.eq.s32.totalorder %v13745_v3, 7 }
0x3901   :  { %8852 = vmatpush1.bf16.msra.mxu1 %v12869_v41  ;;  %v14702_v38 = vld [vmem:[#allocation6] sm:$0xf] }
0x3902   :  { %8853 = vmatprep.subr.bf16.mxu1 %v12870_v54  ;;  %11635 = vmatpush3.bf16.msra.mxu0 %v12889_v34  ;;  %v12925_v25 = vld [vmem:[#allocation25 + $0x30] sm:$0xff]   ;;  %v12926_v15 = vld [vmem:[#allocation25 + $0x38] sm:$0xff]   ;;  %v9247_v28 = vsel %vm1913_vm5, %v14702_v38, 0 }
0x3903   :  { %11636 = vmatprep.subr.bf16.mxu0 %v13444_v1  ;;  %v8698_v36 = vld [vmem:[%s14805_s13] sm:$0x7] }
0x3904   :  { %v8831_v41 = vrot.slane %v8698_v36, %v13778_v57  ;;  %v8835_v54 = vrot.slane %v8698_v36, %v13781_v58 }
0x3905   :  { %8854 = vmatpush1.bf16.msra.mxu1 %v12872_v26 }
0x3906   :  { %8855 = vmatprep.subr.bf16.mxu1 %v12873_v39  ;;  %11637 = vmatpush3.bf16.msra.mxu0 %v12893_v46 }
0x3907   :  { %11638 = vmatprep.subr.bf16.mxu0 %v13444_v1 }
0x3909   :  { %8856 = vmatpush1.bf16.msra.mxu1 %v12876_v45 }
0x390a   :  { %8857 = vmatprep.subr.bf16.mxu1 %v12877_v33  ;;  %11639 = vmatpush3.bf16.msra.mxu0 %v12897_v50 }
0x390b   :  { %11640 = vmatprep.subr.bf16.mxu0 %v13444_v1 }
0x390d   :  { %8858 = vmatpush1.bf16.msra.mxu1 %v12880_v42 }
0x390e   :  { %9084 = vmatprep.subr.bf16.mxu1 %v12884_v51  ;;  %11641 = vmatpush3.bf16.msra.mxu0 %v12901_v52  ;;  %v8839_v52 = vrot.slane %v8698_v36, %v13772_v55  ;;  %v12930_v36 = vld [vmem:[#allocation26 + $0x18] sm:$0xff]  }
0x390f   :  { %11646 = vmatprep.subr.bf16.mxu0 %v13444_v1 }
0x3910   :  { %8876 = vmatmul.mubr.bf16.vlgmr.msra.gmra.mrb[108].mxu1 %v8665_v48 }
0x3911   :  { %9085 = vmatpush1.bf16.msra.mxu1 %v12882_v21  ;;  %9116 = vmatprep.mubr.bf16.mxu1 %v13446_v2 }
0x3912   :  { %9086 = vmatprep.subr.bf16.mxu1 %v12888_v6  ;;  %11643 = vmatmul.mubr.bf16.vlgmr.msra.gmra.mrb[116].mxu0 %v8665_v48 }
0x3913   :  { %11647 = vmatpush3.bf16.msra.mxu0 %v12908_v10  ;;  %11662 = vmatprep.mubr.msk.bf16.mxu0 %vm13445_vm0, %v13444_v1 }
0x3914   :  { %11648 = vmatprep.subr.bf16.mxu0 %v13444_v1 }
0x3915   :  { %9087 = vmatpush1.bf16.msra.mxu1 %v12886_v53  ;;  %v9179_v53 = vld [vmem:[%s14806_s14] sm:$0x1] }
0x3916   :  { %9088 = vmatprep.subr.bf16.mxu1 %v12892_v61 }
0x3917   :  { %11649 = vmatpush3.bf16.msra.mxu0 %v12912_v47 }
0x3918   :  { %11650 = vmatprep.subr.bf16.mxu0 %v13444_v1 }
0x3919   :  { %9089 = vmatpush1.bf16.msra.mxu1 %v12890_v43 }
0x391a   :  { %9090 = vmatprep.subr.bf16.mxu1 %v12896_v56 }
0x391b   :  { %11651 = vmatpush3.bf16.msra.mxu0 %v12913_v0 }
0x391c   :  { %11652 = vmatprep.subr.bf16.mxu0 %v13444_v1 }
0x391d   :  { %9091 = vmatpush1.bf16.msra.mxu1 %v12894_v5 }
0x391e   :  { %9092 = vmatprep.subr.bf16.mxu1 %v12900_v59 }
0x391f   :  { %11653 = vmatpush3.bf16.msra.mxu0 %v12914_v23 }
0x3920   :  { %11654 = vmatprep.subr.bf16.mxu0 %v13444_v1 }
0x3921   :  { %9093 = vmatpush1.bf16.msra.mxu1 %v12898_v62 }
0x3922   :  { %9094 = vmatprep.subr.bf16.mxu1 %v12904_v7 }
0x3923   :  { %11655 = vmatpush3.bf16.msra.mxu0 %v12915_v13 }
0x3924   :  { %11656 = vmatprep.subr.bf16.mxu0 %v13444_v1 }
0x3925   :  { %9095 = vmatpush1.bf16.msra.mxu1 %v12902_v12 }
0x3926   :  { %9096 = vmatprep.subr.bf16.mxu1 %v12907_v9 }
0x3927   :  { %11657 = vmatpush3.bf16.msra.mxu0 %v12916_v63 }
0x3928   :  { %11658 = vmatprep.subr.bf16.mxu0 %v13444_v1 }
0x3929   :  { %9097 = vmatpush1.bf16.msra.mxu1 %v12905_v11 }
0x392a   :  { %9098 = vmatprep.subr.bf16.mxu1 %v12911_v16 }
0x392b   :  { %11659 = vmatpush3.bf16.msra.mxu0 %v12917_v31 }
0x392c   :  { %11660 = vmatprep.subr.bf16.mxu0 %v13444_v1 }
0x392d   :  { %9099 = vmatpush1.bf16.msra.mxu1 %v12909_v14 }
0x392e   :  { %11666 = vmatprep.subr.bf16.mxu1 %v13444_v1 }
0x392f   :  { %11661 = vmatpush3.bf16.msra.mxu0 %v12918_v17 }
0x3930   :  { %9117 = vmatmul.mubr.bf16.vlgmr.msra.gmra.mrb[108].mxu1 %v14613_v27  ;;  %11698 = vmatprep.subr.bf16.mxu0 %v13444_v1 }
0x3931   :  { %11668 = vmatprep.mubr.msk.bf16.mxu1 %vm13445_vm0, %v13444_v1 }
0x3932   :  { %11663 = vmatmul.mubr.bf16.vlgmr.msra.gmra.mrb[120].mxu0 %v14613_v27  ;;  %v12923_v27 = vld [vmem:[#allocation25 + $0x20] sm:$0xff]  }
0x3933   :  { %11714 = vmatprep.mubr.msk.bf16.mxu0 %vm13445_vm0, %v13444_v1  ;;  %11699 = vmatpush3.bf16.msra.mxu0 %v12919_v30 }
0x3934   :  { %11700 = vmatprep.subr.bf16.mxu0 %v13444_v1 }
0x3936   :  { %11667 = vmatpush3.bf16.xpose.msra.mxu1 %v14702_v38  ;;  %v12929_v38 = vld [vmem:[#allocation26 + $0x10] sm:$0xff]  }
0x3937   :  { %11701 = vmatpush3.bf16.msra.mxu0 %v12920_v8  ;;  %11672 = vmatprep.subr.bf16.mxu1 %v13444_v1 }
0x3938   :  { %11702 = vmatprep.subr.bf16.mxu0 %v13444_v1 }
0x393b   :  { %11703 = vmatpush3.bf16.msra.mxu0 %v12921_v24 }
0x393c   :  { %11704 = vmatprep.subr.bf16.mxu0 %v13444_v1 }
0x393f   :  { %11705 = vmatpush3.bf16.msra.mxu0 %v12922_v19 }
0x3940   :  { %11706 = vmatprep.subr.bf16.mxu0 %v13444_v1 }
0x3943   :  { %11707 = vmatpush3.bf16.msra.mxu0 %v12923_v27 }
0x3944   :  { %11708 = vmatprep.subr.bf16.mxu0 %v13444_v1 }
0x3947   :  { %11709 = vmatpush3.bf16.msra.mxu0 %v12924_v20 }
0x3948   :  { %11710 = vmatprep.subr.bf16.mxu0 %v13444_v1 }
0x394b   :  { %11711 = vmatpush3.bf16.msra.mxu0 %v12925_v25 }
0x394c   :  { %11712 = vmatprep.subr.bf16.mxu0 %v13444_v1 }
0x394f   :  { %11713 = vmatpush3.bf16.msra.mxu0 %v12926_v15 }
0x39e5   :  { %v8918_v32 = vpop.f32.mrb[116].mxu0 }
0x39e6   :  { %v11644_v37 = vpop.f32.mrb[117].mxu0  ;;  %v8919_v56 = vadd.f32 %v8918_v32, %v8839_v52  ;;  %v12952_v52 = vld [vmem:[#allocation28 + $0x54] ss:$8 sps:$4 sm:$0xff]  }
0x39e7   :  { %v8921_v60 = vpop.f32.mrb[118].mxu0  ;;  %v12927_v37 = vld [vmem:[#allocation26] sm:$0xff]  }
0x39e8   :  { %v11645_v35 = vpop.f32.mrb[119].mxu0 }
0x39e9   :  { %v12928_v35 = vld [vmem:[#allocation26 + $0x8] sm:$0xff]  }
0x3a03   :  { %v9118_v29 = vpop.f32.mrb[108].mxu1 }
0x3a04   :  { %v11732_v26 = vadd.f32 %v9118_v29, %v8831_v41  ;;  %v9120_v49 = vpop.f32.mrb[109].mxu1  ;;  %v12931_v41 = vld [vmem:[#allocation26 + $0x20] sm:$0xff]   ;;  %v12932_v29 = vld [vmem:[#allocation26 + $0x28] sm:$0xff]  }
0x3a05   :  { %v9122_v39 = vpop.f32.mrb[110].mxu1  ;;  %v11733_v33 = vadd.f32 %v9120_v49, %v8835_v54  ;;  %v9159_v44 = vpop.f32.mrb[120].mxu0  ;;  %v12933_v54 = vld [vmem:[#allocation26 + $0x30] sm:$0xff]   ;;  %v12937_v49 = vld [vmem:[#allocation28 + $0x4] ss:$8 sps:$4 sm:$0xff]  }
0x3a06   :  { %v10510_v45 = vmul.f32 -1.442695, %v11732_v26  ;;  %v9123_v34 = vpop.f32.mrb[111].mxu1  ;;  %v11664_v46 = vpop.f32.mrb[121].mxu0  ;;  %v9180_v43 = vadd.f32 %v9179_v53, %v9159_v44  ;;  %v12934_v26 = vld [vmem:[#allocation26 + $0x38] sm:$0xff]  }
0x3a07   :  { %v10511_v42 = vmul.f32 -1.442695, %v11733_v33  ;;  %v9162_v51 = vpop.f32.mrb[122].mxu0  ;;  %v12947_v53 = vld [vmem:[#allocation28 + $0x40] ss:$8 sps:$4 sm:$0xff]  }
0x3a08   :  { %12959 = vpow2.f32 %v10510_v45  ;;  %v11665_v21 = vpop.f32.mrb[123].mxu0  ;;  %v12935_v45 = vld [vmem:[#allocation28] ss:$8 sps:$4 sm:$0xff]   ;;  %v12938_v51 = vld [vmem:[#allocation28 + $0x10] ss:$8 sps:$4 sm:$0xff]  }
0x3a09   :  { %12961 = vpow2.f32 %v10511_v42  ;;  %v12940_v42 = vld [vmem:[#allocation28 + $0x14] ss:$8 sps:$4 sm:$0xff]   ;;  %v12943_v21 = vld [vmem:[#allocation28 + $0x24] ss:$8 sps:$4 sm:$0xff]  }
0x3a12   :  { %v12960_v48 = vpop.eup %12959 }
0x3a13   :  { %v9169_v50 = vadd.f32 1.0, %v12960_v48  ;;  %v12962_v6 = vpop.eup %12961  ;;  %v12946_v48 = vld [vmem:[#allocation28 + $0x34] ss:$8 sps:$4 sm:$0xff]  }
0x3a14   :  { %v9176_v61 = vadd.f32 1.0, %v12962_v6  ;;  %v12949_v6 = vld [vmem:[#allocation28 + $0x44] ss:$8 sps:$4 sm:$0xff]  }
0x3a15   :  { %12963 = vrcp.f32 %v9169_v50  ;;  %v12944_v50 = vld [vmem:[#allocation28 + $0x30] ss:$8 sps:$4 sm:$0xff]  }
0x3a16   :  { %12965 = vrcp.f32 %v9176_v61  ;;  %v12950_v61 = vld [vmem:[#allocation28 + $0x50] ss:$8 sps:$4 sm:$0xff]  }
0x3a1f   :  { %v12964_v10 = vpop.eup %12963 }
0x3a20   :  { %v9181_v5 = vmul.f32 %v12964_v10, %v9180_v43  ;;  %v12966_v59 = vpop.eup %12965  ;;  %v12955_v43 = vld [vmem:[#allocation28 + $0x64] ss:$8 sps:$4 sm:$0xff]   ;;  %v12958_v10 = vld [vmem:[#allocation28 + $0x74] ss:$8 sps:$4 sm:$0xff]  }
0x3a21   :  { %v9184_v62 = vsub.f32 1.0, %v12966_v59  ;;  %v9186_v12 = vmul.f32 %v12966_v59, %v14609_v40 }
0x3a22   :  { %v9182_v47 = vadd.f32 %v9181_v5, %v8919_v56  ;;  %v12956_v56 = vld [vmem:[#allocation28 + $0x70] ss:$8 sps:$4 sm:$0xff]  }
0x3a24   :  { %12967 = vtanh.f32 %v9182_v47  ;;  %v9498_v47 = vld [vmem:[%s14809_s17] sm:$0x1] }
0x3a2e   :  { %v12968_v0 = vpop.eup %12967 }
0x3a2f   :  { %v9185_v7 = vmul.f32 %v12968_v0, %v9184_v62 }
0x3a31   :  { %v9187_v23 = vadd.f32 %v9186_v12, %v9185_v7 }
0x3a33   :  { %v9188_v9 = vpack.c.bf16 %v9187_v23, %v9187_v23 }
0x3a35   :  { %11669 = vmatmul.mubr.bf16.vlgmr.msra.gmra.mrb[112].mxu1 %v9188_v9  ;;  %11715 = vmatmul.mubr.bf16.vlgmr.msra.gmra.mrb[124].mxu0 %v9188_v9 }
0x3a36   :  { %11674 = vmatprep.mubr.msk.bf16.mxu1 %vm13445_vm0, %v13444_v1  ;;  %11673 = vmatpush3.bf16.msra.mxu1 %v9247_v28 }
0x3a37   :  { %11678 = vmatprep.subr.bf16.mxu1 %v13444_v1 }
0x3b08   :  { %v9224_v55 = vpop.f32.mrb[112].mxu1  ;;  %v14721_v11 = vpop.f32.mrb[124].mxu0 }
0x3b09   :  { %v9230_v13 = vsel %vm13947_vm3, %v9224_v55, -1e+30  ;;  %v11670_v16 = vpop.f32.mrb[113].mxu1  ;;  %v11716_v14 = vpop.f32.mrb[125].mxu0  ;;  %v9518_v55 = vld [vmem:[%s14811_s19] sm:$0x3] }
0x3b0a   :  { %v9227_v63 = vpop.f32.mrb[114].mxu1  ;;  %v9495_v31 = vpop.f32.mrb[126].mxu0  ;;  %v9231_v17 = vsel %vm1896_vm4, %v9230_v13, -inf  ;;  %v9607_v16 = vrot.slane %v9518_v55, %v13781_v58 }
0x3b0b   :  { %v11717_v40 = vpop.f32.mrb[127].mxu0  ;;  %9232 = vmax.xlane.f32.xlu0 %v9231_v17  ;;  %v11671_v30 = vpop.f32.mrb[115].mxu1 }
0x3b98   :  { %v9233_v8 = vpop.xlane.xlu0 %9232 }
0x3b99   :  { %v9234_v24 = vsub.f32 %v9230_v13, %v9233_v8  ;;  %v9603_v13 = vrot.slane %v9518_v55, %v13778_v57 }
0x3b9b   :  { %v9235_v19 = vmul.f32 1.442695, %v9234_v24 }
0x3b9d   :  { %12969 = vpow2.f32 %v9235_v19 }
0x3ba7   :  { %v12970_v27 = vpop.eup %12969 }
0x3ba8   :  { %v9237_v20 = vsel %vm1896_vm4, %v12970_v27, 0.0 }
0x3ba9   :  { %9238 = vadd.xlane.f32.xlu0 %v9237_v20 }
0x3c36   :  { %v9239_v25 = vpop.xlane.xlu0 %9238 }
0x3c37   :  { %12971 = vrcp.f32 %v9239_v25 }
0x3c41   :  { %v12972_v15 = vpop.eup %12971 }
0x3c42   :  { %v9241_v32 = vmul.f32 %v12972_v15, %v12970_v27 }
0x3c44   :  { %v9242_v60 = vpack.c.bf16 %v9241_v32, %v9241_v32 }
0x3c46   :  { %11675 = vmatmul.mubr.msk.bf16.vlgmr.msra.gmra.mrb[116].mxu1 %vm1909_vm6, %v9242_v60 }
0x3c47   :  { %11679 = vmatpush3.bf16.msra.mxu1 %v12927_v37  ;;  %11694 = vmatprep.mubr.msk.bf16.mxu1 %vm13445_vm0, %v13444_v1 }
0x3c48   :  { %11680 = vmatprep.subr.bf16.mxu1 %v13444_v1 }
0x3c4b   :  { %11681 = vmatpush3.bf16.msra.mxu1 %v12928_v35 }
0x3c4c   :  { %11682 = vmatprep.subr.bf16.mxu1 %v13444_v1 }
0x3c4f   :  { %11683 = vmatpush3.bf16.msra.mxu1 %v12929_v38 }
0x3c50   :  { %11684 = vmatprep.subr.bf16.mxu1 %v13444_v1 }
0x3c53   :  { %11685 = vmatpush3.bf16.msra.mxu1 %v12930_v36 }
0x3c54   :  { %11686 = vmatprep.subr.bf16.mxu1 %v13444_v1 }
0x3c57   :  { %11687 = vmatpush3.bf16.msra.mxu1 %v12931_v41 }
0x3c58   :  { %11688 = vmatprep.subr.bf16.mxu1 %v13444_v1 }
0x3c5b   :  { %11689 = vmatpush3.bf16.msra.mxu1 %v12932_v29 }
0x3c5c   :  { %11690 = vmatprep.subr.bf16.mxu1 %v13444_v1 }
0x3c5f   :  { %11691 = vmatpush3.bf16.msra.mxu1 %v12933_v54 }
0x3c60   :  { %11692 = vmatprep.subr.bf16.mxu1 %v13444_v1  ;;  %v12941_v1 = vld [vmem:[#allocation28 + $0x20] ss:$8 sps:$4 sm:$0xff]  }
0x3c63   :  { %11693 = vmatpush3.bf16.msra.mxu1 %v12934_v26 }
0x3c64   :  { %9610 = vmatprep.subr.bf16.mxu1 %v12937_v49 }
0x3d19   :  { %v9283_v39 = vpop.f32.mrb[116].mxu1 }
0x3d1a   :  { %v9305_v34 = vpack.c.bf16 %v9283_v39, %v9283_v39  ;;  %v11676_v33 = vpop.f32.mrb[117].mxu1 }
0x3d1b   :  { %v9286_v44 = vpop.f32.mrb[118].mxu1 }
0x3d1c   :  { %v11677_v46 = vpop.f32.mrb[119].mxu1  ;;  %11695 = vmatmul.mubr.bf16.vlgmr.msra.gmra.mrb[120].mxu1 %v9305_v34 }
0x3d1d   :  { %9611 = vmatpush1.bf16.msra.mxu1 %v12935_v45  ;;  %9642 = vmatprep.mubr.bf16.mxu1 %v13446_v2  ;;  %v12953_v2 = vld [vmem:[#allocation28 + $0x60] ss:$8 sps:$4 sm:$0xff]  }
0x3d1e   :  { %9612 = vmatprep.subr.bf16.mxu1 %v12940_v42 }
0x3d21   :  { %9613 = vmatpush1.bf16.msra.mxu1 %v12938_v51 }
0x3d22   :  { %9614 = vmatprep.subr.bf16.mxu1 %v12943_v21 }
0x3d25   :  { %9615 = vmatpush1.bf16.msra.mxu1 %v12941_v1 }
0x3d26   :  { %9616 = vmatprep.subr.bf16.mxu1 %v12946_v48 }
0x3d29   :  { %9617 = vmatpush1.bf16.msra.mxu1 %v12944_v50 }
0x3d2a   :  { %9618 = vmatprep.subr.bf16.mxu1 %v12949_v6 }
0x3d2d   :  { %9619 = vmatpush1.bf16.msra.mxu1 %v12947_v53 }
0x3d2e   :  { %9620 = vmatprep.subr.bf16.mxu1 %v12952_v52 }
0x3d31   :  { %9621 = vmatpush1.bf16.msra.mxu1 %v12950_v61 }
0x3d32   :  { %9622 = vmatprep.subr.bf16.mxu1 %v12955_v43 }
0x3d35   :  { %9623 = vmatpush1.bf16.msra.mxu1 %v12953_v2 }
0x3d36   :  { %9624 = vmatprep.subr.bf16.mxu1 %v12958_v10 }
0x3d39   :  { %9625 = vmatpush1.bf16.msra.mxu1 %v12956_v56 }
0x3def   :  { %v9404_v5 = vpop.f32.mrb[120].mxu1 }
0x3df0   :  { %v9493_v59 = vadd.f32 %v14721_v11, %v9404_v5  ;;  %v11696_v62 = vpop.f32.mrb[121].mxu1 }
0x3df1   :  { %v9407_v0 = vpop.f32.mrb[122].mxu1 }
0x3df2   :  { %v9499_v7 = vadd.f32 %v9498_v47, %v9493_v59  ;;  %v11697_v12 = vpop.f32.mrb[123].mxu1 }
0x3df4   :  { %12973 = vtanh.f32 %v9499_v7 }
0x3dfe   :  { %v12974_v23 = vpop.eup %12973 }
0x3dff   :  { %v9501_v9 = vpack.c.bf16 %v12974_v23, %v12974_v23 }
0x3e01   :  { %9643 = vmatmul.mubr.bf16.vlgmr.msra.gmra.mrb[124].mxu1 %v9501_v9 }
0x3ed4   :  { %v9644_v14 = vpop.f32.mrb[124].mxu1 }
0x3ed5   :  { %v9645_v63 = vadd.f32 %v9644_v14, %v9603_v13  ;;  %v9646_v31 = vpop.f32.mrb[125].mxu1 }
0x3ed6   :  { %v9647_v11 = vadd.f32 %v9646_v31, %v9607_v16  ;;  %v9648_v17 = vpop.f32.mrb[126].mxu1 }
0x3ed7   :  { %v9649_v40 = vpop.f32.mrb[127].mxu1  ;;  %v9651_v30 = vsel %vm2319_vm7, %v9645_v63, -inf }
0x3ed8   :  { %v9652_v8 = vsel %vm2319_vm7, %v9647_v11, -inf }
0x3ed9   :  { %v9653_v24 = vmax.f32 %v9651_v30, %v9652_v8 }
0x3edb   :  { %9654 = vmax.xlane.f32.xlu1 %v9653_v24 }
0x3f68   :  { %v9655_v19 = vpop.xlane.xlu1 %9654 }
0x3f69   :  { %v9656_v27 = vsub.f32 %v9645_v63, %v9655_v19  ;;  %v9657_v20 = vsub.f32 %v9647_v11, %v9655_v19  ;;  %vm9669_vm0 = vcmp.eq.f32.partialorder %v9645_v63, %v9655_v19  ;;  %vm9670_vm3 = vcmp.eq.f32.partialorder %v9647_v11, %v9655_v19 }
0x3f6a   :  { %v9671_v57 = vsel %vm9669_vm0, %v13745_v3, 256  ;;  %v9672_v58 = vsel %vm9670_vm3, %v13748_v4, 256 }
0x3f6b   :  { %v9673_v28 = vsel %vm2319_vm7, %v9671_v57, 2147483647  ;;  %v9674_v25 = vsel %vm2319_vm7, %v9672_v58, 2147483647  ;;  %v9658_v15 = vmul.f32 1.442695, %v9656_v27 }
0x3f6c   :  { %vm9675_vm5 = vcmp.lt.s32.totalorder %v9673_v28, %v9674_v25  ;;  %v9660_v32 = vmul.f32 1.442695, %v9657_v20 }
0x3f6d   :  { %v9676_v37 = vsel %vm9675_vm5, %v9673_v28, %v9674_v25  ;;  %12975 = vpow2.f32 %v9658_v15 }
0x3f6e   :  { %v9678_v60 = vshra.s32 %v9676_v37, 16  ;;  %12977 = vpow2.f32 %v9660_v32  ;;  %v9677_v54 = vand.u32 65535, %v9676_v37 }
0x3f70   :  { %v9680_v35 = vcvt.s32.f32 %v9678_v60  ;;  %v9679_v49 = vcvt.s32.f32 %v9677_v54 }
0x3f72   :  { %9681 = vmin.xlane.f32.xlu1 %v9680_v35 }
0x3f77   :  { %v12976_v38 = vpop.eup %12975 }
0x3f78   :  { %v12978_v36 = vpop.eup %12977  ;;  %v9662_v41 = vsel %vm2319_vm7, %v12976_v38, 0.0 }
0x3f79   :  { %v9663_v29 = vsel %vm2319_vm7, %v12978_v36, 0.0 }
0x3f7a   :  { %v9664_v4 = vadd.f32 %v9663_v29, %v9662_v41 }
0x3f7c   :  { %9665 = vadd.xlane.f32.xlu0 %v9664_v4 }
0x3fff   :  { %v9682_v26 = vpop.xlane.xlu1 %9681 }
0x4000   :  { %vm9683_vm6 = vcmp.eq.f32.partialorder %v9680_v35, %v9682_v26  ;;  %v9688_v42 = vcvt.f32.s32 %v9682_v26 }
0x4001   :  { %v9684_v39 = vsel %vm9683_vm6, %v9679_v49, inf }
0x4002   :  { %9685 = vmin.xlane.f32.xlu1 %v9684_v39  ;;  %v9689_v46 = vshll.u32 %v9688_v42, 16 }
0x4009   :  { %v9666_v45 = vpop.xlane.xlu0 %9665 }
0x400a   :  { %12979 = vrcp.f32 %v9666_v45 }
0x4014   :  { %v12980_v34 = vpop.eup %12979 }
0x4015   :  { %v9705_v33 = vsel %vm9703_vm2, %v12980_v34, %v14658_v22 }
0x408f   :  { %v9686_v44 = vpop.xlane.xlu1 %9685 }
0x4090   :  { %v9687_v51 = vcvt.f32.s32 %v9686_v44 }
0x4092   :  { %v9690_v21 = vadd.s32 %v9689_v46, %v9687_v51 }
0x4094   :  { %v9704_v1 = vsel %vm9703_vm2, %v9690_v21, %v14661_v18  ;;  %9691 = vst.msk [vmem:[#allocation7] sm:$0x1] %vm2360_vm13, %v9690_v21 }
0x4095   :  { %13318 = shalt.err (!%p14000_p10)  }
0x4096   :  { %9702 = dma.vmem_to_smem %s13991_s2, 16, %s13451_s0, [#allocation9] }
0x4097   :  { %13405 = dma.done.wait [#allocation9], 16 }
0x4098   :  { %13406 = vsyncadd [#allocation9], 4294967280 }
0x4099   :  { %9708 = sfence }
0x409a   :  { %9709 = vst.msk [vmem:[#allocation29] sm:$0x1] %vm1896_vm4, %v9704_v1  ;;  %9710 = vst.msk [vmem:[#allocation30] sm:$0x1] %vm1896_vm4, %v9705_v33  ;;  %s13452_s17 = smov [#allocation29]   ;;  %s13453_s7 = smov [#allocation30]  }
0x409b   :  { %s9717_s19 = sshll.u32 %s13452_s17, 4  ;;  %s9727_s4 = sshll.u32 %s13453_s7, 4  ;;  %s9718_s19 = int_to_ptr.vmem [resolvable:$true] %s9717_s19  ;;  %s9728_s4 = int_to_ptr.vmem [resolvable:$true] %s9727_s4 }
0x409c   :  { %s13319_s21 = scalar_lea.vmem %s9718_s19, 16  ;;  %s13323_s3 = scalar_lea.vmem %s9718_s19, 32 }
0x409d   :  { %p13320_p11 = scmp.ne.s32.totalorder %s9718_s19, %s13319_s21  ;;  %p13324_p12 = scmp.lt.s32.totalorder %s9718_s19, %s9718_s19 }
0x409e   :  { %p13325_p13 = scmp.lt.s32.totalorder %s13323_s3, %s13319_s21 }
0x40a0   :  { %p13326_p0 = por %p13325_p13, %p13324_p12 }
0x40a2   :  { %p13327_p1 = pnand %p13326_p0, %p13320_p11 }
0x40a4   :  { %13330 = shalt.err (!%p13327_p1)
}
0x40a5   :  { %s14844_s15 = sld [smem:[#allocation72_spill]] }
0x40ab   :  { %s13331_s18 = scalar_lea.hbm %s14844_s15, 16 }
0x40ac   :  { %p13332_p2 = scmp.ne.s32.totalorder %s14844_s15, %s13331_s18  ;;  %p13335_p3 = scmp.lt.u32.totalorder %s13331_s18, %s14844_s15 }
0x40ae   :  { %p13337_p4 = pnand %p13335_p3, %p13332_p2 }
0x40b0   :  { %13340 = shalt.err (!%p13337_p4)
}
0x40b1   :  { %9720 = dma.vmem_to_hbm [thread:$0]  %s9718_s19, 16, %s14844_s15, [#allocation13]  }
0x40b2   :  { %s13341_s9 = scalar_lea.vmem %s9728_s4, 16  ;;  %s13345_s25 = scalar_lea.vmem %s9728_s4, 32 }
0x40b3   :  { %p13342_p5 = scmp.ne.s32.totalorder %s9728_s4, %s13341_s9  ;;  %p13346_p6 = scmp.lt.s32.totalorder %s9728_s4, %s9728_s4 }
0x40b4   :  { %p13347_p7 = scmp.lt.s32.totalorder %s13345_s25, %s13341_s9 }
0x40b6   :  { %p13348_p8 = por %p13347_p7, %p13346_p6 }
0x40b8   :  { %p13349_p9 = pnand %p13348_p8, %p13342_p5 }
0x40ba   :  { %13352 = shalt.err (!%p13349_p9)
}
0x40bb   :  { %s14845_s12 = sld [smem:[#allocation73_spill]] }
0x40c1   :  { %s13353_s11 = scalar_lea.hbm %s14845_s12, 16 }
0x40c2   :  { %p13354_p10 = scmp.ne.s32.totalorder %s14845_s12, %s13353_s11  ;;  %p13357_p11 = scmp.lt.u32.totalorder %s13353_s11, %s14845_s12 }
0x40c4   :  { %p13359_p12 = pnand %p13357_p11, %p13354_p10 }
0x40c6   :  { %13362 = shalt.err (!%p13359_p12)
}
0x40c7   :  { %9730 = dma.vmem_to_hbm [thread:$0]  %s9728_s4, 16, %s14845_s12, [#allocation31]  }
0x40c8   :  { %13407 = dma.done.wait [#allocation13], 16  }
0x40c9   :  { %13408 = vsyncadd [#allocation13], 4294967280 }
0x40ca   :  { %13409 = dma.done.wait [#allocation31], 16  }
0x40cb   :  { %13410 = vsyncadd [#allocation31], 4294967280 }
0x40cc   :  { %9737 = vsyncpa [#allocation12], 1 }
0x40cd   :  { %9738 = vsyncpa [#allocation15], 1 }
0x40ce   :  { %9739 = vsyncpa [#allocation18], 1 }
0x40cf   :  { %9740 = vsyncpa [#allocation21], 1 }
0x40d0   :  { %9741 = vsyncpa [#allocation24], 1 }
0x40d1   :  { %9742 = vsyncpa [#allocation27], 1 }
0x40d2   :  { %9743 = vsyncpa [#allocation13], 1 }
0x40d3   :  { %9744 = vsyncpa [#allocation31], 1 }
0x40d4   :  { %9745 = vsyncmov [#allocation9] }
0x40d7   :  { %s9746_s28 = vpop.sfrf %9745 }
0x40d8   :  { %p10545_p13 = scmp.ne.s32.totalorder %s9746_s28, 0 }
0x40da   :  { %9750 = shalt.err (%p10545_p13)  }

</bundles_post_ra>
